<compile_context>
chip_gen: v5e
topology: v5e:2x2
jax: 0.10.0
libtpu: 0.0.40
codegen_flags: <defaults>
</compile_context>

<pallas_src>
import functools

import jax
import jax.numpy as jnp
from jax.experimental import pallas as pl
from jax.experimental.pallas import tpu as pltpu


def _mlp_kernel(x_ref, w1_ref, b1_ref, w2_ref, o_ref, acc_ref):
    """Fused two-layer MLP for one H-chunk.

    Grid: (hi, ki) = (hidden-chunk index, layer-1 K-reduction step).
    acc_ref holds the running (B, th) partial pre-activation of layer 1 for this
    H-chunk.  It is initialised with the layer-1 bias at ki == 0.  On the last
    K step we apply ReLU, run the (th x C) slice of the second matmul and write
    this chunk's partial logits.
    """
    ki = pl.program_id(1)
    nk = pl.num_programs(1)

    @pl.when(ki == 0)
    def _():
        # Fold the layer-1 bias into the accumulator init.
        acc_ref[...] = jnp.broadcast_to(b1_ref[...], acc_ref.shape)

    # Layer-1 partial matmul: (B, tk) bf16 @ (tk, th) bf16 -> fp32 accumulate.
    acc_ref[...] += jnp.dot(
        x_ref[...], w1_ref[...], preferred_element_type=jnp.float32
    )

    @pl.when(ki == nk - 1)
    def _():
        h = jnp.maximum(acc_ref[...], 0.0)  # ReLU
        # Dropout: eval mode -> identity (no-op).
        logits = jnp.dot(
            h.astype(w2_ref.dtype), w2_ref[...],
            preferred_element_type=jnp.float32,
        )
        o_ref[...] = logits.astype(o_ref.dtype)


@functools.partial(jax.jit, static_argnames=("tk", "th"))
def simple_mlp_tinyimagenet_forward(x, w1, b1, w2, b2, *, tk=4096, th=512):
    """x: (B, C, 64, 64).  w1: (C*4096, 1024), w2: (1024, num_classes).

    Weights may be passed as bf16 (preferred; avoids a per-call cast) or fp32.
    Returns (B, num_classes) float32 logits.
    Valid tk values must divide D_in = C*4096 (e.g. 2048/3072/4096/6144 for C=3).
    """
    B = x.shape[0]
    x_flat = x.reshape(B, -1).astype(jnp.bfloat16)   # row-major like torch .view
    D_in = x_flat.shape[1]
    H = w1.shape[1]
    C = w2.shape[1]
    assert D_in % tk == 0, "D_in must be divisible by tk"
    assert H % th == 0, "hidden dim must be divisible by th"
    nk = D_in // tk
    nh = H // th

    # bf16 weight stream, fp32 accumulation in-kernel (no-op if already bf16).
    w1_bf = w1.astype(jnp.bfloat16)
    w2_bf = w2.astype(jnp.bfloat16)
    b1_2d = b1.reshape(1, H).astype(jnp.float32)

    partials = pl.pallas_call(
        _mlp_kernel,
        out_shape=jax.ShapeDtypeStruct((nh, B, C), jnp.float32),
        grid_spec=pltpu.PrefetchScalarGridSpec(
            num_scalar_prefetch=0,
            grid=(nh, nk),
            in_specs=[
                pl.BlockSpec((B, tk), lambda hi, ki: (0, ki)),   # x tile
                pl.BlockSpec((tk, th), lambda hi, ki: (ki, hi)), # W1 tile (bf16)
                pl.BlockSpec((1, th), lambda hi, ki: (0, hi)),   # b1 chunk
                pl.BlockSpec((th, C), lambda hi, ki: (hi, 0)),   # W2 chunk (bf16)
            ],
            out_specs=pl.BlockSpec((None, B, C), lambda hi, ki: (hi, 0, 0)),
            scratch_shapes=[pltpu.VMEM((B, th), jnp.float32)],
        ),
        compiler_params=pltpu.CompilerParams(
            dimension_semantics=("parallel", "arbitrary"),
        ),
    )(x_flat, w1_bf, b1_2d, w2_bf)

    # Reduce the H-chunk partial logits (tiny: nh x B x C) and add classifier bias.
    return partials.sum(axis=0) + b2.reshape(1, C).astype(jnp.float32)


def _init_params(key, num_classes=200, num_channels=3):
    """Deterministic synthetic parameters matching the module's shapes."""
    d_in = num_channels * 64 * 64
    h = 1024
    k1, k2, k3, k4 = jax.random.split(key, 4)
    # Scaled-uniform init (kaiming-uniform-like bounds), deterministic.
    lim1 = 1.0 / jnp.sqrt(d_in)
    lim2 = 1.0 / jnp.sqrt(h)
    w1 = jax.random.uniform(k1, (d_in, h), jnp.float32, -lim1, lim1)
    b1 = jax.random.uniform(k2, (h,), jnp.float32, -lim1, lim1)
    w2 = jax.random.uniform(k3, (h, num_classes), jnp.float32, -lim2, lim2)
    b2 = jax.random.uniform(k4, (num_classes,), jnp.float32, -lim2, lim2)
    return w1, b1, w2, b2


if __name__ == "__main__":
    key = jax.random.PRNGKey(0)
    kp, kx = jax.random.split(key)

    num_classes = 200
    num_channels = 3
    batch = 2

    w1, b1, w2, b2 = _init_params(kp, num_classes, num_channels)
    x = jax.random.normal(kx, (batch, num_channels, 64, 64), jnp.float32)

    # Store / pass the big weights as bf16 so the kernel streams half the bytes.
    w1_bf = w1.astype(jnp.bfloat16)
    w2_bf = w2.astype(jnp.bfloat16)

    out = simple_mlp_tinyimagenet_forward(x, w1_bf, b1, w2_bf, b2)
    out = jax.block_until_ready(out)

    # Pure-JAX fp32 reference (eval-mode dropout = identity).
    ref = jnp.maximum(x.reshape(batch, -1) @ w1 + b1, 0.0) @ w2 + b2
    assert out.shape == (batch, num_classes)
    max_err = float(jnp.max(jnp.abs(out - ref)))
    assert jnp.allclose(out, ref, atol=5e-2, rtol=5e-2), f"max_err={max_err}"

    print("KERNEL_OK")
</pallas_src>

<mosaic_0001>
module attributes {stable_mosaic.version = 11 : i64} {
  func.func @_mlp_kernel(%arg0: i32, %arg1: i32, %arg2: memref<2x4096xbf16, #tpu.memory_space<vmem>>, %arg3: memref<4096x512xbf16, #tpu.memory_space<vmem>>, %arg4: memref<1x512xf32, #tpu.memory_space<vmem>>, %arg5: memref<512x200xbf16, #tpu.memory_space<vmem>>, %arg6: memref<1x2x200xf32, #tpu.memory_space<vmem>>, %arg7: memref<2x512xf32, #tpu.memory_space<vmem>>) attributes {dimension_semantics = [#tpu.dimension_semantics<parallel>, #tpu.dimension_semantics<arbitrary>], iteration_bounds = array<i64: 2, 3>, scalar_prefetch = 0 : i64, scratch_operands = 1 : i64, tpu.core_type = #tpu.core_type<tc>, window_params = [{transform_indices = @transform_0, window_bounds = array<i64: 2, 4096>}, {transform_indices = @transform_1, window_bounds = array<i64: 4096, 512>}, {transform_indices = @transform_2, window_bounds = array<i64: 1, 512>}, {transform_indices = @transform_3, window_bounds = array<i64: 512, 200>}, {transform_indices = @transform_4, window_bounds = array<i64: 1, 2, 200>}]} {
    %c0_i32 = arith.constant 0 : i32
    %0 = arith.cmpi eq, %arg1, %c0_i32 : i32
    %1 = arith.extui %0 : i1 to i32
    %c0_i32_0 = arith.constant 0 : i32
    %2 = arith.cmpi ne, %1, %c0_i32_0 : i32
    scf.if %2 {
      %c0_9 = arith.constant 0 : index
      %c0_10 = arith.constant 0 : index
      %12 = vector.load %arg4[%c0_9, %c0_10] : memref<1x512xf32, #tpu.memory_space<vmem>>, vector<1x512xf32>
      %13 = vector.shape_cast %12 : vector<1x512xf32> to vector<1x512xf32>
      %14 = vector.broadcast %13 : vector<1x512xf32> to vector<2x512xf32>
      %c0_11 = arith.constant 0 : index
      %c0_12 = arith.constant 0 : index
      %15 = vector.load %arg7[%c0_11, %c0_12] : memref<2x512xf32, #tpu.memory_space<vmem>>, vector<2x512xf32>
      tpu.vector_store %arg7[%c0_11, %c0_12], %14 {strides = array<i32>} : memref<2x512xf32, #tpu.memory_space<vmem>>, vector<2x512xf32>,
    } else {
    }
    %c0 = arith.constant 0 : index
    %c0_1 = arith.constant 0 : index
    %3 = vector.load %arg7[%c0, %c0_1] : memref<2x512xf32, #tpu.memory_space<vmem>>, vector<2x512xf32>
    %c0_2 = arith.constant 0 : index
    %c0_3 = arith.constant 0 : index
    %4 = vector.load %arg2[%c0_2, %c0_3] : memref<2x4096xbf16, #tpu.memory_space<vmem>>, vector<2x4096xbf16>
    %c0_4 = arith.constant 0 : index
    %c0_5 = arith.constant 0 : index
    %5 = vector.load %arg3[%c0_4, %c0_5] : memref<4096x512xbf16, #tpu.memory_space<vmem>>, vector<4096x512xbf16>
    %cst = arith.constant dense<0.000000e+00> : vector<2x512xf32>
    %6 = tpu.matmul %4, %5, %cst {dimension_numbers = #tpu.dot_dimension_numbers<[1], [0], [0], [1], [0, 0, 1, 1], [], []>} : vector<2x4096xbf16>, vector<4096x512xbf16>, vector<2x512xf32> -> vector<2x512xf32>
    %7 = arith.addf %3, %6 : vector<2x512xf32>
    %c0_6 = arith.constant 0 : index
    %c0_7 = arith.constant 0 : index
    %8 = vector.load %arg7[%c0_6, %c0_7] : memref<2x512xf32, #tpu.memory_space<vmem>>, vector<2x512xf32>
    tpu.vector_store %arg7[%c0_6, %c0_7], %7 {strides = array<i32>} : memref<2x512xf32, #tpu.memory_space<vmem>>, vector<2x512xf32>,
    %c2_i32 = arith.constant 2 : i32
    %9 = arith.cmpi eq, %arg1, %c2_i32 : i32
    %10 = arith.extui %9 : i1 to i32
    %c0_i32_8 = arith.constant 0 : i32
    %11 = arith.cmpi ne, %10, %c0_i32_8 : i32
    scf.if %11 {
      %c0_9 = arith.constant 0 : index
      %c0_10 = arith.constant 0 : index
      %12 = vector.load %arg7[%c0_9, %c0_10] : memref<2x512xf32, #tpu.memory_space<vmem>>, vector<2x512xf32>
      %cst_11 = arith.constant 0.000000e+00 : f32
      %13 = vector.broadcast %cst_11 : f32 to vector<2x512xf32>
      %14 = arith.maximumf %12, %13 : vector<2x512xf32>
      %15 = arith.truncf %14 : vector<2x512xf32> to vector<2x512xbf16>
      %c0_12 = arith.constant 0 : index
      %c0_13 = arith.constant 0 : index
      %16 = vector.load %arg5[%c0_12, %c0_13] : memref<512x200xbf16, #tpu.memory_space<vmem>>, vector<512x200xbf16>
      %cst_14 = arith.constant dense<0.000000e+00> : vector<2x200xf32>
      %17 = tpu.matmul %15, %16, %cst_14 {dimension_numbers = #tpu.dot_dimension_numbers<[1], [0], [0], [1], [0, 0, 1, 1], [], []>} : vector<2x512xbf16>, vector<512x200xbf16>, vector<2x200xf32> -> vector<2x200xf32>
      %c0_15 = arith.constant 0 : index
      %c0_16 = arith.constant 0 : index
      %c0_17 = arith.constant 0 : index
      %18 = vector.load %arg6[%c0_15, %c0_16, %c0_17] : memref<1x2x200xf32, #tpu.memory_space<vmem>>, vector<1x2x200xf32>
      %19 = vector.shape_cast %18 : vector<1x2x200xf32> to vector<2x200xf32>
      %20 = vector.shape_cast %17 : vector<2x200xf32> to vector<1x2x200xf32>
      tpu.vector_store %arg6[%c0_15, %c0_16, %c0_17], %20 {strides = array<i32>} : memref<1x2x200xf32, #tpu.memory_space<vmem>>, vector<1x2x200xf32>,
    } else {
    }
    return
  }
  func.func @transform_0(%arg0: i32, %arg1: i32) -> (i32, i32) {
    %c0_i32 = arith.constant 0 : i32
    %c0_i32_0 = arith.constant 0 : i32
    return %c0_i32, %arg1 : i32, i32
  }
  func.func @transform_1(%arg0: i32, %arg1: i32) -> (i32, i32) {
    %c0_i32 = arith.constant 0 : i32
    return %arg1, %arg0 : i32, i32
  }
  func.func @transform_2(%arg0: i32, %arg1: i32) -> (i32, i32) {
    %c0_i32 = arith.constant 0 : i32
    %c0_i32_0 = arith.constant 0 : i32
    return %c0_i32, %arg0 : i32, i32
  }
  func.func @transform_3(%arg0: i32, %arg1: i32) -> (i32, i32) {
    %c0_i32 = arith.constant 0 : i32
    %c0_i32_0 = arith.constant 0 : i32
    return %arg0, %c0_i32 : i32, i32
  }
  func.func @transform_4(%arg0: i32, %arg1: i32) -> (i32, i32, i32) {
    %c0_i32 = arith.constant 0 : i32
    %c0_i32_0 = arith.constant 0 : i32
    %c0_i32_1 = arith.constant 0 : i32
    return %arg0, %c0_i32, %c0_i32_0 : i32, i32, i32
  }
}

</mosaic_0001>

<bundles_post_ra>
// kernel: simple_mlp_tinyimagenet_forward.1
= control target key start
LH: loop header
LB: loop body
LE: loop exit
PB: predicated region body
PF: predicated region fallthrough
CT: control target
= control target key end

     0   :  { %s17281_s0 = inlined_call_operand.vmem [shape: bf16[2,12288], index: 0, kind: input, shape index: {}]   ;;  %s17282_s1 = inlined_call_operand.hbm [shape: bf16[12288,1024], index: 1, kind: input, shape index: {}]   ;;  %s17283_s2 = inlined_call_operand.hbm [shape: f32[1,1024], index: 2, kind: input, shape index: {}]   ;;  %s17284_s3 = inlined_call_operand.vmem [shape: bf16[1024,200], index: 3, kind: input, shape index: {}]   ;;  %s17285_s4 = inlined_call_operand.vmem [shape: f32[2,2,200], index: 4, kind: output, shape index: {}]  }
   0x1   :  { %17289 = sst [smem:[#allocation12_spill]] %s17282_s1 }
   0x2   :  { %9 = vsyncpa [#allocation4], 0 }
   0x3   :  { %11 = vsyncpa [#allocation4 + $0x1], 0 }
   0x4   :  { %12 = vsyncpa [#allocation6], 0 }
   0x5   :  { %14 = vsyncpa [#allocation6 + $0x1], 0  ;;  %s14664_s15 = smov 0   ;;  %s14666_s16 = smov 0  }
   0x6   :  { %s14668_s17 = smov 0   ;;  %s14670_s18 = smov 0  }
   0x7   :  { %s14672_s19 = smov 0   ;;  %s14674_s20 = smov 0  }
   0x8   :  { %s14676_s21 = smov 0   ;;  %s14678_s22 = smov 0  }
   0x9   :  { %s14680_s23 = smov 0   ;;  %s14682_s24 = smov 0  }
   0xa   :  { %s14684_s25 = smov 0  }
   0xb LB: > { %17290 = sst [smem:[#allocation9_spill]] %s14630_s24  ;;  %s29_s26 = sadd.s32 1, %s14626_s23  ;;  %s14634_s25 = sphi %s14684_s25, %s20_s25   ;;  %s14630_s24 = sphi %s14682_s24, %s17309_s24   ;;  %s14626_s23 = sphi %s14680_s23, %s17308_s23   ;;  %s14622_s22 = sphi %s14678_s22, %s17298_s22   ;;  %s14618_s21 = sphi %s14676_s21, %s17307_s21   ;;  %s14614_s20 = sphi %s14674_s20, %s17306_s20   ;;  %s14610_s19 = sphi %s14672_s19, %s17305_s19   ;;  %s14606_s18 = sphi %s14670_s18, %s17304_s18   ;;  %s14602_s17 = sphi %s14668_s17, %s17303_s17   ;;  %s14598_s16 = sphi %s14666_s16, %s17302_s16   ;;  %s14594_s15 = sphi %s14664_s15, %s17301_s15  }
   0xc   : > { %p30_p0 = scmp.ge.s32.totalorder %s29_s26, 3  ;;  %s32_s27 = sadd.s32 1, %s14630_s24 }
   0xd   : > { %p74_p1 = scmp.ne.s32.totalorder %s14614_s20, %s14610_s19  ;;  %p75_p2 = scmp.eq.s32.totalorder %s14634_s25, 0 }
   0xe   : > { %s17311_s26 = smov (%p30_p0, %s29_s26), 0  ;;  %s17313_s27 = smov (!%p30_p0, %s32_s27), %s14630_s24 }
   0xf   : > { %17291 = sst [smem:[#allocation10_spill]] %s17311_s26  ;;  %s67_s28 = sadd.s32 1, %s14614_s20 }
  0x10   : > { %p76_p3 = por %p75_p2, %p74_p1  ;;  %p14364_p4 = scmp.lt.s32.totalorder %s14634_s25, 6 }
  0x11   : > { %s190_s29 = sand.u32 1, %s14614_s20   ;;  %s8892_s30 = sshll.u32 %s14630_s24, 2 }
  0x12   : > { %s8890_s5 = sshll.u32 %s190_s29, 13  ;;  %s13262_s6 = sshll.u32 %s14626_s23, 12 }
  0x13   : > { %s200_s7 = sadd.s32 %s13262_s6, %s8892_s30  ;;  %s194_s8 = scalar_lea.vmem [#allocation3], %s8890_s5 }
  0x14   : > { %s205_s9 = sshll.u32 %s194_s8, 4  ;;  %s8894_s10 = sshll.u32 %s200_s7, 2  ;;  %s206_s9 = int_to_ptr.vmem [resolvable:$true] %s205_s9 }
  0x15   : > { %s17292_s1 = sld [smem:[#allocation12_spill]]  ;;  %p14358_p5 = pnand %p14364_p4, %p76_p3 }
  0x16   : > { %s191_s6 = scalar_lea.sflag [#allocation4], %s190_s29  ;;  %s14636_s5 = smov 512  }
  0x17   : > { %s14637_s7 = smov 256   ;;  %s14638_s8 = smov 16  }
  0x18   : > { %p8897_p6 = scmp.ge.s32.totalorder %s14634_s25, 1  ;;  %p242_p7 = scmp.lt.s32.totalorder %s14634_s25, 7 }
  0x19   : > { %s8886_s29 = sadd.s32 4294967295, %s14634_s25   ;;  %p34_p9 = scmp.ge.s32.totalorder %s17313_s27, 2 }
  0x1a   : > { %p14747_p8 = pnand %p8897_p6, %p242_p7  ;;  %p80_p10 = scmp.ne.s32.totalorder %s14610_s19, %s14606_s18 }
  0x1b   : > { %s202_s13 = scalar_lea.hbm %s17292_s1, %s8894_s10  ;;  %s62_s10 = ssub.s32 %s14626_s23, %s17311_s26 }
  0x1c   : > { %s203_s14 = sshll.u32 %s202_s13, 4  ;;  %p81_p11 = scmp.eq.s32.totalorder %s8886_s29, 0  ;;  %s204_s14 = int_to_ptr.hbm [resolvable:$true] %s203_s14 }
  0x1d   : > { %14360 = dma.hbm_to_vmem [thread:$0]  (!%p14358_p5), %s204_s14, 131072, %s206_s9, %s191_s6, %s14636_s5, %s14637_s7, %s14638_s8  }
  0x1e   : > { %s17315_s27 = smov (%p34_p9, %s17313_s27), 0  ;;  %p14758_p12 = por %p81_p11, %p80_p10 }
  0x1f   : > { %17294 = sst [smem:[#allocation11_spill]] %s17315_s27  ;;  %s93_s12 = sadd.s32 1, %s14602_s17 }
  0x20   : > { %s63_s13 = ssub.s32 %s14630_s24, %s17315_s27  ;;  %p106_p13 = scmp.ne.s32.totalorder %s14598_s16, %s14594_s15 }
  0x21   : > { %s64_s14 = sor.u32 %s63_s13, %s62_s10  ;;  %p91_p0 = scmp.eq.s32.totalorder %s63_s13, 0 }
  0x22   : > { %p65_p1 = scmp.eq.s32.totalorder %s64_s14, 0  ;;  %p100_p3 = scmp.ne.s32.totalorder %s14602_s17, %s14598_s16 }
  0x23   : > { %s14770_s6 = scalar_select %p91_p0, %s14602_s17, %s93_s12  }
  0x24   : > { %s14775_s18 = scalar_select %p65_p1, %s14614_s20, %s67_s28  }
  0x25   : > { %p14777_p5 = por %p106_p13, %p81_p11  ;;  %s215_s7 = sand.u32 1, %s14602_s17  }
  0x26   : > { %p102_p6 = por %p100_p3, %p75_p2  ;;  %s8895_s8 = sshll.u32 %s215_s7, 2 }
  0x27   : > { %s223_s29 = scalar_lea.hbm %s17283_s2, %s8892_s30  ;;  %s219_s14 = scalar_lea.vmem [#allocation5], %s8895_s8 }
  0x28   : > { %s225_s13 = sshll.u32 %s223_s29, 4  ;;  %s227_s12 = sshll.u32 %s219_s14, 4  ;;  %s226_s13 = int_to_ptr.hbm [resolvable:$true] %s225_s13  ;;  %s228_s12 = int_to_ptr.vmem [resolvable:$true] %s227_s12 }
  0x29   : > { %p14361_p7 = pnand %p14364_p4, %p102_p6  ;;  %s216_s28 = scalar_lea.sflag [#allocation6], %s215_s7 }
  0x2a   : > { %246 = sbr.rel (%p14747_p8) target bundleno = 1463 (0x5b7), region = 36  ;;  %s248_s1 = sand.u32 (!%p14747_p8), 1, %s14610_s19  }
  0x2b   : > { %14363 = dma.hbm_to_vmem [thread:$0]  (!%p14361_p7), %s226_s13, 64, %s228_s12, %s216_s28  }
  0x2c   : > { %s8898_s27 = sshll.u32 (!%p14747_p8), %s248_s1, 13  ;;  %s249_s26 = scalar_lea.sflag (!%p14747_p8), [#allocation4], %s248_s1 }
  0x2d   : > { %s14794_s24 = scalar_lea.vmem (!%p14747_p8), [#allocation3], %s8898_s27 }
  0x2f   : > { %14585 = dma.done.wait (%p14758_p12), %s249_s26, 131072  }
  0x30   : > { %14587 = vsyncadd (%p14758_p12), %s249_s26, 4294836224  ;;  %s258_s30 = sand.u32 1, %s14598_s16  }
  0x31   : > { %s8899_s7 = sshll.u32 %s258_s30, 2  ;;  %s259_s8 = scalar_lea.sflag [#allocation6], %s258_s30 }
  0x32   : > { %s262_s15 = scalar_lea.vmem [#allocation5], %s8899_s7 }
  0x33   : > { %14589 = dma.done.wait (%p14777_p5), %s259_s8, 64  }
  0x34   : > { %14591 = vsyncadd (%p14777_p5), %s259_s8, 4294967232  ;;  %s8900_s1 = sshll.u32 %s14618_s21, 5  ;;  %s8901_s27 = sshll.u32 %s14622_s22, 6 }
  0x35   : > { %p304_p2 = scmp.lt.s32.totalorder %s8900_s1, 95  ;;  %p312_p4 = scmp.lt.s32.totalorder %s8901_s27, 127 }
  0x36   : > { %p318_p8 = scmp.lt.s32.totalorder %s14622_s22, 1  ;;  %p8906_p9 = scmp.ne.s32.totalorder %s14618_s21, 0 }
  0x37   : > { %s17317_s1 = smov (!%p304_p2, %s8900_s1), 95  ;;  %s17319_s27 = smov (!%p312_p4, %s8901_s27), 127 }
  0x38   : > { %s14811_s9 = scalar_lea.vmem %s17281_s0, %s17317_s1  ;;  %s13263_s10 = sshll.u32 %s17319_s27, 3 }
  0x39   : > { %s14816_s13 = scalar_lea.vmem %s17284_s3, %s13263_s10  ;;  %s17321_s22 = smov (!%p318_p8, %s14622_s22), 1 }
  0x3a   : > { %s13264_s14 = sshll.u32 %s17321_s22, 2  ;;  %326 = sbr.rel (%p8906_p9) target bundleno = 71 (0x47), region = 48 }
  0x3b   : > { %s14822_s30 = scalar_lea.vmem %s17285_s4, %s13264_s14 }
  0x3f   : > { %v327_v0 = vld [vmem:[%s262_s15] sm:$0xf]  ;;  %vm336_vm0 = vcmask 1041408   ;;  %vm338_vm1 = vcmask 1045508   ;;  %vm340_vm2 = vcmask 1043456  }
  0x40   : > { %v329_v1 = vperm.slane %v327_v0, 0  ;;  %v330_v2 = vperm.slane %v327_v0, 1  ;;  %v331_v3 = vperm.slane %v327_v0, 2  ;;  %v332_v4 = vperm.slane %v327_v0, 3 }
  0x42   : > { %v333_v5 = vrot.slane %v330_v2, 6  ;;  %v334_v6 = vrot.slane %v331_v3, 4  ;;  %v335_v7 = vrot.slane %v332_v4, 2 }
  0x44   : > { %v337_v8 = vsel %vm336_vm0, %v329_v1, %v333_v5  ;;  %v339_v9 = vsel %vm338_vm1, %v334_v6, %v335_v7 }
  0x45   : > { %v341_v10 = vsel %vm340_vm2, %v337_v8, %v339_v9 }
  0x46   : > { %343 = vst [vmem:[#allocation2] sm:$0xff] %v341_v10 }
  0x47 PF: > { %v9021_v11 = vld [vmem:[%s14794_s24 + $0xe0] sm:$0xf]  ;;  %v13295_v12 = vld [vmem:[%s14794_s24 + $0xec] sm:$0xf0]  ;;  %vm8236_vm3 = vcmask 1041408   ;;  %vm8238_vm4 = vcmask 1045508  }
  0x48   : > { %v9149_v13 = vld [vmem:[%s14794_s24 + $0x1e0] sm:$0xf]  ;;  %v9022_v14 = vor.u32 %v13295_v12, %v9021_v11  ;;  %v13327_v15 = vld [vmem:[%s14794_s24 + $0x1ec] sm:$0xf0]  ;;  %vm8240_vm5 = vcmask 1043456   ;;  %p13003_p10 = scmp.ne.s32.totalorder %s14618_s21, 2 }
  0x49   : > { %v9277_v16 = vld [vmem:[%s14794_s24 + $0x2e0] sm:$0xf]  ;;  %v13359_v17 = vld [vmem:[%s14794_s24 + $0x2ec] sm:$0xf0]  ;;  %v9150_v18 = vor.u32 %v13327_v15, %v9149_v13 }
  0x4a   : > { %v9278_v19 = vor.u32 %v13359_v17, %v9277_v16  ;;  %v9405_v20 = vld [vmem:[%s14794_s24 + $0x3e0] sm:$0xf]  ;;  %v13391_v21 = vld [vmem:[%s14794_s24 + $0x3ec] sm:$0xf0]  ;;  %6565 = vmatpush.bf16.msra.mxu0 %v9022_v14 }
  0x4b   : > { %v9005_v22 = vld [vmem:[%s14794_s24 + $0xc0] sm:$0xf]  ;;  %v9406_v23 = vor.u32 %v13391_v21, %v9405_v20  ;;  %v13291_v24 = vld [vmem:[%s14794_s24 + $0xcc] sm:$0xf0]  ;;  %6578 = vmatpush.bf16.msra.mxu1 %v9150_v18 }
  0x4c   : > { %v9133_v25 = vld [vmem:[%s14794_s24 + $0x1c0] sm:$0xf]  ;;  %v13323_v26 = vld [vmem:[%s14794_s24 + $0x1cc] sm:$0xf0]  ;;  %6591 = vmatpush.bf16.msra.mxu2 %v9278_v19  ;;  %v9006_v27 = vor.u32 %v13291_v24, %v9005_v22 }
  0x4d   : > { %v9134_v28 = vor.u32 %v13323_v26, %v9133_v25  ;;  %v9261_v29 = vld [vmem:[%s14794_s24 + $0x2c0] sm:$0xf]  ;;  %v13355_v30 = vld [vmem:[%s14794_s24 + $0x2cc] sm:$0xf0]  ;;  %6604 = vmatpush.bf16.msra.mxu3 %v9406_v23 }
  0x4e   : > { %v9389_v31 = vld [vmem:[%s14794_s24 + $0x3c0] sm:$0xf]  ;;  %v9262_v32 = vor.u32 %v13355_v30, %v9261_v29  ;;  %v13387_v33 = vld [vmem:[%s14794_s24 + $0x3cc] sm:$0xf0]  ;;  %6566 = vmatpush.bf16.msra.mxu0 %v9006_v27 }
  0x4f   : > { %v8989_v34 = vld [vmem:[%s14794_s24 + $0xa0] sm:$0xf]  ;;  %v13287_v35 = vld [vmem:[%s14794_s24 + $0xac] sm:$0xf0]  ;;  %v9390_v36 = vor.u32 %v13387_v33, %v9389_v31  ;;  %6579 = vmatpush.bf16.msra.mxu1 %v9134_v28 }
  0x50   : > { %v9117_v37 = vld [vmem:[%s14794_s24 + $0x1a0] sm:$0xf]  ;;  %v13319_v38 = vld [vmem:[%s14794_s24 + $0x1ac] sm:$0xf0]  ;;  %v8990_v40 = vor.u32 %v13287_v35, %v8989_v34  ;;  %6592 = vmatpush.bf16.msra.mxu2 %v9262_v32 }
  0x51   : > { %v9245_v39 = vld [vmem:[%s14794_s24 + $0x2a0] sm:$0xf]  ;;  %v13351_v41 = vld [vmem:[%s14794_s24 + $0x2ac] sm:$0xf0]  ;;  %v9118_v44 = vor.u32 %v13319_v38, %v9117_v37  ;;  %6605 = vmatpush.bf16.msra.mxu3 %v9390_v36 }
  0x52   : > { %v9373_v42 = vld [vmem:[%s14794_s24 + $0x3a0] sm:$0xf]  ;;  %v13383_v43 = vld [vmem:[%s14794_s24 + $0x3ac] sm:$0xf0]  ;;  %v9246_v45 = vor.u32 %v13351_v41, %v9245_v39  ;;  %6567 = vmatpush.bf16.msra.mxu0 %v8990_v40 }
  0x53   : > { %v8973_v46 = vld [vmem:[%s14794_s24 + $0x80] sm:$0xf]  ;;  %v13283_v47 = vld [vmem:[%s14794_s24 + $0x8c] sm:$0xf0]  ;;  %v9374_v49 = vor.u32 %v13383_v43, %v9373_v42  ;;  %6580 = vmatpush.bf16.msra.mxu1 %v9118_v44 }
  0x54   : > { %v9101_v48 = vld [vmem:[%s14794_s24 + $0x180] sm:$0xf]  ;;  %v13315_v50 = vld [vmem:[%s14794_s24 + $0x18c] sm:$0xf0]  ;;  %v8974_v55 = vor.u32 %v13283_v47, %v8973_v46  ;;  %6593 = vmatpush.bf16.msra.mxu2 %v9246_v45 }
  0x55   : > { %v9229_v51 = vld [vmem:[%s14794_s24 + $0x280] sm:$0xf]  ;;  %v13347_v52 = vld [vmem:[%s14794_s24 + $0x28c] sm:$0xf0]  ;;  %v9102_v56 = vor.u32 %v13315_v50, %v9101_v48  ;;  %6606 = vmatpush.bf16.msra.mxu3 %v9374_v49 }
  0x56   : > { %v9357_v53 = vld [vmem:[%s14794_s24 + $0x380] sm:$0xf]  ;;  %v13379_v54 = vld [vmem:[%s14794_s24 + $0x38c] sm:$0xf0]  ;;  %v9230_v57 = vor.u32 %v13347_v52, %v9229_v51  ;;  %6568 = vmatpush.bf16.msra.mxu0 %v8974_v55 }
  0x57   : > { %v8957_v58 = vld [vmem:[%s14794_s24 + $0x60] sm:$0xf]  ;;  %v13279_v59 = vld [vmem:[%s14794_s24 + $0x6c] sm:$0xf0]  ;;  %v9358_v61 = vor.u32 %v13379_v54, %v9357_v53  ;;  %6581 = vmatpush.bf16.msra.mxu1 %v9102_v56 }
  0x58   : > { %v9085_v60 = vld [vmem:[%s14794_s24 + $0x160] sm:$0xf]  ;;  %v13311_v62 = vld [vmem:[%s14794_s24 + $0x16c] sm:$0xf0]  ;;  %v8958_v3 = vor.u32 %v13279_v59, %v8957_v58  ;;  %6594 = vmatpush.bf16.msra.mxu2 %v9230_v57 }
  0x59   : > { %v9213_v63 = vld [vmem:[%s14794_s24 + $0x260] sm:$0xf]  ;;  %v13343_v0 = vld [vmem:[%s14794_s24 + $0x26c] sm:$0xf0]  ;;  %v9086_v4 = vor.u32 %v13311_v62, %v9085_v60  ;;  %6607 = vmatpush.bf16.msra.mxu3 %v9358_v61 }
  0x5a   : > { %v9341_v1 = vld [vmem:[%s14794_s24 + $0x360] sm:$0xf]  ;;  %v13375_v2 = vld [vmem:[%s14794_s24 + $0x36c] sm:$0xf0]  ;;  %v9214_v5 = vor.u32 %v13343_v0, %v9213_v63  ;;  %6569 = vmatpush.bf16.msra.mxu0 %v8958_v3 }
  0x5b   : > { %v8941_v6 = vld [vmem:[%s14794_s24 + $0x40] sm:$0xf]  ;;  %v13275_v7 = vld [vmem:[%s14794_s24 + $0x4c] sm:$0xf0]  ;;  %v9342_v9 = vor.u32 %v13375_v2, %v9341_v1  ;;  %6582 = vmatpush.bf16.msra.mxu1 %v9086_v4 }
  0x5c   : > { %v9069_v8 = vld [vmem:[%s14794_s24 + $0x140] sm:$0xf]  ;;  %v13307_v10 = vld [vmem:[%s14794_s24 + $0x14c] sm:$0xf0]  ;;  %v8942_v15 = vor.u32 %v13275_v7, %v8941_v6  ;;  %6595 = vmatpush.bf16.msra.mxu2 %v9214_v5 }
  0x5d   : > { %v9197_v11 = vld [vmem:[%s14794_s24 + $0x240] sm:$0xf]  ;;  %v13339_v12 = vld [vmem:[%s14794_s24 + $0x24c] sm:$0xf0]  ;;  %v9070_v16 = vor.u32 %v13307_v10, %v9069_v8  ;;  %6608 = vmatpush.bf16.msra.mxu3 %v9342_v9 }
  0x5e   : > { %v9325_v13 = vld [vmem:[%s14794_s24 + $0x340] sm:$0xf]  ;;  %v13371_v14 = vld [vmem:[%s14794_s24 + $0x34c] sm:$0xf0]  ;;  %v9198_v17 = vor.u32 %v13339_v12, %v9197_v11  ;;  %6570 = vmatpush.bf16.msra.mxu0 %v8942_v15 }
  0x5f   : > { %v8925_v18 = vld [vmem:[%s14794_s24 + $0x20] sm:$0xf]  ;;  %v13271_v19 = vld [vmem:[%s14794_s24 + $0x2c] sm:$0xf0]  ;;  %v9326_v21 = vor.u32 %v13371_v14, %v9325_v13  ;;  %6583 = vmatpush.bf16.msra.mxu1 %v9070_v16 }
  0x60   : > { %v9053_v20 = vld [vmem:[%s14794_s24 + $0x120] sm:$0xf]  ;;  %v13303_v22 = vld [vmem:[%s14794_s24 + $0x12c] sm:$0xf0]  ;;  %v8926_v27 = vor.u32 %v13271_v19, %v8925_v18  ;;  %6596 = vmatpush.bf16.msra.mxu2 %v9198_v17 }
  0x61   : > { %v9181_v23 = vld [vmem:[%s14794_s24 + $0x220] sm:$0xf]  ;;  %v13335_v24 = vld [vmem:[%s14794_s24 + $0x22c] sm:$0xf0]  ;;  %v9054_v30 = vor.u32 %v13303_v22, %v9053_v20  ;;  %6609 = vmatpush.bf16.msra.mxu3 %v9326_v21 }
  0x62   : > { %v9309_v25 = vld [vmem:[%s14794_s24 + $0x320] sm:$0xf]  ;;  %v13367_v26 = vld [vmem:[%s14794_s24 + $0x32c] sm:$0xf0]  ;;  %v9182_v31 = vor.u32 %v13335_v24, %v9181_v23  ;;  %6571 = vmatpush.bf16.msra.mxu0 %v8926_v27 }
  0x63   : > { %v8909_v28 = vld [vmem:[%s14794_s24] sm:$0xf]  ;;  %v13267_v29 = vld [vmem:[%s14794_s24 + $0xc] sm:$0xf0]  ;;  %v9310_v35 = vor.u32 %v13367_v26, %v9309_v25  ;;  %6584 = vmatpush.bf16.msra.mxu1 %v9054_v30 }
  0x64   : > { %v9037_v32 = vld [vmem:[%s14794_s24 + $0x100] sm:$0xf]  ;;  %v13299_v33 = vld [vmem:[%s14794_s24 + $0x10c] sm:$0xf0]  ;;  %v8910_v42 = vor.u32 %v13267_v29, %v8909_v28  ;;  %6597 = vmatpush.bf16.msra.mxu2 %v9182_v31 }
  0x65   : > { %v9165_v34 = vld [vmem:[%s14794_s24 + $0x200] sm:$0xf]  ;;  %v13331_v36 = vld [vmem:[%s14794_s24 + $0x20c] sm:$0xf0]  ;;  %v9038_v46 = vor.u32 %v13299_v33, %v9037_v32  ;;  %6610 = vmatpush.bf16.msra.mxu3 %v9310_v35 }
  0x66   : > { %v9293_v37 = vld [vmem:[%s14794_s24 + $0x300] sm:$0xf]  ;;  %v13363_v38 = vld [vmem:[%s14794_s24 + $0x30c] sm:$0xf0]  ;;  %v9166_v47 = vor.u32 %v13331_v36, %v9165_v34  ;;  %6572 = vmatpush.bf16.msra.mxu0 %v8910_v42 }
  0x67   : > { %v9533_v39 = vld [vmem:[%s14794_s24 + $0x4e0] sm:$0xf]  ;;  %v13423_v40 = vld [vmem:[%s14794_s24 + $0x4ec] sm:$0xf0]  ;;  %v9294_v50 = vor.u32 %v13363_v38, %v9293_v37  ;;  %6585 = vmatpush.bf16.msra.mxu1 %v9038_v46 }
  0x68   : > { %v9661_v41 = vld [vmem:[%s14794_s24 + $0x5e0] sm:$0xf]  ;;  %v13455_v43 = vld [vmem:[%s14794_s24 + $0x5ec] sm:$0xf0]  ;;  %v9534_v51 = vor.u32 %v13423_v40, %v9533_v39  ;;  %6598 = vmatpush.bf16.msra.mxu2 %v9166_v47 }
  0x69   : > { %v9789_v44 = vld [vmem:[%s14794_s24 + $0x6e0] sm:$0xf]  ;;  %v13487_v45 = vld [vmem:[%s14794_s24 + $0x6ec] sm:$0xf0]  ;;  %v9662_v52 = vor.u32 %v13455_v43, %v9661_v41  ;;  %6611 = vmatpush.bf16.msra.mxu3 %v9294_v50 }
  0x6a   : > { %v9917_v48 = vld [vmem:[%s14794_s24 + $0x7e0] sm:$0xf]  ;;  %v13519_v49 = vld [vmem:[%s14794_s24 + $0x7ec] sm:$0xf0]  ;;  %v9790_v53 = vor.u32 %v13487_v45, %v9789_v44  ;;  %6617 = vmatpush.bf16.msrb.mxu0 %v9534_v51 }
  0x6b   : > { %v9517_v54 = vld [vmem:[%s14794_s24 + $0x4c0] sm:$0xf]  ;;  %v13419_v55 = vld [vmem:[%s14794_s24 + $0x4cc] sm:$0xf0]  ;;  %v9918_v57 = vor.u32 %v13519_v49, %v9917_v48  ;;  %6630 = vmatpush.bf16.msrb.mxu1 %v9662_v52 }
  0x6c   : > { %v9645_v56 = vld [vmem:[%s14794_s24 + $0x5c0] sm:$0xf]  ;;  %v13451_v58 = vld [vmem:[%s14794_s24 + $0x5cc] sm:$0xf0]  ;;  %v9518_v63 = vor.u32 %v13419_v55, %v9517_v54  ;;  %6643 = vmatpush.bf16.msrb.mxu2 %v9790_v53 }
  0x6d   : > { %v9773_v59 = vld [vmem:[%s14794_s24 + $0x6c0] sm:$0xf]  ;;  %v13483_v60 = vld [vmem:[%s14794_s24 + $0x6cc] sm:$0xf0]  ;;  %v9646_v2 = vor.u32 %v13451_v58, %v9645_v56  ;;  %6656 = vmatpush.bf16.msrb.mxu3 %v9918_v57 }
  0x6e   : > { %v9901_v61 = vld [vmem:[%s14794_s24 + $0x7c0] sm:$0xf]  ;;  %v13515_v62 = vld [vmem:[%s14794_s24 + $0x7cc] sm:$0xf0]  ;;  %v9774_v3 = vor.u32 %v13483_v60, %v9773_v59  ;;  %6618 = vmatpush.bf16.msrb.mxu0 %v9518_v63 }
  0x6f   : > { %v9501_v0 = vld [vmem:[%s14794_s24 + $0x4a0] sm:$0xf]  ;;  %v13415_v1 = vld [vmem:[%s14794_s24 + $0x4ac] sm:$0xf0]  ;;  %v9902_v7 = vor.u32 %v13515_v62, %v9901_v61  ;;  %6631 = vmatpush.bf16.msrb.mxu1 %v9646_v2 }
  0x70   : > { %v9629_v4 = vld [vmem:[%s14794_s24 + $0x5a0] sm:$0xf]  ;;  %v13447_v5 = vld [vmem:[%s14794_s24 + $0x5ac] sm:$0xf0]  ;;  %v9502_v12 = vor.u32 %v13415_v1, %v9501_v0  ;;  %6644 = vmatpush.bf16.msrb.mxu2 %v9774_v3 }
  0x71   : > { %v345_v6 = vld [vmem:[%s14811_s9] sm:$0xff]  ;;  %v9757_v8 = vld [vmem:[%s14794_s24 + $0x6a0] sm:$0xf]  ;;  %v9630_v13 = vor.u32 %v13447_v5, %v9629_v4  ;;  %6657 = vmatpush.bf16.msrb.mxu3 %v9902_v7 }
  0x72   : > { %v13479_v9 = vld [vmem:[%s14794_s24 + $0x6ac] sm:$0xf0]  ;;  %1374 = vst [vmem:[#allocation1] ss:$9 sm:$0xff] %v345_v6  ;;  %v9885_v10 = vld [vmem:[%s14794_s24 + $0x7a0] sm:$0xf]  ;;  %6619 = vmatpush.bf16.msrb.mxu0 %v9502_v12 }
  0x73   : > { %v13511_v11 = vld [vmem:[%s14794_s24 + $0x7ac] sm:$0xf0]  ;;  %v9758_v14 = vor.u32 %v13479_v9, %v9757_v8  ;;  %v9485_v15 = vld [vmem:[%s14794_s24 + $0x480] sm:$0xf]  ;;  %6632 = vmatpush.bf16.msrb.mxu1 %v9630_v13  ;;  %v346_v8 = vld [vmem:[%s14811_s9 + $0x8] sm:$0xff] }
  0x74   : > { %v13411_v16 = vld [vmem:[%s14794_s24 + $0x48c] sm:$0xf0]  ;;  %v9613_v17 = vld [vmem:[%s14794_s24 + $0x580] sm:$0xf]  ;;  %v9886_v18 = vor.u32 %v13511_v11, %v9885_v10 }
  0x75   : > { %v13443_v19 = vld [vmem:[%s14794_s24 + $0x58c] sm:$0xf0]  ;;  %v9741_v20 = vld [vmem:[%s14794_s24 + $0x680] sm:$0xf]  ;;  %v9486_v25 = vor.u32 %v13411_v16, %v9485_v15  ;;  %6645 = vmatpush.bf16.msrb.mxu2 %v9758_v14 }
  0x76   : > { %v13475_v21 = vld [vmem:[%s14794_s24 + $0x68c] sm:$0xf0]  ;;  %v9869_v22 = vld [vmem:[%s14794_s24 + $0x780] sm:$0xf]  ;;  %v9614_v29 = vor.u32 %v13443_v19, %v9613_v17  ;;  %6658 = vmatpush.bf16.msrb.mxu3 %v9886_v18 }
  0x77   : > { %v13507_v23 = vld [vmem:[%s14794_s24 + $0x78c] sm:$0xf0]  ;;  %v9469_v24 = vld [vmem:[%s14794_s24 + $0x460] sm:$0xf]  ;;  %v9742_v30 = vor.u32 %v13475_v21, %v9741_v20  ;;  %6620 = vmatpush.bf16.msrb.mxu0 %v9486_v25 }
  0x78   : > { %v13407_v26 = vld [vmem:[%s14794_s24 + $0x46c] sm:$0xf0]  ;;  %v9597_v27 = vld [vmem:[%s14794_s24 + $0x560] sm:$0xf]  ;;  %v9870_v34 = vor.u32 %v13507_v23, %v9869_v22  ;;  %6633 = vmatpush.bf16.msrb.mxu1 %v9614_v29 }
  0x79   : > { %v13439_v28 = vld [vmem:[%s14794_s24 + $0x56c] sm:$0xf0]  ;;  %v14926_v31 = vld [vmem:[#allocation1 + $0x12] sm:$0xff]  ;;  %v14935_v37 = vld [vmem:[#allocation1 + $0x9] sm:$0xff]  ;;  %v9470_v40 = vor.u32 %v13407_v26, %v9469_v24  ;;  %6646 = vmatpush.bf16.msrb.mxu2 %v9742_v30 }
  0x7a   : > { %v14928_v32 = vld [vmem:[#allocation1] sm:$0xff]  ;;  %v9725_v35 = vld [vmem:[%s14794_s24 + $0x660] sm:$0xf]  ;;  %6599 = vmatmul.bf16.vlgmr.msra.gmra.mxu2 %v14926_v31  ;;  %6586 = vmatmul.bf16.vlgmr.msra.gmra.mxu1 %v14935_v37  ;;  %v9598_v41 = vor.u32 %v13439_v28, %v9597_v27  ;;  %v14964_v7 = vld [vmem:[#allocation1 + $0x36] sm:$0xff] }
  0x7b   : > { %v14930_v33 = vld [vmem:[#allocation1 + $0x1b] sm:$0xff]  ;;  %v9853_v38 = vld [vmem:[%s14794_s24 + $0x760] sm:$0xf]  ;;  %6573 = vmatmul.bf16.vlgmr.msra.gmra.mxu0 %v14928_v32  ;;  %6659 = vmatpush.bf16.msrb.mxu3 %v9870_v34  ;;  %v14967_v11 = vld [vmem:[#allocation1 + $0x24] sm:$0xff] }
  0x7c   : > { %v13471_v36 = vld [vmem:[%s14794_s24 + $0x66c] sm:$0xf0]  ;;  %6612 = vmatmul.bf16.vlgmr.msra.gmra.mxu3 %v14930_v33  ;;  %v9453_v43 = vld [vmem:[%s14794_s24 + $0x440] sm:$0xf]  ;;  %6621 = vmatpush.bf16.msrb.mxu0 %v9470_v40 }
  0x7d   : > { %v13503_v39 = vld [vmem:[%s14794_s24 + $0x76c] sm:$0xf0]  ;;  %v9726_v42 = vor.u32 %v13471_v36, %v9725_v35  ;;  %v9581_v45 = vld [vmem:[%s14794_s24 + $0x540] sm:$0xf]  ;;  %6634 = vmatpush.bf16.msrb.mxu1 %v9598_v41 }
  0x7e   : > { %v13403_v44 = vld [vmem:[%s14794_s24 + $0x44c] sm:$0xf0]  ;;  %v9854_v46 = vor.u32 %v13503_v39, %v9853_v38  ;;  %v9709_v48 = vld [vmem:[%s14794_s24 + $0x640] sm:$0xf] }
  0x7f   : > { %v13435_v47 = vld [vmem:[%s14794_s24 + $0x54c] sm:$0xf0]  ;;  %v9837_v50 = vld [vmem:[%s14794_s24 + $0x740] sm:$0xf]  ;;  %v9454_v52 = vor.u32 %v13403_v44, %v9453_v43  ;;  %6647 = vmatpush.bf16.msrb.mxu2 %v9726_v42 }
  0x80   : > { %v13467_v49 = vld [vmem:[%s14794_s24 + $0x64c] sm:$0xf0]  ;;  %v9437_v53 = vld [vmem:[%s14794_s24 + $0x420] sm:$0xf]  ;;  %v9582_v54 = vor.u32 %v13435_v47, %v9581_v45  ;;  %6660 = vmatpush.bf16.msrb.mxu3 %v9854_v46 }
  0x81   : > { %v13499_v51 = vld [vmem:[%s14794_s24 + $0x74c] sm:$0xf0]  ;;  %v9710_v55 = vor.u32 %v13467_v49, %v9709_v48  ;;  %v9565_v57 = vld [vmem:[%s14794_s24 + $0x520] sm:$0xf]  ;;  %6622 = vmatpush.bf16.msrb.mxu0 %v9454_v52 }
  0x82   : > { %v13399_v56 = vld [vmem:[%s14794_s24 + $0x42c] sm:$0xf0]  ;;  %v9838_v59 = vor.u32 %v13499_v51, %v9837_v50  ;;  %v9693_v60 = vld [vmem:[%s14794_s24 + $0x620] sm:$0xf]  ;;  %6635 = vmatpush.bf16.msrb.mxu1 %v9582_v54 }
  0x83   : > { %v13431_v58 = vld [vmem:[%s14794_s24 + $0x52c] sm:$0xf0]  ;;  %v9821_v62 = vld [vmem:[%s14794_s24 + $0x720] sm:$0xf]  ;;  %v9438_v2 = vor.u32 %v13399_v56, %v9437_v53  ;;  %6648 = vmatpush.bf16.msrb.mxu2 %v9710_v55 }
  0x84   : > { %v13463_v61 = vld [vmem:[%s14794_s24 + $0x62c] sm:$0xf0]  ;;  %v9421_v0 = vld [vmem:[%s14794_s24 + $0x400] sm:$0xf]  ;;  %v9566_v9 = vor.u32 %v13431_v58, %v9565_v57  ;;  %6661 = vmatpush.bf16.msrb.mxu3 %v9838_v59 }
  0x85   : > { %v13495_v63 = vld [vmem:[%s14794_s24 + $0x72c] sm:$0xf0]  ;;  %v9549_v3 = vld [vmem:[%s14794_s24 + $0x500] sm:$0xf]  ;;  %v9694_v10 = vor.u32 %v13463_v61, %v9693_v60  ;;  %6623 = vmatpush.bf16.msrb.mxu0 %v9438_v2 }
  0x86   : > { %v13395_v1 = vld [vmem:[%s14794_s24 + $0x40c] sm:$0xf0]  ;;  %v9677_v5 = vld [vmem:[%s14794_s24 + $0x600] sm:$0xf]  ;;  %v9822_v14 = vor.u32 %v13495_v63, %v9821_v62  ;;  %6636 = vmatpush.bf16.msrb.mxu1 %v9566_v9 }
  0x87   : > { %v13427_v4 = vld [vmem:[%s14794_s24 + $0x50c] sm:$0xf0]  ;;  %v14971_v13 = vld [vmem:[#allocation1 + $0x2d] sm:$0xff]  ;;  %v9422_v20 = vor.u32 %v13395_v1, %v9421_v0  ;;  %6649 = vmatpush.bf16.msrb.mxu2 %v9694_v10 }
  0x88   : > { %v13459_v6 = vld [vmem:[%s14794_s24 + $0x60c] sm:$0xf0]  ;;  %v9805_v15 = vld [vmem:[%s14794_s24 + $0x700] sm:$0xf]  ;;  %v9550_v24 = vor.u32 %v13427_v4, %v9549_v3  ;;  %6662 = vmatpush.bf16.msrb.mxu3 %v9822_v14 }
  0x89   : > { %v14969_v12 = vld [vmem:[#allocation1 + $0x3f] sm:$0xff]  ;;  %v10045_v17 = vld [vmem:[%s14794_s24 + $0x8e0] sm:$0xf]  ;;  %v9678_v25 = vor.u32 %v13459_v6, %v9677_v5  ;;  %6624 = vmatpush.bf16.msrb.mxu0 %v9422_v20 }
  0x8a   : > { %v13491_v16 = vld [vmem:[%s14794_s24 + $0x70c] sm:$0xf0]  ;;  %1384 = vst [vmem:[#allocation1] ss:$9 sm:$0xff] %v346_v8  ;;  %v10173_v19 = vld [vmem:[%s14794_s24 + $0x9e0] sm:$0xf]  ;;  %6637 = vmatpush.bf16.msrb.mxu1 %v9550_v24 }
  0x8b   : > { %v13551_v18 = vld [vmem:[%s14794_s24 + $0x8ec] sm:$0xf0]  ;;  %v10301_v22 = vld [vmem:[%s14794_s24 + $0xae0] sm:$0xf]  ;;  %v9806_v28 = vor.u32 %v13491_v16, %v9805_v15  ;;  %6650 = vmatpush.bf16.msrb.mxu2 %v9678_v25 }
  0x8c   : > { %v13583_v21 = vld [vmem:[%s14794_s24 + $0x9ec] sm:$0xf0]  ;;  %v10429_v26 = vld [vmem:[%s14794_s24 + $0xbe0] sm:$0xf]  ;;  %v10046_v29 = vor.u32 %v13551_v18, %v10045_v17  ;;  %6625 = vmatmul.bf16.vlgmr.msrb.gmra.mxu0 %v14967_v11 }
  0x8d   : > { %v13615_v23 = vld [vmem:[%s14794_s24 + $0xaec] sm:$0xf0]  ;;  %v10174_v30 = vor.u32 %v13583_v21, %v10173_v19  ;;  %v10029_v35 = vld [vmem:[%s14794_s24 + $0x8c0] sm:$0xf]  ;;  %6663 = vmatpush.bf16.msrb.mxu3 %v9806_v28  ;;  %6638 = vmatmul.bf16.vlgmr.msrb.gmra.mxu1 %v14971_v13 }
  0x8e   : > { %v13647_v27 = vld [vmem:[%s14794_s24 + $0xbec] sm:$0xf0]  ;;  %v10302_v34 = vor.u32 %v13615_v23, %v10301_v22  ;;  %v10157_v38 = vld [vmem:[%s14794_s24 + $0x9c0] sm:$0xf]  ;;  %6669 = vmatpush.bf16.msra.mxu0 %v10046_v29  ;;  %6651 = vmatmul.bf16.vlgmr.msrb.gmra.mxu2 %v14964_v7 }
  0x8f   : > { %v13547_v36 = vld [vmem:[%s14794_s24 + $0x8cc] sm:$0xf0]  ;;  %v10430_v39 = vor.u32 %v13647_v27, %v10429_v26  ;;  %v10285_v41 = vld [vmem:[%s14794_s24 + $0xac0] sm:$0xf]  ;;  %6682 = vmatpush.bf16.msra.mxu1 %v10174_v30 }
  0x90   : > { %v13579_v40 = vld [vmem:[%s14794_s24 + $0x9cc] sm:$0xf0]  ;;  %v10413_v43 = vld [vmem:[%s14794_s24 + $0xbc0] sm:$0xf]  ;;  %v10030_v45 = vor.u32 %v13547_v36, %v10029_v35  ;;  %6695 = vmatpush.bf16.msra.mxu2 %v10302_v34  ;;  %6664 = vmatmul.bf16.vlgmr.msrb.gmra.mxu3 %v14969_v12 }
  0x91   : > { %v13611_v42 = vld [vmem:[%s14794_s24 + $0xacc] sm:$0xf0]  ;;  %v10158_v46 = vor.u32 %v13579_v40, %v10157_v38  ;;  %v10013_v48 = vld [vmem:[%s14794_s24 + $0x8a0] sm:$0xf]  ;;  %6708 = vmatpush.bf16.msra.mxu3 %v10430_v39 }
  0x92   : > { %v13643_v44 = vld [vmem:[%s14794_s24 + $0xbcc] sm:$0xf0]  ;;  %v10286_v47 = vor.u32 %v13611_v42, %v10285_v41  ;;  %v10141_v50 = vld [vmem:[%s14794_s24 + $0x9a0] sm:$0xf]  ;;  %6670 = vmatpush.bf16.msra.mxu0 %v10030_v45 }
  0x93   : > { %v13543_v49 = vld [vmem:[%s14794_s24 + $0x8ac] sm:$0xf0]  ;;  %v10414_v51 = vor.u32 %v13643_v44, %v10413_v43  ;;  %v10269_v53 = vld [vmem:[%s14794_s24 + $0xaa0] sm:$0xf]  ;;  %6683 = vmatpush.bf16.msra.mxu1 %v10158_v46 }
  0x94   : > { %v13575_v52 = vld [vmem:[%s14794_s24 + $0x9ac] sm:$0xf0]  ;;  %v10397_v55 = vld [vmem:[%s14794_s24 + $0xba0] sm:$0xf]  ;;  %v10014_v57 = vor.u32 %v13543_v49, %v10013_v48  ;;  %6696 = vmatpush.bf16.msra.mxu2 %v10286_v47 }
  0x95   : > { %v13607_v54 = vld [vmem:[%s14794_s24 + $0xaac] sm:$0xf0]  ;;  %v10142_v58 = vor.u32 %v13575_v52, %v10141_v50  ;;  %v9997_v60 = vld [vmem:[%s14794_s24 + $0x880] sm:$0xf]  ;;  %6709 = vmatpush.bf16.msra.mxu3 %v10414_v51 }
  0x96   : > { %v13639_v56 = vld [vmem:[%s14794_s24 + $0xbac] sm:$0xf0]  ;;  %v10270_v59 = vor.u32 %v13607_v54, %v10269_v53  ;;  %v10125_v62 = vld [vmem:[%s14794_s24 + $0x980] sm:$0xf]  ;;  %6671 = vmatpush.bf16.msra.mxu0 %v10014_v57 }
  0x97   : > { %v13539_v61 = vld [vmem:[%s14794_s24 + $0x88c] sm:$0xf0]  ;;  %v10398_v63 = vor.u32 %v13639_v56, %v10397_v55  ;;  %v10253_v1 = vld [vmem:[%s14794_s24 + $0xa80] sm:$0xf]  ;;  %6684 = vmatpush.bf16.msra.mxu1 %v10142_v58 }
  0x98   : > { %v13571_v0 = vld [vmem:[%s14794_s24 + $0x98c] sm:$0xf0]  ;;  %v10381_v3 = vld [vmem:[%s14794_s24 + $0xb80] sm:$0xf]  ;;  %v9998_v5 = vor.u32 %v13539_v61, %v9997_v60  ;;  %6697 = vmatpush.bf16.msra.mxu2 %v10270_v59 }
  0x99   : > { %v13603_v2 = vld [vmem:[%s14794_s24 + $0xa8c] sm:$0xf0]  ;;  %v10126_v6 = vor.u32 %v13571_v0, %v10125_v62  ;;  %v9981_v9 = vld [vmem:[%s14794_s24 + $0x860] sm:$0xf]  ;;  %6710 = vmatpush.bf16.msra.mxu3 %v10398_v63 }
  0x9a   : > { %v13635_v4 = vld [vmem:[%s14794_s24 + $0xb8c] sm:$0xf0]  ;;  %v10254_v8 = vor.u32 %v13603_v2, %v10253_v1  ;;  %v10109_v14 = vld [vmem:[%s14794_s24 + $0x960] sm:$0xf]  ;;  %6672 = vmatpush.bf16.msra.mxu0 %v9998_v5 }
  0x9b   : > { %v13535_v10 = vld [vmem:[%s14794_s24 + $0x86c] sm:$0xf0]  ;;  %v10382_v15 = vor.u32 %v13635_v4, %v10381_v3  ;;  %v10237_v17 = vld [vmem:[%s14794_s24 + $0xa60] sm:$0xf]  ;;  %6685 = vmatpush.bf16.msra.mxu1 %v10126_v6 }
  0x9c   : > { %v13567_v16 = vld [vmem:[%s14794_s24 + $0x96c] sm:$0xf0]  ;;  %v10365_v19 = vld [vmem:[%s14794_s24 + $0xb60] sm:$0xf]  ;;  %v9982_v21 = vor.u32 %v13535_v10, %v9981_v9  ;;  %6698 = vmatpush.bf16.msra.mxu2 %v10254_v8 }
  0x9d   : > { %v13599_v18 = vld [vmem:[%s14794_s24 + $0xa6c] sm:$0xf0]  ;;  %v10110_v22 = vor.u32 %v13567_v16, %v10109_v14  ;;  %v9965_v24 = vld [vmem:[%s14794_s24 + $0x840] sm:$0xf]  ;;  %6711 = vmatpush.bf16.msra.mxu3 %v10382_v15 }
  0x9e   : > { %v13631_v20 = vld [vmem:[%s14794_s24 + $0xb6c] sm:$0xf0]  ;;  %v10238_v23 = vor.u32 %v13599_v18, %v10237_v17  ;;  %v10093_v26 = vld [vmem:[%s14794_s24 + $0x940] sm:$0xf]  ;;  %6673 = vmatpush.bf16.msra.mxu0 %v9982_v21 }
  0x9f   : > { %v13531_v25 = vld [vmem:[%s14794_s24 + $0x84c] sm:$0xf0]  ;;  %v10366_v27 = vor.u32 %v13631_v20, %v10365_v19  ;;  %v10221_v29 = vld [vmem:[%s14794_s24 + $0xa40] sm:$0xf]  ;;  %6686 = vmatpush.bf16.msra.mxu1 %v10110_v22 }
  0xa0   : > { %v13563_v28 = vld [vmem:[%s14794_s24 + $0x94c] sm:$0xf0]  ;;  %v10349_v34 = vld [vmem:[%s14794_s24 + $0xb40] sm:$0xf]  ;;  %v9966_v36 = vor.u32 %v13531_v25, %v9965_v24  ;;  %6699 = vmatpush.bf16.msra.mxu2 %v10238_v23 }
  0xa1   : > { %v13595_v30 = vld [vmem:[%s14794_s24 + $0xa4c] sm:$0xf0]  ;;  %v10094_v38 = vor.u32 %v13563_v28, %v10093_v26  ;;  %v9949_v40 = vld [vmem:[%s14794_s24 + $0x820] sm:$0xf]  ;;  %6712 = vmatpush.bf16.msra.mxu3 %v10366_v27 }
  0xa2   : > { %v13627_v35 = vld [vmem:[%s14794_s24 + $0xb4c] sm:$0xf0]  ;;  %v10222_v39 = vor.u32 %v13595_v30, %v10221_v29  ;;  %v10077_v42 = vld [vmem:[%s14794_s24 + $0x920] sm:$0xf]  ;;  %6674 = vmatpush.bf16.msra.mxu0 %v9966_v36 }
  0xa3   : > { %v13527_v41 = vld [vmem:[%s14794_s24 + $0x82c] sm:$0xf0]  ;;  %v10350_v43 = vor.u32 %v13627_v35, %v10349_v34  ;;  %v10205_v45 = vld [vmem:[%s14794_s24 + $0xa20] sm:$0xf]  ;;  %6687 = vmatpush.bf16.msra.mxu1 %v10094_v38 }
  0xa4   : > { %v13559_v44 = vld [vmem:[%s14794_s24 + $0x92c] sm:$0xf0]  ;;  %v10333_v47 = vld [vmem:[%s14794_s24 + $0xb20] sm:$0xf]  ;;  %v9950_v49 = vor.u32 %v13527_v41, %v9949_v40  ;;  %6700 = vmatpush.bf16.msra.mxu2 %v10222_v39 }
  0xa5   : > { %v13591_v46 = vld [vmem:[%s14794_s24 + $0xa2c] sm:$0xf0]  ;;  %v9933_v50 = vld [vmem:[%s14794_s24 + $0x800] sm:$0xf]  ;;  %v10078_v52 = vor.u32 %v13559_v44, %v10077_v42  ;;  %6713 = vmatpush.bf16.msra.mxu3 %v10350_v43 }
  0xa6   : > { %v13623_v48 = vld [vmem:[%s14794_s24 + $0xb2c] sm:$0xf0]  ;;  %v10206_v53 = vor.u32 %v13591_v46, %v10205_v45  ;;  %v10061_v54 = vld [vmem:[%s14794_s24 + $0x900] sm:$0xf]  ;;  %6675 = vmatpush.bf16.msra.mxu0 %v9950_v49 }
  0xa7   : > { %v13523_v51 = vld [vmem:[%s14794_s24 + $0x80c] sm:$0xf0]  ;;  %v10189_v56 = vld [vmem:[%s14794_s24 + $0xa00] sm:$0xf]  ;;  %v10334_v57 = vor.u32 %v13623_v48, %v10333_v47  ;;  %6688 = vmatpush.bf16.msra.mxu1 %v10078_v52 }
  0xa8   : > { %v13555_v55 = vld [vmem:[%s14794_s24 + $0x90c] sm:$0xf0]  ;;  %v10317_v59 = vld [vmem:[%s14794_s24 + $0xb00] sm:$0xf]  ;;  %v9934_v0 = vor.u32 %v13523_v51, %v9933_v50  ;;  %6701 = vmatpush.bf16.msra.mxu2 %v10206_v53 }
  0xa9   : > { %v13587_v58 = vld [vmem:[%s14794_s24 + $0xa0c] sm:$0xf0]  ;;  %v10557_v61 = vld [vmem:[%s14794_s24 + $0xce0] sm:$0xf]  ;;  %v10062_v4 = vor.u32 %v13555_v55, %v10061_v54  ;;  %6714 = vmatpush.bf16.msra.mxu3 %v10334_v57 }
  0xaa   : > { %v13619_v60 = vld [vmem:[%s14794_s24 + $0xb0c] sm:$0xf0]  ;;  %v10685_v63 = vld [vmem:[%s14794_s24 + $0xde0] sm:$0xf]  ;;  %v10190_v5 = vor.u32 %v13587_v58, %v10189_v56  ;;  %6676 = vmatpush.bf16.msra.mxu0 %v9934_v0 }
  0xab   : > { %v13679_v62 = vld [vmem:[%s14794_s24 + $0xcec] sm:$0xf0]  ;;  %v10813_v2 = vld [vmem:[%s14794_s24 + $0xee0] sm:$0xf]  ;;  %v10318_v9 = vor.u32 %v13619_v60, %v10317_v59  ;;  %6689 = vmatpush.bf16.msra.mxu1 %v10062_v4 }
  0xac   : > { %v13711_v1 = vld [vmem:[%s14794_s24 + $0xdec] sm:$0xf0]  ;;  %v10941_v6 = vld [vmem:[%s14794_s24 + $0xfe0] sm:$0xf]  ;;  %v10558_v10 = vor.u32 %v13679_v62, %v10557_v61  ;;  %6702 = vmatpush.bf16.msra.mxu2 %v10190_v5 }
  0xad   : > { %v13743_v3 = vld [vmem:[%s14794_s24 + $0xeec] sm:$0xf0]  ;;  %v10686_v14 = vor.u32 %v13711_v1, %v10685_v63  ;;  %v10541_v16 = vld [vmem:[%s14794_s24 + $0xcc0] sm:$0xf]  ;;  %6715 = vmatpush.bf16.msra.mxu3 %v10318_v9 }
  0xae   : > { %v13775_v8 = vld [vmem:[%s14794_s24 + $0xfec] sm:$0xf0]  ;;  %v10814_v15 = vor.u32 %v13743_v3, %v10813_v2  ;;  %v10669_v18 = vld [vmem:[%s14794_s24 + $0xdc0] sm:$0xf]  ;;  %6721 = vmatpush.bf16.msrb.mxu0 %v10558_v10 }
  0xaf   : > { %v13675_v17 = vld [vmem:[%s14794_s24 + $0xccc] sm:$0xf0]  ;;  %v10942_v19 = vor.u32 %v13775_v8, %v10941_v6  ;;  %v10797_v21 = vld [vmem:[%s14794_s24 + $0xec0] sm:$0xf]  ;;  %6734 = vmatpush.bf16.msrb.mxu1 %v10686_v14 }
  0xb0   : > { %v13707_v20 = vld [vmem:[%s14794_s24 + $0xdcc] sm:$0xf0]  ;;  %v10925_v24 = vld [vmem:[%s14794_s24 + $0xfc0] sm:$0xf]  ;;  %v10542_v29 = vor.u32 %v13675_v17, %v10541_v16  ;;  %6747 = vmatpush.bf16.msrb.mxu2 %v10814_v15 }
  0xb1   : > { %v13739_v22 = vld [vmem:[%s14794_s24 + $0xecc] sm:$0xf0]  ;;  %v15061_v26 = vld [vmem:[#allocation1 + $0x12] sm:$0xff]  ;;  %v15063_v27 = vld [vmem:[#allocation1 + $0x9] sm:$0xff]  ;;  %v10670_v30 = vor.u32 %v13707_v20, %v10669_v18  ;;  %6760 = vmatpush.bf16.msrb.mxu3 %v10942_v19 }
  0xb2   : > { %v15057_v23 = vld [vmem:[#allocation1] sm:$0xff]  ;;  %v10798_v34 = vor.u32 %v13739_v22, %v10797_v21  ;;  %v10525_v35 = vld [vmem:[%s14794_s24 + $0xca0] sm:$0xf]  ;;  %6703 = vmatmul.bf16.vlgmr.msra.gmra.mxu2 %v15061_v26  ;;  %6690 = vmatmul.bf16.vlgmr.msra.gmra.mxu1 %v15063_v27 }
  0xb3   : > { %v13771_v25 = vld [vmem:[%s14794_s24 + $0xfcc] sm:$0xf0]  ;;  %v10653_v38 = vld [vmem:[%s14794_s24 + $0xda0] sm:$0xf]  ;;  %6677 = vmatmul.bf16.vlgmr.msra.gmra.mxu0 %v15057_v23  ;;  %6735 = vmatpush.bf16.msrb.mxu1 %v10670_v30 }
  0xb4   : > { %v15065_v28 = vld [vmem:[#allocation1 + $0x1b] sm:$0xff]  ;;  %v10926_v39 = vor.u32 %v13771_v25, %v10925_v24  ;;  %v10781_v41 = vld [vmem:[%s14794_s24 + $0xea0] sm:$0xf]  ;;  %6722 = vmatpush.bf16.msrb.mxu0 %v10542_v29  ;;  %6748 = vmatpush.bf16.msrb.mxu2 %v10798_v34 }
  0xb5   : > { %v13671_v36 = vld [vmem:[%s14794_s24 + $0xcac] sm:$0xf0]  ;;  %v10909_v43 = vld [vmem:[%s14794_s24 + $0xfa0] sm:$0xf]  ;;  %6716 = vmatmul.bf16.vlgmr.msra.gmra.mxu3 %v15065_v28 }
  0xb6   : > { %v13703_v40 = vld [vmem:[%s14794_s24 + $0xdac] sm:$0xf0]  ;;  %v10526_v45 = vor.u32 %v13671_v36, %v10525_v35  ;;  %v10509_v48 = vld [vmem:[%s14794_s24 + $0xc80] sm:$0xf]  ;;  %6761 = vmatpush.bf16.msrb.mxu3 %v10926_v39 }
  0xb7   : > { %v13735_v42 = vld [vmem:[%s14794_s24 + $0xeac] sm:$0xf0]  ;;  %v10654_v46 = vor.u32 %v13703_v40, %v10653_v38  ;;  %v10637_v50 = vld [vmem:[%s14794_s24 + $0xd80] sm:$0xf] }
  0xb8   : > { %v13767_v44 = vld [vmem:[%s14794_s24 + $0xfac] sm:$0xf0]  ;;  %v10782_v47 = vor.u32 %v13735_v42, %v10781_v41  ;;  %v10765_v53 = vld [vmem:[%s14794_s24 + $0xe80] sm:$0xf]  ;;  %6723 = vmatpush.bf16.msrb.mxu0 %v10526_v45 }
  0xb9   : > { %v13667_v49 = vld [vmem:[%s14794_s24 + $0xc8c] sm:$0xf0]  ;;  %v10910_v51 = vor.u32 %v13767_v44, %v10909_v43  ;;  %v10893_v55 = vld [vmem:[%s14794_s24 + $0xf80] sm:$0xf]  ;;  %6736 = vmatpush.bf16.msrb.mxu1 %v10654_v46 }
  0xba   : > { %v13699_v52 = vld [vmem:[%s14794_s24 + $0xd8c] sm:$0xf0]  ;;  %v10510_v57 = vor.u32 %v13667_v49, %v10509_v48  ;;  %6749 = vmatpush.bf16.msrb.mxu2 %v10782_v47  ;;  %v10493_v60 = vld [vmem:[%s14794_s24 + $0xc60] sm:$0xf] }
  0xbb   : > { %v13731_v54 = vld [vmem:[%s14794_s24 + $0xe8c] sm:$0xf0]  ;;  %v10638_v58 = vor.u32 %v13699_v52, %v10637_v50  ;;  %v10621_v62 = vld [vmem:[%s14794_s24 + $0xd60] sm:$0xf]  ;;  %6762 = vmatpush.bf16.msrb.mxu3 %v10910_v51 }
  0xbc   : > { %v13763_v56 = vld [vmem:[%s14794_s24 + $0xf8c] sm:$0xf0]  ;;  %v10766_v59 = vor.u32 %v13731_v54, %v10765_v53  ;;  %v10749_v1 = vld [vmem:[%s14794_s24 + $0xe60] sm:$0xf]  ;;  %6724 = vmatpush.bf16.msrb.mxu0 %v10510_v57  ;;  %v15123_v57 = vld [vmem:[#allocation1 + $0x24] sm:$0xff] }
  0xbd   : > { %v13663_v61 = vld [vmem:[%s14794_s24 + $0xc6c] sm:$0xf0]  ;;  %v10894_v63 = vor.u32 %v13763_v56, %v10893_v55  ;;  %v10877_v3 = vld [vmem:[%s14794_s24 + $0xf60] sm:$0xf]  ;;  %6737 = vmatpush.bf16.msrb.mxu1 %v10638_v58  ;;  %v15125_v58 = vld [vmem:[#allocation1 + $0x36] sm:$0xff] }
  0xbe   : > { %v13695_v0 = vld [vmem:[%s14794_s24 + $0xd6c] sm:$0xf0]  ;;  %v10494_v5 = vor.u32 %v13663_v61, %v10493_v60  ;;  %6750 = vmatpush.bf16.msrb.mxu2 %v10766_v59  ;;  %v10477_v9 = vld [vmem:[%s14794_s24 + $0xc40] sm:$0xf] }
  0xbf   : > { %v13727_v2 = vld [vmem:[%s14794_s24 + $0xe6c] sm:$0xf0]  ;;  %v10622_v6 = vor.u32 %v13695_v0, %v10621_v62  ;;  %v10605_v14 = vld [vmem:[%s14794_s24 + $0xd40] sm:$0xf]  ;;  %6763 = vmatpush.bf16.msrb.mxu3 %v10894_v63 }
  0xc0   : > { %v13759_v4 = vld [vmem:[%s14794_s24 + $0xf6c] sm:$0xf0]  ;;  %v10750_v8 = vor.u32 %v13727_v2, %v10749_v1  ;;  %v10733_v17 = vld [vmem:[%s14794_s24 + $0xe40] sm:$0xf]  ;;  %6725 = vmatpush.bf16.msrb.mxu0 %v10494_v5 }
  0xc1   : > { %v13659_v10 = vld [vmem:[%s14794_s24 + $0xc4c] sm:$0xf0]  ;;  %v10878_v15 = vor.u32 %v13759_v4, %v10877_v3  ;;  %v10861_v19 = vld [vmem:[%s14794_s24 + $0xf40] sm:$0xf]  ;;  %6738 = vmatpush.bf16.msrb.mxu1 %v10622_v6 }
  0xc2   : > { %v13691_v16 = vld [vmem:[%s14794_s24 + $0xd4c] sm:$0xf0]  ;;  %v10478_v21 = vor.u32 %v13659_v10, %v10477_v9  ;;  %v10461_v22 = vld [vmem:[%s14794_s24 + $0xc20] sm:$0xf]  ;;  %6751 = vmatpush.bf16.msrb.mxu2 %v10750_v8 }
  0xc3   : > { %v13723_v18 = vld [vmem:[%s14794_s24 + $0xe4c] sm:$0xf0]  ;;  %v10606_v24 = vor.u32 %v13691_v16, %v10605_v14  ;;  %v10589_v30 = vld [vmem:[%s14794_s24 + $0xd20] sm:$0xf]  ;;  %6764 = vmatpush.bf16.msrb.mxu3 %v10878_v15 }
  0xc4   : > { %v13755_v20 = vld [vmem:[%s14794_s24 + $0xf4c] sm:$0xf0]  ;;  %v10734_v25 = vor.u32 %v13723_v18, %v10733_v17  ;;  %v10717_v36 = vld [vmem:[%s14794_s24 + $0xe20] sm:$0xf]  ;;  %6726 = vmatpush.bf16.msrb.mxu0 %v10478_v21 }
  0xc5   : > { %v13655_v29 = vld [vmem:[%s14794_s24 + $0xc2c] sm:$0xf0]  ;;  %v10862_v35 = vor.u32 %v13755_v20, %v10861_v19  ;;  %v10845_v39 = vld [vmem:[%s14794_s24 + $0xf20] sm:$0xf]  ;;  %6739 = vmatpush.bf16.msrb.mxu1 %v10606_v24 }
  0xc6   : > { %v13687_v34 = vld [vmem:[%s14794_s24 + $0xd2c] sm:$0xf0]  ;;  %v10445_v41 = vld [vmem:[%s14794_s24 + $0xc00] sm:$0xf]  ;;  %v10462_v43 = vor.u32 %v13655_v29, %v10461_v22  ;;  %6752 = vmatpush.bf16.msrb.mxu2 %v10734_v25 }
  0xc7   : > { %v13719_v38 = vld [vmem:[%s14794_s24 + $0xe2c] sm:$0xf0]  ;;  %v10573_v44 = vld [vmem:[%s14794_s24 + $0xd00] sm:$0xf]  ;;  %v10590_v48 = vor.u32 %v13687_v34, %v10589_v30  ;;  %6765 = vmatpush.bf16.msrb.mxu3 %v10862_v35 }
  0xc8   : > { %v13751_v40 = vld [vmem:[%s14794_s24 + $0xf2c] sm:$0xf0]  ;;  %v10701_v46 = vld [vmem:[%s14794_s24 + $0xe00] sm:$0xf]  ;;  %v10718_v49 = vor.u32 %v13719_v38, %v10717_v36  ;;  %6727 = vmatpush.bf16.msrb.mxu0 %v10462_v43 }
  0xc9   : > { %v13651_v42 = vld [vmem:[%s14794_s24 + $0xc0c] sm:$0xf0]  ;;  %v10829_v50 = vld [vmem:[%s14794_s24 + $0xf00] sm:$0xf]  ;;  %v10846_v54 = vor.u32 %v13751_v40, %v10845_v39  ;;  %6740 = vmatpush.bf16.msrb.mxu1 %v10590_v48 }
  0xca   : > { %v13683_v45 = vld [vmem:[%s14794_s24 + $0xd0c] sm:$0xf0]  ;;  %v11069_v52 = vld [vmem:[%s14794_s24 + $0x10e0] sm:$0xf]  ;;  %v10446_v62 = vor.u32 %v13651_v42, %v10445_v41  ;;  %6753 = vmatpush.bf16.msrb.mxu2 %v10718_v49 }
  0xcb   : > { %v13715_v47 = vld [vmem:[%s14794_s24 + $0xe0c] sm:$0xf0]  ;;  %v11197_v55 = vld [vmem:[%s14794_s24 + $0x11e0] sm:$0xf]  ;;  %v10574_v1 = vor.u32 %v13683_v45, %v10573_v44  ;;  %6766 = vmatpush.bf16.msrb.mxu3 %v10846_v54 }
  0xcc   : > { %v13747_v51 = vld [vmem:[%s14794_s24 + $0xf0c] sm:$0xf0]  ;;  %v15127_v59 = vld [vmem:[#allocation1 + $0x2d] sm:$0xff]  ;;  %v10702_v2 = vor.u32 %v13715_v47, %v10701_v46  ;;  %6728 = vmatpush.bf16.msrb.mxu0 %v10446_v62 }
  0xcd   : > { %v13807_v53 = vld [vmem:[%s14794_s24 + $0x10ec] sm:$0xf0]  ;;  %v347_v61 = vld [vmem:[%s14811_s9 + $0x10] sm:$0xff]  ;;  %v10830_v5 = vor.u32 %v13747_v51, %v10829_v50  ;;  %6741 = vmatpush.bf16.msrb.mxu1 %v10574_v1 }
  0xce   : > { %v13839_v56 = vld [vmem:[%s14794_s24 + $0x11ec] sm:$0xf0]  ;;  %v11325_v63 = vld [vmem:[%s14794_s24 + $0x12e0] sm:$0xf]  ;;  %v11070_v6 = vor.u32 %v13807_v53, %v11069_v52  ;;  %6754 = vmatpush.bf16.msrb.mxu2 %v10702_v2 }
  0xcf   : > { %v15129_v60 = vld [vmem:[#allocation1 + $0x3f] sm:$0xff]  ;;  %v11453_v3 = vld [vmem:[%s14794_s24 + $0x13e0] sm:$0xf]  ;;  %v11198_v8 = vor.u32 %v13839_v56, %v11197_v55  ;;  %6767 = vmatpush.bf16.msrb.mxu3 %v10830_v5  ;;  %6729 = vmatmul.bf16.vlgmr.msrb.gmra.mxu0 %v15123_v57 }
  0xd0   : > { %v13871_v0 = vld [vmem:[%s14794_s24 + $0x12ec] sm:$0xf0]  ;;  %1394 = vst [vmem:[#allocation1] ss:$9 sm:$0xff] %v347_v61  ;;  %v11053_v10 = vld [vmem:[%s14794_s24 + $0x10c0] sm:$0xf]  ;;  %6773 = vmatpush.bf16.msra.mxu0 %v11070_v6  ;;  %6742 = vmatmul.bf16.vlgmr.msrb.gmra.mxu1 %v15127_v59 }
  0xd1   : > { %v13903_v4 = vld [vmem:[%s14794_s24 + $0x13ec] sm:$0xf0]  ;;  %v11326_v9 = vor.u32 %v13871_v0, %v11325_v63  ;;  %v11181_v15 = vld [vmem:[%s14794_s24 + $0x11c0] sm:$0xf]  ;;  %6786 = vmatpush.bf16.msra.mxu1 %v11198_v8  ;;  %6755 = vmatmul.bf16.vlgmr.msrb.gmra.mxu2 %v15125_v58 }
  0xd2   : > { %v13803_v14 = vld [vmem:[%s14794_s24 + $0x10cc] sm:$0xf0]  ;;  %v11454_v16 = vor.u32 %v13903_v4, %v11453_v3  ;;  %v11309_v18 = vld [vmem:[%s14794_s24 + $0x12c0] sm:$0xf]  ;;  %6768 = vmatmul.bf16.vlgmr.msrb.gmra.mxu3 %v15129_v60 }
  0xd3   : > { %v13835_v17 = vld [vmem:[%s14794_s24 + $0x11cc] sm:$0xf0]  ;;  %v11437_v20 = vld [vmem:[%s14794_s24 + $0x13c0] sm:$0xf]  ;;  %v11054_v22 = vor.u32 %v13803_v14, %v11053_v10  ;;  %6799 = vmatpush.bf16.msra.mxu2 %v11326_v9 }
  0xd4   : > { %v13867_v19 = vld [vmem:[%s14794_s24 + $0x12cc] sm:$0xf0]  ;;  %v11182_v24 = vor.u32 %v13835_v17, %v11181_v15  ;;  %v11037_v29 = vld [vmem:[%s14794_s24 + $0x10a0] sm:$0xf]  ;;  %6812 = vmatpush.bf16.msra.mxu3 %v11454_v16 }
  0xd5   : > { %v13899_v21 = vld [vmem:[%s14794_s24 + $0x13cc] sm:$0xf0]  ;;  %v11310_v25 = vor.u32 %v13867_v19, %v11309_v18  ;;  %v11165_v34 = vld [vmem:[%s14794_s24 + $0x11a0] sm:$0xf]  ;;  %6774 = vmatpush.bf16.msra.mxu0 %v11054_v22 }
  0xd6   : > { %v13799_v30 = vld [vmem:[%s14794_s24 + $0x10ac] sm:$0xf0]  ;;  %v11438_v35 = vor.u32 %v13899_v21, %v11437_v20  ;;  %v11293_v38 = vld [vmem:[%s14794_s24 + $0x12a0] sm:$0xf]  ;;  %6787 = vmatpush.bf16.msra.mxu1 %v11182_v24 }
  0xd7   : > { %v13831_v36 = vld [vmem:[%s14794_s24 + $0x11ac] sm:$0xf0]  ;;  %v11421_v40 = vld [vmem:[%s14794_s24 + $0x13a0] sm:$0xf]  ;;  %v11038_v42 = vor.u32 %v13799_v30, %v11037_v29  ;;  %6800 = vmatpush.bf16.msra.mxu2 %v11310_v25 }
  0xd8   : > { %v13863_v39 = vld [vmem:[%s14794_s24 + $0x12ac] sm:$0xf0]  ;;  %v11166_v43 = vor.u32 %v13831_v36, %v11165_v34  ;;  %v11021_v45 = vld [vmem:[%s14794_s24 + $0x1080] sm:$0xf]  ;;  %6813 = vmatpush.bf16.msra.mxu3 %v11438_v35 }
  0xd9   : > { %v13895_v41 = vld [vmem:[%s14794_s24 + $0x13ac] sm:$0xf0]  ;;  %v11294_v44 = vor.u32 %v13863_v39, %v11293_v38  ;;  %v11149_v47 = vld [vmem:[%s14794_s24 + $0x1180] sm:$0xf]  ;;  %6775 = vmatpush.bf16.msra.mxu0 %v11038_v42 }
  0xda   : > { %v13795_v46 = vld [vmem:[%s14794_s24 + $0x108c] sm:$0xf0]  ;;  %v11422_v48 = vor.u32 %v13895_v41, %v11421_v40  ;;  %v11277_v50 = vld [vmem:[%s14794_s24 + $0x1280] sm:$0xf]  ;;  %6788 = vmatpush.bf16.msra.mxu1 %v11166_v43 }
  0xdb   : > { %v13827_v49 = vld [vmem:[%s14794_s24 + $0x118c] sm:$0xf0]  ;;  %v11405_v52 = vld [vmem:[%s14794_s24 + $0x1380] sm:$0xf]  ;;  %v11022_v54 = vor.u32 %v13795_v46, %v11021_v45  ;;  %6801 = vmatpush.bf16.msra.mxu2 %v11294_v44 }
  0xdc   : > { %v13859_v51 = vld [vmem:[%s14794_s24 + $0x128c] sm:$0xf0]  ;;  %v11150_v55 = vor.u32 %v13827_v49, %v11149_v47  ;;  %v11005_v61 = vld [vmem:[%s14794_s24 + $0x1060] sm:$0xf]  ;;  %6814 = vmatpush.bf16.msra.mxu3 %v11422_v48 }
  0xdd   : > { %v13891_v53 = vld [vmem:[%s14794_s24 + $0x138c] sm:$0xf0]  ;;  %v11278_v56 = vor.u32 %v13859_v51, %v11277_v50  ;;  %v11133_v63 = vld [vmem:[%s14794_s24 + $0x1160] sm:$0xf]  ;;  %6776 = vmatpush.bf16.msra.mxu0 %v11022_v54 }
  0xde   : > { %v13791_v62 = vld [vmem:[%s14794_s24 + $0x106c] sm:$0xf0]  ;;  %v11406_v0 = vor.u32 %v13891_v53, %v11405_v52  ;;  %v11261_v2 = vld [vmem:[%s14794_s24 + $0x1260] sm:$0xf]  ;;  %6789 = vmatpush.bf16.msra.mxu1 %v11150_v55 }
  0xdf   : > { %v13823_v1 = vld [vmem:[%s14794_s24 + $0x116c] sm:$0xf0]  ;;  %v11389_v4 = vld [vmem:[%s14794_s24 + $0x1360] sm:$0xf]  ;;  %v11006_v6 = vor.u32 %v13791_v62, %v11005_v61  ;;  %6802 = vmatpush.bf16.msra.mxu2 %v11278_v56 }
  0xe0   : > { %v13855_v3 = vld [vmem:[%s14794_s24 + $0x126c] sm:$0xf0]  ;;  %v11134_v8 = vor.u32 %v13823_v1, %v11133_v63  ;;  %v10989_v10 = vld [vmem:[%s14794_s24 + $0x1040] sm:$0xf]  ;;  %6815 = vmatpush.bf16.msra.mxu3 %v11406_v0 }
  0xe1   : > { %v13887_v5 = vld [vmem:[%s14794_s24 + $0x136c] sm:$0xf0]  ;;  %v11262_v9 = vor.u32 %v13855_v3, %v11261_v2  ;;  %v11117_v15 = vld [vmem:[%s14794_s24 + $0x1140] sm:$0xf]  ;;  %6777 = vmatpush.bf16.msra.mxu0 %v11006_v6 }
  0xe2   : > { %v13787_v14 = vld [vmem:[%s14794_s24 + $0x104c] sm:$0xf0]  ;;  %v11390_v16 = vor.u32 %v13887_v5, %v11389_v4  ;;  %v11245_v18 = vld [vmem:[%s14794_s24 + $0x1240] sm:$0xf]  ;;  %6790 = vmatpush.bf16.msra.mxu1 %v11134_v8 }
  0xe3   : > { %v13819_v17 = vld [vmem:[%s14794_s24 + $0x114c] sm:$0xf0]  ;;  %v11373_v20 = vld [vmem:[%s14794_s24 + $0x1340] sm:$0xf]  ;;  %v10990_v22 = vor.u32 %v13787_v14, %v10989_v10  ;;  %6803 = vmatpush.bf16.msra.mxu2 %v11262_v9 }
  0xe4   : > { %v13851_v19 = vld [vmem:[%s14794_s24 + $0x124c] sm:$0xf0]  ;;  %v11118_v24 = vor.u32 %v13819_v17, %v11117_v15  ;;  %v10973_v29 = vld [vmem:[%s14794_s24 + $0x1020] sm:$0xf]  ;;  %6816 = vmatpush.bf16.msra.mxu3 %v11390_v16 }
  0xe5   : > { %v13883_v21 = vld [vmem:[%s14794_s24 + $0x134c] sm:$0xf0]  ;;  %v11246_v25 = vor.u32 %v13851_v19, %v11245_v18  ;;  %v11101_v34 = vld [vmem:[%s14794_s24 + $0x1120] sm:$0xf]  ;;  %6778 = vmatpush.bf16.msra.mxu0 %v10990_v22 }
  0xe6   : > { %v13783_v30 = vld [vmem:[%s14794_s24 + $0x102c] sm:$0xf0]  ;;  %v11374_v35 = vor.u32 %v13883_v21, %v11373_v20  ;;  %v11229_v38 = vld [vmem:[%s14794_s24 + $0x1220] sm:$0xf]  ;;  %6791 = vmatpush.bf16.msra.mxu1 %v11118_v24 }
  0xe7   : > { %v13815_v36 = vld [vmem:[%s14794_s24 + $0x112c] sm:$0xf0]  ;;  %v11357_v40 = vld [vmem:[%s14794_s24 + $0x1320] sm:$0xf]  ;;  %v10974_v42 = vor.u32 %v13783_v30, %v10973_v29  ;;  %6804 = vmatpush.bf16.msra.mxu2 %v11246_v25 }
  0xe8   : > { %v13847_v39 = vld [vmem:[%s14794_s24 + $0x122c] sm:$0xf0]  ;;  %v10957_v43 = vld [vmem:[%s14794_s24 + $0x1000] sm:$0xf]  ;;  %v11102_v45 = vor.u32 %v13815_v36, %v11101_v34  ;;  %6817 = vmatpush.bf16.msra.mxu3 %v11374_v35 }
  0xe9   : > { %v13879_v41 = vld [vmem:[%s14794_s24 + $0x132c] sm:$0xf0]  ;;  %v11230_v46 = vor.u32 %v13847_v39, %v11229_v38  ;;  %v11085_v47 = vld [vmem:[%s14794_s24 + $0x1100] sm:$0xf]  ;;  %6779 = vmatpush.bf16.msra.mxu0 %v10974_v42 }
  0xea   : > { %v13779_v44 = vld [vmem:[%s14794_s24 + $0x100c] sm:$0xf0]  ;;  %v11213_v49 = vld [vmem:[%s14794_s24 + $0x1200] sm:$0xf]  ;;  %v11358_v50 = vor.u32 %v13879_v41, %v11357_v40  ;;  %6792 = vmatpush.bf16.msra.mxu1 %v11102_v45 }
  0xeb   : > { %v13811_v48 = vld [vmem:[%s14794_s24 + $0x110c] sm:$0xf0]  ;;  %v11341_v52 = vld [vmem:[%s14794_s24 + $0x1300] sm:$0xf]  ;;  %v10958_v61 = vor.u32 %v13779_v44, %v10957_v43  ;;  %6805 = vmatpush.bf16.msra.mxu2 %v11230_v46 }
  0xec   : > { %v13843_v51 = vld [vmem:[%s14794_s24 + $0x120c] sm:$0xf0]  ;;  %v11581_v54 = vld [vmem:[%s14794_s24 + $0x14e0] sm:$0xf]  ;;  %v11086_v1 = vor.u32 %v13811_v48, %v11085_v47  ;;  %6818 = vmatpush.bf16.msra.mxu3 %v11358_v50 }
  0xed   : > { %v13875_v53 = vld [vmem:[%s14794_s24 + $0x130c] sm:$0xf0]  ;;  %v11709_v56 = vld [vmem:[%s14794_s24 + $0x15e0] sm:$0xf]  ;;  %v11214_v2 = vor.u32 %v13843_v51, %v11213_v49  ;;  %6780 = vmatpush.bf16.msra.mxu0 %v10958_v61 }
  0xee   : > { %v13935_v55 = vld [vmem:[%s14794_s24 + $0x14ec] sm:$0xf0]  ;;  %v11837_v63 = vld [vmem:[%s14794_s24 + $0x16e0] sm:$0xf]  ;;  %v11342_v5 = vor.u32 %v13875_v53, %v11341_v52  ;;  %6793 = vmatpush.bf16.msra.mxu1 %v11086_v1 }
  0xef   : > { %v13967_v62 = vld [vmem:[%s14794_s24 + $0x15ec] sm:$0xf0]  ;;  %v11965_v3 = vld [vmem:[%s14794_s24 + $0x17e0] sm:$0xf]  ;;  %v11582_v6 = vor.u32 %v13935_v55, %v11581_v54  ;;  %6806 = vmatpush.bf16.msra.mxu2 %v11214_v2 }
  0xf0   : > { %v13999_v0 = vld [vmem:[%s14794_s24 + $0x16ec] sm:$0xf0]  ;;  %v11710_v8 = vor.u32 %v13967_v62, %v11709_v56  ;;  %v11565_v10 = vld [vmem:[%s14794_s24 + $0x14c0] sm:$0xf]  ;;  %6819 = vmatpush.bf16.msra.mxu3 %v11342_v5 }
  0xf1   : > { %v14031_v4 = vld [vmem:[%s14794_s24 + $0x17ec] sm:$0xf0]  ;;  %v11838_v9 = vor.u32 %v13999_v0, %v11837_v63  ;;  %v11693_v15 = vld [vmem:[%s14794_s24 + $0x15c0] sm:$0xf]  ;;  %6825 = vmatpush.bf16.msrb.mxu0 %v11582_v6 }
  0xf2   : > { %v13931_v14 = vld [vmem:[%s14794_s24 + $0x14cc] sm:$0xf0]  ;;  %v11966_v16 = vor.u32 %v14031_v4, %v11965_v3  ;;  %v11821_v18 = vld [vmem:[%s14794_s24 + $0x16c0] sm:$0xf]  ;;  %6838 = vmatpush.bf16.msrb.mxu1 %v11710_v8 }
  0xf3   : > { %v13963_v17 = vld [vmem:[%s14794_s24 + $0x15cc] sm:$0xf0]  ;;  %v11949_v21 = vld [vmem:[%s14794_s24 + $0x17c0] sm:$0xf]  ;;  %v11566_v30 = vor.u32 %v13931_v14, %v11565_v10  ;;  %6851 = vmatpush.bf16.msrb.mxu2 %v11838_v9 }
  0xf4   : > { %v13995_v19 = vld [vmem:[%s14794_s24 + $0x16cc] sm:$0xf0]  ;;  %v15214_v24 = vld [vmem:[#allocation1 + $0x12] sm:$0xff]  ;;  %v15216_v25 = vld [vmem:[#allocation1 + $0x9] sm:$0xff]  ;;  %v11694_v34 = vor.u32 %v13963_v17, %v11693_v15  ;;  %6864 = vmatpush.bf16.msrb.mxu3 %v11966_v16 }
  0xf5   : > { %v15210_v20 = vld [vmem:[#allocation1] sm:$0xff]  ;;  %v11822_v35 = vor.u32 %v13995_v19, %v11821_v18  ;;  %v11549_v36 = vld [vmem:[%s14794_s24 + $0x14a0] sm:$0xf]  ;;  %6807 = vmatmul.bf16.vlgmr.msra.gmra.mxu2 %v15214_v24  ;;  %6794 = vmatmul.bf16.vlgmr.msra.gmra.mxu1 %v15216_v25 }
  0xf6   : > { %v14027_v22 = vld [vmem:[%s14794_s24 + $0x17cc] sm:$0xf0]  ;;  %v11677_v39 = vld [vmem:[%s14794_s24 + $0x15a0] sm:$0xf]  ;;  %6781 = vmatmul.bf16.vlgmr.msra.gmra.mxu0 %v15210_v20  ;;  %6839 = vmatpush.bf16.msrb.mxu1 %v11694_v34 }
  0xf7   : > { %v15218_v29 = vld [vmem:[#allocation1 + $0x1b] sm:$0xff]  ;;  %v11950_v40 = vor.u32 %v14027_v22, %v11949_v21  ;;  %v11805_v42 = vld [vmem:[%s14794_s24 + $0x16a0] sm:$0xf]  ;;  %6826 = vmatpush.bf16.msrb.mxu0 %v11566_v30  ;;  %6852 = vmatpush.bf16.msrb.mxu2 %v11822_v35 }
  0xf8   : > { %v13927_v38 = vld [vmem:[%s14794_s24 + $0x14ac] sm:$0xf0]  ;;  %v11933_v44 = vld [vmem:[%s14794_s24 + $0x17a0] sm:$0xf]  ;;  %6820 = vmatmul.bf16.vlgmr.msra.gmra.mxu3 %v15218_v29 }
  0xf9   : > { %v13959_v41 = vld [vmem:[%s14794_s24 + $0x15ac] sm:$0xf0]  ;;  %v11550_v46 = vor.u32 %v13927_v38, %v11549_v36  ;;  %v11533_v49 = vld [vmem:[%s14794_s24 + $0x1480] sm:$0xf]  ;;  %6865 = vmatpush.bf16.msrb.mxu3 %v11950_v40  ;;  %v6574_v40 = vpop.f32.mrf.mxu0 }
  0xfa   : > { %v13991_v43 = vld [vmem:[%s14794_s24 + $0x16ac] sm:$0xf0]  ;;  %v11678_v47 = vor.u32 %v13959_v41, %v11677_v39  ;;  %v11661_v51 = vld [vmem:[%s14794_s24 + $0x1580] sm:$0xf] }
  0xfb   : > { %v14023_v45 = vld [vmem:[%s14794_s24 + $0x17ac] sm:$0xf0]  ;;  %v11806_v48 = vor.u32 %v13991_v43, %v11805_v42  ;;  %v11789_v54 = vld [vmem:[%s14794_s24 + $0x1680] sm:$0xf]  ;;  %6827 = vmatpush.bf16.msrb.mxu0 %v11550_v46  ;;  %v6587_v46 = vpop.f32.mrf.mxu1 }
  0xfc   : > { %v13923_v50 = vld [vmem:[%s14794_s24 + $0x148c] sm:$0xf0]  ;;  %v11934_v52 = vor.u32 %v14023_v45, %v11933_v44  ;;  %v11917_v56 = vld [vmem:[%s14794_s24 + $0x1780] sm:$0xf]  ;;  %6840 = vmatpush.bf16.msrb.mxu1 %v11678_v47 }
  0xfd   : > { %v13955_v53 = vld [vmem:[%s14794_s24 + $0x158c] sm:$0xf0]  ;;  %v11534_v62 = vor.u32 %v13923_v50, %v11533_v49  ;;  %6853 = vmatpush.bf16.msrb.mxu2 %v11806_v48  ;;  %v11517_v1 = vld [vmem:[%s14794_s24 + $0x1460] sm:$0xf] }
  0xfe   : > { %v13987_v55 = vld [vmem:[%s14794_s24 + $0x168c] sm:$0xf0]  ;;  %v11662_v63 = vor.u32 %v13955_v53, %v11661_v51  ;;  %v11645_v3 = vld [vmem:[%s14794_s24 + $0x1560] sm:$0xf]  ;;  %6866 = vmatpush.bf16.msrb.mxu3 %v11934_v52  ;;  %v6588_v51 = vadd.f32 %v6587_v46, %v6574_v40 }
  0xff   : > { %v14019_v61 = vld [vmem:[%s14794_s24 + $0x178c] sm:$0xf0]  ;;  %v11790_v0 = vor.u32 %v13987_v55, %v11789_v54  ;;  %v11773_v6 = vld [vmem:[%s14794_s24 + $0x1660] sm:$0xf]  ;;  %6828 = vmatpush.bf16.msrb.mxu0 %v11534_v62 }
 0x100   : > { %v13919_v2 = vld [vmem:[%s14794_s24 + $0x146c] sm:$0xf0]  ;;  %v11918_v4 = vor.u32 %v14019_v61, %v11917_v56  ;;  %v11901_v9 = vld [vmem:[%s14794_s24 + $0x1760] sm:$0xf]  ;;  %6841 = vmatpush.bf16.msrb.mxu1 %v11662_v63 }
 0x101   : > { %v13951_v5 = vld [vmem:[%s14794_s24 + $0x156c] sm:$0xf0]  ;;  %v11518_v14 = vor.u32 %v13919_v2, %v11517_v1  ;;  %6854 = vmatpush.bf16.msrb.mxu2 %v11790_v0  ;;  %v11501_v17 = vld [vmem:[%s14794_s24 + $0x1440] sm:$0xf] }
 0x102   : > { %v13983_v8 = vld [vmem:[%s14794_s24 + $0x166c] sm:$0xf0]  ;;  %v11646_v15 = vor.u32 %v13951_v5, %v11645_v3  ;;  %v11629_v19 = vld [vmem:[%s14794_s24 + $0x1540] sm:$0xf]  ;;  %6867 = vmatpush.bf16.msrb.mxu3 %v11918_v4 }
 0x103   : > { %v14015_v10 = vld [vmem:[%s14794_s24 + $0x176c] sm:$0xf0]  ;;  %v11774_v16 = vor.u32 %v13983_v8, %v11773_v6  ;;  %v11757_v30 = vld [vmem:[%s14794_s24 + $0x1640] sm:$0xf]  ;;  %6829 = vmatpush.bf16.msrb.mxu0 %v11518_v14  ;;  %v6600_v6 = vpop.f32.mrf.mxu2  ;;  %v15276_v14 = vld [vmem:[#allocation1 + $0x24] sm:$0xff] }
 0x104   : > { %v13915_v18 = vld [vmem:[%s14794_s24 + $0x144c] sm:$0xf0]  ;;  %v11902_v21 = vor.u32 %v14015_v10, %v11901_v9  ;;  %v11885_v35 = vld [vmem:[%s14794_s24 + $0x1740] sm:$0xf]  ;;  %6842 = vmatpush.bf16.msrb.mxu1 %v11646_v15  ;;  %v15278_v15 = vld [vmem:[#allocation1 + $0x36] sm:$0xff] }
 0x105   : > { %v13947_v22 = vld [vmem:[%s14794_s24 + $0x154c] sm:$0xf0]  ;;  %v11502_v38 = vor.u32 %v13915_v18, %v11501_v17  ;;  %v11485_v39 = vld [vmem:[%s14794_s24 + $0x1420] sm:$0xf]  ;;  %6855 = vmatpush.bf16.msrb.mxu2 %v11774_v16  ;;  %v6601_v16 = vadd.f32 %v6600_v6, %v6588_v51  ;;  %v6613_v17 = vpop.f32.mrf.mxu3 }
 0x106   : > { %v13979_v34 = vld [vmem:[%s14794_s24 + $0x164c] sm:$0xf0]  ;;  %v11630_v41 = vor.u32 %v13947_v22, %v11629_v19  ;;  %v11613_v44 = vld [vmem:[%s14794_s24 + $0x1520] sm:$0xf]  ;;  %6868 = vmatpush.bf16.msrb.mxu3 %v11902_v21  ;;  %v348_v21 = vld [vmem:[%s14811_s9 + $0x18] sm:$0xff] }
 0x107   : > { %v14011_v36 = vld [vmem:[%s14794_s24 + $0x174c] sm:$0xf0]  ;;  %v11758_v42 = vor.u32 %v13979_v34, %v11757_v30  ;;  %v11741_v48 = vld [vmem:[%s14794_s24 + $0x1620] sm:$0xf]  ;;  %6830 = vmatpush.bf16.msrb.mxu0 %v11502_v38 }
 0x108   : > { %v13911_v43 = vld [vmem:[%s14794_s24 + $0x142c] sm:$0xf0]  ;;  %v11886_v47 = vor.u32 %v14011_v36, %v11885_v35  ;;  %v11869_v50 = vld [vmem:[%s14794_s24 + $0x1720] sm:$0xf]  ;;  %6843 = vmatpush.bf16.msrb.mxu1 %v11630_v41  ;;  %v15287_v35 = vadd.f32 %v6613_v17, %v6601_v16  ;;  %v6576_v36 = vpop.f32.mrf.mxu0 }
 0x109   : > { %v13943_v45 = vld [vmem:[%s14794_s24 + $0x152c] sm:$0xf0]  ;;  %v11469_v53 = vld [vmem:[%s14794_s24 + $0x1400] sm:$0xf]  ;;  %v11486_v55 = vor.u32 %v13911_v43, %v11485_v39  ;;  %6856 = vmatpush.bf16.msrb.mxu2 %v11758_v42  ;;  %v6589_v42 = vpop.f32.mrf.mxu1 }
 0x10a   : > { %v13975_v49 = vld [vmem:[%s14794_s24 + $0x162c] sm:$0xf0]  ;;  %v11597_v56 = vld [vmem:[%s14794_s24 + $0x1500] sm:$0xf]  ;;  %v11614_v0 = vor.u32 %v13943_v45, %v11613_v44  ;;  %6869 = vmatpush.bf16.msrb.mxu3 %v11886_v47 }
 0x10b   : > { %v14007_v52 = vld [vmem:[%s14794_s24 + $0x172c] sm:$0xf0]  ;;  %v11725_v62 = vld [vmem:[%s14794_s24 + $0x1600] sm:$0xf]  ;;  %v11742_v1 = vor.u32 %v13975_v49, %v11741_v48  ;;  %6831 = vmatpush.bf16.msrb.mxu0 %v11486_v55 }
 0x10c   : > { %v13907_v54 = vld [vmem:[%s14794_s24 + $0x140c] sm:$0xf0]  ;;  %v11853_v2 = vld [vmem:[%s14794_s24 + $0x1700] sm:$0xf]  ;;  %v11870_v8 = vor.u32 %v14007_v52, %v11869_v50  ;;  %6844 = vmatpush.bf16.msrb.mxu1 %v11614_v0 }
 0x10d   : > { %v13939_v61 = vld [vmem:[%s14794_s24 + $0x150c] sm:$0xf0]  ;;  %v12093_v4 = vld [vmem:[%s14794_s24 + $0x18e0] sm:$0xf]  ;;  %v11470_v22 = vor.u32 %v13907_v54, %v11469_v53  ;;  %6857 = vmatpush.bf16.msrb.mxu2 %v11742_v1 }
 0x10e   : > { %v13971_v63 = vld [vmem:[%s14794_s24 + $0x160c] sm:$0xf0]  ;;  %v12221_v9 = vld [vmem:[%s14794_s24 + $0x19e0] sm:$0xf]  ;;  %v11598_v38 = vor.u32 %v13939_v61, %v11597_v56  ;;  %6870 = vmatpush.bf16.msrb.mxu3 %v11870_v8  ;;  %v6602_v56 = vpop.f32.mrf.mxu2 }
 0x10f   : > { %v14003_v3 = vld [vmem:[%s14794_s24 + $0x170c] sm:$0xf0]  ;;  %v15280_v18 = vld [vmem:[#allocation1 + $0x2d] sm:$0xff]  ;;  %v11726_v39 = vor.u32 %v13971_v63, %v11725_v62  ;;  %6832 = vmatpush.bf16.msrb.mxu0 %v11470_v22  ;;  %v6615_v62 = vpop.f32.mrf.mxu3 }
 0x110   : > { %v14063_v5 = vld [vmem:[%s14794_s24 + $0x18ec] sm:$0xf0]  ;;  %v12349_v30 = vld [vmem:[%s14794_s24 + $0x1ae0] sm:$0xf]  ;;  %v11854_v43 = vor.u32 %v14003_v3, %v11853_v2  ;;  %6845 = vmatpush.bf16.msrb.mxu1 %v11598_v38 }
 0x111   : > { %v14095_v10 = vld [vmem:[%s14794_s24 + $0x19ec] sm:$0xf0]  ;;  %v12477_v40 = vld [vmem:[%s14794_s24 + $0x1be0] sm:$0xf]  ;;  %v12094_v44 = vor.u32 %v14063_v5, %v12093_v4  ;;  %6858 = vmatpush.bf16.msrb.mxu2 %v11726_v39 }
 0x112   : > { %v15282_v19 = vld [vmem:[#allocation1 + $0x3f] sm:$0xff]  ;;  %v12222_v45 = vor.u32 %v14095_v10, %v12221_v9  ;;  %v12077_v47 = vld [vmem:[%s14794_s24 + $0x18c0] sm:$0xf]  ;;  %6871 = vmatpush.bf16.msrb.mxu3 %v11854_v43  ;;  %6833 = vmatmul.bf16.vlgmr.msrb.gmra.mxu0 %v15276_v14 }
 0x113   : > { %v14127_v34 = vld [vmem:[%s14794_s24 + $0x1aec] sm:$0xf0]  ;;  %1404 = vst [vmem:[#allocation1] ss:$9 sm:$0xff] %v348_v21  ;;  %v12205_v49 = vld [vmem:[%s14794_s24 + $0x19c0] sm:$0xf]  ;;  %6877 = vmatpush.bf16.msra.mxu0 %v12094_v44  ;;  %6846 = vmatmul.bf16.vlgmr.msrb.gmra.mxu1 %v15280_v18  ;;  %v6626_v44 = vpop.f32.mrf.mxu0 }
 0x114   : > { %v14159_v41 = vld [vmem:[%s14794_s24 + $0x1bec] sm:$0xf0]  ;;  %v12350_v46 = vor.u32 %v14127_v34, %v12349_v30  ;;  %v12333_v52 = vld [vmem:[%s14794_s24 + $0x1ac0] sm:$0xf]  ;;  %6890 = vmatpush.bf16.msra.mxu1 %v12222_v45  ;;  %6859 = vmatmul.bf16.vlgmr.msrb.gmra.mxu2 %v15278_v15 }
 0x115   : > { %v14059_v48 = vld [vmem:[%s14794_s24 + $0x18cc] sm:$0xf0]  ;;  %v12478_v50 = vor.u32 %v14159_v41, %v12477_v40  ;;  %v12461_v54 = vld [vmem:[%s14794_s24 + $0x1bc0] sm:$0xf]  ;;  %6872 = vmatmul.bf16.vlgmr.msrb.gmra.mxu3 %v15282_v19 }
 0x116   : > { %v14091_v51 = vld [vmem:[%s14794_s24 + $0x19cc] sm:$0xf0]  ;;  %v12078_v61 = vor.u32 %v14059_v48, %v12077_v47  ;;  %6903 = vmatpush.bf16.msra.mxu2 %v12350_v46  ;;  %v12061_v1 = vld [vmem:[%s14794_s24 + $0x18a0] sm:$0xf] }
 0x117   : > { %v14123_v53 = vld [vmem:[%s14794_s24 + $0x1acc] sm:$0xf0]  ;;  %v12206_v63 = vor.u32 %v14091_v51, %v12205_v49  ;;  %v12189_v3 = vld [vmem:[%s14794_s24 + $0x19a0] sm:$0xf]  ;;  %6916 = vmatpush.bf16.msra.mxu3 %v12478_v50  ;;  %v6627_v50 = vadd.f32 %v6626_v44, %v15287_v35  ;;  %v6639_v51 = vpop.f32.mrf.mxu1 }
 0x118   : > { %v14155_v55 = vld [vmem:[%s14794_s24 + $0x1bcc] sm:$0xf0]  ;;  %v12334_v0 = vor.u32 %v14123_v53, %v12333_v52  ;;  %v12317_v6 = vld [vmem:[%s14794_s24 + $0x1aa0] sm:$0xf]  ;;  %6878 = vmatpush.bf16.msra.mxu0 %v12078_v61 }
 0x119   : > { %v14055_v2 = vld [vmem:[%s14794_s24 + $0x18ac] sm:$0xf0]  ;;  %v12462_v4 = vor.u32 %v14155_v55, %v12461_v54  ;;  %v12445_v9 = vld [vmem:[%s14794_s24 + $0x1ba0] sm:$0xf]  ;;  %6891 = vmatpush.bf16.msra.mxu1 %v12206_v63  ;;  %v6640_v62 = vadd.f32 %v6639_v51, %v6627_v50 }
 0x11a   : > { %v14087_v5 = vld [vmem:[%s14794_s24 + $0x19ac] sm:$0xf0]  ;;  %v12062_v16 = vor.u32 %v14055_v2, %v12061_v1  ;;  %6904 = vmatpush.bf16.msra.mxu2 %v12334_v0  ;;  %v12045_v22 = vld [vmem:[%s14794_s24 + $0x1880] sm:$0xf] }
 0x11b   : > { %v14119_v8 = vld [vmem:[%s14794_s24 + $0x1aac] sm:$0xf0]  ;;  %v12190_v17 = vor.u32 %v14087_v5, %v12189_v3  ;;  %v12173_v34 = vld [vmem:[%s14794_s24 + $0x1980] sm:$0xf]  ;;  %6917 = vmatpush.bf16.msra.mxu3 %v12462_v4  ;;  %v6652_v4 = vpop.f32.mrf.mxu2 }
 0x11c   : > { %v14151_v10 = vld [vmem:[%s14794_s24 + $0x1bac] sm:$0xf0]  ;;  %v12318_v21 = vor.u32 %v14119_v8, %v12317_v6  ;;  %v12301_v39 = vld [vmem:[%s14794_s24 + $0x1a80] sm:$0xf]  ;;  %6879 = vmatpush.bf16.msra.mxu0 %v12062_v16  ;;  %v6665_v16 = vpop.f32.mrf.mxu3 }
 0x11d   : > { %v14051_v30 = vld [vmem:[%s14794_s24 + $0x188c] sm:$0xf0]  ;;  %v12446_v36 = vor.u32 %v14151_v10, %v12445_v9  ;;  %v12429_v41 = vld [vmem:[%s14794_s24 + $0x1b80] sm:$0xf]  ;;  %6892 = vmatpush.bf16.msra.mxu1 %v12190_v17  ;;  %v6653_v10 = vadd.f32 %v6652_v4, %v6640_v62 }
 0x11e   : > { %v14083_v38 = vld [vmem:[%s14794_s24 + $0x198c] sm:$0xf0]  ;;  %v12046_v43 = vor.u32 %v14051_v30, %v12045_v22  ;;  %6905 = vmatpush.bf16.msra.mxu2 %v12318_v21  ;;  %v12029_v47 = vld [vmem:[%s14794_s24 + $0x1860] sm:$0xf] }
 0x11f   : > { %v14115_v40 = vld [vmem:[%s14794_s24 + $0x1a8c] sm:$0xf0]  ;;  %v12174_v45 = vor.u32 %v14083_v38, %v12173_v34  ;;  %v12157_v49 = vld [vmem:[%s14794_s24 + $0x1960] sm:$0xf]  ;;  %6918 = vmatpush.bf16.msra.mxu3 %v12446_v36  ;;  %v15336_v30 = vadd.f32 %v6665_v16, %v6653_v10  ;;  %v6628_v34 = vpop.f32.mrf.mxu0 }
 0x120   : > { %v14147_v42 = vld [vmem:[%s14794_s24 + $0x1b8c] sm:$0xf0]  ;;  %v12302_v46 = vor.u32 %v14115_v40, %v12301_v39  ;;  %v12285_v54 = vld [vmem:[%s14794_s24 + $0x1a60] sm:$0xf]  ;;  %6880 = vmatpush.bf16.msra.mxu0 %v12046_v43 }
 0x121   : > { %v14047_v48 = vld [vmem:[%s14794_s24 + $0x186c] sm:$0xf0]  ;;  %v12430_v52 = vor.u32 %v14147_v42, %v12429_v41  ;;  %v12413_v56 = vld [vmem:[%s14794_s24 + $0x1b60] sm:$0xf]  ;;  %6893 = vmatpush.bf16.msra.mxu1 %v12174_v45  ;;  %v6641_v42 = vpop.f32.mrf.mxu1 }
 0x122   : > { %v14079_v53 = vld [vmem:[%s14794_s24 + $0x196c] sm:$0xf0]  ;;  %v12030_v63 = vor.u32 %v14047_v48, %v12029_v47  ;;  %6906 = vmatpush.bf16.msra.mxu2 %v12302_v46  ;;  %v12013_v1 = vld [vmem:[%s14794_s24 + $0x1840] sm:$0xf] }
 0x123   : > { %v14111_v55 = vld [vmem:[%s14794_s24 + $0x1a6c] sm:$0xf0]  ;;  %v12158_v35 = vor.u32 %v14079_v53, %v12157_v49  ;;  %v12141_v3 = vld [vmem:[%s14794_s24 + $0x1940] sm:$0xf]  ;;  %6919 = vmatpush.bf16.msra.mxu3 %v12430_v52 }
 0x124   : > { %v14143_v61 = vld [vmem:[%s14794_s24 + $0x1b6c] sm:$0xf0]  ;;  %v12286_v0 = vor.u32 %v14111_v55, %v12285_v54  ;;  %v12269_v8 = vld [vmem:[%s14794_s24 + $0x1a40] sm:$0xf]  ;;  %6881 = vmatpush.bf16.msra.mxu0 %v12030_v63 }
 0x125   : > { %v14043_v2 = vld [vmem:[%s14794_s24 + $0x184c] sm:$0xf0]  ;;  %v12414_v5 = vor.u32 %v14143_v61, %v12413_v56  ;;  %v12397_v17 = vld [vmem:[%s14794_s24 + $0x1b40] sm:$0xf]  ;;  %6894 = vmatpush.bf16.msra.mxu1 %v12158_v35  ;;  %v6654_v61 = vpop.f32.mrf.mxu2 }
 0x126   : > { %v14075_v6 = vld [vmem:[%s14794_s24 + $0x194c] sm:$0xf0]  ;;  %v12014_v22 = vor.u32 %v14043_v2, %v12013_v1  ;;  %6907 = vmatpush.bf16.msra.mxu2 %v12286_v0  ;;  %v11997_v39 = vld [vmem:[%s14794_s24 + $0x1820] sm:$0xf]  ;;  %v6667_v1 = vpop.f32.mrf.mxu3 }
 0x127   : > { %v14107_v9 = vld [vmem:[%s14794_s24 + $0x1a4c] sm:$0xf0]  ;;  %v12142_v36 = vor.u32 %v14075_v6, %v12141_v3  ;;  %v12125_v41 = vld [vmem:[%s14794_s24 + $0x1920] sm:$0xf]  ;;  %6920 = vmatpush.bf16.msra.mxu3 %v12414_v5 }
 0x128   : > { %v14139_v21 = vld [vmem:[%s14794_s24 + $0x1b4c] sm:$0xf0]  ;;  %v12270_v38 = vor.u32 %v14107_v9, %v12269_v8  ;;  %v12253_v45 = vld [vmem:[%s14794_s24 + $0x1a20] sm:$0xf]  ;;  %6882 = vmatpush.bf16.msra.mxu0 %v12014_v22 }
 0x129   : > { %v14039_v40 = vld [vmem:[%s14794_s24 + $0x182c] sm:$0xf0]  ;;  %v12398_v43 = vor.u32 %v14139_v21, %v12397_v17  ;;  %v12381_v47 = vld [vmem:[%s14794_s24 + $0x1b20] sm:$0xf]  ;;  %6895 = vmatpush.bf16.msra.mxu1 %v12142_v36 }
 0x12a   : > { %v14071_v44 = vld [vmem:[%s14794_s24 + $0x192c] sm:$0xf0]  ;;  %v11998_v49 = vor.u32 %v14039_v40, %v11997_v39  ;;  %v11981_v50 = vld [vmem:[%s14794_s24 + $0x1800] sm:$0xf]  ;;  %6908 = vmatpush.bf16.msra.mxu2 %v12270_v38 }
 0x12b   : > { %v14103_v46 = vld [vmem:[%s14794_s24 + $0x1a2c] sm:$0xf0]  ;;  %v12126_v52 = vor.u32 %v14071_v44, %v12125_v41  ;;  %v12109_v54 = vld [vmem:[%s14794_s24 + $0x1900] sm:$0xf]  ;;  %6921 = vmatpush.bf16.msra.mxu3 %v12398_v43 }
 0x12c   : > { %v14135_v48 = vld [vmem:[%s14794_s24 + $0x1b2c] sm:$0xf0]  ;;  %v12254_v53 = vor.u32 %v14103_v46, %v12253_v45  ;;  %v12237_v56 = vld [vmem:[%s14794_s24 + $0x1a00] sm:$0xf]  ;;  %6883 = vmatpush.bf16.msra.mxu0 %v11998_v49 }
 0x12d   : > { %v14035_v51 = vld [vmem:[%s14794_s24 + $0x180c] sm:$0xf0]  ;;  %v12382_v62 = vor.u32 %v14135_v48, %v12381_v47  ;;  %v12365_v35 = vld [vmem:[%s14794_s24 + $0x1b00] sm:$0xf]  ;;  %6896 = vmatpush.bf16.msra.mxu1 %v12126_v52 }
 0x12e   : > { %v14067_v55 = vld [vmem:[%s14794_s24 + $0x190c] sm:$0xf0]  ;;  %v12605_v2 = vld [vmem:[%s14794_s24 + $0x1ce0] sm:$0xf]  ;;  %v11982_v5 = vor.u32 %v14035_v51, %v11981_v50  ;;  %6909 = vmatpush.bf16.msra.mxu2 %v12254_v53 }
 0x12f   : > { %v14099_v63 = vld [vmem:[%s14794_s24 + $0x1a0c] sm:$0xf0]  ;;  %v12733_v4 = vld [vmem:[%s14794_s24 + $0x1de0] sm:$0xf]  ;;  %v12110_v10 = vor.u32 %v14067_v55, %v12109_v54  ;;  %6922 = vmatpush.bf16.msra.mxu3 %v12382_v62 }
 0x130   : > { %v14131_v0 = vld [vmem:[%s14794_s24 + $0x1b0c] sm:$0xf0]  ;;  %v12861_v8 = vld [vmem:[%s14794_s24 + $0x1ee0] sm:$0xf]  ;;  %v12238_v16 = vor.u32 %v14099_v63, %v12237_v56  ;;  %6884 = vmatpush.bf16.msra.mxu0 %v11982_v5 }
 0x131   : > { %v14191_v3 = vld [vmem:[%s14794_s24 + $0x1cec] sm:$0xf0]  ;;  %v12989_v17 = vld [vmem:[%s14794_s24 + $0x1fe0] sm:$0xf]  ;;  %v12366_v22 = vor.u32 %v14131_v0, %v12365_v35  ;;  %6897 = vmatpush.bf16.msra.mxu1 %v12110_v10 }
 0x132   : > { %v14223_v6 = vld [vmem:[%s14794_s24 + $0x1dec] sm:$0xf0]  ;;  %v12606_v34 = vor.u32 %v14191_v3, %v12605_v2  ;;  %v12589_v39 = vld [vmem:[%s14794_s24 + $0x1cc0] sm:$0xf]  ;;  %6910 = vmatpush.bf16.msra.mxu2 %v12238_v16 }
 0x133   : > { %v14255_v9 = vld [vmem:[%s14794_s24 + $0x1eec] sm:$0xf0]  ;;  %v12734_v36 = vor.u32 %v14223_v6, %v12733_v4  ;;  %v12717_v41 = vld [vmem:[%s14794_s24 + $0x1dc0] sm:$0xf]  ;;  %6923 = vmatpush.bf16.msra.mxu3 %v12366_v22  ;;  %v6678_v22 = vpop.f32.mrf.mxu0 }
 0x134   : > { %v14287_v21 = vld [vmem:[%s14794_s24 + $0x1fec] sm:$0xf0]  ;;  %v12862_v38 = vor.u32 %v14255_v9, %v12861_v8  ;;  %v12845_v44 = vld [vmem:[%s14794_s24 + $0x1ec0] sm:$0xf]  ;;  %6929 = vmatpush.bf16.msrb.mxu0 %v12606_v34 }
 0x135   : > { %v14187_v40 = vld [vmem:[%s14794_s24 + $0x1ccc] sm:$0xf0]  ;;  %v12990_v42 = vor.u32 %v14287_v21, %v12989_v17  ;;  %v12973_v47 = vld [vmem:[%s14794_s24 + $0x1fc0] sm:$0xf]  ;;  %6942 = vmatpush.bf16.msrb.mxu1 %v12734_v36 }
 0x136   : > { %v14219_v43 = vld [vmem:[%s14794_s24 + $0x1dcc] sm:$0xf0]  ;;  %v1407_v49 = vld [vmem:[#allocation1 + $0x12] sm:$0xff]  ;;  %v1406_v50 = vld [vmem:[#allocation1 + $0x9] sm:$0xff]  ;;  %v12590_v52 = vor.u32 %v14187_v40, %v12589_v39  ;;  %6955 = vmatpush.bf16.msrb.mxu2 %v12862_v38  ;;  %v6679_v38 = vadd.f32 %v6678_v22, %v15336_v30  ;;  %v6691_v40 = vpop.f32.mrf.mxu1 }
 0x137   : > { %v14251_v45 = vld [vmem:[%s14794_s24 + $0x1ecc] sm:$0xf0]  ;;  %v12718_v53 = vor.u32 %v14219_v43, %v12717_v41  ;;  %v12573_v55 = vld [vmem:[%s14794_s24 + $0x1ca0] sm:$0xf]  ;;  %6968 = vmatpush.bf16.msrb.mxu3 %v12990_v42  ;;  %6911 = vmatmul.bf16.vlgmr.msra.gmra.mxu2 %v1407_v49 }
 0x138   : > { %v1405_v46 = vld [vmem:[#allocation1] sm:$0xff]  ;;  %v12846_v54 = vor.u32 %v14251_v45, %v12845_v44  ;;  %v12701_v61 = vld [vmem:[%s14794_s24 + $0x1da0] sm:$0xf]  ;;  %6898 = vmatmul.bf16.vlgmr.msra.gmra.mxu1 %v1406_v50  ;;  %6930 = vmatpush.bf16.msrb.mxu0 %v12590_v52 }
 0x139   : > { %v14283_v48 = vld [vmem:[%s14794_s24 + $0x1fcc] sm:$0xf0]  ;;  %6885 = vmatmul.bf16.vlgmr.msra.gmra.mxu0 %v1405_v46  ;;  %v12829_v35 = vld [vmem:[%s14794_s24 + $0x1ea0] sm:$0xf]  ;;  %6943 = vmatpush.bf16.msrb.mxu1 %v12718_v53 }
 0x13a   : > { %v1408_v51 = vld [vmem:[#allocation1 + $0x1b] sm:$0xff]  ;;  %v12974_v62 = vor.u32 %v14283_v48, %v12973_v47  ;;  %v12957_v1 = vld [vmem:[%s14794_s24 + $0x1fa0] sm:$0xf]  ;;  %6956 = vmatpush.bf16.msrb.mxu2 %v12846_v54  ;;  %v6692_v47 = vadd.f32 %v6691_v40, %v6679_v38 }
 0x13b   : > { %v14183_v56 = vld [vmem:[%s14794_s24 + $0x1cac] sm:$0xf0]  ;;  %6924 = vmatmul.bf16.vlgmr.msra.gmra.mxu3 %v1408_v51  ;;  %v12557_v6 = vld [vmem:[%s14794_s24 + $0x1c80] sm:$0xf] }
 0x13c   : > { %v14215_v63 = vld [vmem:[%s14794_s24 + $0x1dac] sm:$0xf0]  ;;  %v12574_v3 = vor.u32 %v14183_v56, %v12573_v55  ;;  %v12685_v9 = vld [vmem:[%s14794_s24 + $0x1d80] sm:$0xf]  ;;  %6969 = vmatpush.bf16.msrb.mxu3 %v12974_v62 }
 0x13d   : > { %v14247_v0 = vld [vmem:[%s14794_s24 + $0x1eac] sm:$0xf0]  ;;  %v12702_v4 = vor.u32 %v14215_v63, %v12701_v61  ;;  %v12813_v17 = vld [vmem:[%s14794_s24 + $0x1e80] sm:$0xf]  ;;  %v6704_v63 = vpop.f32.mrf.mxu2 }
 0x13e   : > { %v14279_v2 = vld [vmem:[%s14794_s24 + $0x1fac] sm:$0xf0]  ;;  %v12830_v5 = vor.u32 %v14247_v0, %v12829_v35  ;;  %v12941_v34 = vld [vmem:[%s14794_s24 + $0x1f80] sm:$0xf]  ;;  %6931 = vmatpush.bf16.msrb.mxu0 %v12574_v3  ;;  %v6717_v3 = vpop.f32.mrf.mxu3 }
 0x13f   : > { %v14179_v8 = vld [vmem:[%s14794_s24 + $0x1c8c] sm:$0xf0]  ;;  %v12958_v10 = vor.u32 %v14279_v2, %v12957_v1  ;;  %6944 = vmatpush.bf16.msrb.mxu1 %v12702_v4  ;;  %v12541_v43 = vld [vmem:[%s14794_s24 + $0x1c60] sm:$0xf]  ;;  %v6705_v2 = vadd.f32 %v6704_v63, %v6692_v47 }
 0x140   : > { %v14211_v16 = vld [vmem:[%s14794_s24 + $0x1d8c] sm:$0xf0]  ;;  %v12558_v39 = vor.u32 %v14179_v8, %v12557_v6  ;;  %6957 = vmatpush.bf16.msrb.mxu2 %v12830_v5  ;;  %v12669_v45 = vld [vmem:[%s14794_s24 + $0x1d60] sm:$0xf]  ;;  %v6680_v6 = vpop.f32.mrf.mxu0 }
 0x141   : > { %v14243_v21 = vld [vmem:[%s14794_s24 + $0x1e8c] sm:$0xf0]  ;;  %v12686_v41 = vor.u32 %v14211_v16, %v12685_v9  ;;  %6970 = vmatpush.bf16.msrb.mxu3 %v12958_v10  ;;  %v12797_v49 = vld [vmem:[%s14794_s24 + $0x1e60] sm:$0xf]  ;;  %v6693_v9 = vpop.f32.mrf.mxu1  ;;  %v15403_v10 = vadd.f32 %v6717_v3, %v6705_v2 }
 0x142   : > { %v14275_v36 = vld [vmem:[%s14794_s24 + $0x1f8c] sm:$0xf0]  ;;  %v12814_v42 = vor.u32 %v14243_v21, %v12813_v17  ;;  %v12925_v50 = vld [vmem:[%s14794_s24 + $0x1f60] sm:$0xf]  ;;  %6932 = vmatpush.bf16.msrb.mxu0 %v12558_v39 }
 0x143   : > { %v14175_v44 = vld [vmem:[%s14794_s24 + $0x1c6c] sm:$0xf0]  ;;  %v12942_v46 = vor.u32 %v14275_v36, %v12941_v34  ;;  %6945 = vmatpush.bf16.msrb.mxu1 %v12686_v41  ;;  %v12525_v55 = vld [vmem:[%s14794_s24 + $0x1c40] sm:$0xf] }
 0x144   : > { %v14207_v48 = vld [vmem:[%s14794_s24 + $0x1d6c] sm:$0xf0]  ;;  %v12542_v52 = vor.u32 %v14175_v44, %v12541_v43  ;;  %6958 = vmatpush.bf16.msrb.mxu2 %v12814_v42  ;;  %v12653_v61 = vld [vmem:[%s14794_s24 + $0x1d40] sm:$0xf] }
 0x145   : > { %v14239_v30 = vld [vmem:[%s14794_s24 + $0x1e6c] sm:$0xf0]  ;;  %v12670_v53 = vor.u32 %v14207_v48, %v12669_v45  ;;  %6971 = vmatpush.bf16.msrb.mxu3 %v12942_v46  ;;  %v12781_v0 = vld [vmem:[%s14794_s24 + $0x1e40] sm:$0xf] }
 0x146   : > { %v14271_v51 = vld [vmem:[%s14794_s24 + $0x1f6c] sm:$0xf0]  ;;  %v12798_v54 = vor.u32 %v14239_v30, %v12797_v49  ;;  %v12909_v4 = vld [vmem:[%s14794_s24 + $0x1f40] sm:$0xf]  ;;  %6933 = vmatpush.bf16.msrb.mxu0 %v12542_v52 }
 0x147   : > { %v14171_v56 = vld [vmem:[%s14794_s24 + $0x1c4c] sm:$0xf0]  ;;  %v12926_v62 = vor.u32 %v14271_v51, %v12925_v50  ;;  %6946 = vmatpush.bf16.msrb.mxu1 %v12670_v53  ;;  %v12509_v21 = vld [vmem:[%s14794_s24 + $0x1c20] sm:$0xf] }
 0x148   : > { %v14203_v35 = vld [vmem:[%s14794_s24 + $0x1d4c] sm:$0xf0]  ;;  %v12526_v8 = vor.u32 %v14171_v56, %v12525_v55  ;;  %6959 = vmatpush.bf16.msrb.mxu2 %v12798_v54  ;;  %v12637_v34 = vld [vmem:[%s14794_s24 + $0x1d20] sm:$0xf]  ;;  %v6706_v54 = vpop.f32.mrf.mxu2  ;;  %v13293_v55 = vld [vmem:[%s14794_s24 + $0xe4] sm:$0xf] }
 0x149   : > { %v14235_v1 = vld [vmem:[%s14794_s24 + $0x1e4c] sm:$0xf0]  ;;  %v12654_v16 = vor.u32 %v14203_v35, %v12653_v61  ;;  %6972 = vmatpush.bf16.msrb.mxu3 %v12926_v62  ;;  %v12765_v39 = vld [vmem:[%s14794_s24 + $0x1e20] sm:$0xf]  ;;  %v9023_v56 = vld [vmem:[%s14794_s24 + $0xf0] sm:$0xf0]  ;;  %v6719_v62 = vpop.f32.mrf.mxu3 }
 0x14a   : > { %v14267_v5 = vld [vmem:[%s14794_s24 + $0x1f4c] sm:$0xf0]  ;;  %v12782_v17 = vor.u32 %v14235_v1, %v12781_v0  ;;  %v12893_v41 = vld [vmem:[%s14794_s24 + $0x1f20] sm:$0xf]  ;;  %6934 = vmatpush.bf16.msrb.mxu0 %v12526_v8  ;;  %v13325_v61 = vld [vmem:[%s14794_s24 + $0x1e4] sm:$0xf]  ;;  %v9026_v8 = vor.u32 %v13293_v55, %v9023_v56 }
 0x14b   : > { %v14167_v22 = vld [vmem:[%s14794_s24 + $0x1c2c] sm:$0xf0]  ;;  %v12910_v36 = vor.u32 %v14267_v5, %v12909_v4  ;;  %v12493_v44 = vld [vmem:[%s14794_s24 + $0x1c00] sm:$0xf]  ;;  %6947 = vmatpush.bf16.msrb.mxu1 %v12654_v16  ;;  %v9151_v35 = vld [vmem:[%s14794_s24 + $0x1f0] sm:$0xf0] }
 0x14c   : > { %v14199_v38 = vld [vmem:[%s14794_s24 + $0x1d2c] sm:$0xf0]  ;;  %v12510_v43 = vor.u32 %v14167_v22, %v12509_v21  ;;  %6960 = vmatpush.bf16.msrb.mxu2 %v12782_v17  ;;  %v12621_v48 = vld [vmem:[%s14794_s24 + $0x1d00] sm:$0xf]  ;;  %v13357_v0 = vld [vmem:[%s14794_s24 + $0x2e4] sm:$0xf]  ;;  %v9154_v9 = vor.u32 %v13325_v61, %v9151_v35 }
 0x14d   : > { %v14231_v40 = vld [vmem:[%s14794_s24 + $0x1e2c] sm:$0xf0]  ;;  %v12638_v46 = vor.u32 %v14199_v38, %v12637_v34  ;;  %v12749_v30 = vld [vmem:[%s14794_s24 + $0x1e00] sm:$0xf]  ;;  %6973 = vmatpush.bf16.msrb.mxu3 %v12910_v36  ;;  %v9279_v1 = vld [vmem:[%s14794_s24 + $0x2f0] sm:$0xf0] }
 0x14e   : > { %v14263_v42 = vld [vmem:[%s14794_s24 + $0x1f2c] sm:$0xf0]  ;;  %v12766_v47 = vor.u32 %v14231_v40, %v12765_v39  ;;  %v12877_v52 = vld [vmem:[%s14794_s24 + $0x1f00] sm:$0xf]  ;;  %6935 = vmatpush.bf16.msrb.mxu0 %v12510_v43  ;;  %v13389_v4 = vld [vmem:[%s14794_s24 + $0x3e4] sm:$0xf]  ;;  %v9282_v16 = vor.u32 %v13357_v0, %v9279_v1 }
 0x14f   : > { %v14163_v45 = vld [vmem:[%s14794_s24 + $0x1c0c] sm:$0xf0]  ;;  %v12894_v50 = vor.u32 %v14263_v42, %v12893_v41  ;;  %6948 = vmatpush.bf16.msrb.mxu1 %v12638_v46  ;;  %v9407_v5 = vld [vmem:[%s14794_s24 + $0x3f0] sm:$0xf0]  ;;  %v13289_v17 = vld [vmem:[%s14794_s24 + $0xc4] sm:$0xf] }
 0x150   : > { %v14195_v49 = vld [vmem:[%s14794_s24 + $0x1d0c] sm:$0xf0]  ;;  %v12494_v63 = vor.u32 %v14163_v45, %v12493_v44  ;;  %6961 = vmatpush.bf16.msrb.mxu2 %v12766_v47  ;;  %v9007_v21 = vld [vmem:[%s14794_s24 + $0xd0] sm:$0xf0]  ;;  %v13321_v22 = vld [vmem:[%s14794_s24 + $0x1c4] sm:$0xf]  ;;  %v9410_v34 = vor.u32 %v13389_v4, %v9407_v5 }
 0x151   : > { %v14227_v51 = vld [vmem:[%s14794_s24 + $0x1e0c] sm:$0xf0]  ;;  %v12622_v2 = vor.u32 %v14195_v49, %v12621_v48  ;;  %6974 = vmatpush.bf16.msrb.mxu3 %v12894_v50  ;;  %v9135_v36 = vld [vmem:[%s14794_s24 + $0x1d0] sm:$0xf0]  ;;  %v13353_v38 = vld [vmem:[%s14794_s24 + $0x2c4] sm:$0xf]  ;;  %v9010_v46 = vor.u32 %v13289_v17, %v9007_v21  ;;  %v6743_v21 = vpop.f32.mrf.mxu1 }
 0x152   : > { %v14259_v53 = vld [vmem:[%s14794_s24 + $0x1f0c] sm:$0xf0]  ;;  %v12750_v3 = vor.u32 %v14227_v51, %v12749_v30  ;;  %6936 = vmatpush.bf16.msrb.mxu0 %v12494_v63  ;;  %v9263_v39 = vld [vmem:[%s14794_s24 + $0x2d0] sm:$0xf0]  ;;  %v13385_v41 = vld [vmem:[%s14794_s24 + $0x3c4] sm:$0xf]  ;;  %v9138_v47 = vor.u32 %v13321_v22, %v9135_v36 }
 0x153   : > { %v12878_v6 = vor.u32 %v14259_v53, %v12877_v52  ;;  %6949 = vmatpush.bf16.msrb.mxu1 %v12622_v2  ;;  %v1409_v40 = vld [vmem:[#allocation1 + $0x24] sm:$0xff]  ;;  %v1411_v43 = vld [vmem:[#allocation1 + $0x36] sm:$0xff]  ;;  %v1410_v44 = vld [vmem:[#allocation1 + $0x2d] sm:$0xff]  ;;  %v9266_v48 = vor.u32 %v13353_v38, %v9263_v39 }
 0x154   : > { %6962 = vmatpush.bf16.msrb.mxu2 %v12750_v3  ;;  %v9391_v42 = vld [vmem:[%s14794_s24 + $0x3d0] sm:$0xf0]  ;;  %v13285_v49 = vld [vmem:[%s14794_s24 + $0xa4] sm:$0xf] }
 0x155   : > { %6975 = vmatpush.bf16.msrb.mxu3 %v12878_v6  ;;  %v1412_v45 = vld [vmem:[#allocation1 + $0x3f] sm:$0xff]  ;;  %v13317_v50 = vld [vmem:[%s14794_s24 + $0x1a4] sm:$0xf]  ;;  %6937 = vmatmul.bf16.vlgmr.msrb.gmra.mxu0 %v1409_v40  ;;  %v9394_v51 = vor.u32 %v13385_v41, %v9391_v42  ;;  %v6730_v6 = vpop.f32.mrf.mxu0 }
 0x156   : > { %6981 = vmatpush.bf16.msra.mxu0 %v9026_v8  ;;  %v8991_v30 = vld [vmem:[%s14794_s24 + $0xb0] sm:$0xf0]  ;;  %v13349_v53 = vld [vmem:[%s14794_s24 + $0x2a4] sm:$0xf]  ;;  %6950 = vmatmul.bf16.vlgmr.msrb.gmra.mxu1 %v1410_v44 }
 0x157   : > { %6994 = vmatpush.bf16.msra.mxu1 %v9154_v9  ;;  %v9119_v52 = vld [vmem:[%s14794_s24 + $0x1b0] sm:$0xf0]  ;;  %6963 = vmatmul.bf16.vlgmr.msrb.gmra.mxu2 %v1411_v43  ;;  %v13381_v55 = vld [vmem:[%s14794_s24 + $0x3a4] sm:$0xf]  ;;  %v8994_v61 = vor.u32 %v13285_v49, %v8991_v30 }
 0x158   : > { %7007 = vmatpush.bf16.msra.mxu2 %v9282_v16  ;;  %v9247_v54 = vld [vmem:[%s14794_s24 + $0x2b0] sm:$0xf0]  ;;  %6976 = vmatmul.bf16.vlgmr.msrb.gmra.mxu3 %v1412_v45  ;;  %v9122_v62 = vor.u32 %v13317_v50, %v9119_v52  ;;  %v13281_v35 = vld [vmem:[%s14794_s24 + $0x84] sm:$0xf]  ;;  %v6731_v16 = vadd.f32 %v6730_v6, %v15403_v10  ;;  %v6756_v52 = vpop.f32.mrf.mxu2 }
 0x159   : > { %7020 = vmatpush.bf16.msra.mxu3 %v9410_v34  ;;  %v9375_v56 = vld [vmem:[%s14794_s24 + $0x3b0] sm:$0xf0]  ;;  %v9250_v63 = vor.u32 %v13349_v53, %v9247_v54  ;;  %v13313_v1 = vld [vmem:[%s14794_s24 + $0x184] sm:$0xf] }
 0x15a   : > { %6982 = vmatpush.bf16.msra.mxu0 %v9010_v46  ;;  %v8975_v0 = vld [vmem:[%s14794_s24 + $0x90] sm:$0xf0]  ;;  %v9378_v2 = vor.u32 %v13381_v55, %v9375_v56  ;;  %v13345_v4 = vld [vmem:[%s14794_s24 + $0x284] sm:$0xf]  ;;  %v6744_v41 = vadd.f32 %v6743_v21, %v6731_v16 }
 0x15b   : > { %6995 = vmatpush.bf16.msra.mxu1 %v9138_v47  ;;  %v9103_v3 = vld [vmem:[%s14794_s24 + $0x190] sm:$0xf0]  ;;  %v13377_v8 = vld [vmem:[%s14794_s24 + $0x384] sm:$0xf]  ;;  %v8978_v17 = vor.u32 %v13281_v35, %v8975_v0 }
 0x15c   : > { %7008 = vmatpush.bf16.msra.mxu2 %v9266_v48  ;;  %v9231_v5 = vld [vmem:[%s14794_s24 + $0x290] sm:$0xf0]  ;;  %v9106_v22 = vor.u32 %v13313_v1, %v9103_v3  ;;  %v13277_v36 = vld [vmem:[%s14794_s24 + $0x64] sm:$0xf]  ;;  %v6757_v56 = vadd.f32 %v6756_v52, %v6744_v41  ;;  %v6745_v1 = vpop.f32.mrf.mxu1 }
 0x15d   : > { %7021 = vmatpush.bf16.msra.mxu3 %v9394_v51  ;;  %v9359_v9 = vld [vmem:[%s14794_s24 + $0x390] sm:$0xf0]  ;;  %v9234_v34 = vor.u32 %v13345_v4, %v9231_v5  ;;  %v13309_v39 = vld [vmem:[%s14794_s24 + $0x164] sm:$0xf]  ;;  %v6732_v35 = vpop.f32.mrf.mxu0 }
 0x15e   : > { %6983 = vmatpush.bf16.msra.mxu0 %v8994_v61  ;;  %v8959_v38 = vld [vmem:[%s14794_s24 + $0x70] sm:$0xf0]  ;;  %v9362_v40 = vor.u32 %v13377_v8, %v9359_v9  ;;  %v13341_v43 = vld [vmem:[%s14794_s24 + $0x264] sm:$0xf]  ;;  %v6769_v61 = vpop.f32.mrf.mxu3 }
 0x15f   : > { %6996 = vmatpush.bf16.msra.mxu1 %v9122_v62  ;;  %v9087_v42 = vld [vmem:[%s14794_s24 + $0x170] sm:$0xf0]  ;;  %v13373_v44 = vld [vmem:[%s14794_s24 + $0x364] sm:$0xf]  ;;  %v8962_v46 = vor.u32 %v13277_v36, %v8959_v38 }
 0x160   : > { %7009 = vmatpush.bf16.msra.mxu2 %v9250_v63  ;;  %v9215_v10 = vld [vmem:[%s14794_s24 + $0x270] sm:$0xf0]  ;;  %v9090_v47 = vor.u32 %v13309_v39, %v9087_v42  ;;  %v13273_v49 = vld [vmem:[%s14794_s24 + $0x44] sm:$0xf] }
 0x161   : > { %7022 = vmatpush.bf16.msra.mxu3 %v9378_v2  ;;  %v9343_v45 = vld [vmem:[%s14794_s24 + $0x370] sm:$0xf0]  ;;  %v9218_v48 = vor.u32 %v13341_v43, %v9215_v10  ;;  %v13305_v50 = vld [vmem:[%s14794_s24 + $0x144] sm:$0xf]  ;;  %v15470_v2 = vadd.f32 %v6769_v61, %v6757_v56 }
 0x162   : > { %6984 = vmatpush.bf16.msra.mxu0 %v8978_v17  ;;  %v8943_v30 = vld [vmem:[%s14794_s24 + $0x50] sm:$0xf0]  ;;  %v9346_v51 = vor.u32 %v13373_v44, %v9343_v45  ;;  %v13337_v54 = vld [vmem:[%s14794_s24 + $0x244] sm:$0xf] }
 0x163   : > { %6997 = vmatpush.bf16.msra.mxu1 %v9106_v22  ;;  %v9071_v53 = vld [vmem:[%s14794_s24 + $0x150] sm:$0xf0]  ;;  %v13369_v62 = vld [vmem:[%s14794_s24 + $0x344] sm:$0xf]  ;;  %v8946_v0 = vor.u32 %v13273_v49, %v8943_v30 }
 0x164   : > { %7010 = vmatpush.bf16.msra.mxu2 %v9234_v34  ;;  %v9199_v55 = vld [vmem:[%s14794_s24 + $0x250] sm:$0xf0]  ;;  %v9074_v3 = vor.u32 %v13305_v50, %v9071_v53  ;;  %v13269_v5 = vld [vmem:[%s14794_s24 + $0x24] sm:$0xf] }
 0x165   : > { %7023 = vmatpush.bf16.msra.mxu3 %v9362_v40  ;;  %v9327_v63 = vld [vmem:[%s14794_s24 + $0x350] sm:$0xf0]  ;;  %v9202_v4 = vor.u32 %v13337_v54, %v9199_v55  ;;  %v13301_v8 = vld [vmem:[%s14794_s24 + $0x124] sm:$0xf] }
 0x166   : > { %6985 = vmatpush.bf16.msra.mxu0 %v8962_v46  ;;  %v8927_v6 = vld [vmem:[%s14794_s24 + $0x30] sm:$0xf0]  ;;  %v9330_v9 = vor.u32 %v13369_v62, %v9327_v63  ;;  %v13333_v17 = vld [vmem:[%s14794_s24 + $0x224] sm:$0xf] }
 0x167   : > { %6998 = vmatpush.bf16.msra.mxu1 %v9090_v47  ;;  %v9055_v16 = vld [vmem:[%s14794_s24 + $0x130] sm:$0xf0]  ;;  %v13365_v22 = vld [vmem:[%s14794_s24 + $0x324] sm:$0xf]  ;;  %v8930_v36 = vor.u32 %v13269_v5, %v8927_v6 }
 0x168   : > { %7011 = vmatpush.bf16.msra.mxu2 %v9218_v48  ;;  %v9183_v21 = vld [vmem:[%s14794_s24 + $0x230] sm:$0xf0]  ;;  %v13265_v38 = vld [vmem:[%s14794_s24 + $0x4] sm:$0xf]  ;;  %v9058_v40 = vor.u32 %v13301_v8, %v9055_v16  ;;  %v6758_v48 = vpop.f32.mrf.mxu2 }
 0x169   : > { %7024 = vmatpush.bf16.msra.mxu3 %v9346_v51  ;;  %v9311_v34 = vld [vmem:[%s14794_s24 + $0x330] sm:$0xf0]  ;;  %v9186_v41 = vor.u32 %v13333_v17, %v9183_v21  ;;  %v13297_v42 = vld [vmem:[%s14794_s24 + $0x104] sm:$0xf]  ;;  %v6771_v51 = vpop.f32.mrf.mxu3 }
 0x16a   : > { %6986 = vmatpush.bf16.msra.mxu0 %v8946_v0  ;;  %v8911_v39 = vld [vmem:[%s14794_s24 + $0x10] sm:$0xf0]  ;;  %v13329_v10 = vld [vmem:[%s14794_s24 + $0x204] sm:$0xf]  ;;  %v9314_v44 = vor.u32 %v13365_v22, %v9311_v34 }
 0x16b   : > { %6999 = vmatpush.bf16.msra.mxu1 %v9074_v3  ;;  %v9039_v43 = vld [vmem:[%s14794_s24 + $0x110] sm:$0xf0]  ;;  %v13361_v46 = vld [vmem:[%s14794_s24 + $0x304] sm:$0xf]  ;;  %v8914_v52 = vor.u32 %v13265_v38, %v8911_v39 }
 0x16c   : > { %7012 = vmatpush.bf16.msra.mxu2 %v9202_v4  ;;  %v9167_v45 = vld [vmem:[%s14794_s24 + $0x210] sm:$0xf0]  ;;  %v13421_v49 = vld [vmem:[%s14794_s24 + $0x4e4] sm:$0xf]  ;;  %v9042_v56 = vor.u32 %v13297_v42, %v9039_v43 }
 0x16d   : > { %7025 = vmatpush.bf16.msra.mxu3 %v9330_v9  ;;  %v9295_v47 = vld [vmem:[%s14794_s24 + $0x310] sm:$0xf0]  ;;  %v13453_v50 = vld [vmem:[%s14794_s24 + $0x5e4] sm:$0xf]  ;;  %v9170_v61 = vor.u32 %v13329_v10, %v9167_v45 }
 0x16e   : > { %v9535_v30 = vld [vmem:[%s14794_s24 + $0x4f0] sm:$0xf0]  ;;  %6987 = vmatpush.bf16.msra.mxu0 %v8930_v36  ;;  %v13485_v54 = vld [vmem:[%s14794_s24 + $0x6e4] sm:$0xf]  ;;  %v9298_v35 = vor.u32 %v13361_v46, %v9295_v47 }
 0x16f   : > { %v9663_v53 = vld [vmem:[%s14794_s24 + $0x5f0] sm:$0xf0]  ;;  %7000 = vmatpush.bf16.msra.mxu1 %v9058_v40  ;;  %v13517_v62 = vld [vmem:[%s14794_s24 + $0x7e4] sm:$0xf]  ;;  %v9538_v0 = vor.u32 %v13421_v49, %v9535_v30 }
 0x170   : > { %v9791_v55 = vld [vmem:[%s14794_s24 + $0x6f0] sm:$0xf0]  ;;  %7013 = vmatpush.bf16.msra.mxu2 %v9186_v41  ;;  %v9666_v1 = vor.u32 %v13453_v50, %v9663_v53  ;;  %v13417_v4 = vld [vmem:[%s14794_s24 + $0x4c4] sm:$0xf] }
 0x171   : > { %v9919_v63 = vld [vmem:[%s14794_s24 + $0x7f0] sm:$0xf0]  ;;  %7026 = vmatpush.bf16.msra.mxu3 %v9314_v44  ;;  %v9794_v3 = vor.u32 %v13485_v54, %v9791_v55  ;;  %v13449_v6 = vld [vmem:[%s14794_s24 + $0x5c4] sm:$0xf] }
 0x172   : > { %v9519_v5 = vld [vmem:[%s14794_s24 + $0x4d0] sm:$0xf0]  ;;  %6988 = vmatpush.bf16.msra.mxu0 %v8914_v52  ;;  %v9922_v8 = vor.u32 %v13517_v62, %v9919_v63  ;;  %v13481_v16 = vld [vmem:[%s14794_s24 + $0x6c4] sm:$0xf] }
 0x173   : > { %v9647_v9 = vld [vmem:[%s14794_s24 + $0x5d0] sm:$0xf0]  ;;  %7001 = vmatpush.bf16.msra.mxu1 %v9042_v56  ;;  %v13513_v21 = vld [vmem:[%s14794_s24 + $0x7c4] sm:$0xf]  ;;  %v9522_v34 = vor.u32 %v13417_v4, %v9519_v5  ;;  %v6782_v56 = vpop.f32.mrf.mxu0 }
 0x174   : > { %v9775_v17 = vld [vmem:[%s14794_s24 + $0x6d0] sm:$0xf0]  ;;  %7014 = vmatpush.bf16.msra.mxu2 %v9170_v61  ;;  %v9650_v36 = vor.u32 %v13449_v6, %v9647_v9  ;;  %v13413_v39 = vld [vmem:[%s14794_s24 + $0x4a4] sm:$0xf]  ;;  %v6783_v63 = vadd.f32 %v6782_v56, %v15470_v2 }
 0x175   : > { %v9903_v22 = vld [vmem:[%s14794_s24 + $0x7d0] sm:$0xf0]  ;;  %7027 = vmatpush.bf16.msra.mxu3 %v9298_v35  ;;  %v9778_v38 = vor.u32 %v13481_v16, %v9775_v17  ;;  %v13445_v41 = vld [vmem:[%s14794_s24 + $0x5a4] sm:$0xf]  ;;  %6989 = vmatmul.bf16.vlgmr.msra.gmra.mxu0 %v14928_v32 }
 0x176   : > { %7033 = vmatpush.bf16.msrb.mxu0 %v9538_v0  ;;  %v9503_v40 = vld [vmem:[%s14794_s24 + $0x4b0] sm:$0xf0]  ;;  %v9906_v42 = vor.u32 %v13513_v21, %v9903_v22  ;;  %v13477_v10 = vld [vmem:[%s14794_s24 + $0x6a4] sm:$0xf]  ;;  %7002 = vmatmul.bf16.vlgmr.msra.gmra.mxu1 %v14935_v37  ;;  %v6795_v0 = vpop.f32.mrf.mxu1 }
 0x177   : > { %7046 = vmatpush.bf16.msrb.mxu1 %v9666_v1  ;;  %v9631_v43 = vld [vmem:[%s14794_s24 + $0x5b0] sm:$0xf0]  ;;  %7015 = vmatmul.bf16.vlgmr.msra.gmra.mxu2 %v14926_v31  ;;  %v13509_v45 = vld [vmem:[%s14794_s24 + $0x7a4] sm:$0xf]  ;;  %v9506_v47 = vor.u32 %v13413_v39, %v9503_v40  ;;  %v6796_v9 = vadd.f32 %v6795_v0, %v6783_v63 }
 0x178   : > { %7059 = vmatpush.bf16.msrb.mxu2 %v9794_v3  ;;  %v9759_v44 = vld [vmem:[%s14794_s24 + $0x6b0] sm:$0xf0]  ;;  %7028 = vmatmul.bf16.vlgmr.msra.gmra.mxu3 %v14930_v33  ;;  %v9634_v48 = vor.u32 %v13445_v41, %v9631_v43  ;;  %v13409_v30 = vld [vmem:[%s14794_s24 + $0x484] sm:$0xf]  ;;  %v6808_v43 = vpop.f32.mrf.mxu2 }
 0x179   : > { %7072 = vmatpush.bf16.msrb.mxu3 %v9922_v8  ;;  %v9887_v46 = vld [vmem:[%s14794_s24 + $0x7b0] sm:$0xf0]  ;;  %v9762_v49 = vor.u32 %v13477_v10, %v9759_v44  ;;  %v13441_v51 = vld [vmem:[%s14794_s24 + $0x584] sm:$0xf] }
 0x17a   : > { %7034 = vmatpush.bf16.msrb.mxu0 %v9522_v34  ;;  %v9487_v50 = vld [vmem:[%s14794_s24 + $0x490] sm:$0xf0]  ;;  %v9890_v52 = vor.u32 %v13509_v45, %v9887_v46  ;;  %v13473_v54 = vld [vmem:[%s14794_s24 + $0x684] sm:$0xf]  ;;  %v6809_v46 = vadd.f32 %v6808_v43, %v6796_v9 }
 0x17b   : > { %7047 = vmatpush.bf16.msrb.mxu1 %v9650_v36  ;;  %v9615_v53 = vld [vmem:[%s14794_s24 + $0x590] sm:$0xf0]  ;;  %v13505_v61 = vld [vmem:[%s14794_s24 + $0x784] sm:$0xf]  ;;  %v9490_v35 = vor.u32 %v13409_v30, %v9487_v50  ;;  %v6784_v30 = vpop.f32.mrf.mxu0 }
 0x17c   : > { %7060 = vmatpush.bf16.msrb.mxu2 %v9778_v38  ;;  %v9743_v55 = vld [vmem:[%s14794_s24 + $0x690] sm:$0xf0]  ;;  %v9618_v1 = vor.u32 %v13441_v51, %v9615_v53  ;;  %v13405_v4 = vld [vmem:[%s14794_s24 + $0x464] sm:$0xf] }
 0x17d   : > { %7073 = vmatpush.bf16.msrb.mxu3 %v9906_v42  ;;  %v9871_v62 = vld [vmem:[%s14794_s24 + $0x790] sm:$0xf0]  ;;  %v9746_v3 = vor.u32 %v13473_v54, %v9743_v55  ;;  %v13437_v6 = vld [vmem:[%s14794_s24 + $0x564] sm:$0xf] }
 0x17e   : > { %7035 = vmatpush.bf16.msrb.mxu0 %v9506_v47  ;;  %v9471_v5 = vld [vmem:[%s14794_s24 + $0x470] sm:$0xf0]  ;;  %v9874_v8 = vor.u32 %v13505_v61, %v9871_v62  ;;  %v13469_v17 = vld [vmem:[%s14794_s24 + $0x664] sm:$0xf]  ;;  %v6821_v47 = vpop.f32.mrf.mxu3  ;;  %v6797_v51 = vpop.f32.mrf.mxu1 }
 0x17f   : > { %7048 = vmatpush.bf16.msrb.mxu1 %v9634_v48  ;;  %v9599_v16 = vld [vmem:[%s14794_s24 + $0x570] sm:$0xf0]  ;;  %v13501_v21 = vld [vmem:[%s14794_s24 + $0x764] sm:$0xf]  ;;  %v9474_v34 = vor.u32 %v13405_v4, %v9471_v5 }
 0x180   : > { %7061 = vmatpush.bf16.msrb.mxu2 %v9762_v49  ;;  %v9727_v2 = vld [vmem:[%s14794_s24 + $0x670] sm:$0xf0]  ;;  %v9602_v36 = vor.u32 %v13437_v6, %v9599_v16  ;;  %v13401_v39 = vld [vmem:[%s14794_s24 + $0x444] sm:$0xf] }
 0x181   : > { %7074 = vmatpush.bf16.msrb.mxu3 %v9890_v52  ;;  %v9855_v22 = vld [vmem:[%s14794_s24 + $0x770] sm:$0xf0]  ;;  %v9730_v38 = vor.u32 %v13469_v17, %v9727_v2  ;;  %v13433_v41 = vld [vmem:[%s14794_s24 + $0x544] sm:$0xf]  ;;  %v15541_v52 = vadd.f32 %v6821_v47, %v6809_v46 }
 0x182   : > { %7036 = vmatpush.bf16.msrb.mxu0 %v9490_v35  ;;  %v9455_v40 = vld [vmem:[%s14794_s24 + $0x450] sm:$0xf0]  ;;  %v9858_v42 = vor.u32 %v13501_v21, %v9855_v22  ;;  %v13465_v44 = vld [vmem:[%s14794_s24 + $0x644] sm:$0xf] }
 0x183   : > { %7049 = vmatpush.bf16.msrb.mxu1 %v9618_v1  ;;  %v9583_v10 = vld [vmem:[%s14794_s24 + $0x550] sm:$0xf0]  ;;  %v13497_v48 = vld [vmem:[%s14794_s24 + $0x744] sm:$0xf]  ;;  %v9458_v50 = vor.u32 %v13401_v39, %v9455_v40 }
 0x184   : > { %7062 = vmatpush.bf16.msrb.mxu2 %v9746_v3  ;;  %v9711_v45 = vld [vmem:[%s14794_s24 + $0x650] sm:$0xf0]  ;;  %v9586_v53 = vor.u32 %v13433_v41, %v9583_v10  ;;  %v13397_v55 = vld [vmem:[%s14794_s24 + $0x424] sm:$0xf] }
 0x185   : > { %7075 = vmatpush.bf16.msrb.mxu3 %v9874_v8  ;;  %v9839_v49 = vld [vmem:[%s14794_s24 + $0x750] sm:$0xf0]  ;;  %v9714_v54 = vor.u32 %v13465_v44, %v9711_v45  ;;  %v13429_v61 = vld [vmem:[%s14794_s24 + $0x524] sm:$0xf] }
 0x186   : > { %7037 = vmatpush.bf16.msrb.mxu0 %v9474_v34  ;;  %v9439_v56 = vld [vmem:[%s14794_s24 + $0x430] sm:$0xf0]  ;;  %v9842_v62 = vor.u32 %v13497_v48, %v9839_v49  ;;  %v13461_v35 = vld [vmem:[%s14794_s24 + $0x624] sm:$0xf] }
 0x187   : > { %7050 = vmatpush.bf16.msrb.mxu1 %v9602_v36  ;;  %v9567_v63 = vld [vmem:[%s14794_s24 + $0x530] sm:$0xf0]  ;;  %v13493_v1 = vld [vmem:[%s14794_s24 + $0x724] sm:$0xf]  ;;  %v9442_v4 = vor.u32 %v13397_v55, %v9439_v56 }
 0x188   : > { %7063 = vmatpush.bf16.msrb.mxu2 %v9730_v38  ;;  %v9695_v0 = vld [vmem:[%s14794_s24 + $0x630] sm:$0xf0]  ;;  %v13393_v5 = vld [vmem:[%s14794_s24 + $0x404] sm:$0xf]  ;;  %v9570_v8 = vor.u32 %v13429_v61, %v9567_v63  ;;  %v6810_v38 = vpop.f32.mrf.mxu2 }
 0x189   : > { %7076 = vmatpush.bf16.msrb.mxu3 %v9858_v42  ;;  %v9823_v3 = vld [vmem:[%s14794_s24 + $0x730] sm:$0xf0]  ;;  %v9698_v9 = vor.u32 %v13461_v35, %v9695_v0  ;;  %v13425_v16 = vld [vmem:[%s14794_s24 + $0x504] sm:$0xf]  ;;  %v6823_v42 = vpop.f32.mrf.mxu3 }
 0x18a   : > { %7038 = vmatpush.bf16.msrb.mxu0 %v9458_v50  ;;  %v9423_v6 = vld [vmem:[%s14794_s24 + $0x410] sm:$0xf0]  ;;  %v13457_v2 = vld [vmem:[%s14794_s24 + $0x604] sm:$0xf]  ;;  %v9826_v21 = vor.u32 %v13493_v1, %v9823_v3 }
 0x18b   : > { %7051 = vmatpush.bf16.msrb.mxu1 %v9586_v53  ;;  %v9551_v17 = vld [vmem:[%s14794_s24 + $0x510] sm:$0xf0]  ;;  %v13489_v34 = vld [vmem:[%s14794_s24 + $0x704] sm:$0xf]  ;;  %v9426_v43 = vor.u32 %v13393_v5, %v9423_v6 }
 0x18c   : > { %7064 = vmatpush.bf16.msrb.mxu2 %v9714_v54  ;;  %v9679_v22 = vld [vmem:[%s14794_s24 + $0x610] sm:$0xf0]  ;;  %v13549_v39 = vld [vmem:[%s14794_s24 + $0x8e4] sm:$0xf]  ;;  %v9554_v46 = vor.u32 %v13425_v16, %v9551_v17 }
 0x18d   : > { %7077 = vmatpush.bf16.msrb.mxu3 %v9842_v62  ;;  %v9807_v36 = vld [vmem:[%s14794_s24 + $0x710] sm:$0xf0]  ;;  %v13581_v41 = vld [vmem:[%s14794_s24 + $0x9e4] sm:$0xf]  ;;  %v9682_v47 = vor.u32 %v13457_v2, %v9679_v22 }
 0x18e   : > { %v10047_v40 = vld [vmem:[%s14794_s24 + $0x8f0] sm:$0xf0]  ;;  %7039 = vmatpush.bf16.msrb.mxu0 %v9442_v4  ;;  %v13613_v44 = vld [vmem:[%s14794_s24 + $0xae4] sm:$0xf]  ;;  %v9810_v30 = vor.u32 %v13489_v34, %v9807_v36 }
 0x18f   : > { %v10175_v10 = vld [vmem:[%s14794_s24 + $0x9f0] sm:$0xf0]  ;;  %7052 = vmatpush.bf16.msrb.mxu1 %v9570_v8  ;;  %v13645_v48 = vld [vmem:[%s14794_s24 + $0xbe4] sm:$0xf]  ;;  %v10050_v50 = vor.u32 %v13549_v39, %v10047_v40 }
 0x190   : > { %v10303_v45 = vld [vmem:[%s14794_s24 + $0xaf0] sm:$0xf0]  ;;  %7065 = vmatpush.bf16.msrb.mxu2 %v9698_v9  ;;  %v10178_v51 = vor.u32 %v13581_v41, %v10175_v10  ;;  %v13545_v54 = vld [vmem:[%s14794_s24 + $0x8c4] sm:$0xf] }
 0x191   : > { %v10431_v49 = vld [vmem:[%s14794_s24 + $0xbf0] sm:$0xf0]  ;;  %7078 = vmatpush.bf16.msrb.mxu3 %v9826_v21  ;;  %v10306_v53 = vor.u32 %v13613_v44, %v10303_v45  ;;  %v13577_v56 = vld [vmem:[%s14794_s24 + $0x9c4] sm:$0xf] }
 0x192   : > { %v10031_v55 = vld [vmem:[%s14794_s24 + $0x8d0] sm:$0xf0]  ;;  %7040 = vmatpush.bf16.msrb.mxu0 %v9426_v43  ;;  %v10434_v61 = vor.u32 %v13645_v48, %v10431_v49  ;;  %v13609_v63 = vld [vmem:[%s14794_s24 + $0xac4] sm:$0xf] }
 0x193   : > { %v10159_v62 = vld [vmem:[%s14794_s24 + $0x9d0] sm:$0xf0]  ;;  %7053 = vmatpush.bf16.msrb.mxu1 %v9554_v46  ;;  %v13641_v0 = vld [vmem:[%s14794_s24 + $0xbc4] sm:$0xf]  ;;  %v10034_v3 = vor.u32 %v13545_v54, %v10031_v55  ;;  %v6834_v46 = vpop.f32.mrf.mxu0 }
 0x194   : > { %v10287_v35 = vld [vmem:[%s14794_s24 + $0xad0] sm:$0xf0]  ;;  %7066 = vmatpush.bf16.msrb.mxu2 %v9682_v47  ;;  %v10162_v4 = vor.u32 %v13577_v56, %v10159_v62  ;;  %v13541_v6 = vld [vmem:[%s14794_s24 + $0x8a4] sm:$0xf]  ;;  %v6835_v49 = vadd.f32 %v6834_v46, %v15541_v52 }
 0x195   : > { %v10415_v1 = vld [vmem:[%s14794_s24 + $0xbd0] sm:$0xf0]  ;;  %7079 = vmatpush.bf16.msrb.mxu3 %v9810_v30  ;;  %v10290_v5 = vor.u32 %v13609_v63, %v10287_v35  ;;  %v13573_v9 = vld [vmem:[%s14794_s24 + $0x9a4] sm:$0xf]  ;;  %7041 = vmatmul.bf16.vlgmr.msrb.gmra.mxu0 %v14967_v11 }
 0x196   : > { %7085 = vmatpush.bf16.msra.mxu0 %v10050_v50  ;;  %v10015_v8 = vld [vmem:[%s14794_s24 + $0x8b0] sm:$0xf0]  ;;  %v10418_v16 = vor.u32 %v13641_v0, %v10415_v1  ;;  %v13605_v2 = vld [vmem:[%s14794_s24 + $0xaa4] sm:$0xf]  ;;  %7054 = vmatmul.bf16.vlgmr.msrb.gmra.mxu1 %v14971_v13  ;;  %v6847_v50 = vpop.f32.mrf.mxu1 }
 0x197   : > { %7098 = vmatpush.bf16.msra.mxu1 %v10178_v51  ;;  %7067 = vmatmul.bf16.vlgmr.msrb.gmra.mxu2 %v14964_v7  ;;  %v10143_v17 = vld [vmem:[%s14794_s24 + $0x9b0] sm:$0xf0]  ;;  %v13637_v22 = vld [vmem:[%s14794_s24 + $0xba4] sm:$0xf]  ;;  %v10018_v36 = vor.u32 %v13541_v6, %v10015_v8  ;;  %v6848_v62 = vadd.f32 %v6847_v50, %v6835_v49 }
 0x198   : > { %7111 = vmatpush.bf16.msra.mxu2 %v10306_v53  ;;  %v10271_v21 = vld [vmem:[%s14794_s24 + $0xab0] sm:$0xf0]  ;;  %7080 = vmatmul.bf16.vlgmr.msrb.gmra.mxu3 %v14969_v12  ;;  %v10146_v38 = vor.u32 %v13573_v9, %v10143_v17  ;;  %v13537_v40 = vld [vmem:[%s14794_s24 + $0x884] sm:$0xf]  ;;  %v6860_v17 = vpop.f32.mrf.mxu2 }
 0x199   : > { %7124 = vmatpush.bf16.msra.mxu3 %v10434_v61  ;;  %v10399_v34 = vld [vmem:[%s14794_s24 + $0xbb0] sm:$0xf0]  ;;  %v10274_v39 = vor.u32 %v13605_v2, %v10271_v21  ;;  %v13569_v42 = vld [vmem:[%s14794_s24 + $0x984] sm:$0xf] }
 0x19a   : > { %7086 = vmatpush.bf16.msra.mxu0 %v10034_v3  ;;  %v9999_v41 = vld [vmem:[%s14794_s24 + $0x890] sm:$0xf0]  ;;  %v10402_v43 = vor.u32 %v13637_v22, %v10399_v34  ;;  %v13601_v44 = vld [vmem:[%s14794_s24 + $0xa84] sm:$0xf]  ;;  %v6861_v34 = vadd.f32 %v6860_v17, %v6848_v62 }
 0x19b   : > { %7099 = vmatpush.bf16.msra.mxu1 %v10162_v4  ;;  %v10127_v10 = vld [vmem:[%s14794_s24 + $0x990] sm:$0xf0]  ;;  %v13633_v47 = vld [vmem:[%s14794_s24 + $0xb84] sm:$0xf]  ;;  %v10002_v30 = vor.u32 %v13537_v40, %v9999_v41  ;;  %v6836_v40 = vpop.f32.mrf.mxu0 }
 0x19c   : > { %7112 = vmatpush.bf16.msra.mxu2 %v10290_v5  ;;  %v10255_v45 = vld [vmem:[%s14794_s24 + $0xa90] sm:$0xf0]  ;;  %v10130_v51 = vor.u32 %v13569_v42, %v10127_v10  ;;  %v13533_v54 = vld [vmem:[%s14794_s24 + $0x864] sm:$0xf] }
 0x19d   : > { %7125 = vmatpush.bf16.msra.mxu3 %v10418_v16  ;;  %v10383_v48 = vld [vmem:[%s14794_s24 + $0xb90] sm:$0xf0]  ;;  %v10258_v53 = vor.u32 %v13601_v44, %v10255_v45  ;;  %v13565_v56 = vld [vmem:[%s14794_s24 + $0x964] sm:$0xf] }
 0x19e   : > { %7087 = vmatpush.bf16.msra.mxu0 %v10018_v36  ;;  %v9983_v55 = vld [vmem:[%s14794_s24 + $0x870] sm:$0xf0]  ;;  %v10386_v61 = vor.u32 %v13633_v47, %v10383_v48  ;;  %v13597_v35 = vld [vmem:[%s14794_s24 + $0xa64] sm:$0xf]  ;;  %v6873_v36 = vpop.f32.mrf.mxu3  ;;  %v6849_v42 = vpop.f32.mrf.mxu1 }
 0x19f   : > { %7100 = vmatpush.bf16.msra.mxu1 %v10146_v38  ;;  %v10111_v63 = vld [vmem:[%s14794_s24 + $0x970] sm:$0xf0]  ;;  %v13629_v0 = vld [vmem:[%s14794_s24 + $0xb64] sm:$0xf]  ;;  %v9986_v3 = vor.u32 %v13533_v54, %v9983_v55 }
 0x1a0   : > { %7113 = vmatpush.bf16.msra.mxu2 %v10274_v39  ;;  %v10239_v52 = vld [vmem:[%s14794_s24 + $0xa70] sm:$0xf0]  ;;  %v10114_v4 = vor.u32 %v13565_v56, %v10111_v63  ;;  %v13529_v6 = vld [vmem:[%s14794_s24 + $0x844] sm:$0xf] }
 0x1a1   : > { %7126 = vmatpush.bf16.msra.mxu3 %v10402_v43  ;;  %v10367_v1 = vld [vmem:[%s14794_s24 + $0xb70] sm:$0xf0]  ;;  %v10242_v5 = vor.u32 %v13597_v35, %v10239_v52  ;;  %v13561_v9 = vld [vmem:[%s14794_s24 + $0x944] sm:$0xf]  ;;  %v15612_v43 = vadd.f32 %v6873_v36, %v6861_v34 }
 0x1a2   : > { %7088 = vmatpush.bf16.msra.mxu0 %v10002_v30  ;;  %v9967_v8 = vld [vmem:[%s14794_s24 + $0x850] sm:$0xf0]  ;;  %v10370_v16 = vor.u32 %v13629_v0, %v10367_v1  ;;  %v13593_v21 = vld [vmem:[%s14794_s24 + $0xa44] sm:$0xf] }
 0x1a3   : > { %7101 = vmatpush.bf16.msra.mxu1 %v10130_v51  ;;  %v10095_v2 = vld [vmem:[%s14794_s24 + $0x950] sm:$0xf0]  ;;  %v13625_v38 = vld [vmem:[%s14794_s24 + $0xb44] sm:$0xf]  ;;  %v9970_v41 = vor.u32 %v13529_v6, %v9967_v8 }
 0x1a4   : > { %7114 = vmatpush.bf16.msra.mxu2 %v10258_v53  ;;  %v10223_v22 = vld [vmem:[%s14794_s24 + $0xa50] sm:$0xf0]  ;;  %v10098_v10 = vor.u32 %v13561_v9, %v10095_v2  ;;  %v13525_v45 = vld [vmem:[%s14794_s24 + $0x824] sm:$0xf] }
 0x1a5   : > { %7127 = vmatpush.bf16.msra.mxu3 %v10386_v61  ;;  %v10351_v39 = vld [vmem:[%s14794_s24 + $0xb50] sm:$0xf0]  ;;  %v10226_v44 = vor.u32 %v13593_v21, %v10223_v22  ;;  %v13557_v47 = vld [vmem:[%s14794_s24 + $0x924] sm:$0xf] }
 0x1a6   : > { %7089 = vmatpush.bf16.msra.mxu0 %v9986_v3  ;;  %v9951_v46 = vld [vmem:[%s14794_s24 + $0x830] sm:$0xf0]  ;;  %v10354_v48 = vor.u32 %v13625_v38, %v10351_v39  ;;  %v13589_v30 = vld [vmem:[%s14794_s24 + $0xa24] sm:$0xf] }
 0x1a7   : > { %7102 = vmatpush.bf16.msra.mxu1 %v10114_v4  ;;  %v10079_v49 = vld [vmem:[%s14794_s24 + $0x930] sm:$0xf0]  ;;  %v13621_v51 = vld [vmem:[%s14794_s24 + $0xb24] sm:$0xf]  ;;  %v9954_v54 = vor.u32 %v13525_v45, %v9951_v46 }
 0x1a8   : > { %7115 = vmatpush.bf16.msra.mxu2 %v10242_v5  ;;  %v10207_v50 = vld [vmem:[%s14794_s24 + $0xa30] sm:$0xf0]  ;;  %v13521_v55 = vld [vmem:[%s14794_s24 + $0x804] sm:$0xf]  ;;  %v10082_v61 = vor.u32 %v13557_v47, %v10079_v49  ;;  %v6862_v5 = vpop.f32.mrf.mxu2 }
 0x1a9   : > { %7128 = vmatpush.bf16.msra.mxu3 %v10370_v16  ;;  %v10335_v53 = vld [vmem:[%s14794_s24 + $0xb30] sm:$0xf0]  ;;  %v10210_v62 = vor.u32 %v13589_v30, %v10207_v50  ;;  %v13553_v63 = vld [vmem:[%s14794_s24 + $0x904] sm:$0xf]  ;;  %v6875_v16 = vpop.f32.mrf.mxu3 }
 0x1aa   : > { %7090 = vmatpush.bf16.msra.mxu0 %v9970_v41  ;;  %v9935_v56 = vld [vmem:[%s14794_s24 + $0x810] sm:$0xf0]  ;;  %v13585_v52 = vld [vmem:[%s14794_s24 + $0xa04] sm:$0xf]  ;;  %v10338_v0 = vor.u32 %v13621_v51, %v10335_v53 }
 0x1ab   : > { %7103 = vmatpush.bf16.msra.mxu1 %v10098_v10  ;;  %v10063_v35 = vld [vmem:[%s14794_s24 + $0x910] sm:$0xf0]  ;;  %v13617_v3 = vld [vmem:[%s14794_s24 + $0xb04] sm:$0xf]  ;;  %v9938_v17 = vor.u32 %v13521_v55, %v9935_v56 }
 0x1ac   : > { %7116 = vmatpush.bf16.msra.mxu2 %v10226_v44  ;;  %v10191_v1 = vld [vmem:[%s14794_s24 + $0xa10] sm:$0xf0]  ;;  %v13677_v6 = vld [vmem:[%s14794_s24 + $0xce4] sm:$0xf]  ;;  %v10066_v34 = vor.u32 %v13553_v63, %v10063_v35 }
 0x1ad   : > { %7129 = vmatpush.bf16.msra.mxu3 %v10354_v48  ;;  %v10319_v4 = vld [vmem:[%s14794_s24 + $0xb10] sm:$0xf0]  ;;  %v13709_v9 = vld [vmem:[%s14794_s24 + $0xde4] sm:$0xf]  ;;  %v10194_v36 = vor.u32 %v13585_v52, %v10191_v1 }
 0x1ae   : > { %v10559_v8 = vld [vmem:[%s14794_s24 + $0xcf0] sm:$0xf0]  ;;  %7091 = vmatpush.bf16.msra.mxu0 %v9954_v54  ;;  %v13741_v21 = vld [vmem:[%s14794_s24 + $0xee4] sm:$0xf]  ;;  %v10322_v40 = vor.u32 %v13617_v3, %v10319_v4 }
 0x1af   : > { %v10687_v2 = vld [vmem:[%s14794_s24 + $0xdf0] sm:$0xf0]  ;;  %7104 = vmatpush.bf16.msra.mxu1 %v10082_v61  ;;  %v13773_v38 = vld [vmem:[%s14794_s24 + $0xfe4] sm:$0xf]  ;;  %v10562_v41 = vor.u32 %v13677_v6, %v10559_v8 }
 0x1b0   : > { %v10815_v22 = vld [vmem:[%s14794_s24 + $0xef0] sm:$0xf0]  ;;  %7117 = vmatpush.bf16.msra.mxu2 %v10210_v62  ;;  %v10690_v42 = vor.u32 %v13709_v9, %v10687_v2  ;;  %v13673_v44 = vld [vmem:[%s14794_s24 + $0xcc4] sm:$0xf] }
 0x1b1   : > { %v10943_v39 = vld [vmem:[%s14794_s24 + $0xff0] sm:$0xf0]  ;;  %7130 = vmatpush.bf16.msra.mxu3 %v10338_v0  ;;  %v10818_v10 = vor.u32 %v13741_v21, %v10815_v22  ;;  %v13705_v46 = vld [vmem:[%s14794_s24 + $0xdc4] sm:$0xf] }
 0x1b2   : > { %v10543_v45 = vld [vmem:[%s14794_s24 + $0xcd0] sm:$0xf0]  ;;  %7092 = vmatpush.bf16.msra.mxu0 %v9938_v17  ;;  %v10946_v47 = vor.u32 %v13773_v38, %v10943_v39  ;;  %v13737_v49 = vld [vmem:[%s14794_s24 + $0xec4] sm:$0xf] }
 0x1b3   : > { %v10671_v48 = vld [vmem:[%s14794_s24 + $0xdd0] sm:$0xf0]  ;;  %7105 = vmatpush.bf16.msra.mxu1 %v10066_v34  ;;  %v13769_v50 = vld [vmem:[%s14794_s24 + $0xfc4] sm:$0xf]  ;;  %v10546_v53 = vor.u32 %v13673_v44, %v10543_v45 }
 0x1b4   : > { %v10799_v30 = vld [vmem:[%s14794_s24 + $0xed0] sm:$0xf0]  ;;  %7118 = vmatpush.bf16.msra.mxu2 %v10194_v36  ;;  %v10674_v54 = vor.u32 %v13705_v46, %v10671_v48  ;;  %v13669_v56 = vld [vmem:[%s14794_s24 + $0xca4] sm:$0xf] }
 0x1b5   : > { %v10927_v51 = vld [vmem:[%s14794_s24 + $0xfd0] sm:$0xf0]  ;;  %7131 = vmatpush.bf16.msra.mxu3 %v10322_v40  ;;  %v10802_v55 = vor.u32 %v13737_v49, %v10799_v30  ;;  %v13701_v62 = vld [vmem:[%s14794_s24 + $0xda4] sm:$0xf]  ;;  %7093 = vmatmul.bf16.vlgmr.msra.gmra.mxu0 %v15057_v23 }
 0x1b6   : > { %7137 = vmatpush.bf16.msrb.mxu0 %v10562_v41  ;;  %v10527_v61 = vld [vmem:[%s14794_s24 + $0xcb0] sm:$0xf0]  ;;  %v10930_v63 = vor.u32 %v13769_v50, %v10927_v51  ;;  %v13733_v52 = vld [vmem:[%s14794_s24 + $0xea4] sm:$0xf]  ;;  %7106 = vmatmul.bf16.vlgmr.msra.gmra.mxu1 %v15063_v27  ;;  %v6886_v34 = vpop.f32.mrf.mxu0  ;;  %v6899_v41 = vpop.f32.mrf.mxu1 }
 0x1b7   : > { %7150 = vmatpush.bf16.msrb.mxu1 %v10690_v42  ;;  %v10655_v35 = vld [vmem:[%s14794_s24 + $0xdb0] sm:$0xf0]  ;;  %7119 = vmatmul.bf16.vlgmr.msra.gmra.mxu2 %v15061_v26  ;;  %v13765_v1 = vld [vmem:[%s14794_s24 + $0xfa4] sm:$0xf]  ;;  %v10530_v4 = vor.u32 %v13669_v56, %v10527_v61  ;;  %v6887_v39 = vadd.f32 %v6886_v34, %v15612_v43 }
 0x1b8   : > { %7163 = vmatpush.bf16.msrb.mxu2 %v10818_v10  ;;  %v10783_v0 = vld [vmem:[%s14794_s24 + $0xeb0] sm:$0xf0]  ;;  %7132 = vmatmul.bf16.vlgmr.msra.gmra.mxu3 %v15065_v28  ;;  %v10658_v5 = vor.u32 %v13701_v62, %v10655_v35  ;;  %v13665_v8 = vld [vmem:[%s14794_s24 + $0xc84] sm:$0xf] }
 0x1b9   : > { %7176 = vmatpush.bf16.msrb.mxu3 %v10946_v47  ;;  %v10911_v3 = vld [vmem:[%s14794_s24 + $0xfb0] sm:$0xf0]  ;;  %v10786_v6 = vor.u32 %v13733_v52, %v10783_v0  ;;  %v13697_v16 = vld [vmem:[%s14794_s24 + $0xd84] sm:$0xf]  ;;  %v6900_v48 = vadd.f32 %v6899_v41, %v6887_v39 }
 0x1ba   : > { %7138 = vmatpush.bf16.msrb.mxu0 %v10546_v53  ;;  %v10511_v9 = vld [vmem:[%s14794_s24 + $0xc90] sm:$0xf0]  ;;  %v10914_v17 = vor.u32 %v13765_v1, %v10911_v3  ;;  %v13729_v21 = vld [vmem:[%s14794_s24 + $0xe84] sm:$0xf]  ;;  %v6912_v35 = vpop.f32.mrf.mxu2 }
 0x1bb   : > { %7151 = vmatpush.bf16.msrb.mxu1 %v10674_v54  ;;  %v10639_v2 = vld [vmem:[%s14794_s24 + $0xd90] sm:$0xf0]  ;;  %v13761_v36 = vld [vmem:[%s14794_s24 + $0xf84] sm:$0xf]  ;;  %v10514_v40 = vor.u32 %v13665_v8, %v10511_v9  ;;  %v6913_v3 = vadd.f32 %v6912_v35, %v6900_v48 }
 0x1bc   : > { %7164 = vmatpush.bf16.msrb.mxu2 %v10802_v55  ;;  %v10767_v22 = vld [vmem:[%s14794_s24 + $0xe90] sm:$0xf0]  ;;  %v10642_v42 = vor.u32 %v13697_v16, %v10639_v2  ;;  %v13661_v44 = vld [vmem:[%s14794_s24 + $0xc64] sm:$0xf] }
 0x1bd   : > { %7177 = vmatpush.bf16.msrb.mxu3 %v10930_v63  ;;  %v10895_v38 = vld [vmem:[%s14794_s24 + $0xf90] sm:$0xf0]  ;;  %v10770_v10 = vor.u32 %v13729_v21, %v10767_v22  ;;  %v13693_v46 = vld [vmem:[%s14794_s24 + $0xd64] sm:$0xf] }
 0x1be   : > { %7139 = vmatpush.bf16.msrb.mxu0 %v10530_v4  ;;  %v10495_v45 = vld [vmem:[%s14794_s24 + $0xc70] sm:$0xf0]  ;;  %v10898_v47 = vor.u32 %v13761_v36, %v10895_v38  ;;  %v13725_v30 = vld [vmem:[%s14794_s24 + $0xe64] sm:$0xf]  ;;  %v6925_v4 = vpop.f32.mrf.mxu3  ;;  %v6888_v8 = vpop.f32.mrf.mxu0 }
 0x1bf   : > { %7152 = vmatpush.bf16.msrb.mxu1 %v10658_v5  ;;  %v10623_v49 = vld [vmem:[%s14794_s24 + $0xd70] sm:$0xf0]  ;;  %v13757_v50 = vld [vmem:[%s14794_s24 + $0xf64] sm:$0xf]  ;;  %v10498_v53 = vor.u32 %v13661_v44, %v10495_v45  ;;  %v6901_v16 = vpop.f32.mrf.mxu1 }
 0x1c0   : > { %7165 = vmatpush.bf16.msrb.mxu2 %v10786_v6  ;;  %v10751_v43 = vld [vmem:[%s14794_s24 + $0xe70] sm:$0xf0]  ;;  %v10626_v54 = vor.u32 %v13693_v46, %v10623_v49  ;;  %v13657_v56 = vld [vmem:[%s14794_s24 + $0xc44] sm:$0xf] }
 0x1c1   : > { %7178 = vmatpush.bf16.msrb.mxu3 %v10914_v17  ;;  %v10879_v51 = vld [vmem:[%s14794_s24 + $0xf70] sm:$0xf0]  ;;  %v10754_v55 = vor.u32 %v13725_v30, %v10751_v43  ;;  %v13689_v62 = vld [vmem:[%s14794_s24 + $0xd44] sm:$0xf]  ;;  %v15683_v17 = vadd.f32 %v6925_v4, %v6913_v3 }
 0x1c2   : > { %7140 = vmatpush.bf16.msrb.mxu0 %v10514_v40  ;;  %v10479_v61 = vld [vmem:[%s14794_s24 + $0xc50] sm:$0xf0]  ;;  %v10882_v63 = vor.u32 %v13757_v50, %v10879_v51  ;;  %v13721_v0 = vld [vmem:[%s14794_s24 + $0xe44] sm:$0xf] }
 0x1c3   : > { %7153 = vmatpush.bf16.msrb.mxu1 %v10642_v42  ;;  %v10607_v52 = vld [vmem:[%s14794_s24 + $0xd50] sm:$0xf0]  ;;  %v13753_v5 = vld [vmem:[%s14794_s24 + $0xf44] sm:$0xf]  ;;  %v10482_v9 = vor.u32 %v13657_v56, %v10479_v61 }
 0x1c4   : > { %7166 = vmatpush.bf16.msrb.mxu2 %v10770_v10  ;;  %v10735_v1 = vld [vmem:[%s14794_s24 + $0xe50] sm:$0xf0]  ;;  %v10610_v2 = vor.u32 %v13689_v62, %v10607_v52  ;;  %v13653_v22 = vld [vmem:[%s14794_s24 + $0xc24] sm:$0xf] }
 0x1c5   : > { %7179 = vmatpush.bf16.msrb.mxu3 %v10898_v47  ;;  %v10863_v6 = vld [vmem:[%s14794_s24 + $0xf50] sm:$0xf0]  ;;  %v10738_v21 = vor.u32 %v13721_v0, %v10735_v1  ;;  %v13685_v36 = vld [vmem:[%s14794_s24 + $0xd24] sm:$0xf] }
 0x1c6   : > { %7141 = vmatpush.bf16.msrb.mxu0 %v10498_v53  ;;  %v10463_v34 = vld [vmem:[%s14794_s24 + $0xc30] sm:$0xf0]  ;;  %v10866_v38 = vor.u32 %v13753_v5, %v10863_v6  ;;  %v13717_v40 = vld [vmem:[%s14794_s24 + $0xe24] sm:$0xf] }
 0x1c7   : > { %7154 = vmatpush.bf16.msrb.mxu1 %v10626_v54  ;;  %v10591_v39 = vld [vmem:[%s14794_s24 + $0xd30] sm:$0xf0]  ;;  %v13749_v42 = vld [vmem:[%s14794_s24 + $0xf24] sm:$0xf]  ;;  %v10466_v44 = vor.u32 %v13653_v22, %v10463_v34 }
 0x1c8   : > { %7167 = vmatpush.bf16.msrb.mxu2 %v10754_v55  ;;  %v10719_v41 = vld [vmem:[%s14794_s24 + $0xe30] sm:$0xf0]  ;;  %v13649_v45 = vld [vmem:[%s14794_s24 + $0xc04] sm:$0xf]  ;;  %v10594_v47 = vor.u32 %v13685_v36, %v10591_v39  ;;  %v6914_v55 = vpop.f32.mrf.mxu2 }
 0x1c9   : > { %7180 = vmatpush.bf16.msrb.mxu3 %v10882_v63  ;;  %v10847_v10 = vld [vmem:[%s14794_s24 + $0xf30] sm:$0xf0]  ;;  %v10722_v48 = vor.u32 %v13717_v40, %v10719_v41  ;;  %v13681_v49 = vld [vmem:[%s14794_s24 + $0xd04] sm:$0xf]  ;;  %v6927_v63 = vpop.f32.mrf.mxu3 }
 0x1ca   : > { %7142 = vmatpush.bf16.msrb.mxu0 %v10482_v9  ;;  %v10447_v46 = vld [vmem:[%s14794_s24 + $0xc10] sm:$0xf0]  ;;  %v13713_v43 = vld [vmem:[%s14794_s24 + $0xe04] sm:$0xf]  ;;  %v10850_v50 = vor.u32 %v13749_v42, %v10847_v10 }
 0x1cb   : > { %7155 = vmatpush.bf16.msrb.mxu1 %v10610_v2  ;;  %v10575_v30 = vld [vmem:[%s14794_s24 + $0xd10] sm:$0xf0]  ;;  %v13745_v53 = vld [vmem:[%s14794_s24 + $0xf04] sm:$0xf]  ;;  %v10450_v35 = vor.u32 %v13649_v45, %v10447_v46 }
 0x1cc   : > { %7168 = vmatpush.bf16.msrb.mxu2 %v10738_v21  ;;  %v10703_v51 = vld [vmem:[%s14794_s24 + $0xe10] sm:$0xf0]  ;;  %v13805_v56 = vld [vmem:[%s14794_s24 + $0x10e4] sm:$0xf]  ;;  %v10578_v3 = vor.u32 %v13681_v49, %v10575_v30 }
 0x1cd   : > { %7181 = vmatpush.bf16.msrb.mxu3 %v10866_v38  ;;  %v10831_v54 = vld [vmem:[%s14794_s24 + $0xf10] sm:$0xf0]  ;;  %v13837_v62 = vld [vmem:[%s14794_s24 + $0x11e4] sm:$0xf]  ;;  %v10706_v4 = vor.u32 %v13713_v43, %v10703_v51 }
 0x1ce   : > { %v11071_v61 = vld [vmem:[%s14794_s24 + $0x10f0] sm:$0xf0]  ;;  %7143 = vmatpush.bf16.msrb.mxu0 %v10466_v44  ;;  %v13869_v0 = vld [vmem:[%s14794_s24 + $0x12e4] sm:$0xf]  ;;  %v10834_v8 = vor.u32 %v13745_v53, %v10831_v54 }
 0x1cf   : > { %v11199_v52 = vld [vmem:[%s14794_s24 + $0x11f0] sm:$0xf0]  ;;  %7156 = vmatpush.bf16.msrb.mxu1 %v10594_v47  ;;  %v13901_v5 = vld [vmem:[%s14794_s24 + $0x13e4] sm:$0xf]  ;;  %v11074_v9 = vor.u32 %v13805_v56, %v11071_v61 }
 0x1d0   : > { %v11327_v1 = vld [vmem:[%s14794_s24 + $0x12f0] sm:$0xf0]  ;;  %7169 = vmatpush.bf16.msrb.mxu2 %v10722_v48  ;;  %v11202_v16 = vor.u32 %v13837_v62, %v11199_v52  ;;  %v13801_v21 = vld [vmem:[%s14794_s24 + $0x10c4] sm:$0xf] }
 0x1d1   : > { %v11455_v6 = vld [vmem:[%s14794_s24 + $0x13f0] sm:$0xf0]  ;;  %7182 = vmatpush.bf16.msrb.mxu3 %v10850_v50  ;;  %v11330_v2 = vor.u32 %v13869_v0, %v11327_v1  ;;  %v13833_v34 = vld [vmem:[%s14794_s24 + $0x11c4] sm:$0xf] }
 0x1d2   : > { %v11055_v22 = vld [vmem:[%s14794_s24 + $0x10d0] sm:$0xf0]  ;;  %7144 = vmatpush.bf16.msrb.mxu0 %v10450_v35  ;;  %v11458_v36 = vor.u32 %v13901_v5, %v11455_v6  ;;  %v13865_v39 = vld [vmem:[%s14794_s24 + $0x12c4] sm:$0xf] }
 0x1d3   : > { %v11183_v38 = vld [vmem:[%s14794_s24 + $0x11d0] sm:$0xf0]  ;;  %7157 = vmatpush.bf16.msrb.mxu1 %v10578_v3  ;;  %v13897_v41 = vld [vmem:[%s14794_s24 + $0x13c4] sm:$0xf]  ;;  %v11058_v10 = vor.u32 %v13801_v21, %v11055_v22  ;;  %v6938_v3 = vpop.f32.mrf.mxu0 }
 0x1d4   : > { %v11311_v40 = vld [vmem:[%s14794_s24 + $0x12d0] sm:$0xf0]  ;;  %7170 = vmatpush.bf16.msrb.mxu2 %v10706_v4  ;;  %v11186_v44 = vor.u32 %v13833_v34, %v11183_v38  ;;  %v13797_v46 = vld [vmem:[%s14794_s24 + $0x10a4] sm:$0xf]  ;;  %v6939_v6 = vadd.f32 %v6938_v3, %v15683_v17 }
 0x1d5   : > { %v11439_v42 = vld [vmem:[%s14794_s24 + $0x13d0] sm:$0xf0]  ;;  %7183 = vmatpush.bf16.msrb.mxu3 %v10834_v8  ;;  %v11314_v45 = vor.u32 %v13865_v39, %v11311_v40  ;;  %v13829_v48 = vld [vmem:[%s14794_s24 + $0x11a4] sm:$0xf]  ;;  %7145 = vmatmul.bf16.vlgmr.msrb.gmra.mxu0 %v15123_v57 }
 0x1d6   : > { %7189 = vmatpush.bf16.msra.mxu0 %v11074_v9  ;;  %v11039_v47 = vld [vmem:[%s14794_s24 + $0x10b0] sm:$0xf0]  ;;  %v11442_v49 = vor.u32 %v13897_v41, %v11439_v42  ;;  %v13861_v43 = vld [vmem:[%s14794_s24 + $0x12a4] sm:$0xf]  ;;  %7158 = vmatmul.bf16.vlgmr.msrb.gmra.mxu1 %v15127_v59  ;;  %v6951_v9 = vpop.f32.mrf.mxu1 }
 0x1d7   : > { %7202 = vmatpush.bf16.msra.mxu1 %v11202_v16  ;;  %v11167_v30 = vld [vmem:[%s14794_s24 + $0x11b0] sm:$0xf0]  ;;  %7171 = vmatmul.bf16.vlgmr.msrb.gmra.mxu2 %v15125_v58  ;;  %v13893_v51 = vld [vmem:[%s14794_s24 + $0x13a4] sm:$0xf]  ;;  %v11042_v54 = vor.u32 %v13797_v46, %v11039_v47  ;;  %v6952_v38 = vadd.f32 %v6951_v9, %v6939_v6 }
 0x1d8   : > { %7215 = vmatpush.bf16.msra.mxu2 %v11330_v2  ;;  %v11295_v50 = vld [vmem:[%s14794_s24 + $0x12b0] sm:$0xf0]  ;;  %7184 = vmatmul.bf16.vlgmr.msrb.gmra.mxu3 %v15129_v60  ;;  %v11170_v55 = vor.u32 %v13829_v48, %v11167_v30  ;;  %v13793_v61 = vld [vmem:[%s14794_s24 + $0x1084] sm:$0xf] }
 0x1d9   : > { %7228 = vmatpush.bf16.msra.mxu3 %v11458_v36  ;;  %v11423_v53 = vld [vmem:[%s14794_s24 + $0x13b0] sm:$0xf0]  ;;  %v11298_v56 = vor.u32 %v13861_v43, %v11295_v50  ;;  %v13825_v63 = vld [vmem:[%s14794_s24 + $0x1184] sm:$0xf] }
 0x1da   : > { %7190 = vmatpush.bf16.msra.mxu0 %v11058_v10  ;;  %v11023_v62 = vld [vmem:[%s14794_s24 + $0x1090] sm:$0xf0]  ;;  %v11426_v35 = vor.u32 %v13893_v51, %v11423_v53  ;;  %v13857_v0 = vld [vmem:[%s14794_s24 + $0x1284] sm:$0xf]  ;;  %v6964_v30 = vpop.f32.mrf.mxu2 }
 0x1db   : > { %7203 = vmatpush.bf16.msra.mxu1 %v11186_v44  ;;  %v11151_v52 = vld [vmem:[%s14794_s24 + $0x1190] sm:$0xf0]  ;;  %v13889_v4 = vld [vmem:[%s14794_s24 + $0x1384] sm:$0xf]  ;;  %v11026_v8 = vor.u32 %v13793_v61, %v11023_v62  ;;  %v6965_v53 = vadd.f32 %v6964_v30, %v6952_v38  ;;  %v6940_v61 = vpop.f32.mrf.mxu0 }
 0x1dc   : > { %7216 = vmatpush.bf16.msra.mxu2 %v11314_v45  ;;  %v11279_v1 = vld [vmem:[%s14794_s24 + $0x1290] sm:$0xf0]  ;;  %v11154_v16 = vor.u32 %v13825_v63, %v11151_v52  ;;  %v13789_v21 = vld [vmem:[%s14794_s24 + $0x1064] sm:$0xf] }
 0x1dd   : > { %7229 = vmatpush.bf16.msra.mxu3 %v11442_v49  ;;  %v11407_v5 = vld [vmem:[%s14794_s24 + $0x1390] sm:$0xf0]  ;;  %v11282_v2 = vor.u32 %v13857_v0, %v11279_v1  ;;  %v13821_v34 = vld [vmem:[%s14794_s24 + $0x1164] sm:$0xf] }
 0x1de   : > { %7191 = vmatpush.bf16.msra.mxu0 %v11042_v54  ;;  %v11007_v22 = vld [vmem:[%s14794_s24 + $0x1070] sm:$0xf0]  ;;  %v11410_v36 = vor.u32 %v13889_v4, %v11407_v5  ;;  %v13853_v40 = vld [vmem:[%s14794_s24 + $0x1264] sm:$0xf]  ;;  %v6977_v54 = vpop.f32.mrf.mxu3  ;;  %v6953_v63 = vpop.f32.mrf.mxu1 }
 0x1df   : > { %7204 = vmatpush.bf16.msra.mxu1 %v11170_v55  ;;  %v11135_v39 = vld [vmem:[%s14794_s24 + $0x1170] sm:$0xf0]  ;;  %v13885_v41 = vld [vmem:[%s14794_s24 + $0x1364] sm:$0xf]  ;;  %v11010_v10 = vor.u32 %v13789_v21, %v11007_v22 }
 0x1e0   : > { %7217 = vmatpush.bf16.msra.mxu2 %v11298_v56  ;;  %v11263_v17 = vld [vmem:[%s14794_s24 + $0x1270] sm:$0xf0]  ;;  %v11138_v44 = vor.u32 %v13821_v34, %v11135_v39  ;;  %v13785_v46 = vld [vmem:[%s14794_s24 + $0x1044] sm:$0xf] }
 0x1e1   : > { %7230 = vmatpush.bf16.msra.mxu3 %v11426_v35  ;;  %v11391_v42 = vld [vmem:[%s14794_s24 + $0x1370] sm:$0xf0]  ;;  %v11266_v45 = vor.u32 %v13853_v40, %v11263_v17  ;;  %v13817_v48 = vld [vmem:[%s14794_s24 + $0x1144] sm:$0xf]  ;;  %v15754_v35 = vadd.f32 %v6977_v54, %v6965_v53 }
 0x1e2   : > { %7192 = vmatpush.bf16.msra.mxu0 %v11026_v8  ;;  %v10991_v47 = vld [vmem:[%s14794_s24 + $0x1050] sm:$0xf0]  ;;  %v11394_v49 = vor.u32 %v13885_v41, %v11391_v42  ;;  %v13849_v50 = vld [vmem:[%s14794_s24 + $0x1244] sm:$0xf] }
 0x1e3   : > { %7205 = vmatpush.bf16.msra.mxu1 %v11154_v16  ;;  %v11119_v43 = vld [vmem:[%s14794_s24 + $0x1150] sm:$0xf0]  ;;  %v13881_v55 = vld [vmem:[%s14794_s24 + $0x1344] sm:$0xf]  ;;  %v10994_v62 = vor.u32 %v13785_v46, %v10991_v47 }
 0x1e4   : > { %7218 = vmatpush.bf16.msra.mxu2 %v11282_v2  ;;  %v11247_v51 = vld [vmem:[%s14794_s24 + $0x1250] sm:$0xf0]  ;;  %v11122_v52 = vor.u32 %v13817_v48, %v11119_v43  ;;  %v13781_v1 = vld [vmem:[%s14794_s24 + $0x1024] sm:$0xf] }
 0x1e5   : > { %7231 = vmatpush.bf16.msra.mxu3 %v11410_v36  ;;  %v11375_v56 = vld [vmem:[%s14794_s24 + $0x1350] sm:$0xf0]  ;;  %v11250_v0 = vor.u32 %v13849_v50, %v11247_v51  ;;  %v13813_v4 = vld [vmem:[%s14794_s24 + $0x1124] sm:$0xf] }
 0x1e6   : > { %7193 = vmatpush.bf16.msra.mxu0 %v11010_v10  ;;  %v10975_v3 = vld [vmem:[%s14794_s24 + $0x1030] sm:$0xf0]  ;;  %v11378_v5 = vor.u32 %v13881_v55, %v11375_v56  ;;  %v13845_v8 = vld [vmem:[%s14794_s24 + $0x1224] sm:$0xf] }
 0x1e7   : > { %7206 = vmatpush.bf16.msra.mxu1 %v11138_v44  ;;  %v11103_v6 = vld [vmem:[%s14794_s24 + $0x1130] sm:$0xf0]  ;;  %v13877_v16 = vld [vmem:[%s14794_s24 + $0x1324] sm:$0xf]  ;;  %v10978_v21 = vor.u32 %v13781_v1, %v10975_v3 }
 0x1e8   : > { %7219 = vmatpush.bf16.msra.mxu2 %v11266_v45  ;;  %v11231_v9 = vld [vmem:[%s14794_s24 + $0x1230] sm:$0xf0]  ;;  %v13777_v22 = vld [vmem:[%s14794_s24 + $0x1004] sm:$0xf]  ;;  %v11106_v36 = vor.u32 %v13813_v4, %v11103_v6  ;;  %v6966_v45 = vpop.f32.mrf.mxu2 }
 0x1e9   : > { %7232 = vmatpush.bf16.msra.mxu3 %v11394_v49  ;;  %v11359_v2 = vld [vmem:[%s14794_s24 + $0x1330] sm:$0xf0]  ;;  %v11234_v38 = vor.u32 %v13845_v8, %v11231_v9  ;;  %v13809_v39 = vld [vmem:[%s14794_s24 + $0x1104] sm:$0xf]  ;;  %v6979_v49 = vpop.f32.mrf.mxu3 }
 0x1ea   : > { %7194 = vmatpush.bf16.msra.mxu0 %v10994_v62  ;;  %v10959_v34 = vld [vmem:[%s14794_s24 + $0x1010] sm:$0xf0]  ;;  %v13841_v17 = vld [vmem:[%s14794_s24 + $0x1204] sm:$0xf]  ;;  %v11362_v41 = vor.u32 %v13877_v16, %v11359_v2 }
 0x1eb   : > { %7207 = vmatpush.bf16.msra.mxu1 %v11122_v52  ;;  %v11087_v40 = vld [vmem:[%s14794_s24 + $0x1110] sm:$0xf0]  ;;  %v13873_v10 = vld [vmem:[%s14794_s24 + $0x1304] sm:$0xf]  ;;  %v10962_v30 = vor.u32 %v13777_v22, %v10959_v34 }
 0x1ec   : > { %7220 = vmatpush.bf16.msra.mxu2 %v11250_v0  ;;  %v11215_v42 = vld [vmem:[%s14794_s24 + $0x1210] sm:$0xf0]  ;;  %v13933_v46 = vld [vmem:[%s14794_s24 + $0x14e4] sm:$0xf]  ;;  %v11090_v53 = vor.u32 %v13809_v39, %v11087_v40 }
 0x1ed   : > { %7233 = vmatpush.bf16.msra.mxu3 %v11378_v5  ;;  %v11343_v44 = vld [vmem:[%s14794_s24 + $0x1310] sm:$0xf0]  ;;  %v13965_v48 = vld [vmem:[%s14794_s24 + $0x15e4] sm:$0xf]  ;;  %v11218_v54 = vor.u32 %v13841_v17, %v11215_v42 }
 0x1ee   : > { %v11583_v47 = vld [vmem:[%s14794_s24 + $0x14f0] sm:$0xf0]  ;;  %7195 = vmatpush.bf16.msra.mxu0 %v10978_v21  ;;  %v13997_v50 = vld [vmem:[%s14794_s24 + $0x16e4] sm:$0xf]  ;;  %v11346_v61 = vor.u32 %v13873_v10, %v11343_v44 }
 0x1ef   : > { %v11711_v43 = vld [vmem:[%s14794_s24 + $0x15f0] sm:$0xf0]  ;;  %7208 = vmatpush.bf16.msra.mxu1 %v11106_v36  ;;  %v14029_v55 = vld [vmem:[%s14794_s24 + $0x17e4] sm:$0xf]  ;;  %v11586_v62 = vor.u32 %v13933_v46, %v11583_v47 }
 0x1f0   : > { %v11839_v51 = vld [vmem:[%s14794_s24 + $0x16f0] sm:$0xf0]  ;;  %7221 = vmatpush.bf16.msra.mxu2 %v11234_v38  ;;  %v11714_v63 = vor.u32 %v13965_v48, %v11711_v43  ;;  %v13929_v0 = vld [vmem:[%s14794_s24 + $0x14c4] sm:$0xf] }
 0x1f1   : > { %v11967_v56 = vld [vmem:[%s14794_s24 + $0x17f0] sm:$0xf0]  ;;  %7234 = vmatpush.bf16.msra.mxu3 %v11362_v41  ;;  %v11842_v52 = vor.u32 %v13997_v50, %v11839_v51  ;;  %v13961_v3 = vld [vmem:[%s14794_s24 + $0x15c4] sm:$0xf] }
 0x1f2   : > { %v11567_v1 = vld [vmem:[%s14794_s24 + $0x14d0] sm:$0xf0]  ;;  %7196 = vmatpush.bf16.msra.mxu0 %v10962_v30  ;;  %v11970_v4 = vor.u32 %v14029_v55, %v11967_v56  ;;  %v13993_v6 = vld [vmem:[%s14794_s24 + $0x16c4] sm:$0xf]  ;;  %v6990_v56 = vpop.f32.mrf.mxu0 }
 0x1f3   : > { %v11695_v5 = vld [vmem:[%s14794_s24 + $0x15d0] sm:$0xf0]  ;;  %7209 = vmatpush.bf16.msra.mxu1 %v11090_v53  ;;  %v14025_v9 = vld [vmem:[%s14794_s24 + $0x17c4] sm:$0xf]  ;;  %v11570_v2 = vor.u32 %v13929_v0, %v11567_v1  ;;  %v7003_v1 = vpop.f32.mrf.mxu1 }
 0x1f4   : > { %v11823_v8 = vld [vmem:[%s14794_s24 + $0x16d0] sm:$0xf0]  ;;  %7222 = vmatpush.bf16.msra.mxu2 %v11218_v54  ;;  %v11698_v21 = vor.u32 %v13961_v3, %v11695_v5  ;;  %v13925_v34 = vld [vmem:[%s14794_s24 + $0x14a4] sm:$0xf] }
 0x1f5   : > { %v11951_v16 = vld [vmem:[%s14794_s24 + $0x17d0] sm:$0xf0]  ;;  %7235 = vmatpush.bf16.msra.mxu3 %v11346_v61  ;;  %v11826_v22 = vor.u32 %v13993_v6, %v11823_v8  ;;  %v13957_v38 = vld [vmem:[%s14794_s24 + $0x15a4] sm:$0xf]  ;;  %7197 = vmatmul.bf16.vlgmr.msra.gmra.mxu0 %v15210_v20  ;;  %v7004_v8 = vadd.f32 %v7003_v1, %v6990_v56 }
 0x1f6   : > { %7241 = vmatpush.bf16.msrb.mxu0 %v11586_v62  ;;  %v11551_v36 = vld [vmem:[%s14794_s24 + $0x14b0] sm:$0xf0]  ;;  %v11954_v39 = vor.u32 %v14025_v9, %v11951_v16  ;;  %v13989_v17 = vld [vmem:[%s14794_s24 + $0x16a4] sm:$0xf]  ;;  %7210 = vmatmul.bf16.vlgmr.msra.gmra.mxu1 %v15216_v25 }
 0x1f7   : > { %7254 = vmatpush.bf16.msrb.mxu1 %v11714_v63  ;;  %v11679_v40 = vld [vmem:[%s14794_s24 + $0x15b0] sm:$0xf0]  ;;  %7223 = vmatmul.bf16.vlgmr.msra.gmra.mxu2 %v15214_v24  ;;  %v14021_v42 = vld [vmem:[%s14794_s24 + $0x17a4] sm:$0xf]  ;;  %v11554_v44 = vor.u32 %v13925_v34, %v11551_v36 }
 0x1f8   : > { %7267 = vmatpush.bf16.msrb.mxu2 %v11842_v52  ;;  %v11807_v41 = vld [vmem:[%s14794_s24 + $0x16b0] sm:$0xf0]  ;;  %7236 = vmatmul.bf16.vlgmr.msra.gmra.mxu3 %v15218_v29  ;;  %v11682_v45 = vor.u32 %v13957_v38, %v11679_v40  ;;  %v13921_v47 = vld [vmem:[%s14794_s24 + $0x1484] sm:$0xf] }
 0x1f9   : > { %7280 = vmatpush.bf16.msrb.mxu3 %v11970_v4  ;;  %v11935_v10 = vld [vmem:[%s14794_s24 + $0x17b0] sm:$0xf0]  ;;  %v11810_v46 = vor.u32 %v13989_v17, %v11807_v41  ;;  %v13953_v49 = vld [vmem:[%s14794_s24 + $0x1584] sm:$0xf] }
 0x1fa   : > { %7242 = vmatpush.bf16.msrb.mxu0 %v11570_v2  ;;  %v11535_v48 = vld [vmem:[%s14794_s24 + $0x1490] sm:$0xf0]  ;;  %v11938_v30 = vor.u32 %v14021_v42, %v11935_v10  ;;  %v13985_v50 = vld [vmem:[%s14794_s24 + $0x1684] sm:$0xf] }
 0x1fb   : > { %7255 = vmatpush.bf16.msrb.mxu1 %v11698_v21  ;;  %v11663_v43 = vld [vmem:[%s14794_s24 + $0x1590] sm:$0xf0]  ;;  %v14017_v53 = vld [vmem:[%s14794_s24 + $0x1784] sm:$0xf]  ;;  %v11538_v55 = vor.u32 %v13921_v47, %v11535_v48 }
 0x1fc   : > { %7268 = vmatpush.bf16.msrb.mxu2 %v11826_v22  ;;  %v11791_v51 = vld [vmem:[%s14794_s24 + $0x1690] sm:$0xf0]  ;;  %v11666_v61 = vor.u32 %v13953_v49, %v11663_v43  ;;  %v13917_v63 = vld [vmem:[%s14794_s24 + $0x1464] sm:$0xf]  ;;  %v6992_v49 = vpop.f32.mrf.mxu0 }
 0x1fd   : > { %7281 = vmatpush.bf16.msrb.mxu3 %v11954_v39  ;;  %v11919_v54 = vld [vmem:[%s14794_s24 + $0x1790] sm:$0xf0]  ;;  %v11794_v62 = vor.u32 %v13985_v50, %v11791_v51  ;;  %v13949_v0 = vld [vmem:[%s14794_s24 + $0x1564] sm:$0xf]  ;;  %v7016_v39 = vpop.f32.mrf.mxu2 }
 0x1fe   : > { %7243 = vmatpush.bf16.msrb.mxu0 %v11554_v44  ;;  %v11519_v52 = vld [vmem:[%s14794_s24 + $0x1470] sm:$0xf0]  ;;  %v11922_v3 = vor.u32 %v14017_v53, %v11919_v54  ;;  %v13981_v5 = vld [vmem:[%s14794_s24 + $0x1664] sm:$0xf]  ;;  %v7017_v10 = vadd.f32 %v7016_v39, %v7004_v8  ;;  %v7029_v44 = vpop.f32.mrf.mxu3  ;;  %v7005_v54 = vpop.f32.mrf.mxu1 }
 0x1ff   : > { %7256 = vmatpush.bf16.msrb.mxu1 %v11682_v45  ;;  %v11647_v4 = vld [vmem:[%s14794_s24 + $0x1570] sm:$0xf0]  ;;  %v14013_v9 = vld [vmem:[%s14794_s24 + $0x1764] sm:$0xf]  ;;  %v11522_v2 = vor.u32 %v13917_v63, %v11519_v52 }
 0x200   : > { %7269 = vmatpush.bf16.msrb.mxu2 %v11810_v46  ;;  %v11775_v6 = vld [vmem:[%s14794_s24 + $0x1670] sm:$0xf0]  ;;  %v11650_v21 = vor.u32 %v13949_v0, %v11647_v4  ;;  %v13913_v34 = vld [vmem:[%s14794_s24 + $0x1444] sm:$0xf]  ;;  %v15824_v48 = vadd.f32 %v7029_v44, %v7017_v10 }
 0x201   : > { %7282 = vmatpush.bf16.msrb.mxu3 %v11938_v30  ;;  %v11903_v16 = vld [vmem:[%s14794_s24 + $0x1770] sm:$0xf0]  ;;  %v11778_v22 = vor.u32 %v13981_v5, %v11775_v6  ;;  %v13945_v38 = vld [vmem:[%s14794_s24 + $0x1544] sm:$0xf] }
 0x202   : > { %7244 = vmatpush.bf16.msrb.mxu0 %v11538_v55  ;;  %v11503_v36 = vld [vmem:[%s14794_s24 + $0x1450] sm:$0xf0]  ;;  %v11906_v40 = vor.u32 %v14013_v9, %v11903_v16  ;;  %v13977_v41 = vld [vmem:[%s14794_s24 + $0x1644] sm:$0xf] }
 0x203   : > { %7257 = vmatpush.bf16.msrb.mxu1 %v11666_v61  ;;  %v11631_v17 = vld [vmem:[%s14794_s24 + $0x1550] sm:$0xf0]  ;;  %v14009_v45 = vld [vmem:[%s14794_s24 + $0x1744] sm:$0xf]  ;;  %v11506_v47 = vor.u32 %v13913_v34, %v11503_v36 }
 0x204   : > { %7270 = vmatpush.bf16.msrb.mxu2 %v11794_v62  ;;  %v11759_v42 = vld [vmem:[%s14794_s24 + $0x1650] sm:$0xf0]  ;;  %v11634_v30 = vor.u32 %v13945_v38, %v11631_v17  ;;  %v13909_v50 = vld [vmem:[%s14794_s24 + $0x1424] sm:$0xf] }
 0x205   : > { %7283 = vmatpush.bf16.msrb.mxu3 %v11922_v3  ;;  %v11887_v46 = vld [vmem:[%s14794_s24 + $0x1750] sm:$0xf0]  ;;  %v11762_v43 = vor.u32 %v13977_v41, %v11759_v42  ;;  %v13941_v53 = vld [vmem:[%s14794_s24 + $0x1524] sm:$0xf]  ;;  %v7018_v16 = vpop.f32.mrf.mxu2 }
 0x206   : > { %7245 = vmatpush.bf16.msrb.mxu0 %v11522_v2  ;;  %v11487_v51 = vld [vmem:[%s14794_s24 + $0x1430] sm:$0xf0]  ;;  %v11890_v55 = vor.u32 %v14009_v45, %v11887_v46  ;;  %v13973_v61 = vld [vmem:[%s14794_s24 + $0x1624] sm:$0xf]  ;;  %v7031_v36 = vpop.f32.mrf.mxu3 }
 0x207   : > { %7258 = vmatpush.bf16.msrb.mxu1 %v11650_v21  ;;  %v11615_v56 = vld [vmem:[%s14794_s24 + $0x1530] sm:$0xf0]  ;;  %v14005_v63 = vld [vmem:[%s14794_s24 + $0x1724] sm:$0xf]  ;;  %v11490_v0 = vor.u32 %v13909_v50, %v11487_v51 }
 0x208   : > { %7271 = vmatpush.bf16.msrb.mxu2 %v11778_v22  ;;  %v11743_v62 = vld [vmem:[%s14794_s24 + $0x1630] sm:$0xf0]  ;;  %v13905_v1 = vld [vmem:[%s14794_s24 + $0x1404] sm:$0xf]  ;;  %v11618_v4 = vor.u32 %v13941_v53, %v11615_v56 }
 0x209   : > { %7284 = vmatpush.bf16.msrb.mxu3 %v11906_v40  ;;  %v11871_v52 = vld [vmem:[%s14794_s24 + $0x1730] sm:$0xf0]  ;;  %v11746_v5 = vor.u32 %v13973_v61, %v11743_v62  ;;  %v13937_v6 = vld [vmem:[%s14794_s24 + $0x1504] sm:$0xf] }
 0x20a   : > { %7246 = vmatpush.bf16.msrb.mxu0 %v11506_v47  ;;  %v11471_v3 = vld [vmem:[%s14794_s24 + $0x1410] sm:$0xf0]  ;;  %v13969_v9 = vld [vmem:[%s14794_s24 + $0x1604] sm:$0xf]  ;;  %v11874_v2 = vor.u32 %v14005_v63, %v11871_v52 }
 0x20b   : > { %7259 = vmatpush.bf16.msrb.mxu1 %v11634_v30  ;;  %v11599_v8 = vld [vmem:[%s14794_s24 + $0x1510] sm:$0xf0]  ;;  %v14001_v22 = vld [vmem:[%s14794_s24 + $0x1704] sm:$0xf]  ;;  %v11474_v17 = vor.u32 %v13905_v1, %v11471_v3 }
 0x20c   : > { %7272 = vmatpush.bf16.msrb.mxu2 %v11762_v43  ;;  %v11727_v21 = vld [vmem:[%s14794_s24 + $0x1610] sm:$0xf0]  ;;  %v14061_v38 = vld [vmem:[%s14794_s24 + $0x18e4] sm:$0xf]  ;;  %v11602_v44 = vor.u32 %v13937_v6, %v11599_v8 }
 0x20d   : > { %7285 = vmatpush.bf16.msrb.mxu3 %v11890_v55  ;;  %v11855_v34 = vld [vmem:[%s14794_s24 + $0x1710] sm:$0xf0]  ;;  %v14093_v40 = vld [vmem:[%s14794_s24 + $0x19e4] sm:$0xf]  ;;  %v11730_v45 = vor.u32 %v13969_v9, %v11727_v21 }
 0x20e   : > { %v12095_v39 = vld [vmem:[%s14794_s24 + $0x18f0] sm:$0xf0]  ;;  %7247 = vmatpush.bf16.msrb.mxu0 %v11490_v0  ;;  %v14125_v42 = vld [vmem:[%s14794_s24 + $0x1ae4] sm:$0xf]  ;;  %v11858_v49 = vor.u32 %v14001_v22, %v11855_v34 }
 0x20f   : > { %v12223_v41 = vld [vmem:[%s14794_s24 + $0x19f0] sm:$0xf0]  ;;  %7260 = vmatpush.bf16.msrb.mxu1 %v11618_v4  ;;  %v14157_v46 = vld [vmem:[%s14794_s24 + $0x1be4] sm:$0xf]  ;;  %v12098_v30 = vor.u32 %v14061_v38, %v12095_v39 }
 0x210   : > { %v12351_v10 = vld [vmem:[%s14794_s24 + $0x1af0] sm:$0xf0]  ;;  %7273 = vmatpush.bf16.msrb.mxu2 %v11746_v5  ;;  %v12226_v43 = vor.u32 %v14093_v40, %v12223_v41  ;;  %v14057_v51 = vld [vmem:[%s14794_s24 + $0x18c4] sm:$0xf] }
 0x211   : > { %v12479_v47 = vld [vmem:[%s14794_s24 + $0x1bf0] sm:$0xf0]  ;;  %7286 = vmatpush.bf16.msrb.mxu3 %v11874_v2  ;;  %v12354_v50 = vor.u32 %v14125_v42, %v12351_v10  ;;  %v14089_v54 = vld [vmem:[%s14794_s24 + $0x19c4] sm:$0xf] }
 0x212   : > { %v12079_v53 = vld [vmem:[%s14794_s24 + $0x18d0] sm:$0xf0]  ;;  %7248 = vmatpush.bf16.msrb.mxu0 %v11474_v17  ;;  %v12482_v55 = vor.u32 %v14157_v46, %v12479_v47  ;;  %v14121_v61 = vld [vmem:[%s14794_s24 + $0x1ac4] sm:$0xf] }
 0x213   : > { %v12207_v56 = vld [vmem:[%s14794_s24 + $0x19d0] sm:$0xf0]  ;;  %7261 = vmatpush.bf16.msrb.mxu1 %v11602_v44  ;;  %v14153_v63 = vld [vmem:[%s14794_s24 + $0x1bc4] sm:$0xf]  ;;  %v12082_v0 = vor.u32 %v14057_v51, %v12079_v53 }
 0x214   : > { %v12335_v62 = vld [vmem:[%s14794_s24 + $0x1ad0] sm:$0xf0]  ;;  %7274 = vmatpush.bf16.msrb.mxu2 %v11730_v45  ;;  %v12210_v1 = vor.u32 %v14089_v54, %v12207_v56  ;;  %v14053_v4 = vld [vmem:[%s14794_s24 + $0x18a4] sm:$0xf] }
 0x215   : > { %v12463_v52 = vld [vmem:[%s14794_s24 + $0x1bd0] sm:$0xf0]  ;;  %7287 = vmatpush.bf16.msrb.mxu3 %v11858_v49  ;;  %v12338_v3 = vor.u32 %v14121_v61, %v12335_v62  ;;  %v14085_v6 = vld [vmem:[%s14794_s24 + $0x19a4] sm:$0xf]  ;;  %7249 = vmatmul.bf16.vlgmr.msrb.gmra.mxu0 %v15276_v14  ;;  %v7042_v49 = vpop.f32.mrf.mxu0 }
 0x216   : > { %7293 = vmatpush.bf16.msra.mxu0 %v12098_v30  ;;  %v12063_v5 = vld [vmem:[%s14794_s24 + $0x18b0] sm:$0xf0]  ;;  %v12466_v8 = vor.u32 %v14153_v63, %v12463_v52  ;;  %v14117_v16 = vld [vmem:[%s14794_s24 + $0x1aa4] sm:$0xf]  ;;  %7262 = vmatmul.bf16.vlgmr.msrb.gmra.mxu1 %v15280_v18  ;;  %v7043_v54 = vadd.f32 %v7042_v49, %v15824_v48 }
 0x217   : > { %7306 = vmatpush.bf16.msra.mxu1 %v12226_v43  ;;  %v12191_v9 = vld [vmem:[%s14794_s24 + $0x19b0] sm:$0xf0]  ;;  %7275 = vmatmul.bf16.vlgmr.msrb.gmra.mxu2 %v15278_v15  ;;  %v14149_v21 = vld [vmem:[%s14794_s24 + $0x1ba4] sm:$0xf]  ;;  %v12066_v34 = vor.u32 %v14053_v4, %v12063_v5 }
 0x218   : > { %7319 = vmatpush.bf16.msra.mxu2 %v12354_v50  ;;  %v12319_v2 = vld [vmem:[%s14794_s24 + $0x1ab0] sm:$0xf0]  ;;  %7288 = vmatmul.bf16.vlgmr.msrb.gmra.mxu3 %v15282_v19  ;;  %v12194_v36 = vor.u32 %v14085_v6, %v12191_v9  ;;  %v14049_v39 = vld [vmem:[%s14794_s24 + $0x1884] sm:$0xf] }
 0x219   : > { %7332 = vmatpush.bf16.msra.mxu3 %v12482_v55  ;;  %v12447_v22 = vld [vmem:[%s14794_s24 + $0x1bb0] sm:$0xf0]  ;;  %v12322_v38 = vor.u32 %v14117_v16, %v12319_v2  ;;  %v14081_v17 = vld [vmem:[%s14794_s24 + $0x1984] sm:$0xf]  ;;  %v7055_v55 = vpop.f32.mrf.mxu1 }
 0x21a   : > { %7294 = vmatpush.bf16.msra.mxu0 %v12082_v0  ;;  %v12047_v40 = vld [vmem:[%s14794_s24 + $0x1890] sm:$0xf0]  ;;  %v12450_v41 = vor.u32 %v14149_v21, %v12447_v22  ;;  %v14113_v10 = vld [vmem:[%s14794_s24 + $0x1a84] sm:$0xf]  ;;  %v7068_v9 = vpop.f32.mrf.mxu2 }
 0x21b   : > { %7307 = vmatpush.bf16.msra.mxu1 %v12210_v1  ;;  %v12175_v42 = vld [vmem:[%s14794_s24 + $0x1990] sm:$0xf0]  ;;  %v14145_v45 = vld [vmem:[%s14794_s24 + $0x1b84] sm:$0xf]  ;;  %v12050_v47 = vor.u32 %v14049_v39, %v12047_v40  ;;  %v7056_v1 = vadd.f32 %v7055_v55, %v7043_v54 }
 0x21c   : > { %7320 = vmatpush.bf16.msra.mxu2 %v12338_v3  ;;  %v12303_v44 = vld [vmem:[%s14794_s24 + $0x1a90] sm:$0xf0]  ;;  %v12178_v30 = vor.u32 %v14081_v17, %v12175_v42  ;;  %v14045_v50 = vld [vmem:[%s14794_s24 + $0x1864] sm:$0xf] }
 0x21d   : > { %7333 = vmatpush.bf16.msra.mxu3 %v12466_v8  ;;  %v12431_v46 = vld [vmem:[%s14794_s24 + $0x1b90] sm:$0xf0]  ;;  %v12306_v43 = vor.u32 %v14113_v10, %v12303_v44  ;;  %v14077_v53 = vld [vmem:[%s14794_s24 + $0x1964] sm:$0xf] }
 0x21e   : > { %7295 = vmatpush.bf16.msra.mxu0 %v12066_v34  ;;  %v12031_v51 = vld [vmem:[%s14794_s24 + $0x1870] sm:$0xf0]  ;;  %v12434_v56 = vor.u32 %v14145_v45, %v12431_v46  ;;  %v14109_v62 = vld [vmem:[%s14794_s24 + $0x1a64] sm:$0xf]  ;;  %v7069_v34 = vadd.f32 %v7068_v9, %v7056_v1 }
 0x21f   : > { %7308 = vmatpush.bf16.msra.mxu1 %v12194_v36  ;;  %v12159_v61 = vld [vmem:[%s14794_s24 + $0x1970] sm:$0xf0]  ;;  %v14141_v52 = vld [vmem:[%s14794_s24 + $0x1b64] sm:$0xf]  ;;  %v12034_v3 = vor.u32 %v14045_v50, %v12031_v51  ;;  %v7081_v36 = vpop.f32.mrf.mxu3 }
 0x220   : > { %7321 = vmatpush.bf16.msra.mxu2 %v12322_v38  ;;  %v12287_v63 = vld [vmem:[%s14794_s24 + $0x1a70] sm:$0xf0]  ;;  %v12162_v48 = vor.u32 %v14077_v53, %v12159_v61  ;;  %v14041_v5 = vld [vmem:[%s14794_s24 + $0x1844] sm:$0xf]  ;;  %v15895_v17 = vadd.f32 %v7081_v36, %v7069_v34 }
 0x221   : > { %7334 = vmatpush.bf16.msra.mxu3 %v12450_v41  ;;  %v12415_v0 = vld [vmem:[%s14794_s24 + $0x1b70] sm:$0xf0]  ;;  %v12290_v4 = vor.u32 %v14109_v62, %v12287_v63  ;;  %v14073_v8 = vld [vmem:[%s14794_s24 + $0x1944] sm:$0xf]  ;;  %v7044_v41 = vpop.f32.mrf.mxu0 }
 0x222   : > { %7296 = vmatpush.bf16.msra.mxu0 %v12050_v47  ;;  %v12015_v6 = vld [vmem:[%s14794_s24 + $0x1850] sm:$0xf0]  ;;  %v12418_v16 = vor.u32 %v14141_v52, %v12415_v0  ;;  %v14105_v21 = vld [vmem:[%s14794_s24 + $0x1a44] sm:$0xf]  ;;  %v7057_v47 = vpop.f32.mrf.mxu1  ;;  %v7070_v1 = vpop.f32.mrf.mxu2 }
 0x223   : > { %7309 = vmatpush.bf16.msra.mxu1 %v12178_v30  ;;  %v12143_v2 = vld [vmem:[%s14794_s24 + $0x1950] sm:$0xf0]  ;;  %v14137_v38 = vld [vmem:[%s14794_s24 + $0x1b44] sm:$0xf]  ;;  %v12018_v40 = vor.u32 %v14041_v5, %v12015_v6 }
 0x224   : > { %7322 = vmatpush.bf16.msra.mxu2 %v12306_v43  ;;  %v12271_v22 = vld [vmem:[%s14794_s24 + $0x1a50] sm:$0xf0]  ;;  %v12146_v42 = vor.u32 %v14073_v8, %v12143_v2  ;;  %v14037_v44 = vld [vmem:[%s14794_s24 + $0x1824] sm:$0xf] }
 0x225   : > { %7335 = vmatpush.bf16.msra.mxu3 %v12434_v56  ;;  %v12399_v39 = vld [vmem:[%s14794_s24 + $0x1b50] sm:$0xf0]  ;;  %v12274_v10 = vor.u32 %v14105_v21, %v12271_v22  ;;  %v14069_v46 = vld [vmem:[%s14794_s24 + $0x1924] sm:$0xf] }
 0x226   : > { %7297 = vmatpush.bf16.msra.mxu0 %v12034_v3  ;;  %v11999_v45 = vld [vmem:[%s14794_s24 + $0x1830] sm:$0xf0]  ;;  %v12402_v49 = vor.u32 %v14137_v38, %v12399_v39  ;;  %v14101_v43 = vld [vmem:[%s14794_s24 + $0x1a24] sm:$0xf] }
 0x227   : > { %7310 = vmatpush.bf16.msra.mxu1 %v12162_v48  ;;  %v12127_v30 = vld [vmem:[%s14794_s24 + $0x1930] sm:$0xf0]  ;;  %v14133_v51 = vld [vmem:[%s14794_s24 + $0x1b24] sm:$0xf]  ;;  %v12002_v54 = vor.u32 %v14037_v44, %v11999_v45  ;;  %v7083_v6 = vpop.f32.mrf.mxu3 }
 0x228   : > { %7323 = vmatpush.bf16.msra.mxu2 %v12290_v4  ;;  %v12255_v50 = vld [vmem:[%s14794_s24 + $0x1a30] sm:$0xf0]  ;;  %v14033_v55 = vld [vmem:[%s14794_s24 + $0x1804] sm:$0xf]  ;;  %v12130_v61 = vor.u32 %v14069_v46, %v12127_v30 }
 0x229   : > { %7336 = vmatpush.bf16.msra.mxu3 %v12418_v16  ;;  %v12383_v53 = vld [vmem:[%s14794_s24 + $0x1b30] sm:$0xf0]  ;;  %v12258_v62 = vor.u32 %v14101_v43, %v12255_v50  ;;  %v14065_v63 = vld [vmem:[%s14794_s24 + $0x1904] sm:$0xf] }
 0x22a   : > { %7298 = vmatpush.bf16.msra.mxu0 %v12018_v40  ;;  %v11983_v56 = vld [vmem:[%s14794_s24 + $0x1810] sm:$0xf0]  ;;  %v14097_v0 = vld [vmem:[%s14794_s24 + $0x1a04] sm:$0xf]  ;;  %v12386_v3 = vor.u32 %v14133_v51, %v12383_v53 }
 0x22b   : > { %7311 = vmatpush.bf16.msra.mxu1 %v12146_v42  ;;  %v12111_v52 = vld [vmem:[%s14794_s24 + $0x1910] sm:$0xf0]  ;;  %v14129_v4 = vld [vmem:[%s14794_s24 + $0x1b04] sm:$0xf]  ;;  %v11986_v2 = vor.u32 %v14033_v55, %v11983_v56 }
 0x22c   : > { %7324 = vmatpush.bf16.msra.mxu2 %v12274_v10  ;;  %v12239_v48 = vld [vmem:[%s14794_s24 + $0x1a10] sm:$0xf0]  ;;  %v14189_v8 = vld [vmem:[%s14794_s24 + $0x1ce4] sm:$0xf]  ;;  %v12114_v36 = vor.u32 %v14065_v63, %v12111_v52 }
 0x22d   : > { %7337 = vmatpush.bf16.msra.mxu3 %v12402_v49  ;;  %v12367_v5 = vld [vmem:[%s14794_s24 + $0x1b10] sm:$0xf0]  ;;  %v14221_v16 = vld [vmem:[%s14794_s24 + $0x1de4] sm:$0xf]  ;;  %v12242_v38 = vor.u32 %v14097_v0, %v12239_v48 }
 0x22e   : > { %v12607_v9 = vld [vmem:[%s14794_s24 + $0x1cf0] sm:$0xf0]  ;;  %7299 = vmatpush.bf16.msra.mxu0 %v12002_v54  ;;  %v14253_v22 = vld [vmem:[%s14794_s24 + $0x1ee4] sm:$0xf]  ;;  %v12370_v41 = vor.u32 %v14129_v4, %v12367_v5  ;;  %v14458_v5 = vld [vmem:[#allocation1 + $0x9] sm:$0xff] }
 0x22f   : > { %v12735_v21 = vld [vmem:[%s14794_s24 + $0x1df0] sm:$0xf0]  ;;  %7312 = vmatpush.bf16.msra.mxu1 %v12130_v61  ;;  %v14285_v39 = vld [vmem:[%s14794_s24 + $0x1fe4] sm:$0xf]  ;;  %v12610_v42 = vor.u32 %v14189_v8, %v12607_v9  ;;  %v14459_v9 = vld [vmem:[#allocation1 + $0x1b] sm:$0xff] }
 0x230   : > { %v12863_v34 = vld [vmem:[%s14794_s24 + $0x1ef0] sm:$0xf0]  ;;  %7325 = vmatpush.bf16.msra.mxu2 %v12258_v62  ;;  %v12738_v10 = vor.u32 %v14221_v16, %v12735_v21  ;;  %v14185_v45 = vld [vmem:[%s14794_s24 + $0x1cc4] sm:$0xf] }
 0x231   : > { %v12991_v40 = vld [vmem:[%s14794_s24 + $0x1ff0] sm:$0xf0]  ;;  %7338 = vmatpush.bf16.msra.mxu3 %v12386_v3  ;;  %v12866_v44 = vor.u32 %v14253_v22, %v12863_v34  ;;  %v14217_v47 = vld [vmem:[%s14794_s24 + $0x1dc4] sm:$0xf] }
 0x232   : > { %v12591_v46 = vld [vmem:[%s14794_s24 + $0x1cd0] sm:$0xf0]  ;;  %7300 = vmatpush.bf16.msra.mxu0 %v11986_v2  ;;  %v12994_v49 = vor.u32 %v14285_v39, %v12991_v40  ;;  %v14249_v43 = vld [vmem:[%s14794_s24 + $0x1ec4] sm:$0xf] }
 0x233   : > { %v12719_v30 = vld [vmem:[%s14794_s24 + $0x1dd0] sm:$0xf0]  ;;  %7313 = vmatpush.bf16.msra.mxu1 %v12114_v36  ;;  %v14281_v51 = vld [vmem:[%s14794_s24 + $0x1fc4] sm:$0xf]  ;;  %v12594_v54 = vor.u32 %v14185_v45, %v12591_v46 }
 0x234   : > { %v12847_v50 = vld [vmem:[%s14794_s24 + $0x1ed0] sm:$0xf0]  ;;  %7326 = vmatpush.bf16.msra.mxu2 %v12242_v38  ;;  %v12722_v55 = vor.u32 %v14217_v47, %v12719_v30  ;;  %v14181_v61 = vld [vmem:[%s14794_s24 + $0x1ca4] sm:$0xf]  ;;  %v7107_v47 = vpop.f32.mrf.mxu1 }
 0x235   : > { %v12975_v53 = vld [vmem:[%s14794_s24 + $0x1fd0] sm:$0xf0]  ;;  %7339 = vmatpush.bf16.msra.mxu3 %v12370_v41  ;;  %v12850_v56 = vor.u32 %v14249_v43, %v12847_v50  ;;  %v14213_v63 = vld [vmem:[%s14794_s24 + $0x1da4] sm:$0xf] }
 0x236   : > { %7345 = vmatpush.bf16.msrb.mxu0 %v12610_v42  ;;  %v12575_v62 = vld [vmem:[%s14794_s24 + $0x1cb0] sm:$0xf0]  ;;  %v12978_v0 = vor.u32 %v14281_v51, %v12975_v53  ;;  %v14245_v3 = vld [vmem:[%s14794_s24 + $0x1ea4] sm:$0xf]  ;;  %7314 = vmatmul.bf16.vlgmr.msra.gmra.mxu1 %v14458_v5  ;;  %v7094_v42 = vpop.f32.mrf.mxu0 }
 0x237   : > { %7358 = vmatpush.bf16.msrb.mxu1 %v12738_v10  ;;  %v14456_v52 = vld [vmem:[#allocation1] sm:$0xff]  ;;  %v14457_v4 = vld [vmem:[#allocation1 + $0x12] sm:$0xff]  ;;  %v12578_v16 = vor.u32 %v14181_v61, %v12575_v62  ;;  %v7095_v45 = vadd.f32 %v7094_v42, %v15895_v17 }
 0x238   : > { %7371 = vmatpush.bf16.msrb.mxu2 %v12866_v44  ;;  %7301 = vmatmul.bf16.vlgmr.msra.gmra.mxu0 %v14456_v52  ;;  %v12703_v1 = vld [vmem:[%s14794_s24 + $0x1db0] sm:$0xf0]  ;;  %v14277_v6 = vld [vmem:[%s14794_s24 + $0x1fa4] sm:$0xf] }
 0x239   : > { %7384 = vmatpush.bf16.msrb.mxu3 %v12994_v49  ;;  %v12831_v48 = vld [vmem:[%s14794_s24 + $0x1eb0] sm:$0xf0]  ;;  %7327 = vmatmul.bf16.vlgmr.msra.gmra.mxu2 %v14457_v4  ;;  %v12706_v2 = vor.u32 %v14213_v63, %v12703_v1  ;;  %v14177_v22 = vld [vmem:[%s14794_s24 + $0x1c84] sm:$0xf] }
 0x23a   : > { %v12959_v8 = vld [vmem:[%s14794_s24 + $0x1fb0] sm:$0xf0]  ;;  %7340 = vmatmul.bf16.vlgmr.msra.gmra.mxu3 %v14459_v9  ;;  %7346 = vmatpush.bf16.msrb.mxu0 %v12594_v54  ;;  %v12834_v21 = vor.u32 %v14245_v3, %v12831_v48  ;;  %v14209_v36 = vld [vmem:[%s14794_s24 + $0x1d84] sm:$0xf]  ;;  %v7108_v54 = vadd.f32 %v7107_v47, %v7095_v45  ;;  %v7120_v5 = vpop.f32.mrf.mxu2 }
 0x23b   : > { %7359 = vmatpush.bf16.msrb.mxu1 %v12722_v55  ;;  %v12559_v34 = vld [vmem:[%s14794_s24 + $0x1c90] sm:$0xf0]  ;;  %v12962_v38 = vor.u32 %v14277_v6, %v12959_v8  ;;  %v14241_v40 = vld [vmem:[%s14794_s24 + $0x1e84] sm:$0xf] }
 0x23c   : > { %7372 = vmatpush.bf16.msrb.mxu2 %v12850_v56  ;;  %v12687_v39 = vld [vmem:[%s14794_s24 + $0x1d90] sm:$0xf0]  ;;  %v14273_v10 = vld [vmem:[%s14794_s24 + $0x1f84] sm:$0xf]  ;;  %v12562_v46 = vor.u32 %v14177_v22, %v12559_v34 }
 0x23d   : > { %7385 = vmatpush.bf16.msrb.mxu3 %v12978_v0  ;;  %v12815_v41 = vld [vmem:[%s14794_s24 + $0x1e90] sm:$0xf0]  ;;  %v12690_v49 = vor.u32 %v14209_v36, %v12687_v39  ;;  %v14173_v43 = vld [vmem:[%s14794_s24 + $0x1c64] sm:$0xf] }
 0x23e   : > { %v12943_v44 = vld [vmem:[%s14794_s24 + $0x1f90] sm:$0xf0]  ;;  %7347 = vmatpush.bf16.msrb.mxu0 %v12578_v16  ;;  %v12818_v30 = vor.u32 %v14241_v40, %v12815_v41  ;;  %v14205_v51 = vld [vmem:[%s14794_s24 + $0x1d64] sm:$0xf]  ;;  %v7121_v16 = vadd.f32 %v7120_v5, %v7108_v54  ;;  %v7096_v34 = vpop.f32.mrf.mxu0 }
 0x23f   : > { %7360 = vmatpush.bf16.msrb.mxu1 %v12706_v2  ;;  %v12543_v50 = vld [vmem:[%s14794_s24 + $0x1c70] sm:$0xf0]  ;;  %v12946_v53 = vor.u32 %v14273_v10, %v12943_v44  ;;  %v14237_v56 = vld [vmem:[%s14794_s24 + $0x1e64] sm:$0xf]  ;;  %v7133_v2 = vpop.f32.mrf.mxu3  ;;  %v13392_v34 = vld [vmem:[%s14794_s24 + $0x3f4] sm:$0xf0] }
 0x240   : > { %7373 = vmatpush.bf16.msrb.mxu2 %v12834_v21  ;;  %v12671_v55 = vld [vmem:[%s14794_s24 + $0x1d70] sm:$0xf0]  ;;  %v14269_v61 = vld [vmem:[%s14794_s24 + $0x1f64] sm:$0xf]  ;;  %v12546_v63 = vor.u32 %v14173_v43, %v12543_v50  ;;  %v15962_v39 = vadd.f32 %v7133_v2, %v7121_v16  ;;  %v13360_v16 = vld [vmem:[%s14794_s24 + $0x2f4] sm:$0xf0] }
 0x241   : > { %7386 = vmatpush.bf16.msrb.mxu3 %v12962_v38  ;;  %v12799_v17 = vld [vmem:[%s14794_s24 + $0x1e70] sm:$0xf0]  ;;  %v12674_v52 = vor.u32 %v14205_v51, %v12671_v55  ;;  %v14169_v1 = vld [vmem:[%s14794_s24 + $0x1c44] sm:$0xf]  ;;  %v7109_v38 = vpop.f32.mrf.mxu1 }
 0x242   : > { %v12927_v62 = vld [vmem:[%s14794_s24 + $0x1f70] sm:$0xf0]  ;;  %7348 = vmatpush.bf16.msrb.mxu0 %v12562_v46  ;;  %v12802_v0 = vor.u32 %v14237_v56, %v12799_v17  ;;  %v14201_v48 = vld [vmem:[%s14794_s24 + $0x1d44] sm:$0xf] }
 0x243   : > { %7361 = vmatpush.bf16.msrb.mxu1 %v12690_v49  ;;  %v12527_v3 = vld [vmem:[%s14794_s24 + $0x1c50] sm:$0xf0]  ;;  %v12930_v4 = vor.u32 %v14269_v61, %v12927_v62  ;;  %v14233_v8 = vld [vmem:[%s14794_s24 + $0x1e44] sm:$0xf] }
 0x244   : > { %7374 = vmatpush.bf16.msrb.mxu2 %v12818_v30  ;;  %v12655_v6 = vld [vmem:[%s14794_s24 + $0x1d50] sm:$0xf0]  ;;  %v14265_v21 = vld [vmem:[%s14794_s24 + $0x1f44] sm:$0xf]  ;;  %v12530_v36 = vor.u32 %v14169_v1, %v12527_v3  ;;  %v7122_v1 = vpop.f32.mrf.mxu2  ;;  %v9029_v3 = vld [vmem:[%s14794_s24 + $0xe8] sm:$0xf] }
 0x245   : > { %7387 = vmatpush.bf16.msrb.mxu3 %v12946_v53  ;;  %v12783_v9 = vld [vmem:[%s14794_s24 + $0x1e50] sm:$0xf0]  ;;  %v12658_v40 = vor.u32 %v14201_v48, %v12655_v6  ;;  %v14165_v42 = vld [vmem:[%s14794_s24 + $0x1c24] sm:$0xf]  ;;  %v13296_v48 = vld [vmem:[%s14794_s24 + $0xf4] sm:$0xf0] }
 0x246   : > { %v12911_v22 = vld [vmem:[%s14794_s24 + $0x1f50] sm:$0xf0]  ;;  %7349 = vmatpush.bf16.msrb.mxu0 %v12546_v63  ;;  %v12786_v41 = vor.u32 %v14233_v8, %v12783_v9  ;;  %v14197_v44 = vld [vmem:[%s14794_s24 + $0x1d24] sm:$0xf]  ;;  %v13328_v8 = vld [vmem:[%s14794_s24 + $0x1f4] sm:$0xf0]  ;;  %v9030_v38 = vor.u32 %v13296_v48, %v9029_v3 }
 0x247   : > { %7362 = vmatpush.bf16.msrb.mxu1 %v12674_v52  ;;  %v12511_v10 = vld [vmem:[%s14794_s24 + $0x1c30] sm:$0xf0]  ;;  %v12914_v45 = vor.u32 %v14265_v21, %v12911_v22  ;;  %v14229_v47 = vld [vmem:[%s14794_s24 + $0x1e24] sm:$0xf]  ;;  %v7135_v5 = vpop.f32.mrf.mxu3  ;;  %v9285_v9 = vld [vmem:[%s14794_s24 + $0x2e8] sm:$0xf] }
 0x248   : > { %7375 = vmatpush.bf16.msrb.mxu2 %v12802_v0  ;;  %v12639_v46 = vld [vmem:[%s14794_s24 + $0x1d30] sm:$0xf0]  ;;  %v14261_v30 = vld [vmem:[%s14794_s24 + $0x1f24] sm:$0xf]  ;;  %v12514_v50 = vor.u32 %v14165_v42, %v12511_v10  ;;  %v9413_v22 = vld [vmem:[%s14794_s24 + $0x3e8] sm:$0xf] }
 0x249   : > { %7388 = vmatpush.bf16.msrb.mxu3 %v12930_v4  ;;  %v12767_v49 = vld [vmem:[%s14794_s24 + $0x1e30] sm:$0xf0]  ;;  %v14161_v51 = vld [vmem:[%s14794_s24 + $0x1c04] sm:$0xf]  ;;  %v12642_v54 = vor.u32 %v14197_v44, %v12639_v46  ;;  %v9157_v4 = vld [vmem:[%s14794_s24 + $0x1e8] sm:$0xf] }
 0x24a   : > { %v12895_v43 = vld [vmem:[%s14794_s24 + $0x1f30] sm:$0xf0]  ;;  %7350 = vmatpush.bf16.msrb.mxu0 %v12530_v36  ;;  %v12770_v55 = vor.u32 %v14229_v47, %v12767_v49  ;;  %v14193_v56 = vld [vmem:[%s14794_s24 + $0x1d04] sm:$0xf]  ;;  %v9013_v42 = vld [vmem:[%s14794_s24 + $0xc8] sm:$0xf] }
 0x24b   : > { %v12495_v53 = vld [vmem:[%s14794_s24 + $0x1c10] sm:$0xf0]  ;;  %7363 = vmatpush.bf16.msrb.mxu1 %v12658_v40  ;;  %v14225_v61 = vld [vmem:[%s14794_s24 + $0x1e04] sm:$0xf]  ;;  %v12898_v62 = vor.u32 %v14261_v30, %v12895_v43  ;;  %v9158_v40 = vor.u32 %v13328_v8, %v9157_v4  ;;  %v13292_v10 = vld [vmem:[%s14794_s24 + $0xd4] sm:$0xf0] }
 0x24c   : > { %7376 = vmatpush.bf16.msrb.mxu2 %v12786_v41  ;;  %v12623_v17 = vld [vmem:[%s14794_s24 + $0x1d10] sm:$0xf0]  ;;  %v14257_v52 = vld [vmem:[%s14794_s24 + $0x1f04] sm:$0xf]  ;;  %v12498_v6 = vor.u32 %v14161_v51, %v12495_v53  ;;  %v9286_v41 = vor.u32 %v13360_v16, %v9285_v9  ;;  %v9141_v44 = vld [vmem:[%s14794_s24 + $0x1c8] sm:$0xf] }
 0x24d   : > { %7389 = vmatpush.bf16.msrb.mxu3 %v12914_v45  ;;  %v12751_v63 = vld [vmem:[%s14794_s24 + $0x1e10] sm:$0xf0]  ;;  %v12626_v2 = vor.u32 %v14193_v56, %v12623_v17  ;;  %v9414_v45 = vor.u32 %v13392_v34, %v9413_v22  ;;  %v13324_v46 = vld [vmem:[%s14794_s24 + $0x1d4] sm:$0xf0]  ;;  %v9269_v47 = vld [vmem:[%s14794_s24 + $0x2c8] sm:$0xf] }
 0x24e   : > { %v12879_v0 = vld [vmem:[%s14794_s24 + $0x1f10] sm:$0xf0]  ;;  %7351 = vmatpush.bf16.msrb.mxu0 %v12514_v50  ;;  %v12754_v21 = vor.u32 %v14225_v61, %v12751_v63  ;;  %v13356_v49 = vld [vmem:[%s14794_s24 + $0x2d4] sm:$0xf0]  ;;  %v9397_v30 = vld [vmem:[%s14794_s24 + $0x3c8] sm:$0xf]  ;;  %v9014_v50 = vor.u32 %v13292_v10, %v9013_v42  ;;  %v9142_v51 = vor.u32 %v13324_v46, %v9141_v44 }
 0x24f   : > { %7364 = vmatpush.bf16.msrb.mxu1 %v12642_v54  ;;  %v12882_v36 = vor.u32 %v14257_v52, %v12879_v0  ;;  %v13388_v43 = vld [vmem:[%s14794_s24 + $0x3d4] sm:$0xf0]  ;;  %v9270_v53 = vor.u32 %v13356_v49, %v9269_v47  ;;  %v8997_v54 = vld [vmem:[%s14794_s24 + $0xa8] sm:$0xf]  ;;  %v14462_v1 = vld [vmem:[#allocation1 + $0x2d] sm:$0xff] }
 0x250   : > { %7377 = vmatpush.bf16.msrb.mxu2 %v12770_v55  ;;  %v13288_v55 = vld [vmem:[%s14794_s24 + $0xb4] sm:$0xf0]  ;;  %v9125_v56 = vld [vmem:[%s14794_s24 + $0x1a8] sm:$0xf]  ;;  %v9398_v61 = vor.u32 %v13388_v43, %v9397_v30  ;;  %v14463_v4 = vld [vmem:[#allocation1 + $0x3f] sm:$0xff] }
 0x251   : > { %7390 = vmatpush.bf16.msrb.mxu3 %v12898_v62  ;;  %v14460_v17 = vld [vmem:[#allocation1 + $0x24] sm:$0xff]  ;;  %v9253_v63 = vld [vmem:[%s14794_s24 + $0x2a8] sm:$0xf]  ;;  %v8998_v5 = vor.u32 %v13288_v55, %v8997_v54 }
 0x252   : > { %7352 = vmatpush.bf16.msrb.mxu0 %v12498_v6  ;;  %v13320_v62 = vld [vmem:[%s14794_s24 + $0x1b4] sm:$0xf0]  ;;  %v14461_v0 = vld [vmem:[#allocation1 + $0x36] sm:$0xff] }
 0x253   : > { %7365 = vmatpush.bf16.msrb.mxu1 %v12626_v2  ;;  %v13352_v52 = vld [vmem:[%s14794_s24 + $0x2b4] sm:$0xf0]  ;;  %v9381_v3 = vld [vmem:[%s14794_s24 + $0x3a8] sm:$0xf]  ;;  %v9126_v6 = vor.u32 %v13320_v62, %v9125_v56  ;;  %v7159_v44 = vpop.f32.mrf.mxu1 }
 0x254   : > { %7378 = vmatpush.bf16.msrb.mxu2 %v12754_v21  ;;  %v13384_v48 = vld [vmem:[%s14794_s24 + $0x3b4] sm:$0xf0]  ;;  %v9254_v8 = vor.u32 %v13352_v52, %v9253_v63  ;;  %v8981_v9 = vld [vmem:[%s14794_s24 + $0x88] sm:$0xf] }
 0x255   : > { %7391 = vmatpush.bf16.msrb.mxu3 %v12882_v36  ;;  %7353 = vmatmul.bf16.vlgmr.msrb.gmra.mxu0 %v14460_v17  ;;  %v13284_v16 = vld [vmem:[%s14794_s24 + $0x94] sm:$0xf0]  ;;  %v9109_v2 = vld [vmem:[%s14794_s24 + $0x188] sm:$0xf]  ;;  %v9382_v21 = vor.u32 %v13384_v48, %v9381_v3 }
 0x256   : > { %7397 = vmatpush.bf16.msra.mxu0 %v9030_v38  ;;  %7366 = vmatmul.bf16.vlgmr.msrb.gmra.mxu1 %v14462_v1  ;;  %v13316_v22 = vld [vmem:[%s14794_s24 + $0x194] sm:$0xf0]  ;;  %v9237_v34 = vld [vmem:[%s14794_s24 + $0x288] sm:$0xf]  ;;  %v7146_v38 = vpop.f32.mrf.mxu0  ;;  %v8982_v10 = vor.u32 %v13284_v16, %v8981_v9 }
 0x257   : > { %7410 = vmatpush.bf16.msra.mxu1 %v9158_v40  ;;  %7379 = vmatmul.bf16.vlgmr.msrb.gmra.mxu2 %v14461_v0  ;;  %v13348_v36 = vld [vmem:[%s14794_s24 + $0x294] sm:$0xf0]  ;;  %v9365_v40 = vld [vmem:[%s14794_s24 + $0x388] sm:$0xf]  ;;  %v7147_v42 = vadd.f32 %v7146_v38, %v15962_v39 }
 0x258   : > { %7423 = vmatpush.bf16.msra.mxu2 %v9286_v41  ;;  %7392 = vmatmul.bf16.vlgmr.msrb.gmra.mxu3 %v14463_v4  ;;  %v13380_v41 = vld [vmem:[%s14794_s24 + $0x394] sm:$0xf0]  ;;  %v9238_v46 = vor.u32 %v13348_v36, %v9237_v34  ;;  %v8965_v47 = vld [vmem:[%s14794_s24 + $0x68] sm:$0xf] }
 0x259   : > { %7436 = vmatpush.bf16.msra.mxu3 %v9414_v45  ;;  %v9110_v45 = vor.u32 %v13316_v22, %v9109_v2  ;;  %v13280_v49 = vld [vmem:[%s14794_s24 + $0x74] sm:$0xf0]  ;;  %v9093_v30 = vld [vmem:[%s14794_s24 + $0x168] sm:$0xf]  ;;  %v9366_v43 = vor.u32 %v13380_v41, %v9365_v40 }
 0x25a   : > { %7398 = vmatpush.bf16.msra.mxu0 %v9014_v50  ;;  %v7160_v50 = vadd.f32 %v7159_v44, %v7147_v42  ;;  %v13344_v39 = vld [vmem:[%s14794_s24 + $0x274] sm:$0xf0]  ;;  %v9349_v54 = vld [vmem:[%s14794_s24 + $0x368] sm:$0xf]  ;;  %v8966_v56 = vor.u32 %v13280_v49, %v8965_v47  ;;  %v7172_v1 = vpop.f32.mrf.mxu2 }
 0x25b   : > { %7411 = vmatpush.bf16.msra.mxu1 %v9142_v51  ;;  %v13312_v51 = vld [vmem:[%s14794_s24 + $0x174] sm:$0xf0]  ;;  %v8949_v62 = vld [vmem:[%s14794_s24 + $0x48] sm:$0xf] }
 0x25c   : > { %7424 = vmatpush.bf16.msra.mxu2 %v9270_v53  ;;  %v9221_v53 = vld [vmem:[%s14794_s24 + $0x268] sm:$0xf]  ;;  %v13376_v55 = vld [vmem:[%s14794_s24 + $0x374] sm:$0xf0]  ;;  %v9094_v17 = vor.u32 %v13312_v51, %v9093_v30 }
 0x25d   : > { %7437 = vmatpush.bf16.msra.mxu3 %v9398_v61  ;;  %v9222_v61 = vor.u32 %v13344_v39, %v9221_v53  ;;  %v13276_v63 = vld [vmem:[%s14794_s24 + $0x54] sm:$0xf0]  ;;  %v9077_v52 = vld [vmem:[%s14794_s24 + $0x148] sm:$0xf]  ;;  %v9350_v0 = vor.u32 %v13376_v55, %v9349_v54 }
 0x25e   : > { %7399 = vmatpush.bf16.msra.mxu0 %v8998_v5  ;;  %v13308_v3 = vld [vmem:[%s14794_s24 + $0x154] sm:$0xf0]  ;;  %v9205_v48 = vld [vmem:[%s14794_s24 + $0x248] sm:$0xf]  ;;  %v7173_v5 = vadd.f32 %v7172_v1, %v7160_v50  ;;  %v7148_v16 = vpop.f32.mrf.mxu0  ;;  %v8950_v2 = vor.u32 %v13276_v63, %v8949_v62 }
 0x25f   : > { %7412 = vmatpush.bf16.msra.mxu1 %v9126_v6  ;;  %v13340_v4 = vld [vmem:[%s14794_s24 + $0x254] sm:$0xf0]  ;;  %v7185_v6 = vpop.f32.mrf.mxu3  ;;  %v9078_v34 = vor.u32 %v13308_v3, %v9077_v52  ;;  %v8933_v38 = vld [vmem:[%s14794_s24 + $0x28] sm:$0xf] }
 0x260   : > { %7425 = vmatpush.bf16.msra.mxu2 %v9254_v8  ;;  %v9333_v8 = vld [vmem:[%s14794_s24 + $0x348] sm:$0xf]  ;;  %v13372_v9 = vld [vmem:[%s14794_s24 + $0x354] sm:$0xf0]  ;;  %v16029_v22 = vadd.f32 %v7185_v6, %v7173_v5  ;;  %v9206_v36 = vor.u32 %v13340_v4, %v9205_v48 }
 0x261   : > { %7438 = vmatpush.bf16.msra.mxu3 %v9382_v21  ;;  %v7161_v21 = vpop.f32.mrf.mxu1  ;;  %v13272_v40 = vld [vmem:[%s14794_s24 + $0x34] sm:$0xf0]  ;;  %v9061_v41 = vld [vmem:[%s14794_s24 + $0x128] sm:$0xf]  ;;  %v9334_v42 = vor.u32 %v13372_v9, %v9333_v8 }
 0x262   : > { %7400 = vmatpush.bf16.msra.mxu0 %v8982_v10  ;;  %v13304_v10 = vld [vmem:[%s14794_s24 + $0x134] sm:$0xf0]  ;;  %v9189_v44 = vld [vmem:[%s14794_s24 + $0x228] sm:$0xf]  ;;  %v8934_v49 = vor.u32 %v13272_v40, %v8933_v38  ;;  %v7174_v62 = vpop.f32.mrf.mxu2 }
 0x263   : > { %7413 = vmatpush.bf16.msra.mxu1 %v9110_v45  ;;  %v13336_v45 = vld [vmem:[%s14794_s24 + $0x234] sm:$0xf0]  ;;  %v8917_v30 = vld [vmem:[%s14794_s24 + $0x8] sm:$0xf]  ;;  %v9062_v50 = vor.u32 %v13304_v10, %v9061_v41 }
 0x264   : > { %7426 = vmatpush.bf16.msra.mxu2 %v9238_v46  ;;  %v9317_v46 = vld [vmem:[%s14794_s24 + $0x328] sm:$0xf]  ;;  %v13368_v47 = vld [vmem:[%s14794_s24 + $0x334] sm:$0xf0]  ;;  %v9190_v51 = vor.u32 %v13336_v45, %v9189_v44 }
 0x265   : > { %7439 = vmatpush.bf16.msra.mxu3 %v9366_v43  ;;  %v13268_v43 = vld [vmem:[%s14794_s24 + $0x14] sm:$0xf0]  ;;  %v9045_v53 = vld [vmem:[%s14794_s24 + $0x108] sm:$0xf]  ;;  %v9318_v55 = vor.u32 %v13368_v47, %v9317_v46 }
 0x266   : > { %7401 = vmatpush.bf16.msra.mxu0 %v8966_v56  ;;  %v13300_v39 = vld [vmem:[%s14794_s24 + $0x114] sm:$0xf0]  ;;  %v9173_v54 = vld [vmem:[%s14794_s24 + $0x208] sm:$0xf]  ;;  %v8918_v3 = vor.u32 %v13268_v43, %v8917_v30 }
 0x267   : > { %7414 = vmatpush.bf16.msra.mxu1 %v9094_v17  ;;  %v13332_v56 = vld [vmem:[%s14794_s24 + $0x214] sm:$0xf0]  ;;  %v9301_v17 = vld [vmem:[%s14794_s24 + $0x308] sm:$0xf]  ;;  %v7187_v1 = vpop.f32.mrf.mxu3  ;;  %v9046_v6 = vor.u32 %v13300_v39, %v9045_v53 }
 0x268   : > { %7427 = vmatpush.bf16.msra.mxu2 %v9222_v61  ;;  %v13364_v61 = vld [vmem:[%s14794_s24 + $0x314] sm:$0xf0]  ;;  %v9541_v63 = vld [vmem:[%s14794_s24 + $0x4e8] sm:$0xf]  ;;  %v9174_v8 = vor.u32 %v13332_v56, %v9173_v54 }
 0x269   : > { %7440 = vmatpush.bf16.msra.mxu3 %v9350_v0  ;;  %v13424_v52 = vld [vmem:[%s14794_s24 + $0x4f4] sm:$0xf0]  ;;  %v9669_v0 = vld [vmem:[%s14794_s24 + $0x5e8] sm:$0xf] }
 0x26a   : > { %7402 = vmatpush.bf16.msra.mxu0 %v8950_v2  ;;  %v13456_v48 = vld [vmem:[%s14794_s24 + $0x5f4] sm:$0xf0]  ;;  %v9797_v4 = vld [vmem:[%s14794_s24 + $0x6e8] sm:$0xf]  ;;  %v9302_v2 = vor.u32 %v13364_v61, %v9301_v17  ;;  %v9542_v21 = vor.u32 %v13424_v52, %v9541_v63 }
 0x26b   : > { %7415 = vmatpush.bf16.msra.mxu1 %v9078_v34  ;;  %v13488_v5 = vld [vmem:[%s14794_s24 + $0x6f4] sm:$0xf0]  ;;  %v9925_v9 = vld [vmem:[%s14794_s24 + $0x7e8] sm:$0xf]  ;;  %v9670_v34 = vor.u32 %v13456_v48, %v9669_v0 }
 0x26c   : > { %7428 = vmatpush.bf16.msra.mxu2 %v9206_v36  ;;  %v13520_v16 = vld [vmem:[%s14794_s24 + $0x7f4] sm:$0xf0]  ;;  %v9798_v36 = vor.u32 %v13488_v5, %v9797_v4  ;;  %v9525_v38 = vld [vmem:[%s14794_s24 + $0x4c8] sm:$0xf] }
 0x26d   : > { %7441 = vmatpush.bf16.msra.mxu3 %v9334_v42  ;;  %v13420_v40 = vld [vmem:[%s14794_s24 + $0x4d4] sm:$0xf0]  ;;  %v9653_v41 = vld [vmem:[%s14794_s24 + $0x5c8] sm:$0xf]  ;;  %v9926_v42 = vor.u32 %v13520_v16, %v9925_v9 }
 0x26e   : > { %7403 = vmatpush.bf16.msra.mxu0 %v8934_v49  ;;  %v13452_v10 = vld [vmem:[%s14794_s24 + $0x5d4] sm:$0xf0]  ;;  %v9781_v44 = vld [vmem:[%s14794_s24 + $0x6c8] sm:$0xf]  ;;  %v9526_v49 = vor.u32 %v13420_v40, %v9525_v38 }
 0x26f   : > { %7416 = vmatpush.bf16.msra.mxu1 %v9062_v50  ;;  %v13484_v45 = vld [vmem:[%s14794_s24 + $0x6d4] sm:$0xf0]  ;;  %v9909_v46 = vld [vmem:[%s14794_s24 + $0x7c8] sm:$0xf]  ;;  %v9654_v30 = vor.u32 %v13452_v10, %v9653_v41 }
 0x270   : > { %7429 = vmatpush.bf16.msra.mxu2 %v9190_v51  ;;  %v13516_v47 = vld [vmem:[%s14794_s24 + $0x7d4] sm:$0xf0]  ;;  %v9782_v43 = vor.u32 %v13484_v45, %v9781_v44  ;;  %v9509_v50 = vld [vmem:[%s14794_s24 + $0x4a8] sm:$0xf] }
 0x271   : > { %7442 = vmatpush.bf16.msra.mxu3 %v9318_v55  ;;  %v13416_v51 = vld [vmem:[%s14794_s24 + $0x4b4] sm:$0xf0]  ;;  %v9637_v53 = vld [vmem:[%s14794_s24 + $0x5a8] sm:$0xf]  ;;  %v9910_v39 = vor.u32 %v13516_v47, %v9909_v46 }
 0x272   : > { %7404 = vmatpush.bf16.msra.mxu0 %v8918_v3  ;;  %v13448_v54 = vld [vmem:[%s14794_s24 + $0x5b4] sm:$0xf0]  ;;  %v9765_v55 = vld [vmem:[%s14794_s24 + $0x6a8] sm:$0xf]  ;;  %v9510_v62 = vor.u32 %v13416_v51, %v9509_v50 }
 0x273   : > { %7417 = vmatpush.bf16.msra.mxu1 %v9046_v6  ;;  %v13480_v56 = vld [vmem:[%s14794_s24 + $0x6b4] sm:$0xf0]  ;;  %v9893_v17 = vld [vmem:[%s14794_s24 + $0x7a8] sm:$0xf]  ;;  %v9638_v63 = vor.u32 %v13448_v54, %v9637_v53 }
 0x274   : > { %7430 = vmatpush.bf16.msra.mxu2 %v9174_v8  ;;  %v13512_v61 = vld [vmem:[%s14794_s24 + $0x7b4] sm:$0xf0]  ;;  %v9766_v52 = vor.u32 %v13480_v56, %v9765_v55  ;;  %v9493_v0 = vld [vmem:[%s14794_s24 + $0x488] sm:$0xf]  ;;  %v7198_v8 = vpop.f32.mrf.mxu0 }
 0x275   : > { %7443 = vmatpush.bf16.msra.mxu3 %v9302_v2  ;;  %7405 = vmatmul.bf16.vlgmr.msra.gmra.mxu0 %v14928_v32  ;;  %v13412_v1 = vld [vmem:[%s14794_s24 + $0x494] sm:$0xf0]  ;;  %v9621_v3 = vld [vmem:[%s14794_s24 + $0x588] sm:$0xf]  ;;  %v9894_v48 = vor.u32 %v13512_v61, %v9893_v17  ;;  %v7199_v2 = vadd.f32 %v7198_v8, %v16029_v22 }
 0x276   : > { %7449 = vmatpush.bf16.msrb.mxu0 %v9542_v21  ;;  %7418 = vmatmul.bf16.vlgmr.msra.gmra.mxu1 %v14935_v37  ;;  %v13444_v4 = vld [vmem:[%s14794_s24 + $0x594] sm:$0xf0]  ;;  %v9749_v5 = vld [vmem:[%s14794_s24 + $0x688] sm:$0xf]  ;;  %v9494_v21 = vor.u32 %v13412_v1, %v9493_v0 }
 0x277   : > { %7462 = vmatpush.bf16.msrb.mxu1 %v9670_v34  ;;  %7431 = vmatmul.bf16.vlgmr.msra.gmra.mxu2 %v14926_v31  ;;  %v13476_v6 = vld [vmem:[%s14794_s24 + $0x694] sm:$0xf0]  ;;  %v9877_v9 = vld [vmem:[%s14794_s24 + $0x788] sm:$0xf]  ;;  %v7211_v34 = vpop.f32.mrf.mxu1 }
 0x278   : > { %7475 = vmatpush.bf16.msrb.mxu2 %v9798_v36  ;;  %7444 = vmatmul.bf16.vlgmr.msra.gmra.mxu3 %v14930_v33  ;;  %v13508_v16 = vld [vmem:[%s14794_s24 + $0x794] sm:$0xf0]  ;;  %v9622_v36 = vor.u32 %v13444_v4, %v9621_v3  ;;  %v9750_v38 = vor.u32 %v13476_v6, %v9749_v5  ;;  %v9477_v40 = vld [vmem:[%s14794_s24 + $0x468] sm:$0xf]  ;;  %v7212_v44 = vadd.f32 %v7211_v34, %v7199_v2 }
 0x279   : > { %7488 = vmatpush.bf16.msrb.mxu3 %v9926_v42  ;;  %v13408_v41 = vld [vmem:[%s14794_s24 + $0x474] sm:$0xf0]  ;;  %v9605_v42 = vld [vmem:[%s14794_s24 + $0x568] sm:$0xf]  ;;  %v9878_v10 = vor.u32 %v13508_v16, %v9877_v9 }
 0x27a   : > { %7450 = vmatpush.bf16.msrb.mxu0 %v9526_v49  ;;  %v13440_v45 = vld [vmem:[%s14794_s24 + $0x574] sm:$0xf0]  ;;  %v9733_v46 = vld [vmem:[%s14794_s24 + $0x668] sm:$0xf]  ;;  %v7224_v55 = vpop.f32.mrf.mxu2 }
 0x27b   : > { %7463 = vmatpush.bf16.msrb.mxu1 %v9654_v30  ;;  %v13472_v22 = vld [vmem:[%s14794_s24 + $0x674] sm:$0xf0]  ;;  %v9861_v47 = vld [vmem:[%s14794_s24 + $0x768] sm:$0xf]  ;;  %v9478_v30 = vor.u32 %v13408_v41, %v9477_v40 }
 0x27c   : > { %7476 = vmatpush.bf16.msrb.mxu2 %v9782_v43  ;;  %v13504_v49 = vld [vmem:[%s14794_s24 + $0x774] sm:$0xf0]  ;;  %v9606_v43 = vor.u32 %v13440_v45, %v9605_v42  ;;  %v9734_v50 = vor.u32 %v13472_v22, %v9733_v46  ;;  %v9461_v51 = vld [vmem:[%s14794_s24 + $0x448] sm:$0xf]  ;;  %v7200_v1 = vpop.f32.mrf.mxu0 }
 0x27d   : > { %7489 = vmatpush.bf16.msrb.mxu3 %v9910_v39  ;;  %v13404_v53 = vld [vmem:[%s14794_s24 + $0x454] sm:$0xf0]  ;;  %v9589_v39 = vld [vmem:[%s14794_s24 + $0x548] sm:$0xf]  ;;  %v9862_v54 = vor.u32 %v13504_v49, %v9861_v47 }
 0x27e   : > { %7451 = vmatpush.bf16.msrb.mxu0 %v9510_v62  ;;  %v13436_v56 = vld [vmem:[%s14794_s24 + $0x554] sm:$0xf0]  ;;  %v9717_v17 = vld [vmem:[%s14794_s24 + $0x648] sm:$0xf]  ;;  %v7225_v62 = vadd.f32 %v7224_v55, %v7212_v44  ;;  %v9462_v3 = vor.u32 %v13404_v53, %v9461_v51 }
 0x27f   : > { %7464 = vmatpush.bf16.msrb.mxu1 %v9638_v63  ;;  %v13468_v61 = vld [vmem:[%s14794_s24 + $0x654] sm:$0xf0]  ;;  %v7237_v63 = vpop.f32.mrf.mxu3  ;;  %v9590_v5 = vor.u32 %v13436_v56, %v9589_v39  ;;  %v9445_v8 = vld [vmem:[%s14794_s24 + $0x428] sm:$0xf] }
 0x280   : > { %7477 = vmatpush.bf16.msrb.mxu2 %v9766_v52  ;;  %v9845_v52 = vld [vmem:[%s14794_s24 + $0x748] sm:$0xf]  ;;  %v13500_v0 = vld [vmem:[%s14794_s24 + $0x754] sm:$0xf0]  ;;  %v16100_v4 = vadd.f32 %v7237_v63, %v7225_v62  ;;  %v9718_v6 = vor.u32 %v13468_v61, %v9717_v17 }
 0x281   : > { %7490 = vmatpush.bf16.msrb.mxu3 %v9894_v48  ;;  %v7213_v48 = vpop.f32.mrf.mxu1  ;;  %v13400_v9 = vld [vmem:[%s14794_s24 + $0x434] sm:$0xf0]  ;;  %v9573_v16 = vld [vmem:[%s14794_s24 + $0x528] sm:$0xf]  ;;  %v9846_v2 = vor.u32 %v13500_v0, %v9845_v52 }
 0x282   : > { %7452 = vmatpush.bf16.msrb.mxu0 %v9494_v21  ;;  %v13432_v21 = vld [vmem:[%s14794_s24 + $0x534] sm:$0xf0]  ;;  %v9701_v34 = vld [vmem:[%s14794_s24 + $0x628] sm:$0xf]  ;;  %v9446_v41 = vor.u32 %v13400_v9, %v9445_v8  ;;  %v7226_v51 = vpop.f32.mrf.mxu2 }
 0x283   : > { %7465 = vmatpush.bf16.msrb.mxu1 %v9622_v36  ;;  %v13464_v36 = vld [vmem:[%s14794_s24 + $0x634] sm:$0xf0]  ;;  %v9429_v42 = vld [vmem:[%s14794_s24 + $0x408] sm:$0xf]  ;;  %v9574_v44 = vor.u32 %v13432_v21, %v9573_v16 }
 0x284   : > { %7478 = vmatpush.bf16.msrb.mxu2 %v9750_v38  ;;  %v9829_v38 = vld [vmem:[%s14794_s24 + $0x728] sm:$0xf]  ;;  %v13496_v40 = vld [vmem:[%s14794_s24 + $0x734] sm:$0xf0]  ;;  %v9702_v45 = vor.u32 %v13464_v36, %v9701_v34 }
 0x285   : > { %7491 = vmatpush.bf16.msrb.mxu3 %v9878_v10  ;;  %v13396_v10 = vld [vmem:[%s14794_s24 + $0x414] sm:$0xf0]  ;;  %v9557_v46 = vld [vmem:[%s14794_s24 + $0x508] sm:$0xf]  ;;  %v9830_v49 = vor.u32 %v13496_v40, %v9829_v38 }
 0x286   : > { %7453 = vmatpush.bf16.msrb.mxu0 %v9478_v30  ;;  %v13428_v22 = vld [vmem:[%s14794_s24 + $0x514] sm:$0xf0]  ;;  %v9685_v47 = vld [vmem:[%s14794_s24 + $0x608] sm:$0xf]  ;;  %v9430_v56 = vor.u32 %v13396_v10, %v9429_v42 }
 0x287   : > { %7466 = vmatpush.bf16.msrb.mxu1 %v9606_v43  ;;  %v13460_v30 = vld [vmem:[%s14794_s24 + $0x614] sm:$0xf0]  ;;  %v9813_v43 = vld [vmem:[%s14794_s24 + $0x708] sm:$0xf]  ;;  %v7239_v55 = vpop.f32.mrf.mxu3  ;;  %v9558_v63 = vor.u32 %v13428_v22, %v9557_v46 }
 0x288   : > { %7479 = vmatpush.bf16.msrb.mxu2 %v9734_v50  ;;  %v13492_v50 = vld [vmem:[%s14794_s24 + $0x714] sm:$0xf0]  ;;  %v10053_v53 = vld [vmem:[%s14794_s24 + $0x8e8] sm:$0xf]  ;;  %v9686_v52 = vor.u32 %v13460_v30, %v9685_v47 }
 0x289   : > { %7492 = vmatpush.bf16.msrb.mxu3 %v9862_v54  ;;  %v13552_v39 = vld [vmem:[%s14794_s24 + $0x8f4] sm:$0xf0]  ;;  %v10181_v54 = vld [vmem:[%s14794_s24 + $0x9e8] sm:$0xf] }
 0x28a   : > { %7454 = vmatpush.bf16.msrb.mxu0 %v9462_v3  ;;  %v13584_v17 = vld [vmem:[%s14794_s24 + $0x9f4] sm:$0xf0]  ;;  %v10309_v61 = vld [vmem:[%s14794_s24 + $0xae8] sm:$0xf]  ;;  %v9814_v3 = vor.u32 %v13492_v50, %v9813_v43  ;;  %v10054_v48 = vor.u32 %v13552_v39, %v10053_v53 }
 0x28b   : > { %7467 = vmatpush.bf16.msrb.mxu1 %v9590_v5  ;;  %v13616_v62 = vld [vmem:[%s14794_s24 + $0xaf4] sm:$0xf0]  ;;  %v10437_v0 = vld [vmem:[%s14794_s24 + $0xbe8] sm:$0xf]  ;;  %v10182_v5 = vor.u32 %v13584_v17, %v10181_v54 }
 0x28c   : > { %7480 = vmatpush.bf16.msrb.mxu2 %v9718_v6  ;;  %v13648_v1 = vld [vmem:[%s14794_s24 + $0xbf4] sm:$0xf0]  ;;  %v10310_v6 = vor.u32 %v13616_v62, %v10309_v61  ;;  %v10037_v8 = vld [vmem:[%s14794_s24 + $0x8c8] sm:$0xf] }
 0x28d   : > { %7493 = vmatpush.bf16.msrb.mxu3 %v9846_v2  ;;  %v13548_v9 = vld [vmem:[%s14794_s24 + $0x8d4] sm:$0xf0]  ;;  %v10165_v16 = vld [vmem:[%s14794_s24 + $0x9c8] sm:$0xf]  ;;  %v10438_v2 = vor.u32 %v13648_v1, %v10437_v0 }
 0x28e   : > { %7455 = vmatpush.bf16.msrb.mxu0 %v9446_v41  ;;  %v13580_v21 = vld [vmem:[%s14794_s24 + $0x9d4] sm:$0xf0]  ;;  %v10293_v34 = vld [vmem:[%s14794_s24 + $0xac8] sm:$0xf]  ;;  %v10038_v41 = vor.u32 %v13548_v9, %v10037_v8 }
 0x28f   : > { %7468 = vmatpush.bf16.msrb.mxu1 %v9574_v44  ;;  %v13612_v36 = vld [vmem:[%s14794_s24 + $0xad4] sm:$0xf0]  ;;  %v10421_v38 = vld [vmem:[%s14794_s24 + $0xbc8] sm:$0xf]  ;;  %v10166_v42 = vor.u32 %v13580_v21, %v10165_v16 }
 0x290   : > { %7481 = vmatpush.bf16.msrb.mxu2 %v9702_v45  ;;  %v13644_v40 = vld [vmem:[%s14794_s24 + $0xbd4] sm:$0xf0]  ;;  %v10294_v10 = vor.u32 %v13612_v36, %v10293_v34  ;;  %v10021_v44 = vld [vmem:[%s14794_s24 + $0x8a8] sm:$0xf] }
 0x291   : > { %7494 = vmatpush.bf16.msrb.mxu3 %v9830_v49  ;;  %v13544_v45 = vld [vmem:[%s14794_s24 + $0x8b4] sm:$0xf0]  ;;  %v10149_v46 = vld [vmem:[%s14794_s24 + $0x9a8] sm:$0xf]  ;;  %v10422_v22 = vor.u32 %v13644_v40, %v10421_v38 }
 0x292   : > { %7456 = vmatpush.bf16.msrb.mxu0 %v9430_v56  ;;  %v13576_v47 = vld [vmem:[%s14794_s24 + $0x9b4] sm:$0xf0]  ;;  %v10277_v49 = vld [vmem:[%s14794_s24 + $0xaa8] sm:$0xf]  ;;  %v10022_v51 = vor.u32 %v13544_v45, %v10021_v44 }
 0x293   : > { %7469 = vmatpush.bf16.msrb.mxu1 %v9558_v63  ;;  %v13608_v30 = vld [vmem:[%s14794_s24 + $0xab4] sm:$0xf0]  ;;  %v10405_v43 = vld [vmem:[%s14794_s24 + $0xba8] sm:$0xf]  ;;  %v10150_v53 = vor.u32 %v13576_v47, %v10149_v46 }
 0x294   : > { %7482 = vmatpush.bf16.msrb.mxu2 %v9686_v52  ;;  %v13640_v50 = vld [vmem:[%s14794_s24 + $0xbb4] sm:$0xf0]  ;;  %v10278_v39 = vor.u32 %v13608_v30, %v10277_v49  ;;  %v10005_v54 = vld [vmem:[%s14794_s24 + $0x888] sm:$0xf]  ;;  %v7250_v52 = vpop.f32.mrf.mxu0 }
 0x295   : > { %7495 = vmatpush.bf16.msrb.mxu3 %v9814_v3  ;;  %7457 = vmatmul.bf16.vlgmr.msrb.gmra.mxu0 %v14967_v11  ;;  %v13540_v55 = vld [vmem:[%s14794_s24 + $0x894] sm:$0xf0]  ;;  %v10133_v56 = vld [vmem:[%s14794_s24 + $0x988] sm:$0xf]  ;;  %v10406_v17 = vor.u32 %v13640_v50, %v10405_v43  ;;  %v7251_v3 = vadd.f32 %v7250_v52, %v16100_v4 }
 0x296   : > { %7501 = vmatpush.bf16.msra.mxu0 %v10054_v48  ;;  %7470 = vmatmul.bf16.vlgmr.msrb.gmra.mxu1 %v14971_v13  ;;  %v13572_v61 = vld [vmem:[%s14794_s24 + $0x994] sm:$0xf0]  ;;  %v10261_v62 = vld [vmem:[%s14794_s24 + $0xa88] sm:$0xf]  ;;  %v10006_v48 = vor.u32 %v13540_v55, %v10005_v54 }
 0x297   : > { %7514 = vmatpush.bf16.msra.mxu1 %v10182_v5  ;;  %7483 = vmatmul.bf16.vlgmr.msrb.gmra.mxu2 %v14964_v7  ;;  %v13604_v63 = vld [vmem:[%s14794_s24 + $0xa94] sm:$0xf0]  ;;  %v10389_v0 = vld [vmem:[%s14794_s24 + $0xb88] sm:$0xf]  ;;  %v7263_v5 = vpop.f32.mrf.mxu1 }
 0x298   : > { %7527 = vmatpush.bf16.msra.mxu2 %v10310_v6  ;;  %7496 = vmatmul.bf16.vlgmr.msrb.gmra.mxu3 %v14969_v12  ;;  %v13636_v1 = vld [vmem:[%s14794_s24 + $0xb94] sm:$0xf0]  ;;  %v10134_v6 = vor.u32 %v13572_v61, %v10133_v56  ;;  %v10262_v8 = vor.u32 %v13604_v63, %v10261_v62  ;;  %v9989_v9 = vld [vmem:[%s14794_s24 + $0x868] sm:$0xf]  ;;  %v7264_v34 = vadd.f32 %v7263_v5, %v7251_v3 }
 0x299   : > { %7540 = vmatpush.bf16.msra.mxu3 %v10438_v2  ;;  %v13536_v16 = vld [vmem:[%s14794_s24 + $0x874] sm:$0xf0]  ;;  %v10117_v2 = vld [vmem:[%s14794_s24 + $0x968] sm:$0xf]  ;;  %v10390_v21 = vor.u32 %v13636_v1, %v10389_v0 }
 0x29a   : > { %7502 = vmatpush.bf16.msra.mxu0 %v10038_v41  ;;  %v13568_v36 = vld [vmem:[%s14794_s24 + $0x974] sm:$0xf0]  ;;  %v10245_v38 = vld [vmem:[%s14794_s24 + $0xa68] sm:$0xf]  ;;  %v7276_v49 = vpop.f32.mrf.mxu2 }
 0x29b   : > { %7515 = vmatpush.bf16.msra.mxu1 %v10166_v42  ;;  %v13600_v4 = vld [vmem:[%s14794_s24 + $0xa74] sm:$0xf0]  ;;  %v10373_v40 = vld [vmem:[%s14794_s24 + $0xb68] sm:$0xf]  ;;  %v9990_v42 = vor.u32 %v13536_v16, %v9989_v9 }
 0x29c   : > { %7528 = vmatpush.bf16.msra.mxu2 %v10294_v10  ;;  %v13632_v41 = vld [vmem:[%s14794_s24 + $0xb74] sm:$0xf0]  ;;  %v10118_v10 = vor.u32 %v13568_v36, %v10117_v2  ;;  %v10246_v44 = vor.u32 %v13600_v4, %v10245_v38  ;;  %v9973_v45 = vld [vmem:[%s14794_s24 + $0x848] sm:$0xf]  ;;  %v7252_v55 = vpop.f32.mrf.mxu0 }
 0x29d   : > { %7541 = vmatpush.bf16.msra.mxu3 %v10422_v22  ;;  %v13532_v46 = vld [vmem:[%s14794_s24 + $0x854] sm:$0xf0]  ;;  %v10101_v22 = vld [vmem:[%s14794_s24 + $0x948] sm:$0xf]  ;;  %v10374_v47 = vor.u32 %v13632_v41, %v10373_v40 }
 0x29e   : > { %7503 = vmatpush.bf16.msra.mxu0 %v10022_v51  ;;  %v13564_v30 = vld [vmem:[%s14794_s24 + $0x954] sm:$0xf0]  ;;  %v10229_v43 = vld [vmem:[%s14794_s24 + $0xa48] sm:$0xf]  ;;  %v7277_v51 = vadd.f32 %v7276_v49, %v7264_v34  ;;  %v9974_v56 = vor.u32 %v13532_v46, %v9973_v45 }
 0x29f   : > { %7516 = vmatpush.bf16.msra.mxu1 %v10150_v53  ;;  %v13596_v50 = vld [vmem:[%s14794_s24 + $0xa54] sm:$0xf0]  ;;  %v7289_v53 = vpop.f32.mrf.mxu3  ;;  %v10102_v62 = vor.u32 %v13564_v30, %v10101_v22  ;;  %v9957_v52 = vld [vmem:[%s14794_s24 + $0x828] sm:$0xf] }
 0x2a0   : > { %7529 = vmatpush.bf16.msra.mxu2 %v10278_v39  ;;  %v10357_v39 = vld [vmem:[%s14794_s24 + $0xb48] sm:$0xf]  ;;  %v13628_v54 = vld [vmem:[%s14794_s24 + $0xb54] sm:$0xf0]  ;;  %v16171_v61 = vadd.f32 %v7289_v53, %v7277_v51  ;;  %v10230_v63 = vor.u32 %v13596_v50, %v10229_v43 }
 0x2a1   : > { %7542 = vmatpush.bf16.msra.mxu3 %v10406_v17  ;;  %v7265_v17 = vpop.f32.mrf.mxu1  ;;  %v13528_v0 = vld [vmem:[%s14794_s24 + $0x834] sm:$0xf0]  ;;  %v10085_v1 = vld [vmem:[%s14794_s24 + $0x928] sm:$0xf]  ;;  %v10358_v3 = vor.u32 %v13628_v54, %v10357_v39 }
 0x2a2   : > { %7504 = vmatpush.bf16.msra.mxu0 %v10006_v48  ;;  %v13560_v48 = vld [vmem:[%s14794_s24 + $0x934] sm:$0xf0]  ;;  %v10213_v5 = vld [vmem:[%s14794_s24 + $0xa28] sm:$0xf]  ;;  %v9958_v16 = vor.u32 %v13528_v0, %v9957_v52  ;;  %v7278_v45 = vpop.f32.mrf.mxu2 }
 0x2a3   : > { %7517 = vmatpush.bf16.msra.mxu1 %v10134_v6  ;;  %v13592_v6 = vld [vmem:[%s14794_s24 + $0xa34] sm:$0xf0]  ;;  %v9941_v2 = vld [vmem:[%s14794_s24 + $0x808] sm:$0xf]  ;;  %v10086_v34 = vor.u32 %v13560_v48, %v10085_v1 }
 0x2a4   : > { %7530 = vmatpush.bf16.msra.mxu2 %v10262_v8  ;;  %v10341_v8 = vld [vmem:[%s14794_s24 + $0xb28] sm:$0xf]  ;;  %v13624_v9 = vld [vmem:[%s14794_s24 + $0xb34] sm:$0xf0]  ;;  %v10214_v36 = vor.u32 %v13592_v6, %v10213_v5 }
 0x2a5   : > { %7543 = vmatpush.bf16.msra.mxu3 %v10390_v21  ;;  %v13524_v21 = vld [vmem:[%s14794_s24 + $0x814] sm:$0xf0]  ;;  %v10069_v38 = vld [vmem:[%s14794_s24 + $0x908] sm:$0xf]  ;;  %v10342_v41 = vor.u32 %v13624_v9, %v10341_v8 }
 0x2a6   : > { %7505 = vmatpush.bf16.msra.mxu0 %v9990_v42  ;;  %v13556_v4 = vld [vmem:[%s14794_s24 + $0x914] sm:$0xf0]  ;;  %v10197_v40 = vld [vmem:[%s14794_s24 + $0xa08] sm:$0xf]  ;;  %v9942_v30 = vor.u32 %v13524_v21, %v9941_v2 }
 0x2a7   : > { %7518 = vmatpush.bf16.msra.mxu1 %v10118_v10  ;;  %v13588_v42 = vld [vmem:[%s14794_s24 + $0xa14] sm:$0xf0]  ;;  %v10325_v10 = vld [vmem:[%s14794_s24 + $0xb08] sm:$0xf]  ;;  %v7291_v49 = vpop.f32.mrf.mxu3  ;;  %v10070_v53 = vor.u32 %v13556_v4, %v10069_v38 }
 0x2a8   : > { %7531 = vmatpush.bf16.msra.mxu2 %v10246_v44  ;;  %v13620_v44 = vld [vmem:[%s14794_s24 + $0xb14] sm:$0xf0]  ;;  %v10565_v46 = vld [vmem:[%s14794_s24 + $0xce8] sm:$0xf]  ;;  %v10198_v39 = vor.u32 %v13588_v42, %v10197_v40 }
 0x2a9   : > { %7544 = vmatpush.bf16.msra.mxu3 %v10374_v47  ;;  %v13680_v22 = vld [vmem:[%s14794_s24 + $0xcf4] sm:$0xf0]  ;;  %v10693_v47 = vld [vmem:[%s14794_s24 + $0xde8] sm:$0xf] }
 0x2aa   : > { %7506 = vmatpush.bf16.msra.mxu0 %v9974_v56  ;;  %v13712_v43 = vld [vmem:[%s14794_s24 + $0xdf4] sm:$0xf0]  ;;  %v10821_v50 = vld [vmem:[%s14794_s24 + $0xee8] sm:$0xf]  ;;  %v10326_v56 = vor.u32 %v13620_v44, %v10325_v10  ;;  %v10566_v17 = vor.u32 %v13680_v22, %v10565_v46 }
 0x2ab   : > { %7519 = vmatpush.bf16.msra.mxu1 %v10102_v62  ;;  %v13744_v51 = vld [vmem:[%s14794_s24 + $0xef4] sm:$0xf0]  ;;  %v10949_v54 = vld [vmem:[%s14794_s24 + $0xfe8] sm:$0xf]  ;;  %v10694_v62 = vor.u32 %v13712_v43, %v10693_v47 }
 0x2ac   : > { %7532 = vmatpush.bf16.msra.mxu2 %v10230_v63  ;;  %v13776_v55 = vld [vmem:[%s14794_s24 + $0xff4] sm:$0xf0]  ;;  %v10822_v63 = vor.u32 %v13744_v51, %v10821_v50  ;;  %v10549_v52 = vld [vmem:[%s14794_s24 + $0xcc8] sm:$0xf] }
 0x2ad   : > { %7545 = vmatpush.bf16.msra.mxu3 %v10358_v3  ;;  %v13676_v0 = vld [vmem:[%s14794_s24 + $0xcd4] sm:$0xf0]  ;;  %v10677_v1 = vld [vmem:[%s14794_s24 + $0xdc8] sm:$0xf]  ;;  %v10950_v3 = vor.u32 %v13776_v55, %v10949_v54 }
 0x2ae   : > { %7507 = vmatpush.bf16.msra.mxu0 %v9958_v16  ;;  %v13708_v48 = vld [vmem:[%s14794_s24 + $0xdd4] sm:$0xf0]  ;;  %v10805_v5 = vld [vmem:[%s14794_s24 + $0xec8] sm:$0xf]  ;;  %v10550_v16 = vor.u32 %v13676_v0, %v10549_v52 }
 0x2af   : > { %7520 = vmatpush.bf16.msra.mxu1 %v10086_v34  ;;  %v13740_v6 = vld [vmem:[%s14794_s24 + $0xed4] sm:$0xf0]  ;;  %v10933_v8 = vld [vmem:[%s14794_s24 + $0xfc8] sm:$0xf]  ;;  %v10678_v2 = vor.u32 %v13708_v48, %v10677_v1 }
 0x2b0   : > { %7533 = vmatpush.bf16.msra.mxu2 %v10214_v36  ;;  %v13772_v9 = vld [vmem:[%s14794_s24 + $0xfd4] sm:$0xf0]  ;;  %v10806_v21 = vor.u32 %v13740_v6, %v10805_v5  ;;  %v10533_v34 = vld [vmem:[%s14794_s24 + $0xca8] sm:$0xf] }
 0x2b1   : > { %7546 = vmatpush.bf16.msra.mxu3 %v10342_v41  ;;  %v13672_v36 = vld [vmem:[%s14794_s24 + $0xcb4] sm:$0xf0]  ;;  %v10661_v38 = vld [vmem:[%s14794_s24 + $0xda8] sm:$0xf]  ;;  %v10934_v4 = vor.u32 %v13772_v9, %v10933_v8 }
 0x2b2   : > { %7508 = vmatpush.bf16.msra.mxu0 %v9942_v30  ;;  %v13704_v40 = vld [vmem:[%s14794_s24 + $0xdb4] sm:$0xf0]  ;;  %v10789_v41 = vld [vmem:[%s14794_s24 + $0xea8] sm:$0xf]  ;;  %v10534_v45 = vor.u32 %v13672_v36, %v10533_v34 }
 0x2b3   : > { %7521 = vmatpush.bf16.msra.mxu1 %v10070_v53  ;;  %v13736_v42 = vld [vmem:[%s14794_s24 + $0xeb4] sm:$0xf0]  ;;  %v10917_v10 = vld [vmem:[%s14794_s24 + $0xfa8] sm:$0xf]  ;;  %v10662_v46 = vor.u32 %v13704_v40, %v10661_v38 }
 0x2b4   : > { %7534 = vmatpush.bf16.msra.mxu2 %v10198_v39  ;;  %v13768_v44 = vld [vmem:[%s14794_s24 + $0xfb4] sm:$0xf0]  ;;  %v10790_v22 = vor.u32 %v13736_v42, %v10789_v41  ;;  %v10517_v47 = vld [vmem:[%s14794_s24 + $0xc88] sm:$0xf] }
 0x2b5   : > { %7547 = vmatpush.bf16.msra.mxu3 %v10326_v56  ;;  %7509 = vmatmul.bf16.vlgmr.msra.gmra.mxu0 %v15057_v23  ;;  %v13668_v49 = vld [vmem:[%s14794_s24 + $0xc94] sm:$0xf0]  ;;  %v10645_v30 = vld [vmem:[%s14794_s24 + $0xd88] sm:$0xf]  ;;  %v10918_v43 = vor.u32 %v13768_v44, %v10917_v10  ;;  %v7302_v39 = vpop.f32.mrf.mxu0 }
 0x2b6   : > { %7553 = vmatpush.bf16.msrb.mxu0 %v10566_v17  ;;  %7522 = vmatmul.bf16.vlgmr.msra.gmra.mxu1 %v15063_v27  ;;  %v13700_v50 = vld [vmem:[%s14794_s24 + $0xd94] sm:$0xf0]  ;;  %v10773_v51 = vld [vmem:[%s14794_s24 + $0xe88] sm:$0xf]  ;;  %v7303_v56 = vadd.f32 %v7302_v39, %v16171_v61  ;;  %v10518_v17 = vor.u32 %v13668_v49, %v10517_v47 }
 0x2b7   : > { %7566 = vmatpush.bf16.msrb.mxu1 %v10694_v62  ;;  %7535 = vmatmul.bf16.vlgmr.msra.gmra.mxu2 %v15061_v26  ;;  %v13732_v53 = vld [vmem:[%s14794_s24 + $0xe94] sm:$0xf0]  ;;  %v10901_v54 = vld [vmem:[%s14794_s24 + $0xf88] sm:$0xf]  ;;  %v7315_v62 = vpop.f32.mrf.mxu1 }
 0x2b8   : > { %7579 = vmatpush.bf16.msrb.mxu2 %v10822_v63  ;;  %7548 = vmatmul.bf16.vlgmr.msra.gmra.mxu3 %v15065_v28  ;;  %v13764_v55 = vld [vmem:[%s14794_s24 + $0xf94] sm:$0xf0]  ;;  %v10646_v63 = vor.u32 %v13700_v50, %v10645_v30  ;;  %v10774_v52 = vor.u32 %v13732_v53, %v10773_v51  ;;  %v10501_v0 = vld [vmem:[%s14794_s24 + $0xc68] sm:$0xf]  ;;  %v7316_v5 = vadd.f32 %v7315_v62, %v7303_v56 }
 0x2b9   : > { %7592 = vmatpush.bf16.msrb.mxu3 %v10950_v3  ;;  %v13664_v1 = vld [vmem:[%s14794_s24 + $0xc74] sm:$0xf0]  ;;  %v10629_v3 = vld [vmem:[%s14794_s24 + $0xd68] sm:$0xf]  ;;  %v10902_v48 = vor.u32 %v13764_v55, %v10901_v54 }
 0x2ba   : > { %7554 = vmatpush.bf16.msrb.mxu0 %v10550_v16  ;;  %v13696_v6 = vld [vmem:[%s14794_s24 + $0xd74] sm:$0xf0]  ;;  %v10757_v8 = vld [vmem:[%s14794_s24 + $0xe68] sm:$0xf] }
 0x2bb   : > { %7567 = vmatpush.bf16.msrb.mxu1 %v10678_v2  ;;  %v13728_v61 = vld [vmem:[%s14794_s24 + $0xe74] sm:$0xf0]  ;;  %v10885_v9 = vld [vmem:[%s14794_s24 + $0xf68] sm:$0xf]  ;;  %v10502_v2 = vor.u32 %v13664_v1, %v10501_v0 }
 0x2bc   : > { %7580 = vmatpush.bf16.msrb.mxu2 %v10806_v21  ;;  %v13760_v16 = vld [vmem:[%s14794_s24 + $0xf74] sm:$0xf0]  ;;  %v10630_v21 = vor.u32 %v13696_v6, %v10629_v3  ;;  %v10758_v34 = vor.u32 %v13728_v61, %v10757_v8  ;;  %v10485_v36 = vld [vmem:[%s14794_s24 + $0xc48] sm:$0xf]  ;;  %v7328_v41 = vpop.f32.mrf.mxu2 }
 0x2bd   : > { %7593 = vmatpush.bf16.msrb.mxu3 %v10934_v4  ;;  %v13660_v38 = vld [vmem:[%s14794_s24 + $0xc54] sm:$0xf0]  ;;  %v10613_v4 = vld [vmem:[%s14794_s24 + $0xd48] sm:$0xf]  ;;  %v10886_v40 = vor.u32 %v13760_v16, %v10885_v9  ;;  %v7304_v49 = vpop.f32.mrf.mxu0 }
 0x2be   : > { %7555 = vmatpush.bf16.msrb.mxu0 %v10534_v45  ;;  %v13692_v42 = vld [vmem:[%s14794_s24 + $0xd54] sm:$0xf0]  ;;  %v10741_v10 = vld [vmem:[%s14794_s24 + $0xe48] sm:$0xf]  ;;  %v7329_v45 = vadd.f32 %v7328_v41, %v7316_v5  ;;  %v10486_v30 = vor.u32 %v13660_v38, %v10485_v36 }
 0x2bf   : > { %7568 = vmatpush.bf16.msrb.mxu1 %v10662_v46  ;;  %v13724_v44 = vld [vmem:[%s14794_s24 + $0xe54] sm:$0xf0]  ;;  %v7341_v46 = vpop.f32.mrf.mxu3  ;;  %v10614_v51 = vor.u32 %v13692_v42, %v10613_v4  ;;  %v10469_v39 = vld [vmem:[%s14794_s24 + $0xc28] sm:$0xf] }
 0x2c0   : > { %7581 = vmatpush.bf16.msrb.mxu2 %v10790_v22  ;;  %v10869_v22 = vld [vmem:[%s14794_s24 + $0xf48] sm:$0xf]  ;;  %v13756_v47 = vld [vmem:[%s14794_s24 + $0xf54] sm:$0xf0]  ;;  %v16242_v50 = vadd.f32 %v7341_v46, %v7329_v45  ;;  %v10742_v53 = vor.u32 %v13724_v44, %v10741_v10 }
 0x2c1   : > { %7594 = vmatpush.bf16.msrb.mxu3 %v10918_v43  ;;  %v7317_v43 = vpop.f32.mrf.mxu1  ;;  %v13656_v54 = vld [vmem:[%s14794_s24 + $0xc34] sm:$0xf0]  ;;  %v10597_v55 = vld [vmem:[%s14794_s24 + $0xd28] sm:$0xf]  ;;  %v10870_v56 = vor.u32 %v13756_v47, %v10869_v22 }
 0x2c2   : > { %7556 = vmatpush.bf16.msrb.mxu0 %v10518_v17  ;;  %v13688_v17 = vld [vmem:[%s14794_s24 + $0xd34] sm:$0xf0]  ;;  %v10725_v62 = vld [vmem:[%s14794_s24 + $0xe28] sm:$0xf]  ;;  %v10470_v1 = vor.u32 %v13656_v54, %v10469_v39 }
 0x2c3   : > { %7569 = vmatpush.bf16.msrb.mxu1 %v10646_v63  ;;  %v13720_v63 = vld [vmem:[%s14794_s24 + $0xe34] sm:$0xf0]  ;;  %v10453_v3 = vld [vmem:[%s14794_s24 + $0xc08] sm:$0xf]  ;;  %v10598_v5 = vor.u32 %v13688_v17, %v10597_v55 }
 0x2c4   : > { %7582 = vmatpush.bf16.msrb.mxu2 %v10774_v52  ;;  %v10853_v52 = vld [vmem:[%s14794_s24 + $0xf28] sm:$0xf]  ;;  %v13752_v0 = vld [vmem:[%s14794_s24 + $0xf34] sm:$0xf0]  ;;  %v10726_v6 = vor.u32 %v13720_v63, %v10725_v62  ;;  %v7330_v36 = vpop.f32.mrf.mxu2 }
 0x2c5   : > { %7595 = vmatpush.bf16.msrb.mxu3 %v10902_v48  ;;  %v13652_v48 = vld [vmem:[%s14794_s24 + $0xc14] sm:$0xf0]  ;;  %v10581_v8 = vld [vmem:[%s14794_s24 + $0xd08] sm:$0xf]  ;;  %v10854_v16 = vor.u32 %v13752_v0, %v10853_v52 }
 0x2c6   : > { %7557 = vmatpush.bf16.msrb.mxu0 %v10502_v2  ;;  %v13684_v61 = vld [vmem:[%s14794_s24 + $0xd14] sm:$0xf0]  ;;  %v10709_v9 = vld [vmem:[%s14794_s24 + $0xe08] sm:$0xf]  ;;  %v10454_v42 = vor.u32 %v13652_v48, %v10453_v3 }
 0x2c7   : > { %7570 = vmatpush.bf16.msrb.mxu1 %v10630_v21  ;;  %v13716_v2 = vld [vmem:[%s14794_s24 + $0xe14] sm:$0xf0]  ;;  %v10837_v21 = vld [vmem:[%s14794_s24 + $0xf08] sm:$0xf]  ;;  %v7343_v41 = vpop.f32.mrf.mxu3  ;;  %v10582_v46 = vor.u32 %v13684_v61, %v10581_v8 }
 0x2c8   : > { %7583 = vmatpush.bf16.msrb.mxu2 %v10758_v34  ;;  %v13748_v34 = vld [vmem:[%s14794_s24 + $0xf14] sm:$0xf0]  ;;  %v11077_v38 = vld [vmem:[%s14794_s24 + $0x10e8] sm:$0xf]  ;;  %v10710_v22 = vor.u32 %v13716_v2, %v10709_v9 }
 0x2c9   : > { %7596 = vmatpush.bf16.msrb.mxu3 %v10886_v40  ;;  %v13808_v4 = vld [vmem:[%s14794_s24 + $0x10f4] sm:$0xf0]  ;;  %v11205_v40 = vld [vmem:[%s14794_s24 + $0x11e8] sm:$0xf] }
 0x2ca   : > { %7558 = vmatpush.bf16.msrb.mxu0 %v10486_v30  ;;  %v13840_v10 = vld [vmem:[%s14794_s24 + $0x11f4] sm:$0xf0]  ;;  %v11333_v44 = vld [vmem:[%s14794_s24 + $0x12e8] sm:$0xf]  ;;  %v10838_v30 = vor.u32 %v13748_v34, %v10837_v21  ;;  %v11078_v43 = vor.u32 %v13808_v4, %v11077_v38 }
 0x2cb   : > { %7571 = vmatpush.bf16.msrb.mxu1 %v10614_v51  ;;  %v13872_v45 = vld [vmem:[%s14794_s24 + $0x12f4] sm:$0xf0]  ;;  %v11461_v47 = vld [vmem:[%s14794_s24 + $0x13e8] sm:$0xf]  ;;  %v11206_v51 = vor.u32 %v13840_v10, %v11205_v40 }
 0x2cc   : > { %7584 = vmatpush.bf16.msrb.mxu2 %v10742_v53  ;;  %v13904_v49 = vld [vmem:[%s14794_s24 + $0x13f4] sm:$0xf0]  ;;  %v11334_v53 = vor.u32 %v13872_v45, %v11333_v44  ;;  %v11061_v39 = vld [vmem:[%s14794_s24 + $0x10c8] sm:$0xf] }
 0x2cd   : > { %7597 = vmatpush.bf16.msrb.mxu3 %v10870_v56  ;;  %v13804_v54 = vld [vmem:[%s14794_s24 + $0x10d4] sm:$0xf0]  ;;  %v11189_v55 = vld [vmem:[%s14794_s24 + $0x11c8] sm:$0xf]  ;;  %v11462_v56 = vor.u32 %v13904_v49, %v11461_v47 }
 0x2ce   : > { %7559 = vmatpush.bf16.msrb.mxu0 %v10470_v1  ;;  %v13836_v17 = vld [vmem:[%s14794_s24 + $0x11d4] sm:$0xf0]  ;;  %v11317_v62 = vld [vmem:[%s14794_s24 + $0x12c8] sm:$0xf]  ;;  %v11062_v1 = vor.u32 %v13804_v54, %v11061_v39 }
 0x2cf   : > { %7572 = vmatpush.bf16.msrb.mxu1 %v10598_v5  ;;  %v13868_v63 = vld [vmem:[%s14794_s24 + $0x12d4] sm:$0xf0]  ;;  %v11445_v52 = vld [vmem:[%s14794_s24 + $0x13c8] sm:$0xf]  ;;  %v11190_v3 = vor.u32 %v13836_v17, %v11189_v55 }
 0x2d0   : > { %7585 = vmatpush.bf16.msrb.mxu2 %v10726_v6  ;;  %v13900_v0 = vld [vmem:[%s14794_s24 + $0x13d4] sm:$0xf0]  ;;  %v11318_v48 = vor.u32 %v13868_v63, %v11317_v62  ;;  %v11045_v5 = vld [vmem:[%s14794_s24 + $0x10a8] sm:$0xf] }
 0x2d1   : > { %7598 = vmatpush.bf16.msrb.mxu3 %v10854_v16  ;;  %v13800_v6 = vld [vmem:[%s14794_s24 + $0x10b4] sm:$0xf0]  ;;  %v11173_v8 = vld [vmem:[%s14794_s24 + $0x11a8] sm:$0xf]  ;;  %v11446_v61 = vor.u32 %v13900_v0, %v11445_v52 }
 0x2d2   : > { %7560 = vmatpush.bf16.msrb.mxu0 %v10454_v42  ;;  %v13832_v9 = vld [vmem:[%s14794_s24 + $0x11b4] sm:$0xf0]  ;;  %v11301_v16 = vld [vmem:[%s14794_s24 + $0x12a8] sm:$0xf]  ;;  %v11046_v36 = vor.u32 %v13800_v6, %v11045_v5 }
 0x2d3   : > { %7573 = vmatpush.bf16.msrb.mxu1 %v10582_v46  ;;  %v13864_v2 = vld [vmem:[%s14794_s24 + $0x12b4] sm:$0xf0]  ;;  %v11429_v21 = vld [vmem:[%s14794_s24 + $0x13a8] sm:$0xf]  ;;  %v11174_v38 = vor.u32 %v13832_v9, %v11173_v8 }
 0x2d4   : > { %7586 = vmatpush.bf16.msrb.mxu2 %v10710_v22  ;;  %v13896_v34 = vld [vmem:[%s14794_s24 + $0x13b4] sm:$0xf0]  ;;  %v11302_v4 = vor.u32 %v13864_v2, %v11301_v16  ;;  %v11029_v40 = vld [vmem:[%s14794_s24 + $0x1088] sm:$0xf]  ;;  %v7354_v22 = vpop.f32.mrf.mxu0 }
 0x2d5   : > { %7599 = vmatpush.bf16.msrb.mxu3 %v10838_v30  ;;  %7561 = vmatmul.bf16.vlgmr.msrb.gmra.mxu0 %v15123_v57  ;;  %v13796_v41 = vld [vmem:[%s14794_s24 + $0x1094] sm:$0xf0]  ;;  %v11157_v42 = vld [vmem:[%s14794_s24 + $0x1188] sm:$0xf]  ;;  %v11430_v10 = vor.u32 %v13896_v34, %v11429_v21  ;;  %v7355_v30 = vadd.f32 %v7354_v22, %v16242_v50 }
 0x2d6   : > { %7605 = vmatpush.bf16.msra.mxu0 %v11078_v43  ;;  %7574 = vmatmul.bf16.vlgmr.msrb.gmra.mxu1 %v15127_v59  ;;  %v13828_v44 = vld [vmem:[%s14794_s24 + $0x1194] sm:$0xf0]  ;;  %v11285_v45 = vld [vmem:[%s14794_s24 + $0x1288] sm:$0xf]  ;;  %v11030_v43 = vor.u32 %v13796_v41, %v11029_v40 }
 0x2d7   : > { %7618 = vmatpush.bf16.msra.mxu1 %v11206_v51  ;;  %7587 = vmatmul.bf16.vlgmr.msrb.gmra.mxu2 %v15125_v58  ;;  %v13860_v46 = vld [vmem:[%s14794_s24 + $0x1294] sm:$0xf0]  ;;  %v11413_v47 = vld [vmem:[%s14794_s24 + $0x1388] sm:$0xf]  ;;  %v7367_v51 = vpop.f32.mrf.mxu1 }
 0x2d8   : > { %7631 = vmatpush.bf16.msra.mxu2 %v11334_v53  ;;  %7600 = vmatmul.bf16.vlgmr.msrb.gmra.mxu3 %v15129_v60  ;;  %v13892_v49 = vld [vmem:[%s14794_s24 + $0x1394] sm:$0xf0]  ;;  %v11158_v53 = vor.u32 %v13828_v44, %v11157_v42  ;;  %v11286_v39 = vor.u32 %v13860_v46, %v11285_v45  ;;  %v11013_v54 = vld [vmem:[%s14794_s24 + $0x1068] sm:$0xf]  ;;  %v7368_v62 = vadd.f32 %v7367_v51, %v7355_v30 }
 0x2d9   : > { %7644 = vmatpush.bf16.msra.mxu3 %v11462_v56  ;;  %v13792_v55 = vld [vmem:[%s14794_s24 + $0x1074] sm:$0xf0]  ;;  %v11141_v56 = vld [vmem:[%s14794_s24 + $0x1168] sm:$0xf]  ;;  %v11414_v17 = vor.u32 %v13892_v49, %v11413_v47 }
 0x2da   : > { %7606 = vmatpush.bf16.msra.mxu0 %v11062_v1  ;;  %v13824_v63 = vld [vmem:[%s14794_s24 + $0x1174] sm:$0xf0]  ;;  %v11269_v52 = vld [vmem:[%s14794_s24 + $0x1268] sm:$0xf]  ;;  %v7380_v16 = vpop.f32.mrf.mxu2 }
 0x2db   : > { %7619 = vmatpush.bf16.msra.mxu1 %v11190_v3  ;;  %v13856_v50 = vld [vmem:[%s14794_s24 + $0x1274] sm:$0xf0]  ;;  %v11397_v0 = vld [vmem:[%s14794_s24 + $0x1368] sm:$0xf]  ;;  %v11014_v3 = vor.u32 %v13792_v55, %v11013_v54 }
 0x2dc   : > { %7632 = vmatpush.bf16.msra.mxu2 %v11318_v48  ;;  %v13888_v1 = vld [vmem:[%s14794_s24 + $0x1374] sm:$0xf0]  ;;  %v11142_v48 = vor.u32 %v13824_v63, %v11141_v56  ;;  %v11270_v5 = vor.u32 %v13856_v50, %v11269_v52  ;;  %v10997_v6 = vld [vmem:[%s14794_s24 + $0x1048] sm:$0xf]  ;;  %v7356_v41 = vpop.f32.mrf.mxu0 }
 0x2dd   : > { %7645 = vmatpush.bf16.msra.mxu3 %v11446_v61  ;;  %v13788_v8 = vld [vmem:[%s14794_s24 + $0x1054] sm:$0xf0]  ;;  %v11125_v61 = vld [vmem:[%s14794_s24 + $0x1148] sm:$0xf]  ;;  %v11398_v9 = vor.u32 %v13888_v1, %v11397_v0 }
 0x2de   : > { %7607 = vmatpush.bf16.msra.mxu0 %v11046_v36  ;;  %v13820_v2 = vld [vmem:[%s14794_s24 + $0x1154] sm:$0xf0]  ;;  %v11253_v21 = vld [vmem:[%s14794_s24 + $0x1248] sm:$0xf]  ;;  %v7381_v36 = vadd.f32 %v7380_v16, %v7368_v62  ;;  %v10998_v42 = vor.u32 %v13788_v8, %v10997_v6 }
 0x2df   : > { %7620 = vmatpush.bf16.msra.mxu1 %v11174_v38  ;;  %v13852_v34 = vld [vmem:[%s14794_s24 + $0x1254] sm:$0xf0]  ;;  %v7393_v38 = vpop.f32.mrf.mxu3  ;;  %v11126_v45 = vor.u32 %v13820_v2, %v11125_v61  ;;  %v10981_v22 = vld [vmem:[%s14794_s24 + $0x1028] sm:$0xf] }
 0x2e0   : > { %7633 = vmatpush.bf16.msra.mxu2 %v11302_v4  ;;  %v11381_v4 = vld [vmem:[%s14794_s24 + $0x1348] sm:$0xf]  ;;  %v13884_v40 = vld [vmem:[%s14794_s24 + $0x1354] sm:$0xf0]  ;;  %v7394_v44 = vadd.f32 %v7393_v38, %v7381_v36  ;;  %v11254_v46 = vor.u32 %v13852_v34, %v11253_v21 }
 0x2e1   : > { %7646 = vmatpush.bf16.msra.mxu3 %v11430_v10  ;;  %v7369_v10 = vpop.f32.mrf.mxu1  ;;  %v13784_v47 = vld [vmem:[%s14794_s24 + $0x1034] sm:$0xf0]  ;;  %v11109_v49 = vld [vmem:[%s14794_s24 + $0x1128] sm:$0xf]  ;;  %v11382_v30 = vor.u32 %v13884_v40, %v11381_v4 }
 0x2e2   : > { %7608 = vmatpush.bf16.msra.mxu0 %v11030_v43  ;;  %v13816_v43 = vld [vmem:[%s14794_s24 + $0x1134] sm:$0xf0]  ;;  %v11237_v51 = vld [vmem:[%s14794_s24 + $0x1228] sm:$0xf]  ;;  %v10982_v56 = vor.u32 %v13784_v47, %v10981_v22 }
 0x2e3   : > { %7621 = vmatpush.bf16.msra.mxu1 %v11158_v53  ;;  %v13848_v53 = vld [vmem:[%s14794_s24 + $0x1234] sm:$0xf0]  ;;  %v11365_v54 = vld [vmem:[%s14794_s24 + $0x1328] sm:$0xf]  ;;  %v11110_v52 = vor.u32 %v13816_v43, %v11109_v49 }
 0x2e4   : > { %7634 = vmatpush.bf16.msra.mxu2 %v11286_v39  ;;  %v8233_v39 = vrot.slane %v7394_v44, 6  ;;  %v13880_v55 = vld [vmem:[%s14794_s24 + $0x1334] sm:$0xf0]  ;;  %v11238_v50 = vor.u32 %v13848_v53, %v11237_v51  ;;  %v11093_v0 = vld [vmem:[%s14794_s24 + $0x1108] sm:$0xf] }
 0x2e5   : > { %7647 = vmatpush.bf16.msra.mxu3 %v11414_v17  ;;  %v10965_v17 = vld [vmem:[%s14794_s24 + $0x1008] sm:$0xf]  ;;  %v13780_v62 = vld [vmem:[%s14794_s24 + $0x1014] sm:$0xf0] }
 0x2e6   : > { %7609 = vmatpush.bf16.msra.mxu0 %v11014_v3  ;;  %v16325_v63 = vsel %vm8236_vm3, %v15754_v35, %v8233_v39  ;;  %v13812_v1 = vld [vmem:[%s14794_s24 + $0x1114] sm:$0xf0]  ;;  %v11221_v3 = vld [vmem:[%s14794_s24 + $0x1208] sm:$0xf]  ;;  %v7382_v35 = vpop.f32.mrf.mxu2  ;;  %v10966_v21 = vor.u32 %v13780_v62, %v10965_v17 }
 0x2e7   : > { %7622 = vmatpush.bf16.msra.mxu1 %v11142_v48  ;;  %v11366_v48 = vor.u32 %v13880_v55, %v11365_v54  ;;  %v11349_v6 = vld [vmem:[%s14794_s24 + $0x1308] sm:$0xf]  ;;  %v13876_v8 = vld [vmem:[%s14794_s24 + $0x1314] sm:$0xf0]  ;;  %v7395_v2 = vpop.f32.mrf.mxu3  ;;  %v11094_v4 = vor.u32 %v13812_v1, %v11093_v0 }
 0x2e8   : > { %7635 = vmatpush.bf16.msra.mxu2 %v11270_v5  ;;  %v13844_v5 = vld [vmem:[%s14794_s24 + $0x1214] sm:$0xf0]  ;;  %v11589_v61 = vld [vmem:[%s14794_s24 + $0x14e8] sm:$0xf]  ;;  %v11350_v10 = vor.u32 %v13876_v8, %v11349_v6 }
 0x2e9   : > { %7648 = vmatpush.bf16.msra.mxu3 %v11398_v9  ;;  %v13936_v9 = vld [vmem:[%s14794_s24 + $0x14f4] sm:$0xf0]  ;;  %v11717_v16 = vld [vmem:[%s14794_s24 + $0x15e8] sm:$0xf]  ;;  %v11222_v40 = vor.u32 %v13844_v5, %v11221_v3 }
 0x2ea   : > { %7610 = vmatpush.bf16.msra.mxu0 %v10998_v42  ;;  %v13968_v34 = vld [vmem:[%s14794_s24 + $0x15f4] sm:$0xf0]  ;;  %v11845_v36 = vld [vmem:[%s14794_s24 + $0x16e8] sm:$0xf]  ;;  %v11590_v44 = vor.u32 %v13936_v9, %v11589_v61 }
 0x2eb   : > { %7623 = vmatpush.bf16.msra.mxu1 %v11126_v45  ;;  %v14000_v38 = vld [vmem:[%s14794_s24 + $0x16f4] sm:$0xf0]  ;;  %v11973_v41 = vld [vmem:[%s14794_s24 + $0x17e8] sm:$0xf]  ;;  %v11718_v45 = vor.u32 %v13968_v34, %v11717_v16 }
 0x2ec   : > { %7636 = vmatpush.bf16.msra.mxu2 %v11254_v46  ;;  %v14032_v42 = vld [vmem:[%s14794_s24 + $0x17f4] sm:$0xf0]  ;;  %v11846_v46 = vor.u32 %v14000_v38, %v11845_v36  ;;  %v11573_v22 = vld [vmem:[%s14794_s24 + $0x14c8] sm:$0xf] }
 0x2ed   : > { %7649 = vmatpush.bf16.msra.mxu3 %v11382_v30  ;;  %v13932_v47 = vld [vmem:[%s14794_s24 + $0x14d4] sm:$0xf0]  ;;  %v11701_v49 = vld [vmem:[%s14794_s24 + $0x15c8] sm:$0xf]  ;;  %v11974_v30 = vor.u32 %v14032_v42, %v11973_v41 }
 0x2ee   : > { %7611 = vmatpush.bf16.msra.mxu0 %v10982_v56  ;;  %v13964_v43 = vld [vmem:[%s14794_s24 + $0x15d4] sm:$0xf0]  ;;  %v11829_v51 = vld [vmem:[%s14794_s24 + $0x16c8] sm:$0xf]  ;;  %v11574_v55 = vor.u32 %v13932_v47, %v11573_v22 }
 0x2ef   : > { %7624 = vmatpush.bf16.msra.mxu1 %v11110_v52  ;;  %v13996_v53 = vld [vmem:[%s14794_s24 + $0x16d4] sm:$0xf0]  ;;  %v11957_v39 = vld [vmem:[%s14794_s24 + $0x17c8] sm:$0xf]  ;;  %v11702_v56 = vor.u32 %v13964_v43, %v11701_v49 }
 0x2f0   : > { %7637 = vmatpush.bf16.msra.mxu2 %v11238_v50  ;;  %v14028_v54 = vld [vmem:[%s14794_s24 + $0x17d4] sm:$0xf0]  ;;  %v11830_v17 = vor.u32 %v13996_v53, %v11829_v51  ;;  %v11557_v62 = vld [vmem:[%s14794_s24 + $0x14a8] sm:$0xf] }
 0x2f1   : > { %7650 = vmatpush.bf16.msra.mxu3 %v11366_v48  ;;  %v13928_v52 = vld [vmem:[%s14794_s24 + $0x14b4] sm:$0xf0]  ;;  %v11685_v50 = vld [vmem:[%s14794_s24 + $0x15a8] sm:$0xf]  ;;  %v11958_v0 = vor.u32 %v14028_v54, %v11957_v39 }
 0x2f2   : > { %7612 = vmatpush.bf16.msra.mxu0 %v10966_v21  ;;  %v13960_v1 = vld [vmem:[%s14794_s24 + $0x15b4] sm:$0xf0]  ;;  %v11813_v3 = vld [vmem:[%s14794_s24 + $0x16a8] sm:$0xf]  ;;  %v11558_v8 = vor.u32 %v13928_v52, %v11557_v62  ;;  %v7406_v42 = vpop.f32.mrf.mxu0 }
 0x2f3   : > { %7625 = vmatpush.bf16.msra.mxu1 %v11094_v4  ;;  %v13992_v48 = vld [vmem:[%s14794_s24 + $0x16b4] sm:$0xf0]  ;;  %v11941_v5 = vld [vmem:[%s14794_s24 + $0x17a8] sm:$0xf]  ;;  %v11686_v35 = vor.u32 %v13960_v1, %v11685_v50  ;;  %v7419_v47 = vpop.f32.mrf.mxu1 }
 0x2f4   : > { %7638 = vmatpush.bf16.msra.mxu2 %v11222_v40  ;;  %v14024_v6 = vld [vmem:[%s14794_s24 + $0x17b4] sm:$0xf0]  ;;  %v11814_v61 = vor.u32 %v13992_v48, %v11813_v3  ;;  %v11541_v9 = vld [vmem:[%s14794_s24 + $0x1488] sm:$0xf]  ;;  %v7420_v53 = vadd.f32 %v7419_v47, %v7406_v42 }
 0x2f5   : > { %7651 = vmatpush.bf16.msra.mxu3 %v11350_v10  ;;  %7613 = vmatmul.bf16.vlgmr.msra.gmra.mxu0 %v15210_v20  ;;  %v13924_v16 = vld [vmem:[%s14794_s24 + $0x1494] sm:$0xf0]  ;;  %v11669_v2 = vld [vmem:[%s14794_s24 + $0x1588] sm:$0xf]  ;;  %v11942_v21 = vor.u32 %v14024_v6, %v11941_v5 }
 0x2f6   : > { %7657 = vmatpush.bf16.msrb.mxu0 %v11590_v44  ;;  %7626 = vmatmul.bf16.vlgmr.msra.gmra.mxu1 %v15216_v25  ;;  %v13956_v34 = vld [vmem:[%s14794_s24 + $0x1594] sm:$0xf0]  ;;  %v11797_v36 = vld [vmem:[%s14794_s24 + $0x1688] sm:$0xf]  ;;  %v11542_v41 = vor.u32 %v13924_v16, %v11541_v9 }
 0x2f7   : > { %7670 = vmatpush.bf16.msrb.mxu1 %v11718_v45  ;;  %7639 = vmatmul.bf16.vlgmr.msra.gmra.mxu2 %v15214_v24  ;;  %v13988_v38 = vld [vmem:[%s14794_s24 + $0x1694] sm:$0xf0]  ;;  %v11925_v4 = vld [vmem:[%s14794_s24 + $0x1788] sm:$0xf]  ;;  %v11670_v10 = vor.u32 %v13956_v34, %v11669_v2 }
 0x2f8   : > { %7683 = vmatpush.bf16.msrb.mxu2 %v11846_v46  ;;  %7652 = vmatmul.bf16.vlgmr.msra.gmra.mxu3 %v15218_v29  ;;  %v14020_v40 = vld [vmem:[%s14794_s24 + $0x1794] sm:$0xf0]  ;;  %v11798_v44 = vor.u32 %v13988_v38, %v11797_v36  ;;  %v11525_v45 = vld [vmem:[%s14794_s24 + $0x1468] sm:$0xf] }
 0x2f9   : > { %7696 = vmatpush.bf16.msrb.mxu3 %v11974_v30  ;;  %v13920_v46 = vld [vmem:[%s14794_s24 + $0x1474] sm:$0xf0]  ;;  %v11653_v22 = vld [vmem:[%s14794_s24 + $0x1568] sm:$0xf]  ;;  %v11926_v49 = vor.u32 %v14020_v40, %v11925_v4 }
 0x2fa   : > { %7658 = vmatpush.bf16.msrb.mxu0 %v11574_v55  ;;  %v13952_v30 = vld [vmem:[%s14794_s24 + $0x1574] sm:$0xf0]  ;;  %v11781_v43 = vld [vmem:[%s14794_s24 + $0x1668] sm:$0xf]  ;;  %v11526_v55 = vor.u32 %v13920_v46, %v11525_v45  ;;  %v7408_v2 = vpop.f32.mrf.mxu0 }
 0x2fb   : > { %7671 = vmatpush.bf16.msrb.mxu1 %v11702_v56  ;;  %v13984_v51 = vld [vmem:[%s14794_s24 + $0x1674] sm:$0xf0]  ;;  %v11909_v39 = vld [vmem:[%s14794_s24 + $0x1768] sm:$0xf]  ;;  %v11654_v56 = vor.u32 %v13952_v30, %v11653_v22  ;;  %v7421_v40 = vpop.f32.mrf.mxu1 }
 0x2fc   : > { %7684 = vmatpush.bf16.msrb.mxu2 %v11830_v17  ;;  %v14016_v54 = vld [vmem:[%s14794_s24 + $0x1774] sm:$0xf0]  ;;  %v11782_v17 = vor.u32 %v13984_v51, %v11781_v43  ;;  %v11509_v62 = vld [vmem:[%s14794_s24 + $0x1448] sm:$0xf] }
 0x2fd   : > { %7697 = vmatpush.bf16.msrb.mxu3 %v11958_v0  ;;  %v13916_v52 = vld [vmem:[%s14794_s24 + $0x1454] sm:$0xf0]  ;;  %v11637_v50 = vld [vmem:[%s14794_s24 + $0x1548] sm:$0xf]  ;;  %v7432_v0 = vpop.f32.mrf.mxu2  ;;  %v11910_v1 = vor.u32 %v14016_v54, %v11909_v39 }
 0x2fe   : > { %7659 = vmatpush.bf16.msrb.mxu0 %v11558_v8  ;;  %v13948_v3 = vld [vmem:[%s14794_s24 + $0x1554] sm:$0xf0]  ;;  %v11765_v48 = vld [vmem:[%s14794_s24 + $0x1648] sm:$0xf]  ;;  %v7433_v6 = vadd.f32 %v7432_v0, %v7420_v53  ;;  %v7445_v8 = vpop.f32.mrf.mxu3  ;;  %v11510_v9 = vor.u32 %v13916_v52, %v11509_v62 }
 0x2ff   : > { %7672 = vmatpush.bf16.msrb.mxu1 %v11686_v35  ;;  %v13980_v5 = vld [vmem:[%s14794_s24 + $0x1654] sm:$0xf0]  ;;  %v11893_v35 = vld [vmem:[%s14794_s24 + $0x1748] sm:$0xf] }
 0x300   : > { %7685 = vmatpush.bf16.msrb.mxu2 %v11814_v61  ;;  %v14012_v61 = vld [vmem:[%s14794_s24 + $0x1754] sm:$0xf0]  ;;  %v16385_v16 = vadd.f32 %v7445_v8, %v7433_v6  ;;  %v11766_v34 = vor.u32 %v13980_v5, %v11765_v48  ;;  %v11493_v36 = vld [vmem:[%s14794_s24 + $0x1428] sm:$0xf] }
 0x301   : > { %7698 = vmatpush.bf16.msrb.mxu3 %v11942_v21  ;;  %v11638_v21 = vor.u32 %v13948_v3, %v11637_v50  ;;  %v13912_v38 = vld [vmem:[%s14794_s24 + $0x1434] sm:$0xf0]  ;;  %v11621_v4 = vld [vmem:[%s14794_s24 + $0x1528] sm:$0xf] }
 0x302   : > { %7660 = vmatpush.bf16.msrb.mxu0 %v11542_v41  ;;  %v11894_v41 = vor.u32 %v14012_v61, %v11893_v35  ;;  %v13944_v42 = vld [vmem:[%s14794_s24 + $0x1534] sm:$0xf0]  ;;  %v11877_v45 = vld [vmem:[%s14794_s24 + $0x1728] sm:$0xf]  ;;  %v11494_v22 = vor.u32 %v13912_v38, %v11493_v36 }
 0x303   : > { %7673 = vmatpush.bf16.msrb.mxu1 %v11670_v10  ;;  %v11749_v10 = vld [vmem:[%s14794_s24 + $0x1628] sm:$0xf]  ;;  %v14008_v46 = vld [vmem:[%s14794_s24 + $0x1734] sm:$0xf0]  ;;  %v11622_v30 = vor.u32 %v13944_v42, %v11621_v4 }
 0x304   : > { %7686 = vmatpush.bf16.msrb.mxu2 %v11798_v44  ;;  %v13976_v44 = vld [vmem:[%s14794_s24 + $0x1634] sm:$0xf0]  ;;  %v11477_v47 = vld [vmem:[%s14794_s24 + $0x1408] sm:$0xf] }
 0x305   : > { %7699 = vmatpush.bf16.msrb.mxu3 %v11926_v49  ;;  %v13908_v49 = vld [vmem:[%s14794_s24 + $0x1414] sm:$0xf0]  ;;  %v11750_v43 = vor.u32 %v13976_v44, %v11749_v10  ;;  %v11605_v51 = vld [vmem:[%s14794_s24 + $0x1508] sm:$0xf]  ;;  %v7434_v54 = vpop.f32.mrf.mxu2 }
 0x306   : > { %7661 = vmatpush.bf16.msrb.mxu0 %v11526_v55  ;;  %v13940_v53 = vld [vmem:[%s14794_s24 + $0x1514] sm:$0xf0]  ;;  %v11733_v39 = vld [vmem:[%s14794_s24 + $0x1608] sm:$0xf]  ;;  %v11878_v55 = vor.u32 %v14008_v46, %v11877_v45  ;;  %v7447_v52 = vpop.f32.mrf.mxu3  ;;  %v11478_v3 = vor.u32 %v13908_v49, %v11477_v47 }
 0x307   : > { %7674 = vmatpush.bf16.msrb.mxu1 %v11654_v56  ;;  %v13972_v56 = vld [vmem:[%s14794_s24 + $0x1614] sm:$0xf0]  ;;  %v12101_v50 = vld [vmem:[%s14794_s24 + $0x18e8] sm:$0xf]  ;;  %v11606_v8 = vor.u32 %v13940_v53, %v11605_v51 }
 0x308   : > { %7687 = vmatpush.bf16.msrb.mxu2 %v11782_v17  ;;  %v11861_v17 = vld [vmem:[%s14794_s24 + $0x1708] sm:$0xf]  ;;  %v14004_v62 = vld [vmem:[%s14794_s24 + $0x1714] sm:$0xf0]  ;;  %v11734_v35 = vor.u32 %v13972_v56, %v11733_v39 }
 0x309   : > { %7700 = vmatpush.bf16.msrb.mxu3 %v11910_v1  ;;  %v14064_v0 = vld [vmem:[%s14794_s24 + $0x18f4] sm:$0xf0]  ;;  %v12229_v1 = vld [vmem:[%s14794_s24 + $0x19e8] sm:$0xf]  ;;  %v11862_v2 = vor.u32 %v14004_v62, %v11861_v17 }
 0x30a   : > { %7662 = vmatpush.bf16.msrb.mxu0 %v11510_v9  ;;  %v14096_v48 = vld [vmem:[%s14794_s24 + $0x19f4] sm:$0xf0]  ;;  %v12357_v5 = vld [vmem:[%s14794_s24 + $0x1ae8] sm:$0xf] }
 0x30b   : > { %7675 = vmatpush.bf16.msrb.mxu1 %v11638_v21  ;;  %v14128_v6 = vld [vmem:[%s14794_s24 + $0x1af4] sm:$0xf0]  ;;  %v12485_v61 = vld [vmem:[%s14794_s24 + $0x1be8] sm:$0xf]  ;;  %v12102_v21 = vor.u32 %v14064_v0, %v12101_v50 }
 0x30c   : > { %7688 = vmatpush.bf16.msrb.mxu2 %v11766_v34  ;;  %v14160_v9 = vld [vmem:[%s14794_s24 + $0x1bf4] sm:$0xf0]  ;;  %v12230_v34 = vor.u32 %v14096_v48, %v12229_v1  ;;  %v12358_v36 = vor.u32 %v14128_v6, %v12357_v5  ;;  %v12085_v38 = vld [vmem:[%s14794_s24 + $0x18c8] sm:$0xf] }
 0x30d   : > { %7701 = vmatpush.bf16.msrb.mxu3 %v11894_v41  ;;  %v14060_v4 = vld [vmem:[%s14794_s24 + $0x18d4] sm:$0xf0]  ;;  %v12213_v40 = vld [vmem:[%s14794_s24 + $0x19c8] sm:$0xf]  ;;  %v12486_v41 = vor.u32 %v14160_v9, %v12485_v61 }
 0x30e   : > { %7663 = vmatpush.bf16.msrb.mxu0 %v11494_v22  ;;  %v14092_v42 = vld [vmem:[%s14794_s24 + $0x19d4] sm:$0xf0]  ;;  %v12341_v10 = vld [vmem:[%s14794_s24 + $0x1ac8] sm:$0xf]  ;;  %v12086_v22 = vor.u32 %v14060_v4, %v12085_v38 }
 0x30f   : > { %7676 = vmatpush.bf16.msrb.mxu1 %v11622_v30  ;;  %v14124_v44 = vld [vmem:[%s14794_s24 + $0x1ad4] sm:$0xf0]  ;;  %v12469_v45 = vld [vmem:[%s14794_s24 + $0x1bc8] sm:$0xf]  ;;  %v12214_v47 = vor.u32 %v14092_v42, %v12213_v40 }
 0x310   : > { %7689 = vmatpush.bf16.msrb.mxu2 %v11750_v43  ;;  %v14156_v46 = vld [vmem:[%s14794_s24 + $0x1bd4] sm:$0xf0]  ;;  %v12342_v49 = vor.u32 %v14124_v44, %v12341_v10  ;;  %v12069_v30 = vld [vmem:[%s14794_s24 + $0x18a8] sm:$0xf] }
 0x311   : > { %7702 = vmatpush.bf16.msrb.mxu3 %v11878_v55  ;;  %v14056_v43 = vld [vmem:[%s14794_s24 + $0x18b4] sm:$0xf0]  ;;  %v12197_v51 = vld [vmem:[%s14794_s24 + $0x19a8] sm:$0xf]  ;;  %v12470_v53 = vor.u32 %v14156_v46, %v12469_v45 }
 0x312   : > { %7664 = vmatpush.bf16.msrb.mxu0 %v11478_v3  ;;  %v14088_v39 = vld [vmem:[%s14794_s24 + $0x19b4] sm:$0xf0]  ;;  %v12325_v54 = vld [vmem:[%s14794_s24 + $0x1aa8] sm:$0xf]  ;;  %v12070_v62 = vor.u32 %v14056_v43, %v12069_v30 }
 0x313   : > { %7677 = vmatpush.bf16.msrb.mxu1 %v11606_v8  ;;  %v14120_v55 = vld [vmem:[%s14794_s24 + $0x1ab4] sm:$0xf0]  ;;  %v12453_v56 = vld [vmem:[%s14794_s24 + $0x1ba8] sm:$0xf]  ;;  %v12198_v52 = vor.u32 %v14088_v39, %v12197_v51 }
 0x314   : > { %7690 = vmatpush.bf16.msrb.mxu2 %v11734_v35  ;;  %v14152_v17 = vld [vmem:[%s14794_s24 + $0x1bb4] sm:$0xf0]  ;;  %v12326_v50 = vor.u32 %v14120_v55, %v12325_v54  ;;  %v12053_v0 = vld [vmem:[%s14794_s24 + $0x1888] sm:$0xf] }
 0x315   : > { %7703 = vmatpush.bf16.msrb.mxu3 %v11862_v2  ;;  %7665 = vmatmul.bf16.vlgmr.msrb.gmra.mxu0 %v15276_v14  ;;  %v14052_v1 = vld [vmem:[%s14794_s24 + $0x1894] sm:$0xf0]  ;;  %v12181_v3 = vld [vmem:[%s14794_s24 + $0x1988] sm:$0xf]  ;;  %v12454_v48 = vor.u32 %v14152_v17, %v12453_v56  ;;  %v7458_v2 = vpop.f32.mrf.mxu0 }
 0x316   : > { %7709 = vmatpush.bf16.msra.mxu0 %v12102_v21  ;;  %7678 = vmatmul.bf16.vlgmr.msrb.gmra.mxu1 %v15280_v18  ;;  %v14084_v5 = vld [vmem:[%s14794_s24 + $0x1994] sm:$0xf0]  ;;  %v12309_v6 = vld [vmem:[%s14794_s24 + $0x1a88] sm:$0xf]  ;;  %v12054_v9 = vor.u32 %v14052_v1, %v12053_v0  ;;  %v7459_v40 = vadd.f32 %v7458_v2, %v16385_v16 }
 0x317   : > { %7722 = vmatpush.bf16.msra.mxu1 %v12230_v34  ;;  %7691 = vmatmul.bf16.vlgmr.msrb.gmra.mxu2 %v15278_v15  ;;  %v14116_v8 = vld [vmem:[%s14794_s24 + $0x1a94] sm:$0xf0]  ;;  %v12437_v35 = vld [vmem:[%s14794_s24 + $0x1b88] sm:$0xf]  ;;  %v12182_v21 = vor.u32 %v14084_v5, %v12181_v3 }
 0x318   : > { %7735 = vmatpush.bf16.msra.mxu2 %v12358_v36  ;;  %7704 = vmatmul.bf16.vlgmr.msrb.gmra.mxu3 %v15282_v19  ;;  %v14148_v61 = vld [vmem:[%s14794_s24 + $0x1b94] sm:$0xf0]  ;;  %v12310_v34 = vor.u32 %v14116_v8, %v12309_v6  ;;  %v12037_v36 = vld [vmem:[%s14794_s24 + $0x1868] sm:$0xf] }
 0x319   : > { %7748 = vmatpush.bf16.msra.mxu3 %v12486_v41  ;;  %v14048_v38 = vld [vmem:[%s14794_s24 + $0x1874] sm:$0xf0]  ;;  %v12165_v4 = vld [vmem:[%s14794_s24 + $0x1968] sm:$0xf]  ;;  %v7471_v41 = vpop.f32.mrf.mxu1  ;;  %v12438_v42 = vor.u32 %v14148_v61, %v12437_v35 }
 0x31a   : > { %7710 = vmatpush.bf16.msra.mxu0 %v12086_v22  ;;  %v14080_v10 = vld [vmem:[%s14794_s24 + $0x1974] sm:$0xf0]  ;;  %v12293_v44 = vld [vmem:[%s14794_s24 + $0x1a68] sm:$0xf]  ;;  %v7484_v39 = vpop.f32.mrf.mxu2 }
 0x31b   : > { %7723 = vmatpush.bf16.msra.mxu1 %v12214_v47  ;;  %v14112_v45 = vld [vmem:[%s14794_s24 + $0x1a74] sm:$0xf0]  ;;  %v12421_v46 = vld [vmem:[%s14794_s24 + $0x1b68] sm:$0xf]  ;;  %v7472_v47 = vadd.f32 %v7471_v41, %v7459_v40  ;;  %v12166_v16 = vor.u32 %v14080_v10, %v12165_v4 }
 0x31c   : > { %7736 = vmatpush.bf16.msra.mxu2 %v12342_v49  ;;  %v14144_v22 = vld [vmem:[%s14794_s24 + $0x1b74] sm:$0xf0]  ;;  %v12038_v49 = vor.u32 %v14048_v38, %v12037_v36  ;;  %v12294_v30 = vor.u32 %v14112_v45, %v12293_v44  ;;  %v12021_v43 = vld [vmem:[%s14794_s24 + $0x1848] sm:$0xf] }
 0x31d   : > { %7749 = vmatpush.bf16.msra.mxu3 %v12470_v53  ;;  %v14044_v51 = vld [vmem:[%s14794_s24 + $0x1854] sm:$0xf0]  ;;  %v12149_v53 = vld [vmem:[%s14794_s24 + $0x1948] sm:$0xf]  ;;  %v12422_v54 = vor.u32 %v14144_v22, %v12421_v46 }
 0x31e   : > { %7711 = vmatpush.bf16.msra.mxu0 %v12070_v62  ;;  %v14076_v55 = vld [vmem:[%s14794_s24 + $0x1954] sm:$0xf0]  ;;  %v12277_v56 = vld [vmem:[%s14794_s24 + $0x1a48] sm:$0xf]  ;;  %v7485_v62 = vadd.f32 %v7484_v39, %v7472_v47  ;;  %v12022_v1 = vor.u32 %v14044_v51, %v12021_v43 }
 0x31f   : > { %7724 = vmatpush.bf16.msra.mxu1 %v12198_v52  ;;  %v14108_v17 = vld [vmem:[%s14794_s24 + $0x1a54] sm:$0xf0]  ;;  %v7497_v52 = vpop.f32.mrf.mxu3  ;;  %v12150_v5 = vor.u32 %v14076_v55, %v12149_v53  ;;  %v12005_v8 = vld [vmem:[%s14794_s24 + $0x1828] sm:$0xf] }
 0x320   : > { %7737 = vmatpush.bf16.msra.mxu2 %v12326_v50  ;;  %v12405_v50 = vld [vmem:[%s14794_s24 + $0x1b48] sm:$0xf]  ;;  %v14140_v0 = vld [vmem:[%s14794_s24 + $0x1b54] sm:$0xf0]  ;;  %v16456_v3 = vadd.f32 %v7497_v52, %v7485_v62  ;;  %v12278_v6 = vor.u32 %v14108_v17, %v12277_v56 }
 0x321   : > { %7750 = vmatpush.bf16.msra.mxu3 %v12454_v48  ;;  %v7460_v48 = vpop.f32.mrf.mxu0  ;;  %v14040_v35 = vld [vmem:[%s14794_s24 + $0x1834] sm:$0xf0]  ;;  %v12133_v61 = vld [vmem:[%s14794_s24 + $0x1928] sm:$0xf]  ;;  %v12406_v2 = vor.u32 %v14140_v0, %v12405_v50 }
 0x322   : > { %7712 = vmatpush.bf16.msra.mxu0 %v12054_v9  ;;  %v7473_v9 = vpop.f32.mrf.mxu1  ;;  %v14104_v36 = vld [vmem:[%s14794_s24 + $0x1a34] sm:$0xf0]  ;;  %v12389_v38 = vld [vmem:[%s14794_s24 + $0x1b28] sm:$0xf]  ;;  %v12006_v40 = vor.u32 %v14040_v35, %v12005_v8  ;;  %v7486_v47 = vpop.f32.mrf.mxu2 }
 0x323   : > { %7725 = vmatpush.bf16.msra.mxu1 %v12182_v21  ;;  %v14072_v21 = vld [vmem:[%s14794_s24 + $0x1934] sm:$0xf0]  ;;  %v11989_v41 = vld [vmem:[%s14794_s24 + $0x1808] sm:$0xf] }
 0x324   : > { %7738 = vmatpush.bf16.msra.mxu2 %v12310_v34  ;;  %v12261_v34 = vld [vmem:[%s14794_s24 + $0x1a28] sm:$0xf]  ;;  %v14136_v4 = vld [vmem:[%s14794_s24 + $0x1b34] sm:$0xf0]  ;;  %v12134_v10 = vor.u32 %v14072_v21, %v12133_v61 }
 0x325   : > { %7751 = vmatpush.bf16.msra.mxu3 %v12438_v42  ;;  %v14036_v42 = vld [vmem:[%s14794_s24 + $0x1814] sm:$0xf0]  ;;  %v12262_v44 = vor.u32 %v14104_v36, %v12261_v34  ;;  %v12117_v45 = vld [vmem:[%s14794_s24 + $0x1908] sm:$0xf] }
 0x326   : > { %7713 = vmatpush.bf16.msra.mxu0 %v12038_v49  ;;  %v14068_v46 = vld [vmem:[%s14794_s24 + $0x1914] sm:$0xf0]  ;;  %v12245_v22 = vld [vmem:[%s14794_s24 + $0x1a08] sm:$0xf]  ;;  %v12390_v49 = vor.u32 %v14136_v4, %v12389_v38  ;;  %v11990_v55 = vor.u32 %v14036_v42, %v11989_v41 }
 0x327   : > { %7726 = vmatpush.bf16.msra.mxu1 %v12166_v16  ;;  %v14100_v16 = vld [vmem:[%s14794_s24 + $0x1a14] sm:$0xf0]  ;;  %v7499_v51 = vpop.f32.mrf.mxu3  ;;  %v12613_v53 = vld [vmem:[%s14794_s24 + $0x1ce8] sm:$0xf]  ;;  %v12118_v52 = vor.u32 %v14068_v46, %v12117_v45  ;;  %v14464_v46 = vld [vmem:[#allocation1] sm:$0xff] }
 0x328   : > { %7739 = vmatpush.bf16.msra.mxu2 %v12294_v30  ;;  %v12373_v30 = vld [vmem:[%s14794_s24 + $0x1b08] sm:$0xf]  ;;  %v14132_v43 = vld [vmem:[%s14794_s24 + $0x1b14] sm:$0xf0]  ;;  %v12246_v50 = vor.u32 %v14100_v16, %v12245_v22 }
 0x329   : > { %7752 = vmatpush.bf16.msra.mxu3 %v12422_v54  ;;  %v14192_v39 = vld [vmem:[%s14794_s24 + $0x1cf4] sm:$0xf0]  ;;  %v12741_v54 = vld [vmem:[%s14794_s24 + $0x1de8] sm:$0xf]  ;;  %v12374_v48 = vor.u32 %v14132_v43, %v12373_v30 }
 0x32a   : > { %7714 = vmatpush.bf16.msra.mxu0 %v12022_v1  ;;  %v14224_v56 = vld [vmem:[%s14794_s24 + $0x1df4] sm:$0xf0]  ;;  %v12869_v17 = vld [vmem:[%s14794_s24 + $0x1ee8] sm:$0xf] }
 0x32b   : > { %7727 = vmatpush.bf16.msra.mxu1 %v12150_v5  ;;  %v14256_v62 = vld [vmem:[%s14794_s24 + $0x1ef4] sm:$0xf0]  ;;  %v12997_v0 = vld [vmem:[%s14794_s24 + $0x1fe8] sm:$0xf]  ;;  %v12614_v5 = vor.u32 %v14192_v39, %v12613_v53 }
 0x32c   : > { %7740 = vmatpush.bf16.msra.mxu2 %v12278_v6  ;;  %v14288_v1 = vld [vmem:[%s14794_s24 + $0x1ff4] sm:$0xf0]  ;;  %v12742_v6 = vor.u32 %v14224_v56, %v12741_v54  ;;  %v12870_v8 = vor.u32 %v14256_v62, %v12869_v17  ;;  %v12597_v35 = vld [vmem:[%s14794_s24 + $0x1cc8] sm:$0xf] }
 0x32d   : > { %7753 = vmatpush.bf16.msra.mxu3 %v12406_v2  ;;  %v14188_v61 = vld [vmem:[%s14794_s24 + $0x1cd4] sm:$0xf0]  ;;  %v12725_v9 = vld [vmem:[%s14794_s24 + $0x1dc8] sm:$0xf]  ;;  %v12998_v2 = vor.u32 %v14288_v1, %v12997_v0 }
 0x32e   : > { %7715 = vmatpush.bf16.msra.mxu0 %v12006_v40  ;;  %v14220_v21 = vld [vmem:[%s14794_s24 + $0x1dd4] sm:$0xf0]  ;;  %v12853_v34 = vld [vmem:[%s14794_s24 + $0x1ec8] sm:$0xf]  ;;  %v12598_v40 = vor.u32 %v14188_v61, %v12597_v35 }
 0x32f   : > { %7728 = vmatpush.bf16.msra.mxu1 %v12134_v10  ;;  %v14252_v36 = vld [vmem:[%s14794_s24 + $0x1ed4] sm:$0xf0]  ;;  %v12981_v38 = vld [vmem:[%s14794_s24 + $0x1fc8] sm:$0xf]  ;;  %v12726_v41 = vor.u32 %v14220_v21, %v12725_v9 }
 0x330   : > { %7741 = vmatpush.bf16.msra.mxu2 %v12262_v44  ;;  %v14284_v4 = vld [vmem:[%s14794_s24 + $0x1fd4] sm:$0xf0]  ;;  %v12854_v42 = vor.u32 %v14252_v36, %v12853_v34  ;;  %v12581_v10 = vld [vmem:[%s14794_s24 + $0x1ca8] sm:$0xf] }
 0x331   : > { %7754 = vmatpush.bf16.msra.mxu3 %v12390_v49  ;;  %v14184_v44 = vld [vmem:[%s14794_s24 + $0x1cb4] sm:$0xf0]  ;;  %v12709_v45 = vld [vmem:[%s14794_s24 + $0x1da8] sm:$0xf]  ;;  %v12982_v22 = vor.u32 %v14284_v4, %v12981_v38 }
 0x332   : > { %7716 = vmatpush.bf16.msra.mxu0 %v11990_v55  ;;  %v14216_v47 = vld [vmem:[%s14794_s24 + $0x1db4] sm:$0xf0]  ;;  %v12837_v49 = vld [vmem:[%s14794_s24 + $0x1ea8] sm:$0xf]  ;;  %v12582_v54 = vor.u32 %v14184_v44, %v12581_v10 }
 0x333   : > { %7729 = vmatpush.bf16.msra.mxu1 %v12118_v52  ;;  %v14248_v16 = vld [vmem:[%s14794_s24 + $0x1eb4] sm:$0xf0]  ;;  %v14465_v30 = vld [vmem:[#allocation1 + $0x12] sm:$0xff]  ;;  %v14467_v39 = vld [vmem:[#allocation1 + $0x1b] sm:$0xff]  ;;  %v12710_v55 = vor.u32 %v14216_v47, %v12709_v45  ;;  %v7523_v9 = vpop.f32.mrf.mxu1 }
 0x334   : > { %7742 = vmatpush.bf16.msra.mxu2 %v12246_v50  ;;  %v14466_v43 = vld [vmem:[#allocation1 + $0x9] sm:$0xff]  ;;  %v12965_v51 = vld [vmem:[%s14794_s24 + $0x1fa8] sm:$0xf]  ;;  %v12838_v56 = vor.u32 %v14248_v16, %v12837_v49 }
 0x335   : > { %7755 = vmatpush.bf16.msra.mxu3 %v12374_v48  ;;  %7717 = vmatmul.bf16.vlgmr.msra.gmra.mxu0 %v14464_v46  ;;  %v14280_v53 = vld [vmem:[%s14794_s24 + $0x1fb4] sm:$0xf0]  ;;  %v12565_v17 = vld [vmem:[%s14794_s24 + $0x1c88] sm:$0xf] }
 0x336   : > { %7761 = vmatpush.bf16.msrb.mxu0 %v12614_v5  ;;  %7730 = vmatmul.bf16.vlgmr.msra.gmra.mxu1 %v14466_v43  ;;  %v14180_v62 = vld [vmem:[%s14794_s24 + $0x1c94] sm:$0xf0]  ;;  %v12693_v52 = vld [vmem:[%s14794_s24 + $0x1d88] sm:$0xf]  ;;  %v12966_v50 = vor.u32 %v14280_v53, %v12965_v51  ;;  %v7510_v5 = vpop.f32.mrf.mxu0 }
 0x337   : > { %7774 = vmatpush.bf16.msrb.mxu1 %v12742_v6  ;;  %7743 = vmatmul.bf16.vlgmr.msra.gmra.mxu2 %v14465_v30  ;;  %v14212_v0 = vld [vmem:[%s14794_s24 + $0x1d94] sm:$0xf0]  ;;  %v12821_v1 = vld [vmem:[%s14794_s24 + $0x1e88] sm:$0xf]  ;;  %v7511_v35 = vadd.f32 %v7510_v5, %v16456_v3  ;;  %v12566_v61 = vor.u32 %v14180_v62, %v12565_v17 }
 0x338   : > { %7787 = vmatpush.bf16.msrb.mxu2 %v12870_v8  ;;  %7756 = vmatmul.bf16.vlgmr.msra.gmra.mxu3 %v14467_v39  ;;  %v14244_v48 = vld [vmem:[%s14794_s24 + $0x1e94] sm:$0xf0]  ;;  %v12949_v6 = vld [vmem:[%s14794_s24 + $0x1f88] sm:$0xf] }
 0x339   : > { %7800 = vmatpush.bf16.msrb.mxu3 %v12998_v2  ;;  %v14276_v8 = vld [vmem:[%s14794_s24 + $0x1f94] sm:$0xf0]  ;;  %v12694_v2 = vor.u32 %v14212_v0, %v12693_v52  ;;  %v12822_v21 = vor.u32 %v14244_v48, %v12821_v1  ;;  %v12549_v34 = vld [vmem:[%s14794_s24 + $0x1c68] sm:$0xf] }
 0x33a   : > { %7762 = vmatpush.bf16.msrb.mxu0 %v12598_v40  ;;  %v14176_v36 = vld [vmem:[%s14794_s24 + $0x1c74] sm:$0xf0]  ;;  %v12677_v38 = vld [vmem:[%s14794_s24 + $0x1d68] sm:$0xf]  ;;  %v12950_v4 = vor.u32 %v14276_v8, %v12949_v6  ;;  %v7524_v40 = vadd.f32 %v7523_v9, %v7511_v35  ;;  %v7536_v43 = vpop.f32.mrf.mxu2 }
 0x33b   : > { %7775 = vmatpush.bf16.msrb.mxu1 %v12726_v41  ;;  %v14208_v41 = vld [vmem:[%s14794_s24 + $0x1d74] sm:$0xf0]  ;;  %v12933_v10 = vld [vmem:[%s14794_s24 + $0x1f68] sm:$0xf]  ;;  %v12550_v45 = vor.u32 %v14176_v36, %v12549_v34 }
 0x33c   : > { %7788 = vmatpush.bf16.msrb.mxu2 %v12854_v42  ;;  %v12805_v42 = vld [vmem:[%s14794_s24 + $0x1e68] sm:$0xf]  ;;  %v14240_v3 = vld [vmem:[%s14794_s24 + $0x1e74] sm:$0xf0]  ;;  %v12678_v46 = vor.u32 %v14208_v41, %v12677_v38 }
 0x33d   : > { %7801 = vmatpush.bf16.msrb.mxu3 %v12982_v22  ;;  %v14272_v44 = vld [vmem:[%s14794_s24 + $0x1f74] sm:$0xf0]  ;;  %v12806_v22 = vor.u32 %v14240_v3, %v12805_v42  ;;  %v12533_v47 = vld [vmem:[%s14794_s24 + $0x1c48] sm:$0xf] }
 0x33e   : > { %7763 = vmatpush.bf16.msrb.mxu0 %v12582_v54  ;;  %v14172_v49 = vld [vmem:[%s14794_s24 + $0x1c54] sm:$0xf0]  ;;  %v12661_v16 = vld [vmem:[%s14794_s24 + $0x1d48] sm:$0xf]  ;;  %v12934_v30 = vor.u32 %v14272_v44, %v12933_v10  ;;  %v7537_v54 = vadd.f32 %v7536_v43, %v7524_v40  ;;  %v7512_v62 = vpop.f32.mrf.mxu0 }
 0x33f   : > { %7776 = vmatpush.bf16.msrb.mxu1 %v12710_v55  ;;  %v14204_v51 = vld [vmem:[%s14794_s24 + $0x1d54] sm:$0xf0]  ;;  %v12789_v53 = vld [vmem:[%s14794_s24 + $0x1e48] sm:$0xf]  ;;  %v7549_v55 = vpop.f32.mrf.mxu3  ;;  %v12534_v52 = vor.u32 %v14172_v49, %v12533_v47  ;;  %v13294_v49 = vld [vmem:[%s14794_s24 + $0xec] sm:$0xf] }
 0x340   : > { %7789 = vmatpush.bf16.msrb.mxu2 %v12838_v56  ;;  %v14236_v39 = vld [vmem:[%s14794_s24 + $0x1e54] sm:$0xf0]  ;;  %v12917_v56 = vld [vmem:[%s14794_s24 + $0x1f48] sm:$0xf]  ;;  %v16523_v0 = vadd.f32 %v7549_v55, %v7537_v54  ;;  %v12662_v1 = vor.u32 %v14204_v51, %v12661_v16  ;;  %v9031_v16 = vld [vmem:[%s14794_s24 + $0xf8] sm:$0xf0] }
 0x341   : > { %7802 = vmatpush.bf16.msrb.mxu3 %v12966_v50  ;;  %v14268_v17 = vld [vmem:[%s14794_s24 + $0x1f54] sm:$0xf0]  ;;  %v7525_v50 = vpop.f32.mrf.mxu1  ;;  %v12790_v48 = vor.u32 %v14236_v39, %v12789_v53  ;;  %v12517_v5 = vld [vmem:[%s14794_s24 + $0x1c28] sm:$0xf]  ;;  %v9159_v53 = vld [vmem:[%s14794_s24 + $0x1f8] sm:$0xf0] }
 0x342   : > { %7764 = vmatpush.bf16.msrb.mxu0 %v12566_v61  ;;  %v14168_v6 = vld [vmem:[%s14794_s24 + $0x1c34] sm:$0xf0]  ;;  %v12645_v8 = vld [vmem:[%s14794_s24 + $0x1d28] sm:$0xf]  ;;  %v12918_v35 = vor.u32 %v14268_v17, %v12917_v56  ;;  %v7538_v47 = vpop.f32.mrf.mxu2  ;;  %v13358_v39 = vld [vmem:[%s14794_s24 + $0x2ec] sm:$0xf]  ;;  %v9034_v50 = vor.u32 %v13294_v49, %v9031_v16 }
 0x343   : > { %7777 = vmatpush.bf16.msrb.mxu1 %v12694_v2  ;;  %v14200_v61 = vld [vmem:[%s14794_s24 + $0x1d34] sm:$0xf0]  ;;  %v12773_v9 = vld [vmem:[%s14794_s24 + $0x1e28] sm:$0xf]  ;;  %v12518_v36 = vor.u32 %v14168_v6, %v12517_v5  ;;  %v9287_v54 = vld [vmem:[%s14794_s24 + $0x2f8] sm:$0xf0] }
 0x344   : > { %7790 = vmatpush.bf16.msrb.mxu2 %v12822_v21  ;;  %v14232_v2 = vld [vmem:[%s14794_s24 + $0x1e34] sm:$0xf0]  ;;  %v12901_v21 = vld [vmem:[%s14794_s24 + $0x1f28] sm:$0xf]  ;;  %v12646_v40 = vor.u32 %v14200_v61, %v12645_v8  ;;  %v13390_v17 = vld [vmem:[%s14794_s24 + $0x3ec] sm:$0xf] }
 0x345   : > { %7803 = vmatpush.bf16.msrb.mxu3 %v12950_v4  ;;  %v14264_v34 = vld [vmem:[%s14794_s24 + $0x1f34] sm:$0xf0]  ;;  %v12501_v38 = vld [vmem:[%s14794_s24 + $0x1c08] sm:$0xf]  ;;  %v12774_v41 = vor.u32 %v14232_v2, %v12773_v9  ;;  %v9415_v62 = vld [vmem:[%s14794_s24 + $0x3f8] sm:$0xf0] }
 0x346   : > { %7765 = vmatpush.bf16.msrb.mxu0 %v12550_v45  ;;  %v14164_v4 = vld [vmem:[%s14794_s24 + $0x1c14] sm:$0xf0]  ;;  %v12629_v42 = vld [vmem:[%s14794_s24 + $0x1d08] sm:$0xf]  ;;  %v12902_v44 = vor.u32 %v14264_v34, %v12901_v21  ;;  %v13290_v5 = vld [vmem:[%s14794_s24 + $0xcc] sm:$0xf] }
 0x347   : > { %7778 = vmatpush.bf16.msrb.mxu1 %v12678_v46  ;;  %v14196_v3 = vld [vmem:[%s14794_s24 + $0x1d14] sm:$0xf0]  ;;  %v12757_v10 = vld [vmem:[%s14794_s24 + $0x1e08] sm:$0xf]  ;;  %v7551_v43 = vpop.f32.mrf.mxu3  ;;  %v12502_v51 = vor.u32 %v14164_v4, %v12501_v38  ;;  %v9015_v6 = vld [vmem:[%s14794_s24 + $0xd8] sm:$0xf0] }
 0x348   : > { %7791 = vmatpush.bf16.msrb.mxu2 %v12806_v22  ;;  %v14228_v45 = vld [vmem:[%s14794_s24 + $0x1e14] sm:$0xf0]  ;;  %v12885_v46 = vld [vmem:[%s14794_s24 + $0x1f08] sm:$0xf]  ;;  %v12630_v55 = vor.u32 %v14196_v3, %v12629_v42  ;;  %v13322_v8 = vld [vmem:[%s14794_s24 + $0x1cc] sm:$0xf] }
 0x349   : > { %7804 = vmatpush.bf16.msrb.mxu3 %v12934_v30  ;;  %v14260_v22 = vld [vmem:[%s14794_s24 + $0x1f14] sm:$0xf0]  ;;  %v13326_v30 = vld [vmem:[%s14794_s24 + $0x1ec] sm:$0xf]  ;;  %v12758_v56 = vor.u32 %v14228_v45, %v12757_v10  ;;  %v9143_v61 = vld [vmem:[%s14794_s24 + $0x1d8] sm:$0xf0] }
 0x34a   : > { %7766 = vmatpush.bf16.msrb.mxu0 %v12534_v52  ;;  %v12886_v52 = vor.u32 %v14260_v22, %v12885_v46  ;;  %v13354_v9 = vld [vmem:[%s14794_s24 + $0x2cc] sm:$0xf]  ;;  %v9271_v2 = vld [vmem:[%s14794_s24 + $0x2d8] sm:$0xf0]  ;;  %v9146_v38 = vor.u32 %v13322_v8, %v9143_v61  ;;  %v14468_v3 = vld [vmem:[#allocation1 + $0x24] sm:$0xff] }
 0x34b   : > { %7779 = vmatpush.bf16.msrb.mxu1 %v12662_v1  ;;  %v9162_v1 = vor.u32 %v13326_v30, %v9159_v53  ;;  %v13386_v21 = vld [vmem:[%s14794_s24 + $0x3cc] sm:$0xf]  ;;  %v9399_v34 = vld [vmem:[%s14794_s24 + $0x3d8] sm:$0xf0]  ;;  %v9274_v4 = vor.u32 %v13354_v9, %v9271_v2 }
 0x34c   : > { %7792 = vmatpush.bf16.msrb.mxu2 %v12790_v48  ;;  %v9290_v48 = vor.u32 %v13358_v39, %v9287_v54  ;;  %v13318_v42 = vld [vmem:[%s14794_s24 + $0x1ac] sm:$0xf]  ;;  %v9402_v10 = vor.u32 %v13386_v21, %v9399_v34  ;;  %v9255_v46 = vld [vmem:[%s14794_s24 + $0x2b8] sm:$0xf0] }
 0x34d   : > { %7805 = vmatpush.bf16.msrb.mxu3 %v12918_v35  ;;  %v9418_v35 = vor.u32 %v13390_v17, %v9415_v62  ;;  %v13350_v45 = vld [vmem:[%s14794_s24 + $0x2ac] sm:$0xf]  ;;  %v14470_v47 = vld [vmem:[#allocation1 + $0x2d] sm:$0xff] }
 0x34e   : > { %7767 = vmatpush.bf16.msrb.mxu0 %v12518_v36  ;;  %v9018_v36 = vor.u32 %v13290_v5, %v9015_v6  ;;  %v14469_v22 = vld [vmem:[#allocation1 + $0x36] sm:$0xff]  ;;  %v9383_v16 = vld [vmem:[%s14794_s24 + $0x3b8] sm:$0xf0]  ;;  %v14471_v30 = vld [vmem:[#allocation1 + $0x3f] sm:$0xff]  ;;  %v9258_v53 = vor.u32 %v13350_v45, %v9255_v46 }
 0x34f   : > { %7780 = vmatpush.bf16.msrb.mxu1 %v12646_v40  ;;  %v13286_v40 = vld [vmem:[%s14794_s24 + $0xac] sm:$0xf]  ;;  %v8983_v54 = vld [vmem:[%s14794_s24 + $0x98] sm:$0xf0] }
 0x350   : > { %7793 = vmatpush.bf16.msrb.mxu2 %v12774_v41  ;;  %v8999_v41 = vld [vmem:[%s14794_s24 + $0xb8] sm:$0xf0]  ;;  %v13382_v49 = vld [vmem:[%s14794_s24 + $0x3ac] sm:$0xf] }
 0x351   : > { %7806 = vmatpush.bf16.msrb.mxu3 %v12902_v44  ;;  %v9127_v44 = vld [vmem:[%s14794_s24 + $0x1b8] sm:$0xf0]  ;;  %v9002_v43 = vor.u32 %v13286_v40, %v8999_v41  ;;  %v13282_v39 = vld [vmem:[%s14794_s24 + $0x8c] sm:$0xf] }
 0x352   : > { %7768 = vmatpush.bf16.msrb.mxu0 %v12502_v51  ;;  %v9130_v51 = vor.u32 %v13318_v42, %v9127_v44  ;;  %v9111_v17 = vld [vmem:[%s14794_s24 + $0x198] sm:$0xf0]  ;;  %v13346_v62 = vld [vmem:[%s14794_s24 + $0x28c] sm:$0xf]  ;;  %v8986_v6 = vor.u32 %v13282_v39, %v8983_v54 }
 0x353   : > { %7781 = vmatpush.bf16.msrb.mxu1 %v12630_v55  ;;  %v13314_v55 = vld [vmem:[%s14794_s24 + $0x18c] sm:$0xf]  ;;  %v7575_v8 = vpop.f32.mrf.mxu1  ;;  %v8967_v2 = vld [vmem:[%s14794_s24 + $0x78] sm:$0xf0] }
 0x354   : > { %7794 = vmatpush.bf16.msrb.mxu2 %v12758_v56  ;;  %v9386_v56 = vor.u32 %v13382_v49, %v9383_v16  ;;  %v13278_v9 = vld [vmem:[%s14794_s24 + $0x6c] sm:$0xf]  ;;  %v9351_v41 = vld [vmem:[%s14794_s24 + $0x378] sm:$0xf0] }
 0x355   : > { %7807 = vmatpush.bf16.msrb.mxu3 %v12886_v52  ;;  %7769 = vmatmul.bf16.vlgmr.msrb.gmra.mxu0 %v14468_v3  ;;  %v9239_v52 = vld [vmem:[%s14794_s24 + $0x298] sm:$0xf0]  ;;  %v13310_v21 = vld [vmem:[%s14794_s24 + $0x16c] sm:$0xf]  ;;  %v8970_v42 = vor.u32 %v13278_v9, %v8967_v2 }
 0x356   : > { %7813 = vmatpush.bf16.msra.mxu0 %v9034_v50  ;;  %7782 = vmatmul.bf16.vlgmr.msrb.gmra.mxu1 %v14470_v47  ;;  %v7562_v50 = vpop.f32.mrf.mxu0  ;;  %v9242_v61 = vor.u32 %v13346_v62, %v9239_v52  ;;  %v13374_v40 = vld [vmem:[%s14794_s24 + $0x36c] sm:$0xf]  ;;  %v8951_v45 = vld [vmem:[%s14794_s24 + $0x58] sm:$0xf0] }
 0x357   : > { %7826 = vmatpush.bf16.msra.mxu1 %v9162_v1  ;;  %7795 = vmatmul.bf16.vlgmr.msrb.gmra.mxu2 %v14469_v22  ;;  %v13378_v1 = vld [vmem:[%s14794_s24 + $0x38c] sm:$0xf]  ;;  %v7563_v5 = vadd.f32 %v7562_v50, %v16523_v0  ;;  %v9223_v0 = vld [vmem:[%s14794_s24 + $0x278] sm:$0xf0]  ;;  %v9354_v22 = vor.u32 %v13374_v40, %v9351_v41 }
 0x358   : > { %7839 = vmatpush.bf16.msra.mxu2 %v9290_v48  ;;  %7808 = vmatmul.bf16.vlgmr.msrb.gmra.mxu3 %v14471_v30  ;;  %v9367_v48 = vld [vmem:[%s14794_s24 + $0x398] sm:$0xf0]  ;;  %v13274_v44 = vld [vmem:[%s14794_s24 + $0x4c] sm:$0xf] }
 0x359   : > { %7852 = vmatpush.bf16.msra.mxu3 %v9418_v35  ;;  %v9114_v35 = vor.u32 %v13314_v55, %v9111_v17  ;;  %v9370_v34 = vor.u32 %v13378_v1, %v9367_v48  ;;  %v13306_v46 = vld [vmem:[%s14794_s24 + $0x14c] sm:$0xf]  ;;  %v9079_v49 = vld [vmem:[%s14794_s24 + $0x158] sm:$0xf0]  ;;  %v8954_v55 = vor.u32 %v13274_v44, %v8951_v45 }
 0x35a   : > { %7814 = vmatpush.bf16.msra.mxu0 %v9018_v36  ;;  %v7576_v36 = vadd.f32 %v7575_v8, %v7563_v5  ;;  %v7588_v47 = vpop.f32.mrf.mxu2  ;;  %v13338_v16 = vld [vmem:[%s14794_s24 + $0x24c] sm:$0xf]  ;;  %v9207_v30 = vld [vmem:[%s14794_s24 + $0x258] sm:$0xf0]  ;;  %v9082_v62 = vor.u32 %v13306_v46, %v9079_v49 }
 0x35b   : > { %7827 = vmatpush.bf16.msra.mxu1 %v9146_v38  ;;  %v9095_v38 = vld [vmem:[%s14794_s24 + $0x178] sm:$0xf0]  ;;  %v9210_v52 = vor.u32 %v13338_v16, %v9207_v30  ;;  %v13270_v50 = vld [vmem:[%s14794_s24 + $0x2c] sm:$0xf] }
 0x35c   : > { %7840 = vmatpush.bf16.msra.mxu2 %v9274_v4  ;;  %v13342_v4 = vld [vmem:[%s14794_s24 + $0x26c] sm:$0xf]  ;;  %v9098_v3 = vor.u32 %v13310_v21, %v9095_v38  ;;  %v9335_v39 = vld [vmem:[%s14794_s24 + $0x358] sm:$0xf0] }
 0x35d   : > { %7853 = vmatpush.bf16.msra.mxu3 %v9402_v10  ;;  %v9226_v10 = vor.u32 %v13342_v4, %v9223_v0  ;;  %v8935_v1 = vld [vmem:[%s14794_s24 + $0x38] sm:$0xf0]  ;;  %v13302_v48 = vld [vmem:[%s14794_s24 + $0x12c] sm:$0xf] }
 0x35e   : > { %7815 = vmatpush.bf16.msra.mxu0 %v9002_v43  ;;  %v7589_v43 = vadd.f32 %v7588_v47, %v7576_v36  ;;  %v7564_v54 = vpop.f32.mrf.mxu0  ;;  %v13334_v8 = vld [vmem:[%s14794_s24 + $0x22c] sm:$0xf]  ;;  %v9319_v9 = vld [vmem:[%s14794_s24 + $0x338] sm:$0xf0]  ;;  %v8938_v2 = vor.u32 %v13270_v50, %v8935_v1 }
 0x35f   : > { %7828 = vmatpush.bf16.msra.mxu1 %v9130_v51  ;;  %v7601_v51 = vpop.f32.mrf.mxu3  ;;  %v13266_v21 = vld [vmem:[%s14794_s24 + $0xc] sm:$0xf]  ;;  %v9047_v0 = vld [vmem:[%s14794_s24 + $0x118] sm:$0xf0] }
 0x360   : > { %7841 = vmatpush.bf16.msra.mxu2 %v9258_v53  ;;  %v13370_v53 = vld [vmem:[%s14794_s24 + $0x34c] sm:$0xf]  ;;  %v16590_v17 = vadd.f32 %v7601_v51, %v7589_v43  ;;  %v9543_v46 = vld [vmem:[%s14794_s24 + $0x4f8] sm:$0xf0] }
 0x361   : > { %7854 = vmatpush.bf16.msra.mxu3 %v9386_v56  ;;  %v7577_v56 = vpop.f32.mrf.mxu1  ;;  %v9338_v5 = vor.u32 %v13370_v53, %v9335_v39  ;;  %v13298_v4 = vld [vmem:[%s14794_s24 + $0x10c] sm:$0xf]  ;;  %v9671_v16 = vld [vmem:[%s14794_s24 + $0x5f8] sm:$0xf0] }
 0x362   : > { %7816 = vmatpush.bf16.msra.mxu0 %v8986_v6  ;;  %v9063_v6 = vld [vmem:[%s14794_s24 + $0x138] sm:$0xf0]  ;;  %v13330_v40 = vld [vmem:[%s14794_s24 + $0x20c] sm:$0xf]  ;;  %v7590_v44 = vpop.f32.mrf.mxu2  ;;  %v9050_v51 = vor.u32 %v13298_v4, %v9047_v0 }
 0x363   : > { %7829 = vmatpush.bf16.msra.mxu1 %v9114_v35  ;;  %v9191_v35 = vld [vmem:[%s14794_s24 + $0x238] sm:$0xf0]  ;;  %v9066_v36 = vor.u32 %v13302_v48, %v9063_v6  ;;  %v13422_v45 = vld [vmem:[%s14794_s24 + $0x4ec] sm:$0xf] }
 0x364   : > { %7842 = vmatpush.bf16.msra.mxu2 %v9242_v61  ;;  %v13366_v61 = vld [vmem:[%s14794_s24 + $0x32c] sm:$0xf]  ;;  %v9194_v38 = vor.u32 %v13334_v8, %v9191_v35  ;;  %v9799_v43 = vld [vmem:[%s14794_s24 + $0x6f8] sm:$0xf0]  ;;  %v9546_v56 = vor.u32 %v13422_v45, %v9543_v46 }
 0x365   : > { %7855 = vmatpush.bf16.msra.mxu3 %v9370_v34  ;;  %v8919_v34 = vld [vmem:[%s14794_s24 + $0x18] sm:$0xf0]  ;;  %v9322_v41 = vor.u32 %v13366_v61, %v9319_v9  ;;  %v13486_v30 = vld [vmem:[%s14794_s24 + $0x6ec] sm:$0xf] }
 0x366   : > { %7817 = vmatpush.bf16.msra.mxu0 %v8970_v42  ;;  %v9175_v42 = vld [vmem:[%s14794_s24 + $0x218] sm:$0xf0]  ;;  %v8922_v49 = vor.u32 %v13266_v21, %v8919_v34  ;;  %v13518_v39 = vld [vmem:[%s14794_s24 + $0x7ec] sm:$0xf] }
 0x367   : > { %7830 = vmatpush.bf16.msra.mxu1 %v9098_v3  ;;  %v13362_v3 = vld [vmem:[%s14794_s24 + $0x30c] sm:$0xf]  ;;  %v7603_v47 = vpop.f32.mrf.mxu3  ;;  %v9178_v53 = vor.u32 %v13330_v40, %v9175_v42  ;;  %v9927_v54 = vld [vmem:[%s14794_s24 + $0x7f8] sm:$0xf0] }
 0x368   : > { %7843 = vmatpush.bf16.msra.mxu2 %v9226_v10  ;;  %v9303_v10 = vld [vmem:[%s14794_s24 + $0x318] sm:$0xf0]  ;;  %v13418_v50 = vld [vmem:[%s14794_s24 + $0x4cc] sm:$0xf] }
 0x369   : > { %7856 = vmatpush.bf16.msra.mxu3 %v9354_v22  ;;  %v13454_v22 = vld [vmem:[%s14794_s24 + $0x5ec] sm:$0xf]  ;;  %v9527_v1 = vld [vmem:[%s14794_s24 + $0x4d8] sm:$0xf0] }
 0x36a   : > { %7818 = vmatpush.bf16.msra.mxu0 %v8954_v55  ;;  %v9306_v55 = vor.u32 %v13362_v3, %v9303_v10  ;;  %v13450_v48 = vld [vmem:[%s14794_s24 + $0x5cc] sm:$0xf]  ;;  %v9655_v6 = vld [vmem:[%s14794_s24 + $0x5d8] sm:$0xf0] }
 0x36b   : > { %7831 = vmatpush.bf16.msra.mxu1 %v9082_v62  ;;  %v9674_v62 = vor.u32 %v13454_v22, %v9671_v16  ;;  %v13482_v8 = vld [vmem:[%s14794_s24 + $0x6cc] sm:$0xf]  ;;  %v9783_v35 = vld [vmem:[%s14794_s24 + $0x6d8] sm:$0xf0]  ;;  %v9658_v21 = vor.u32 %v13450_v48, %v9655_v6 }
 0x36c   : > { %7844 = vmatpush.bf16.msra.mxu2 %v9210_v52  ;;  %v9802_v52 = vor.u32 %v13486_v30, %v9799_v43  ;;  %v13514_v61 = vld [vmem:[%s14794_s24 + $0x7cc] sm:$0xf]  ;;  %v9911_v9 = vld [vmem:[%s14794_s24 + $0x7d8] sm:$0xf0]  ;;  %v9786_v34 = vor.u32 %v13482_v8, %v9783_v35 }
 0x36d   : > { %7857 = vmatpush.bf16.msra.mxu3 %v9338_v5  ;;  %v9930_v5 = vor.u32 %v13518_v39, %v9927_v54  ;;  %v13446_v4 = vld [vmem:[%s14794_s24 + $0x5ac] sm:$0xf]  ;;  %v9914_v0 = vor.u32 %v13514_v61, %v9911_v9  ;;  %v9639_v40 = vld [vmem:[%s14794_s24 + $0x5b8] sm:$0xf0] }
 0x36e   : > { %7819 = vmatpush.bf16.msra.mxu0 %v8938_v2  ;;  %v9530_v2 = vor.u32 %v13418_v50, %v9527_v1  ;;  %v9767_v42 = vld [vmem:[%s14794_s24 + $0x6b8] sm:$0xf0]  ;;  %v13510_v3 = vld [vmem:[%s14794_s24 + $0x7ac] sm:$0xf]  ;;  %v9642_v45 = vor.u32 %v13446_v4, %v9639_v40 }
 0x36f   : > { %7832 = vmatpush.bf16.msra.mxu1 %v9066_v36  ;;  %v13414_v36 = vld [vmem:[%s14794_s24 + $0x4ac] sm:$0xf]  ;;  %v9895_v10 = vld [vmem:[%s14794_s24 + $0x7b8] sm:$0xf0] }
 0x370   : > { %7845 = vmatpush.bf16.msra.mxu2 %v9194_v38  ;;  %v9511_v38 = vld [vmem:[%s14794_s24 + $0x4b8] sm:$0xf0]  ;;  %v13442_v47 = vld [vmem:[%s14794_s24 + $0x58c] sm:$0xf] }
 0x371   : > { %7858 = vmatpush.bf16.msra.mxu3 %v9322_v41  ;;  %v13478_v41 = vld [vmem:[%s14794_s24 + $0x6ac] sm:$0xf]  ;;  %v9514_v44 = vor.u32 %v13414_v36, %v9511_v38  ;;  %v9495_v22 = vld [vmem:[%s14794_s24 + $0x498] sm:$0xf0] }
 0x372   : > { %7820 = vmatpush.bf16.msra.mxu0 %v8922_v49  ;;  %v9770_v46 = vor.u32 %v13478_v41, %v9767_v42  ;;  %v9898_v49 = vor.u32 %v13510_v3, %v9895_v10  ;;  %v9751_v16 = vld [vmem:[%s14794_s24 + $0x698] sm:$0xf0]  ;;  %v7614_v30 = vpop.f32.mrf.mxu0  ;;  %v13506_v43 = vld [vmem:[%s14794_s24 + $0x78c] sm:$0xf] }
 0x373   : > { %7833 = vmatpush.bf16.msra.mxu1 %v9050_v51  ;;  %v9879_v51 = vld [vmem:[%s14794_s24 + $0x798] sm:$0xf0]  ;;  %v7627_v39 = vpop.f32.mrf.mxu1  ;;  %v13502_v6 = vld [vmem:[%s14794_s24 + $0x76c] sm:$0xf] }
 0x374   : > { %7846 = vmatpush.bf16.msra.mxu2 %v9178_v53  ;;  %v9882_v50 = vor.u32 %v13506_v43, %v9879_v51  ;;  %v9607_v48 = vld [vmem:[%s14794_s24 + $0x578] sm:$0xf0]  ;;  %v13498_v3 = vld [vmem:[%s14794_s24 + $0x74c] sm:$0xf] }
 0x375   : > { %7859 = vmatpush.bf16.msra.mxu3 %v9306_v55  ;;  %7821 = vmatmul.bf16.vlgmr.msra.gmra.mxu0 %v14928_v32  ;;  %v9623_v32 = vld [vmem:[%s14794_s24 + $0x598] sm:$0xf0]  ;;  %v13462_v43 = vld [vmem:[%s14794_s24 + $0x62c] sm:$0xf] }
 0x376   : > { %7865 = vmatpush.bf16.msrb.mxu0 %v9546_v56  ;;  %7834 = vmatmul.bf16.vlgmr.msra.gmra.mxu1 %v14935_v37  ;;  %v7615_v37 = vadd.f32 %v7614_v30, %v16590_v17  ;;  %v9626_v54 = vor.u32 %v13442_v47, %v9623_v32  ;;  %v13406_v56 = vld [vmem:[%s14794_s24 + $0x46c] sm:$0xf]  ;;  %v9735_v17 = vld [vmem:[%s14794_s24 + $0x678] sm:$0xf0] }
 0x377   : > { %7878 = vmatpush.bf16.msrb.mxu1 %v9674_v62  ;;  %7847 = vmatmul.bf16.vlgmr.msra.gmra.mxu2 %v14926_v31  ;;  %v13410_v31 = vld [vmem:[%s14794_s24 + $0x48c] sm:$0xf]  ;;  %v9479_v62 = vld [vmem:[%s14794_s24 + $0x478] sm:$0xf0] }
 0x378   : > { %7891 = vmatpush.bf16.msrb.mxu2 %v9802_v52  ;;  %7860 = vmatmul.bf16.vlgmr.msra.gmra.mxu3 %v14930_v33  ;;  %v13474_v33 = vld [vmem:[%s14794_s24 + $0x68c] sm:$0xf]  ;;  %v9498_v53 = vor.u32 %v13410_v31, %v9495_v22  ;;  %v7628_v1 = vadd.f32 %v7627_v39, %v7615_v37  ;;  %v9863_v8 = vld [vmem:[%s14794_s24 + $0x778] sm:$0xf0]  ;;  %v9482_v35 = vor.u32 %v13406_v56, %v9479_v62 }
 0x379   : > { %7904 = vmatpush.bf16.msrb.mxu3 %v9930_v5  ;;  %v9754_v55 = vor.u32 %v13474_v33, %v9751_v16  ;;  %v13438_v52 = vld [vmem:[%s14794_s24 + $0x56c] sm:$0xf]  ;;  %v9866_v36 = vor.u32 %v13502_v6, %v9863_v8  ;;  %v9591_v4 = vld [vmem:[%s14794_s24 + $0x558] sm:$0xf0] }
 0x37a   : > { %7866 = vmatpush.bf16.msrb.mxu0 %v9530_v2  ;;  %v13470_v5 = vld [vmem:[%s14794_s24 + $0x66c] sm:$0xf]  ;;  %v9610_v61 = vor.u32 %v13438_v52, %v9607_v48  ;;  %v7640_v38 = vpop.f32.mrf.mxu2  ;;  %v9719_v40 = vld [vmem:[%s14794_s24 + $0x658] sm:$0xf0] }
 0x37b   : > { %7879 = vmatpush.bf16.msrb.mxu1 %v9658_v21  ;;  %v9738_v9 = vor.u32 %v13470_v5, %v9735_v17  ;;  %v13402_v2 = vld [vmem:[%s14794_s24 + $0x44c] sm:$0xf]  ;;  %v9463_v21 = vld [vmem:[%s14794_s24 + $0x458] sm:$0xf0]  ;;  %v7641_v41 = vadd.f32 %v7640_v38, %v7628_v1  ;;  %v7653_v42 = vpop.f32.mrf.mxu3 }
 0x37c   : > { %7892 = vmatpush.bf16.msrb.mxu2 %v9786_v34  ;;  %v13434_v34 = vld [vmem:[%s14794_s24 + $0x54c] sm:$0xf]  ;;  %v9847_v10 = vld [vmem:[%s14794_s24 + $0x758] sm:$0xf0] }
 0x37d   : > { %7905 = vmatpush.bf16.msrb.mxu3 %v9914_v0  ;;  %v13466_v0 = vld [vmem:[%s14794_s24 + $0x64c] sm:$0xf]  ;;  %v16661_v31 = vadd.f32 %v7653_v42, %v7641_v41  ;;  %v9594_v22 = vor.u32 %v13434_v34, %v9591_v4  ;;  %v9447_v32 = vld [vmem:[%s14794_s24 + $0x438] sm:$0xf0]  ;;  %v9850_v16 = vor.u32 %v13498_v3, %v9847_v10 }
 0x37e   : > { %7867 = vmatpush.bf16.msrb.mxu0 %v9514_v44  ;;  %v7616_v44 = vpop.f32.mrf.mxu0  ;;  %v9722_v47 = vor.u32 %v13466_v0, %v9719_v40  ;;  %v13430_v33 = vld [vmem:[%s14794_s24 + $0x52c] sm:$0xf]  ;;  %v9575_v30 = vld [vmem:[%s14794_s24 + $0x538] sm:$0xf0] }
 0x37f   : > { %7880 = vmatpush.bf16.msrb.mxu1 %v9642_v45  ;;  %v9466_v45 = vor.u32 %v13402_v2, %v9463_v21  ;;  %v9703_v51 = vld [vmem:[%s14794_s24 + $0x638] sm:$0xf0]  ;;  %v13494_v37 = vld [vmem:[%s14794_s24 + $0x72c] sm:$0xf]  ;;  %v9578_v56 = vor.u32 %v13430_v33, %v9575_v30 }
 0x380   : > { %7893 = vmatpush.bf16.msrb.mxu2 %v9770_v46  ;;  %v7629_v46 = vpop.f32.mrf.mxu1  ;;  %v9706_v62 = vor.u32 %v13462_v43, %v9703_v51  ;;  %v13426_v52 = vld [vmem:[%s14794_s24 + $0x50c] sm:$0xf]  ;;  %v9687_v5 = vld [vmem:[%s14794_s24 + $0x618] sm:$0xf0] }
 0x381   : > { %7906 = vmatpush.bf16.msrb.mxu3 %v9898_v49  ;;  %v13398_v49 = vld [vmem:[%s14794_s24 + $0x42c] sm:$0xf]  ;;  %v9815_v6 = vld [vmem:[%s14794_s24 + $0x718] sm:$0xf0] }
 0x382   : > { %7868 = vmatpush.bf16.msrb.mxu0 %v9498_v53  ;;  %v9831_v53 = vld [vmem:[%s14794_s24 + $0x738] sm:$0xf0]  ;;  %v9450_v39 = vor.u32 %v13398_v49, %v9447_v32  ;;  %v13458_v1 = vld [vmem:[%s14794_s24 + $0x60c] sm:$0xf]  ;;  %v7642_v8 = vpop.f32.mrf.mxu2 }
 0x383   : > { %7881 = vmatpush.bf16.msrb.mxu1 %v9626_v54  ;;  %v13394_v54 = vld [vmem:[%s14794_s24 + $0x40c] sm:$0xf]  ;;  %v9834_v48 = vor.u32 %v13494_v37, %v9831_v53  ;;  %v7655_v2 = vpop.f32.mrf.mxu3  ;;  %v10183_v34 = vld [vmem:[%s14794_s24 + $0x9f8] sm:$0xf0]  ;;  %v9690_v0 = vor.u32 %v13458_v1, %v9687_v5 }
 0x384   : > { %7894 = vmatpush.bf16.msrb.mxu2 %v9754_v55  ;;  %v9431_v55 = vld [vmem:[%s14794_s24 + $0x418] sm:$0xf0]  ;;  %v13490_v17 = vld [vmem:[%s14794_s24 + $0x70c] sm:$0xf] }
 0x385   : > { %7907 = vmatpush.bf16.msrb.mxu3 %v9882_v50  ;;  %v9559_v50 = vld [vmem:[%s14794_s24 + $0x518] sm:$0xf0]  ;;  %v9434_v21 = vor.u32 %v13394_v54, %v9431_v55  ;;  %v13646_v40 = vld [vmem:[%s14794_s24 + $0xbec] sm:$0xf]  ;;  %v9818_v42 = vor.u32 %v13490_v17, %v9815_v6 }
 0x386   : > { %7869 = vmatpush.bf16.msrb.mxu0 %v9482_v35  ;;  %v13550_v35 = vld [vmem:[%s14794_s24 + $0x8ec] sm:$0xf]  ;;  %v10311_v38 = vld [vmem:[%s14794_s24 + $0xaf8] sm:$0xf0]  ;;  %v9562_v4 = vor.u32 %v13426_v52, %v9559_v50 }
 0x387   : > { %7882 = vmatpush.bf16.msrb.mxu1 %v9610_v61  ;;  %v10055_v61 = vld [vmem:[%s14794_s24 + $0x8f8] sm:$0xf0]  ;;  %v13610_v32 = vld [vmem:[%s14794_s24 + $0xacc] sm:$0xf] }
 0x388   : > { %7895 = vmatpush.bf16.msrb.mxu2 %v9738_v9  ;;  %v13582_v9 = vld [vmem:[%s14794_s24 + $0x9ec] sm:$0xf]  ;;  %v10439_v41 = vld [vmem:[%s14794_s24 + $0xbf8] sm:$0xf0]  ;;  %v10058_v3 = vor.u32 %v13550_v35, %v10055_v61 }
 0x389   : > { %7908 = vmatpush.bf16.msrb.mxu3 %v9866_v36  ;;  %v13614_v36 = vld [vmem:[%s14794_s24 + $0xaec] sm:$0xf]  ;;  %v10186_v10 = vor.u32 %v13582_v9, %v10183_v34  ;;  %v10039_v46 = vld [vmem:[%s14794_s24 + $0x8d8] sm:$0xf0] }
 0x38a   : > { %7870 = vmatpush.bf16.msrb.mxu0 %v9466_v45  ;;  %v10314_v44 = vor.u32 %v13614_v36, %v10311_v38  ;;  %v13546_v45 = vld [vmem:[%s14794_s24 + $0x8cc] sm:$0xf]  ;;  %v10167_v49 = vld [vmem:[%s14794_s24 + $0x9d8] sm:$0xf0] }
 0x38b   : > { %7883 = vmatpush.bf16.msrb.mxu1 %v9594_v22  ;;  %v13578_v22 = vld [vmem:[%s14794_s24 + $0x9cc] sm:$0xf]  ;;  %v10295_v33 = vld [vmem:[%s14794_s24 + $0xad8] sm:$0xf0]  ;;  %v10042_v43 = vor.u32 %v13546_v45, %v10039_v46 }
 0x38c   : > { %7896 = vmatpush.bf16.msrb.mxu2 %v9722_v47  ;;  %v10442_v47 = vor.u32 %v13646_v40, %v10439_v41  ;;  %v10423_v30 = vld [vmem:[%s14794_s24 + $0xbd8] sm:$0xf0]  ;;  %v10170_v51 = vor.u32 %v13578_v22, %v10167_v49  ;;  %v10298_v37 = vor.u32 %v13610_v32, %v10295_v33  ;;  %v13542_v53 = vld [vmem:[%s14794_s24 + $0x8ac] sm:$0xf] }
 0x38d   : > { %7909 = vmatpush.bf16.msrb.mxu3 %v9850_v16  ;;  %v13642_v16 = vld [vmem:[%s14794_s24 + $0xbcc] sm:$0xf]  ;;  %v10279_v52 = vld [vmem:[%s14794_s24 + $0xab8] sm:$0xf0] }
 0x38e   : > { %7871 = vmatpush.bf16.msrb.mxu0 %v9450_v39  ;;  %v10023_v39 = vld [vmem:[%s14794_s24 + $0x8b8] sm:$0xf0]  ;;  %v13574_v54 = vld [vmem:[%s14794_s24 + $0x9ac] sm:$0xf]  ;;  %v10426_v55 = vor.u32 %v13642_v16, %v10423_v30 }
 0x38f   : > { %7884 = vmatpush.bf16.msrb.mxu1 %v9578_v56  ;;  %v10151_v56 = vld [vmem:[%s14794_s24 + $0x9b8] sm:$0xf0]  ;;  %v13638_v50 = vld [vmem:[%s14794_s24 + $0xbac] sm:$0xf] }
 0x390   : > { %7897 = vmatpush.bf16.msrb.mxu2 %v9706_v62  ;;  %v13606_v62 = vld [vmem:[%s14794_s24 + $0xaac] sm:$0xf]  ;;  %v10407_v1 = vld [vmem:[%s14794_s24 + $0xbb8] sm:$0xf0] }
 0x391   : > { %7910 = vmatpush.bf16.msrb.mxu3 %v9834_v48  ;;  %v10026_v48 = vor.u32 %v13542_v53, %v10023_v39  ;;  %v10282_v5 = vor.u32 %v13606_v62, %v10279_v52  ;;  %v13538_v17 = vld [vmem:[%s14794_s24 + $0x88c] sm:$0xf]  ;;  %v10007_v6 = vld [vmem:[%s14794_s24 + $0x898] sm:$0xf0] }
 0x392   : > { %7872 = vmatpush.bf16.msrb.mxu0 %v9434_v21  ;;  %v10135_v8 = vld [vmem:[%s14794_s24 + $0x998] sm:$0xf0]  ;;  %v13602_v35 = vld [vmem:[%s14794_s24 + $0xa8c] sm:$0xf]  ;;  %v7666_v9 = vpop.f32.mrf.mxu0  ;;  %v10010_v34 = vor.u32 %v13538_v17, %v10007_v6 }
 0x393   : > { %7885 = vmatpush.bf16.msrb.mxu1 %v9562_v4  ;;  %v10263_v61 = vld [vmem:[%s14794_s24 + $0xa98] sm:$0xf0]  ;;  %v13634_v2 = vld [vmem:[%s14794_s24 + $0xb8c] sm:$0xf]  ;;  %v7679_v36 = vpop.f32.mrf.mxu1 }
 0x394   : > { %7898 = vmatpush.bf16.msrb.mxu2 %v9690_v0  ;;  %v10391_v21 = vld [vmem:[%s14794_s24 + $0xb98] sm:$0xf0]  ;;  %v10266_v4 = vor.u32 %v13602_v35, %v10263_v61  ;;  %v13534_v0 = vld [vmem:[%s14794_s24 + $0x86c] sm:$0xf] }
 0x395   : > { %7911 = vmatpush.bf16.msrb.mxu3 %v9818_v42  ;;  %7873 = vmatmul.bf16.vlgmr.msrb.gmra.mxu0 %v14967_v11  ;;  %v13570_v11 = vld [vmem:[%s14794_s24 + $0x98c] sm:$0xf]  ;;  %v9991_v40 = vld [vmem:[%s14794_s24 + $0x878] sm:$0xf0]  ;;  %v10394_v42 = vor.u32 %v13634_v2, %v10391_v21 }
 0x396   : > { %7917 = vmatpush.bf16.msra.mxu0 %v10058_v3  ;;  %7886 = vmatmul.bf16.vlgmr.msrb.gmra.mxu1 %v14971_v13  ;;  %v7667_v13 = vadd.f32 %v7666_v9, %v16661_v31  ;;  %v10138_v38 = vor.u32 %v13570_v11, %v10135_v8  ;;  %v13566_v41 = vld [vmem:[%s14794_s24 + $0x96c] sm:$0xf]  ;;  %v10247_v31 = vld [vmem:[%s14794_s24 + $0xa78] sm:$0xf0]  ;;  %v9994_v22 = vor.u32 %v13534_v0, %v9991_v40 }
 0x397   : > { %7930 = vmatpush.bf16.msra.mxu1 %v10186_v10  ;;  %7899 = vmatmul.bf16.vlgmr.msrb.gmra.mxu2 %v14964_v7  ;;  %v10154_v7 = vor.u32 %v13574_v54, %v10151_v56  ;;  %v10119_v10 = vld [vmem:[%s14794_s24 + $0x978] sm:$0xf0]  ;;  %v13630_v45 = vld [vmem:[%s14794_s24 + $0xb6c] sm:$0xf] }
 0x398   : > { %7943 = vmatpush.bf16.msra.mxu2 %v10314_v44  ;;  %7912 = vmatmul.bf16.vlgmr.msrb.gmra.mxu3 %v14969_v12  ;;  %v10410_v12 = vor.u32 %v13638_v50, %v10407_v1  ;;  %v7680_v3 = vadd.f32 %v7679_v36, %v7667_v13  ;;  %v13598_v44 = vld [vmem:[%s14794_s24 + $0xa6c] sm:$0xf]  ;;  %v10375_v46 = vld [vmem:[%s14794_s24 + $0xb78] sm:$0xf0] }
 0x399   : > { %7956 = vmatpush.bf16.msra.mxu3 %v10442_v47  ;;  %v10122_v47 = vor.u32 %v13566_v41, %v10119_v10  ;;  %v10250_v49 = vor.u32 %v13598_v44, %v10247_v31  ;;  %v13530_v32 = vld [vmem:[%s14794_s24 + $0x84c] sm:$0xf]  ;;  %v9975_v33 = vld [vmem:[%s14794_s24 + $0x858] sm:$0xf0]  ;;  %v10378_v30 = vor.u32 %v13630_v45, %v10375_v46 }
 0x39a   : > { %7918 = vmatpush.bf16.msra.mxu0 %v10042_v43  ;;  %v13562_v16 = vld [vmem:[%s14794_s24 + $0x94c] sm:$0xf]  ;;  %v7692_v43 = vpop.f32.mrf.mxu2  ;;  %v10231_v53 = vld [vmem:[%s14794_s24 + $0xa58] sm:$0xf0]  ;;  %v7668_v62 = vpop.f32.mrf.mxu0  ;;  %v9978_v52 = vor.u32 %v13530_v32, %v9975_v33 }
 0x39b   : > { %7931 = vmatpush.bf16.msra.mxu1 %v10170_v51  ;;  %v10103_v51 = vld [vmem:[%s14794_s24 + $0x958] sm:$0xf0]  ;;  %v7693_v39 = vadd.f32 %v7692_v43, %v7680_v3  ;;  %v7705_v54 = vpop.f32.mrf.mxu3  ;;  %v7681_v50 = vpop.f32.mrf.mxu1  ;;  %v13558_v6 = vld [vmem:[%s14794_s24 + $0x92c] sm:$0xf] }
 0x39c   : > { %7944 = vmatpush.bf16.msra.mxu2 %v10298_v37  ;;  %v13594_v37 = vld [vmem:[%s14794_s24 + $0xa4c] sm:$0xf]  ;;  %v10359_v56 = vld [vmem:[%s14794_s24 + $0xb58] sm:$0xf0] }
 0x39d   : > { %7957 = vmatpush.bf16.msra.mxu3 %v10426_v55  ;;  %v13626_v55 = vld [vmem:[%s14794_s24 + $0xb4c] sm:$0xf]  ;;  %v16732_v1 = vadd.f32 %v7705_v54, %v7693_v39  ;;  %v9959_v17 = vld [vmem:[%s14794_s24 + $0x838] sm:$0xf0] }
 0x39e   : > { %7919 = vmatpush.bf16.msra.mxu0 %v10026_v48  ;;  %v10106_v48 = vor.u32 %v13562_v16, %v10103_v51  ;;  %v10362_v11 = vor.u32 %v13626_v55, %v10359_v56  ;;  %v13590_v8 = vld [vmem:[%s14794_s24 + $0xa2c] sm:$0xf]  ;;  %v10215_v35 = vld [vmem:[%s14794_s24 + $0xa38] sm:$0xf0] }
 0x39f   : > { %7932 = vmatpush.bf16.msra.mxu1 %v10154_v7  ;;  %v10234_v7 = vor.u32 %v13594_v37, %v10231_v53  ;;  %v13622_v61 = vld [vmem:[%s14794_s24 + $0xb2c] sm:$0xf]  ;;  %v10343_v9 = vld [vmem:[%s14794_s24 + $0xb38] sm:$0xf0]  ;;  %v10218_v36 = vor.u32 %v13590_v8, %v10215_v35 }
 0x3a0   : > { %7945 = vmatpush.bf16.msra.mxu2 %v10282_v5  ;;  %v13526_v5 = vld [vmem:[%s14794_s24 + $0x82c] sm:$0xf]  ;;  %v9943_v13 = vld [vmem:[%s14794_s24 + $0x818] sm:$0xf0]  ;;  %v10346_v40 = vor.u32 %v13622_v61, %v10343_v9 }
 0x3a1   : > { %7958 = vmatpush.bf16.msra.mxu3 %v10410_v12  ;;  %v10087_v12 = vld [vmem:[%s14794_s24 + $0x938] sm:$0xf0]  ;;  %v9962_v2 = vor.u32 %v13526_v5, %v9959_v17  ;;  %v13522_v21 = vld [vmem:[%s14794_s24 + $0x80c] sm:$0xf] }
 0x3a2   : > { %7920 = vmatpush.bf16.msra.mxu0 %v10010_v34  ;;  %v10090_v34 = vor.u32 %v13558_v6, %v10087_v12  ;;  %v13586_v0 = vld [vmem:[%s14794_s24 + $0xa0c] sm:$0xf]  ;;  %v10199_v41 = vld [vmem:[%s14794_s24 + $0xa18] sm:$0xf0]  ;;  %v7694_v10 = vpop.f32.mrf.mxu2 }
 0x3a3   : > { %7933 = vmatpush.bf16.msra.mxu1 %v10138_v38  ;;  %v13554_v38 = vld [vmem:[%s14794_s24 + $0x90c] sm:$0xf]  ;;  %v10327_v3 = vld [vmem:[%s14794_s24 + $0xb18] sm:$0xf0]  ;;  %v7707_v46 = vpop.f32.mrf.mxu3  ;;  %v10202_v16 = vor.u32 %v13586_v0, %v10199_v41 }
 0x3a4   : > { %7946 = vmatpush.bf16.msra.mxu2 %v10266_v4  ;;  %v10071_v4 = vld [vmem:[%s14794_s24 + $0x918] sm:$0xf0]  ;;  %v13678_v44 = vld [vmem:[%s14794_s24 + $0xcec] sm:$0xf] }
 0x3a5   : > { %7959 = vmatpush.bf16.msra.mxu3 %v10394_v42  ;;  %v13618_v42 = vld [vmem:[%s14794_s24 + $0xb0c] sm:$0xf]  ;;  %v10567_v31 = vld [vmem:[%s14794_s24 + $0xcf8] sm:$0xf0]  ;;  %v10074_v33 = vor.u32 %v13554_v38, %v10071_v4 }
 0x3a6   : > { %7921 = vmatpush.bf16.msra.mxu0 %v9994_v22  ;;  %v13710_v45 = vld [vmem:[%s14794_s24 + $0xdec] sm:$0xf]  ;;  %v9946_v22 = vor.u32 %v13522_v21, %v9943_v13  ;;  %v10823_v32 = vld [vmem:[%s14794_s24 + $0xef8] sm:$0xf0]  ;;  %v10330_v51 = vor.u32 %v13618_v42, %v10327_v3  ;;  %v10570_v37 = vor.u32 %v13678_v44, %v10567_v31 }
 0x3a7   : > { %7934 = vmatpush.bf16.msra.mxu1 %v10122_v47  ;;  %v10695_v47 = vld [vmem:[%s14794_s24 + $0xdf8] sm:$0xf0]  ;;  %v13674_v54 = vld [vmem:[%s14794_s24 + $0xccc] sm:$0xf] }
 0x3a8   : > { %7947 = vmatpush.bf16.msra.mxu2 %v10250_v49  ;;  %v13742_v49 = vld [vmem:[%s14794_s24 + $0xeec] sm:$0xf]  ;;  %v10951_v43 = vld [vmem:[%s14794_s24 + $0xff8] sm:$0xf0]  ;;  %v10698_v53 = vor.u32 %v13710_v45, %v10695_v47 }
 0x3a9   : > { %7960 = vmatpush.bf16.msra.mxu3 %v10378_v30  ;;  %v13774_v30 = vld [vmem:[%s14794_s24 + $0xfec] sm:$0xf]  ;;  %v10826_v39 = vor.u32 %v13742_v49, %v10823_v32  ;;  %v10551_v55 = vld [vmem:[%s14794_s24 + $0xcd8] sm:$0xf0] }
 0x3aa   : > { %7922 = vmatpush.bf16.msra.mxu0 %v9978_v52  ;;  %v13706_v56 = vld [vmem:[%s14794_s24 + $0xdcc] sm:$0xf]  ;;  %v10954_v62 = vor.u32 %v13774_v30, %v10951_v43  ;;  %v10679_v52 = vld [vmem:[%s14794_s24 + $0xdd8] sm:$0xf0]  ;;  %v10554_v17 = vor.u32 %v13674_v54, %v10551_v55 }
 0x3ab   : > { %7935 = vmatpush.bf16.msra.mxu1 %v10106_v48  ;;  %v13738_v50 = vld [vmem:[%s14794_s24 + $0xecc] sm:$0xf]  ;;  %v10807_v48 = vld [vmem:[%s14794_s24 + $0xed8] sm:$0xf0]  ;;  %v10682_v6 = vor.u32 %v13706_v56, %v10679_v52 }
 0x3ac   : > { %7948 = vmatpush.bf16.msra.mxu2 %v10234_v7  ;;  %v13770_v7 = vld [vmem:[%s14794_s24 + $0xfcc] sm:$0xf]  ;;  %v10935_v5 = vld [vmem:[%s14794_s24 + $0xfd8] sm:$0xf0] }
 0x3ad   : > { %7961 = vmatpush.bf16.msra.mxu3 %v10362_v11  ;;  %v10810_v11 = vor.u32 %v13738_v50, %v10807_v48  ;;  %v13670_v12 = vld [vmem:[%s14794_s24 + $0xcac] sm:$0xf]  ;;  %v10535_v8 = vld [vmem:[%s14794_s24 + $0xcb8] sm:$0xf0]  ;;  %v10938_v61 = vor.u32 %v13770_v7, %v10935_v5 }
 0x3ae   : > { %7923 = vmatpush.bf16.msra.mxu0 %v9962_v2  ;;  %v13702_v35 = vld [vmem:[%s14794_s24 + $0xdac] sm:$0xf]  ;;  %v10663_v9 = vld [vmem:[%s14794_s24 + $0xdb8] sm:$0xf0] }
 0x3af   : > { %7936 = vmatpush.bf16.msra.mxu1 %v10090_v34  ;;  %v13734_v2 = vld [vmem:[%s14794_s24 + $0xeac] sm:$0xf]  ;;  %v10791_v21 = vld [vmem:[%s14794_s24 + $0xeb8] sm:$0xf0] }
 0x3b0   : > { %7949 = vmatpush.bf16.msra.mxu2 %v10218_v36  ;;  %v13766_v13 = vld [vmem:[%s14794_s24 + $0xfac] sm:$0xf]  ;;  %v10919_v34 = vld [vmem:[%s14794_s24 + $0xfb8] sm:$0xf0]  ;;  %v10666_v36 = vor.u32 %v13702_v35, %v10663_v9  ;;  %v10794_v38 = vor.u32 %v13734_v2, %v10791_v21 }
 0x3b1   : > { %7962 = vmatpush.bf16.msra.mxu3 %v10346_v40  ;;  %v13666_v4 = vld [vmem:[%s14794_s24 + $0xc8c] sm:$0xf]  ;;  %v10519_v0 = vld [vmem:[%s14794_s24 + $0xc98] sm:$0xf0] }
 0x3b2   : > { %7924 = vmatpush.bf16.msra.mxu0 %v9946_v22  ;;  %v10647_v40 = vld [vmem:[%s14794_s24 + $0xd98] sm:$0xf0]  ;;  %v13730_v41 = vld [vmem:[%s14794_s24 + $0xe8c] sm:$0xf]  ;;  %v10522_v31 = vor.u32 %v13666_v4, %v10519_v0 }
 0x3b3   : > { %7937 = vmatpush.bf16.msra.mxu1 %v10074_v33  ;;  %v10775_v42 = vld [vmem:[%s14794_s24 + $0xe98] sm:$0xf0]  ;;  %v13762_v3 = vld [vmem:[%s14794_s24 + $0xf8c] sm:$0xf]  ;;  %v7731_v45 = vpop.f32.mrf.mxu1 }
 0x3b4   : > { %7950 = vmatpush.bf16.msra.mxu2 %v10202_v16  ;;  %v10903_v10 = vld [vmem:[%s14794_s24 + $0xf98] sm:$0xf0]  ;;  %v10778_v22 = vor.u32 %v13730_v41, %v10775_v42  ;;  %v13662_v47 = vld [vmem:[%s14794_s24 + $0xc6c] sm:$0xf] }
 0x3b5   : > { %7963 = vmatpush.bf16.msra.mxu3 %v10330_v51  ;;  %7925 = vmatmul.bf16.vlgmr.msra.gmra.mxu0 %v15057_v23  ;;  %v10538_v23 = vor.u32 %v13670_v12, %v10535_v8  ;;  %v10503_v49 = vld [vmem:[%s14794_s24 + $0xc78] sm:$0xf0]  ;;  %v13694_v32 = vld [vmem:[%s14794_s24 + $0xd6c] sm:$0xf]  ;;  %v10906_v33 = vor.u32 %v13762_v3, %v10903_v10 }
 0x3b6   : > { %7969 = vmatpush.bf16.msrb.mxu0 %v10570_v37  ;;  %7938 = vmatmul.bf16.vlgmr.msra.gmra.mxu1 %v15063_v27  ;;  %v10922_v27 = vor.u32 %v13766_v13, %v10919_v34  ;;  %v10631_v30 = vld [vmem:[%s14794_s24 + $0xd78] sm:$0xf0]  ;;  %v13726_v43 = vld [vmem:[%s14794_s24 + $0xe6c] sm:$0xf] }
 0x3b7   : > { %7982 = vmatpush.bf16.msrb.mxu1 %v10698_v53  ;;  %7951 = vmatmul.bf16.vlgmr.msra.gmra.mxu2 %v15061_v26  ;;  %v13698_v26 = vld [vmem:[%s14794_s24 + $0xd8c] sm:$0xf]  ;;  %v10887_v37 = vld [vmem:[%s14794_s24 + $0xf78] sm:$0xf0]  ;;  %v10506_v53 = vor.u32 %v13662_v47, %v10503_v49 }
 0x3b8   : > { %7995 = vmatpush.bf16.msrb.mxu2 %v10826_v39  ;;  %7964 = vmatmul.bf16.vlgmr.msra.gmra.mxu3 %v15065_v28  ;;  %v7718_v28 = vpop.f32.mrf.mxu0  ;;  %v10650_v46 = vor.u32 %v13698_v26, %v10647_v40  ;;  %v13758_v51 = vld [vmem:[%s14794_s24 + $0xf6c] sm:$0xf]  ;;  %v10634_v39 = vor.u32 %v13694_v32, %v10631_v30  ;;  %v10487_v56 = vld [vmem:[%s14794_s24 + $0xc58] sm:$0xf0] }
 0x3b9   : > { %8008 = vmatpush.bf16.msrb.mxu3 %v10954_v62  ;;  %v7719_v44 = vadd.f32 %v7718_v28, %v16732_v1  ;;  %v10759_v1 = vld [vmem:[%s14794_s24 + $0xe78] sm:$0xf0]  ;;  %v13658_v55 = vld [vmem:[%s14794_s24 + $0xc4c] sm:$0xf]  ;;  %v10890_v52 = vor.u32 %v13758_v51, %v10887_v37 }
 0x3ba   : > { %7970 = vmatpush.bf16.msrb.mxu0 %v10554_v17  ;;  %v10762_v54 = vor.u32 %v13726_v43, %v10759_v1  ;;  %v13690_v62 = vld [vmem:[%s14794_s24 + $0xd4c] sm:$0xf]  ;;  %v7744_v50 = vpop.f32.mrf.mxu2  ;;  %v10615_v48 = vld [vmem:[%s14794_s24 + $0xd58] sm:$0xf0]  ;;  %v10490_v35 = vor.u32 %v13658_v55, %v10487_v56 }
 0x3bb   : > { %7983 = vmatpush.bf16.msrb.mxu1 %v10682_v6  ;;  %v7732_v16 = vadd.f32 %v7731_v45, %v7719_v44  ;;  %v13722_v7 = vld [vmem:[%s14794_s24 + $0xe4c] sm:$0xf]  ;;  %v10743_v5 = vld [vmem:[%s14794_s24 + $0xe58] sm:$0xf0]  ;;  %v7757_v6 = vpop.f32.mrf.mxu3  ;;  %v10618_v2 = vor.u32 %v13690_v62, %v10615_v48 }
 0x3bc   : > { %7996 = vmatpush.bf16.msrb.mxu2 %v10810_v11  ;;  %v13754_v11 = vld [vmem:[%s14794_s24 + $0xf4c] sm:$0xf]  ;;  %v10871_v12 = vld [vmem:[%s14794_s24 + $0xf58] sm:$0xf0]  ;;  %v10746_v21 = vor.u32 %v13722_v7, %v10743_v5 }
 0x3bd   : > { %8009 = vmatpush.bf16.msrb.mxu3 %v10938_v61  ;;  %v7745_v17 = vadd.f32 %v7744_v50, %v7732_v16  ;;  %v7733_v61 = vpop.f32.mrf.mxu1  ;;  %v13654_v13 = vld [vmem:[%s14794_s24 + $0xc2c] sm:$0xf]  ;;  %v10471_v34 = vld [vmem:[%s14794_s24 + $0xc38] sm:$0xf0] }
 0x3be   : > { %7971 = vmatpush.bf16.msrb.mxu0 %v10538_v23  ;;  %v13686_v23 = vld [vmem:[%s14794_s24 + $0xd2c] sm:$0xf]  ;;  %v10727_v0 = vld [vmem:[%s14794_s24 + $0xe38] sm:$0xf0]  ;;  %v10474_v40 = vor.u32 %v13654_v13, %v10471_v34 }
 0x3bf   : > { %7984 = vmatpush.bf16.msrb.mxu1 %v10666_v36  ;;  %v16803_v9 = vadd.f32 %v7757_v6, %v7745_v17  ;;  %v10874_v36 = vor.u32 %v13754_v11, %v10871_v12  ;;  %v13718_v4 = vld [vmem:[%s14794_s24 + $0xe2c] sm:$0xf]  ;;  %v10455_v42 = vld [vmem:[%s14794_s24 + $0xc18] sm:$0xf0] }
 0x3c0   : > { %7997 = vmatpush.bf16.msrb.mxu2 %v10794_v38  ;;  %v7720_v8 = vpop.f32.mrf.mxu0  ;;  %v10599_v38 = vld [vmem:[%s14794_s24 + $0xd38] sm:$0xf0]  ;;  %v13750_v26 = vld [vmem:[%s14794_s24 + $0xf2c] sm:$0xf]  ;;  %v10730_v3 = vor.u32 %v13718_v4, %v10727_v0 }
 0x3c1   : > { %8010 = vmatpush.bf16.msrb.mxu3 %v10922_v27  ;;  %v10855_v27 = vld [vmem:[%s14794_s24 + $0xf38] sm:$0xf0]  ;;  %v13650_v41 = vld [vmem:[%s14794_s24 + $0xc0c] sm:$0xf]  ;;  %v10602_v28 = vor.u32 %v13686_v23, %v10599_v38 }
 0x3c2   : > { %7972 = vmatpush.bf16.msrb.mxu0 %v10522_v31  ;;  %v13682_v10 = vld [vmem:[%s14794_s24 + $0xd0c] sm:$0xf]  ;;  %v10583_v44 = vld [vmem:[%s14794_s24 + $0xd18] sm:$0xf0]  ;;  %v10858_v45 = vor.u32 %v13750_v26, %v10855_v27  ;;  %v7746_v49 = vpop.f32.mrf.mxu2  ;;  %v10458_v43 = vor.u32 %v13650_v41, %v10455_v42 }
 0x3c3   : > { %7985 = vmatpush.bf16.msrb.mxu1 %v10650_v46  ;;  %v13714_v31 = vld [vmem:[%s14794_s24 + $0xe0c] sm:$0xf]  ;;  %v10711_v46 = vld [vmem:[%s14794_s24 + $0xe18] sm:$0xf0]  ;;  %v7759_v30 = vpop.f32.mrf.mxu3 }
 0x3c4   : > { %7998 = vmatpush.bf16.msrb.mxu2 %v10778_v22  ;;  %v13746_v22 = vld [vmem:[%s14794_s24 + $0xf0c] sm:$0xf]  ;;  %v10839_v47 = vld [vmem:[%s14794_s24 + $0xf18] sm:$0xf0] }
 0x3c5   : > { %8011 = vmatpush.bf16.msrb.mxu3 %v10906_v33  ;;  %v13806_v32 = vld [vmem:[%s14794_s24 + $0x10ec] sm:$0xf]  ;;  %v11079_v33 = vld [vmem:[%s14794_s24 + $0x10f8] sm:$0xf0]  ;;  %v10842_v56 = vor.u32 %v13746_v22, %v10839_v47 }
 0x3c6   : > { %7973 = vmatpush.bf16.msrb.mxu0 %v10506_v53  ;;  %v13838_v16 = vld [vmem:[%s14794_s24 + $0x11ec] sm:$0xf]  ;;  %v11207_v1 = vld [vmem:[%s14794_s24 + $0x11f8] sm:$0xf0]  ;;  %v10586_v53 = vor.u32 %v13682_v10, %v10583_v44  ;;  %v11082_v62 = vor.u32 %v13806_v32, %v11079_v33 }
 0x3c7   : > { %7986 = vmatpush.bf16.msrb.mxu1 %v10634_v39  ;;  %v13870_v51 = vld [vmem:[%s14794_s24 + $0x12ec] sm:$0xf]  ;;  %v11335_v37 = vld [vmem:[%s14794_s24 + $0x12f8] sm:$0xf0]  ;;  %v10714_v39 = vor.u32 %v13714_v31, %v10711_v46 }
 0x3c8   : > { %7999 = vmatpush.bf16.msrb.mxu2 %v10762_v54  ;;  %v13902_v54 = vld [vmem:[%s14794_s24 + $0x13ec] sm:$0xf]  ;;  %v11463_v55 = vld [vmem:[%s14794_s24 + $0x13f8] sm:$0xf0]  ;;  %v11338_v50 = vor.u32 %v13870_v51, %v11335_v37 }
 0x3c9   : > { %8012 = vmatpush.bf16.msrb.mxu3 %v10890_v52  ;;  %v11210_v52 = vor.u32 %v13838_v16, %v11207_v1  ;;  %v13802_v48 = vld [vmem:[%s14794_s24 + $0x10cc] sm:$0xf]  ;;  %v11063_v7 = vld [vmem:[%s14794_s24 + $0x10d8] sm:$0xf0]  ;;  %v11466_v17 = vor.u32 %v13902_v54, %v11463_v55 }
 0x3ca   : > { %7974 = vmatpush.bf16.msrb.mxu0 %v10490_v35  ;;  %v13834_v5 = vld [vmem:[%s14794_s24 + $0x11cc] sm:$0xf]  ;;  %v11191_v6 = vld [vmem:[%s14794_s24 + $0x11d8] sm:$0xf0]  ;;  %v11066_v61 = vor.u32 %v13802_v48, %v11063_v7 }
 0x3cb   : > { %7987 = vmatpush.bf16.msrb.mxu1 %v10618_v2  ;;  %v13866_v11 = vld [vmem:[%s14794_s24 + $0x12cc] sm:$0xf]  ;;  %v11319_v12 = vld [vmem:[%s14794_s24 + $0x12d8] sm:$0xf0]  ;;  %v11194_v2 = vor.u32 %v13834_v5, %v11191_v6 }
 0x3cc   : > { %8000 = vmatpush.bf16.msrb.mxu2 %v10746_v21  ;;  %v13898_v8 = vld [vmem:[%s14794_s24 + $0x13cc] sm:$0xf]  ;;  %v11447_v35 = vld [vmem:[%s14794_s24 + $0x13d8] sm:$0xf0]  ;;  %v11322_v21 = vor.u32 %v13866_v11, %v11319_v12 }
 0x3cd   : > { %8013 = vmatpush.bf16.msrb.mxu3 %v10874_v36  ;;  %v13798_v13 = vld [vmem:[%s14794_s24 + $0x10ac] sm:$0xf]  ;;  %v11047_v34 = vld [vmem:[%s14794_s24 + $0x10b8] sm:$0xf0]  ;;  %v11450_v36 = vor.u32 %v13898_v8, %v11447_v35 }
 0x3ce   : > { %7975 = vmatpush.bf16.msrb.mxu0 %v10474_v40  ;;  %v13830_v23 = vld [vmem:[%s14794_s24 + $0x11ac] sm:$0xf]  ;;  %v11175_v38 = vld [vmem:[%s14794_s24 + $0x11b8] sm:$0xf0] }
 0x3cf   : > { %7988 = vmatpush.bf16.msrb.mxu1 %v10602_v28  ;;  %v13862_v4 = vld [vmem:[%s14794_s24 + $0x12ac] sm:$0xf]  ;;  %v11303_v0 = vld [vmem:[%s14794_s24 + $0x12b8] sm:$0xf0]  ;;  %v11178_v40 = vor.u32 %v13830_v23, %v11175_v38 }
 0x3d0   : > { %8001 = vmatpush.bf16.msrb.mxu2 %v10730_v3  ;;  %v13894_v26 = vld [vmem:[%s14794_s24 + $0x13ac] sm:$0xf]  ;;  %v11431_v27 = vld [vmem:[%s14794_s24 + $0x13b8] sm:$0xf0]  ;;  %v11306_v41 = vor.u32 %v13862_v4, %v11303_v0 }
 0x3d1   : > { %8014 = vmatpush.bf16.msrb.mxu3 %v10858_v45  ;;  %v13794_v42 = vld [vmem:[%s14794_s24 + $0x108c] sm:$0xf]  ;;  %v11031_v28 = vld [vmem:[%s14794_s24 + $0x1098] sm:$0xf0] }
 0x3d2   : > { %7976 = vmatpush.bf16.msrb.mxu0 %v10458_v43  ;;  %v11159_v3 = vld [vmem:[%s14794_s24 + $0x1198] sm:$0xf0]  ;;  %v13858_v10 = vld [vmem:[%s14794_s24 + $0x128c] sm:$0xf]  ;;  %v11034_v22 = vor.u32 %v13794_v42, %v11031_v28 }
 0x3d3   : > { %7989 = vmatpush.bf16.msrb.mxu1 %v10586_v53  ;;  %v11287_v44 = vld [vmem:[%s14794_s24 + $0x1298] sm:$0xf0]  ;;  %v13890_v31 = vld [vmem:[%s14794_s24 + $0x138c] sm:$0xf]  ;;  %v7783_v47 = vpop.f32.mrf.mxu1 }
 0x3d4   : > { %8002 = vmatpush.bf16.msrb.mxu2 %v10714_v39  ;;  %v11415_v45 = vld [vmem:[%s14794_s24 + $0x1398] sm:$0xf0]  ;;  %v11290_v32 = vor.u32 %v13858_v10, %v11287_v44  ;;  %v13790_v33 = vld [vmem:[%s14794_s24 + $0x106c] sm:$0xf] }
 0x3d5   : > { %8015 = vmatpush.bf16.msrb.mxu3 %v10842_v56  ;;  %7977 = vmatmul.bf16.vlgmr.msrb.gmra.mxu0 %v15123_v57  ;;  %v11050_v57 = vor.u32 %v13798_v13, %v11047_v34  ;;  %v11015_v16 = vld [vmem:[%s14794_s24 + $0x1078] sm:$0xf0]  ;;  %v13822_v30 = vld [vmem:[%s14794_s24 + $0x116c] sm:$0xf]  ;;  %v11418_v43 = vor.u32 %v13890_v31, %v11415_v45 }
 0x3d6   : > { %8021 = vmatpush.bf16.msra.mxu0 %v11082_v62  ;;  %7990 = vmatmul.bf16.vlgmr.msrb.gmra.mxu1 %v15127_v59  ;;  %v11434_v59 = vor.u32 %v13894_v26, %v11431_v27  ;;  %v11143_v51 = vld [vmem:[%s14794_s24 + $0x1178] sm:$0xf0]  ;;  %v13854_v37 = vld [vmem:[%s14794_s24 + $0x126c] sm:$0xf]  ;;  %v11018_v54 = vor.u32 %v13790_v33, %v11015_v16 }
 0x3d7   : > { %8034 = vmatpush.bf16.msra.mxu1 %v11210_v52  ;;  %8003 = vmatmul.bf16.vlgmr.msrb.gmra.mxu2 %v15125_v58  ;;  %v13826_v58 = vld [vmem:[%s14794_s24 + $0x118c] sm:$0xf]  ;;  %v11399_v39 = vld [vmem:[%s14794_s24 + $0x1378] sm:$0xf0]  ;;  %v11146_v55 = vor.u32 %v13822_v30, %v11143_v51 }
 0x3d8   : > { %8047 = vmatpush.bf16.msra.mxu2 %v11338_v50  ;;  %8016 = vmatmul.bf16.vlgmr.msrb.gmra.mxu3 %v15129_v60  ;;  %v7770_v60 = vpop.f32.mrf.mxu0  ;;  %v11162_v49 = vor.u32 %v13826_v58, %v11159_v3  ;;  %v13886_v53 = vld [vmem:[%s14794_s24 + $0x136c] sm:$0xf]  ;;  %v10999_v52 = vld [vmem:[%s14794_s24 + $0x1058] sm:$0xf0] }
 0x3d9   : > { %8060 = vmatpush.bf16.msra.mxu3 %v11466_v17  ;;  %v7771_v46 = vadd.f32 %v7770_v60, %v16803_v9  ;;  %v11271_v9 = vld [vmem:[%s14794_s24 + $0x1278] sm:$0xf0]  ;;  %v13786_v62 = vld [vmem:[%s14794_s24 + $0x104c] sm:$0xf]  ;;  %v11402_v48 = vor.u32 %v13886_v53, %v11399_v39 }
 0x3da   : > { %8022 = vmatpush.bf16.msra.mxu0 %v11066_v61  ;;  %v11274_v56 = vor.u32 %v13854_v37, %v11271_v9  ;;  %v13818_v50 = vld [vmem:[%s14794_s24 + $0x114c] sm:$0xf]  ;;  %v7796_v7 = vpop.f32.mrf.mxu2  ;;  %v11127_v5 = vld [vmem:[%s14794_s24 + $0x1158] sm:$0xf0] }
 0x3db   : > { %8035 = vmatpush.bf16.msra.mxu1 %v11194_v2  ;;  %v7784_v1 = vadd.f32 %v7783_v47, %v7771_v46  ;;  %v13850_v17 = vld [vmem:[%s14794_s24 + $0x124c] sm:$0xf]  ;;  %v11255_v6 = vld [vmem:[%s14794_s24 + $0x1258] sm:$0xf0]  ;;  %v7809_v12 = vpop.f32.mrf.mxu3  ;;  %v11002_v2 = vor.u32 %v13786_v62, %v10999_v52  ;;  %v11130_v34 = vor.u32 %v13818_v50, %v11127_v5 }
 0x3dc   : > { %8048 = vmatpush.bf16.msra.mxu2 %v11322_v21  ;;  %v13882_v8 = vld [vmem:[%s14794_s24 + $0x134c] sm:$0xf]  ;;  %v11383_v35 = vld [vmem:[%s14794_s24 + $0x1358] sm:$0xf0]  ;;  %v7785_v21 = vpop.f32.mrf.mxu1  ;;  %v11258_v23 = vor.u32 %v13850_v17, %v11255_v6 }
 0x3dd   : > { %8061 = vmatpush.bf16.msra.mxu3 %v11450_v36  ;;  %v7797_v11 = vadd.f32 %v7796_v7, %v7784_v1  ;;  %v13782_v36 = vld [vmem:[%s14794_s24 + $0x102c] sm:$0xf]  ;;  %v10983_v38 = vld [vmem:[%s14794_s24 + $0x1038] sm:$0xf0]  ;;  %v11386_v0 = vor.u32 %v13882_v8, %v11383_v35 }
 0x3de   : > { %8023 = vmatpush.bf16.msra.mxu0 %v11050_v57  ;;  %v13814_v4 = vld [vmem:[%s14794_s24 + $0x112c] sm:$0xf]  ;;  %v11111_v26 = vld [vmem:[%s14794_s24 + $0x1138] sm:$0xf0]  ;;  %v10986_v42 = vor.u32 %v13782_v36, %v10983_v38 }
 0x3df   : > { %8036 = vmatpush.bf16.msra.mxu1 %v11178_v40  ;;  %v16874_v13 = vadd.f32 %v7809_v12, %v7797_v11  ;;  %v13846_v27 = vld [vmem:[%s14794_s24 + $0x122c] sm:$0xf]  ;;  %v11239_v57 = vld [vmem:[%s14794_s24 + $0x1238] sm:$0xf0] }
 0x3e0   : > { %8049 = vmatpush.bf16.msra.mxu2 %v11306_v41  ;;  %v7772_v61 = vpop.f32.mrf.mxu0  ;;  %v13878_v40 = vld [vmem:[%s14794_s24 + $0x132c] sm:$0xf]  ;;  %v11367_v41 = vld [vmem:[%s14794_s24 + $0x1338] sm:$0xf0]  ;;  %v11242_v3 = vor.u32 %v13846_v27, %v11239_v57 }
 0x3e1   : > { %8062 = vmatpush.bf16.msra.mxu3 %v11434_v59  ;;  %v13778_v28 = vld [vmem:[%s14794_s24 + $0x100c] sm:$0xf]  ;;  %v10967_v58 = vld [vmem:[%s14794_s24 + $0x1018] sm:$0xf0]  ;;  %v11114_v59 = vor.u32 %v13814_v4, %v11111_v26  ;;  %v11370_v31 = vor.u32 %v13878_v40, %v11367_v41 }
 0x3e2   : > { %8024 = vmatpush.bf16.msra.mxu0 %v11034_v22  ;;  %v13810_v10 = vld [vmem:[%s14794_s24 + $0x110c] sm:$0xf]  ;;  %v11095_v44 = vld [vmem:[%s14794_s24 + $0x1118] sm:$0xf0]  ;;  %v7798_v47 = vpop.f32.mrf.mxu2  ;;  %v10970_v30 = vor.u32 %v13778_v28, %v10967_v58 }
 0x3e3   : > { %8037 = vmatpush.bf16.msra.mxu1 %v11162_v49  ;;  %v13842_v60 = vld [vmem:[%s14794_s24 + $0x120c] sm:$0xf]  ;;  %v11223_v45 = vld [vmem:[%s14794_s24 + $0x1218] sm:$0xf0]  ;;  %v7811_v16 = vpop.f32.mrf.mxu3  ;;  %v11098_v37 = vor.u32 %v13810_v10, %v11095_v44 }
 0x3e4   : > { %8050 = vmatpush.bf16.msra.mxu2 %v11290_v32  ;;  %v13874_v46 = vld [vmem:[%s14794_s24 + $0x130c] sm:$0xf]  ;;  %v11351_v22 = vld [vmem:[%s14794_s24 + $0x1318] sm:$0xf0]  ;;  %v11226_v9 = vor.u32 %v13842_v60, %v11223_v45 }
 0x3e5   : > { %8063 = vmatpush.bf16.msra.mxu3 %v11418_v43  ;;  %v13934_v49 = vld [vmem:[%s14794_s24 + $0x14ec] sm:$0xf]  ;;  %v11591_v32 = vld [vmem:[%s14794_s24 + $0x14f8] sm:$0xf0] }
 0x3e6   : > { %8025 = vmatpush.bf16.msra.mxu0 %v11018_v54  ;;  %v13966_v33 = vld [vmem:[%s14794_s24 + $0x15ec] sm:$0xf]  ;;  %v11719_v43 = vld [vmem:[%s14794_s24 + $0x15f8] sm:$0xf0]  ;;  %v11354_v54 = vor.u32 %v13874_v46, %v11351_v22 }
 0x3e7   : > { %8038 = vmatpush.bf16.msra.mxu1 %v11146_v55  ;;  %v13998_v1 = vld [vmem:[%s14794_s24 + $0x16ec] sm:$0xf]  ;;  %v11847_v51 = vld [vmem:[%s14794_s24 + $0x16f8] sm:$0xf0]  ;;  %v11594_v55 = vor.u32 %v13934_v49, %v11591_v32 }
 0x3e8   : > { %8051 = vmatpush.bf16.msra.mxu2 %v11274_v56  ;;  %v14030_v53 = vld [vmem:[%s14794_s24 + $0x17ec] sm:$0xf]  ;;  %v11975_v39 = vld [vmem:[%s14794_s24 + $0x17f8] sm:$0xf0]  ;;  %v11722_v56 = vor.u32 %v13966_v33, %v11719_v43  ;;  %v11850_v62 = vor.u32 %v13998_v1, %v11847_v51 }
 0x3e9   : > { %8064 = vmatpush.bf16.msra.mxu3 %v11402_v48  ;;  %v13930_v52 = vld [vmem:[%s14794_s24 + $0x14cc] sm:$0xf]  ;;  %v11575_v50 = vld [vmem:[%s14794_s24 + $0x14d8] sm:$0xf0]  ;;  %v11978_v7 = vor.u32 %v14030_v53, %v11975_v39 }
 0x3ea   : > { %8026 = vmatpush.bf16.msra.mxu0 %v11002_v2  ;;  %v13962_v48 = vld [vmem:[%s14794_s24 + $0x15cc] sm:$0xf]  ;;  %v11703_v5 = vld [vmem:[%s14794_s24 + $0x15d8] sm:$0xf0]  ;;  %v11578_v8 = vor.u32 %v13930_v52, %v11575_v50 }
 0x3eb   : > { %8039 = vmatpush.bf16.msra.mxu1 %v11130_v34  ;;  %v13994_v17 = vld [vmem:[%s14794_s24 + $0x16cc] sm:$0xf]  ;;  %v11831_v6 = vld [vmem:[%s14794_s24 + $0x16d8] sm:$0xf0]  ;;  %v11706_v35 = vor.u32 %v13962_v48, %v11703_v5 }
 0x3ec   : > { %8052 = vmatpush.bf16.msra.mxu2 %v11258_v23  ;;  %v14026_v11 = vld [vmem:[%s14794_s24 + $0x17cc] sm:$0xf]  ;;  %v11959_v12 = vld [vmem:[%s14794_s24 + $0x17d8] sm:$0xf0]  ;;  %v11834_v61 = vor.u32 %v13994_v17, %v11831_v6 }
 0x3ed   : > { %8065 = vmatpush.bf16.msra.mxu3 %v11386_v0  ;;  %v13926_v2 = vld [vmem:[%s14794_s24 + $0x14ac] sm:$0xf]  ;;  %v11559_v21 = vld [vmem:[%s14794_s24 + $0x14b8] sm:$0xf0]  ;;  %v11962_v23 = vor.u32 %v14026_v11, %v11959_v12 }
 0x3ee   : > { %8027 = vmatpush.bf16.msra.mxu0 %v10986_v42  ;;  %v13958_v34 = vld [vmem:[%s14794_s24 + $0x15ac] sm:$0xf]  ;;  %v11687_v36 = vld [vmem:[%s14794_s24 + $0x15b8] sm:$0xf0] }
 0x3ef   : > { %8040 = vmatpush.bf16.msra.mxu1 %v11114_v59  ;;  %v13990_v38 = vld [vmem:[%s14794_s24 + $0x16ac] sm:$0xf]  ;;  %v11815_v4 = vld [vmem:[%s14794_s24 + $0x16b8] sm:$0xf0]  ;;  %v11690_v27 = vor.u32 %v13958_v34, %v11687_v36 }
 0x3f0   : > { %8053 = vmatpush.bf16.msra.mxu2 %v11242_v3  ;;  %v14022_v0 = vld [vmem:[%s14794_s24 + $0x17ac] sm:$0xf]  ;;  %v11943_v26 = vld [vmem:[%s14794_s24 + $0x17b8] sm:$0xf0]  ;;  %v11818_v57 = vor.u32 %v13990_v38, %v11815_v4 }
 0x3f1   : > { %8066 = vmatpush.bf16.msra.mxu3 %v11370_v31  ;;  %v13922_v40 = vld [vmem:[%s14794_s24 + $0x148c] sm:$0xf]  ;;  %v11543_v41 = vld [vmem:[%s14794_s24 + $0x1498] sm:$0xf0] }
 0x3f2   : > { %8028 = vmatpush.bf16.msra.mxu0 %v10970_v30  ;;  %v11671_v42 = vld [vmem:[%s14794_s24 + $0x1598] sm:$0xf0]  ;;  %v13986_v28 = vld [vmem:[%s14794_s24 + $0x168c] sm:$0xf]  ;;  %v11546_v3 = vor.u32 %v13922_v40, %v11543_v41  ;;  %v7822_v10 = vpop.f32.mrf.mxu0 }
 0x3f3   : > { %8041 = vmatpush.bf16.msra.mxu1 %v11098_v37  ;;  %v11799_v58 = vld [vmem:[%s14794_s24 + $0x1698] sm:$0xf0]  ;;  %v13918_v31 = vld [vmem:[%s14794_s24 + $0x146c] sm:$0xf]  ;;  %v7835_v22 = vpop.f32.mrf.mxu1 }
 0x3f4   : > { %8054 = vmatpush.bf16.msra.mxu2 %v11226_v9  ;;  %v11927_v59 = vld [vmem:[%s14794_s24 + $0x1798] sm:$0xf0]  ;;  %v11802_v60 = vor.u32 %v13986_v28, %v11799_v58  ;;  %v13950_v46 = vld [vmem:[%s14794_s24 + $0x156c] sm:$0xf]  ;;  %v7836_v16 = vadd.f32 %v7835_v22, %v7822_v10 }
 0x3f5   : > { %8067 = vmatpush.bf16.msra.mxu3 %v11354_v54  ;;  %8029 = vmatmul.bf16.vlgmr.msra.gmra.mxu0 %v15210_v20  ;;  %v11562_v20 = vor.u32 %v13926_v2, %v11559_v21  ;;  %v11527_v45 = vld [vmem:[%s14794_s24 + $0x1478] sm:$0xf0]  ;;  %v13982_v32 = vld [vmem:[%s14794_s24 + $0x166c] sm:$0xf] }
 0x3f6   : > { %8073 = vmatpush.bf16.msrb.mxu0 %v11594_v55  ;;  %8042 = vmatmul.bf16.vlgmr.msra.gmra.mxu1 %v15216_v25  ;;  %v11946_v25 = vor.u32 %v14022_v0, %v11943_v26  ;;  %v11655_v49 = vld [vmem:[%s14794_s24 + $0x1578] sm:$0xf0]  ;;  %v14014_v30 = vld [vmem:[%s14794_s24 + $0x176c] sm:$0xf]  ;;  %v11530_v1 = vor.u32 %v13918_v31, %v11527_v45 }
 0x3f7   : > { %8086 = vmatpush.bf16.msrb.mxu1 %v11722_v56  ;;  %8055 = vmatmul.bf16.vlgmr.msra.gmra.mxu2 %v15214_v24  ;;  %v13954_v24 = vld [vmem:[%s14794_s24 + $0x158c] sm:$0xf]  ;;  %v11783_v33 = vld [vmem:[%s14794_s24 + $0x1678] sm:$0xf0]  ;;  %v11658_v51 = vor.u32 %v13950_v46, %v11655_v49 }
 0x3f8   : > { %8099 = vmatpush.bf16.msrb.mxu2 %v11850_v62  ;;  %8068 = vmatmul.bf16.vlgmr.msra.gmra.mxu3 %v15218_v29  ;;  %v14018_v29 = vld [vmem:[%s14794_s24 + $0x178c] sm:$0xf]  ;;  %v11674_v44 = vor.u32 %v13954_v24, %v11671_v42  ;;  %v11911_v43 = vld [vmem:[%s14794_s24 + $0x1778] sm:$0xf0]  ;;  %v11786_v37 = vor.u32 %v13982_v32, %v11783_v33 }
 0x3f9   : > { %8112 = vmatpush.bf16.msrb.mxu3 %v11978_v7  ;;  %v11930_v47 = vor.u32 %v14018_v29, %v11927_v59  ;;  %v13914_v9 = vld [vmem:[%s14794_s24 + $0x144c] sm:$0xf]  ;;  %v11511_v53 = vld [vmem:[%s14794_s24 + $0x1458] sm:$0xf0]  ;;  %v11914_v55 = vor.u32 %v14014_v30, %v11911_v43 }
 0x3fa   : > { %8074 = vmatpush.bf16.msrb.mxu0 %v11578_v8  ;;  %v13946_v39 = vld [vmem:[%s14794_s24 + $0x154c] sm:$0xf]  ;;  %v7848_v54 = vpop.f32.mrf.mxu2  ;;  %v11639_v56 = vld [vmem:[%s14794_s24 + $0x1558] sm:$0xf0]  ;;  %v11514_v17 = vor.u32 %v13914_v9, %v11511_v53  ;;  %v7824_v11 = vpop.f32.mrf.mxu0 }
 0x3fb   : > { %8087 = vmatpush.bf16.msrb.mxu1 %v11706_v35  ;;  %v13978_v62 = vld [vmem:[%s14794_s24 + $0x164c] sm:$0xf]  ;;  %v11767_v52 = vld [vmem:[%s14794_s24 + $0x1658] sm:$0xf0]  ;;  %v7849_v50 = vadd.f32 %v7848_v54, %v7836_v16  ;;  %v7861_v48 = vpop.f32.mrf.mxu3  ;;  %v11642_v12 = vor.u32 %v13946_v39, %v11639_v56  ;;  %v7837_v21 = vpop.f32.mrf.mxu1 }
 0x3fc   : > { %8100 = vmatpush.bf16.msrb.mxu2 %v11834_v61  ;;  %v14010_v7 = vld [vmem:[%s14794_s24 + $0x174c] sm:$0xf]  ;;  %v11895_v5 = vld [vmem:[%s14794_s24 + $0x1758] sm:$0xf0]  ;;  %v11770_v8 = vor.u32 %v13978_v62, %v11767_v52 }
 0x3fd   : > { %8113 = vmatpush.bf16.msrb.mxu3 %v11962_v23  ;;  %v16944_v6 = vadd.f32 %v7861_v48, %v7849_v50  ;;  %v13910_v35 = vld [vmem:[%s14794_s24 + $0x142c] sm:$0xf]  ;;  %v11495_v61 = vld [vmem:[%s14794_s24 + $0x1438] sm:$0xf0]  ;;  %v11898_v34 = vor.u32 %v14010_v7, %v11895_v5 }
 0x3fe   : > { %8075 = vmatpush.bf16.msrb.mxu0 %v11562_v20  ;;  %v13942_v2 = vld [vmem:[%s14794_s24 + $0x152c] sm:$0xf]  ;;  %v11623_v23 = vld [vmem:[%s14794_s24 + $0x1538] sm:$0xf0]  ;;  %v11498_v26 = vor.u32 %v13910_v35, %v11495_v61 }
 0x3ff   : > { %8088 = vmatpush.bf16.msrb.mxu1 %v11690_v27  ;;  %v13974_v36 = vld [vmem:[%s14794_s24 + $0x162c] sm:$0xf]  ;;  %v11751_v38 = vld [vmem:[%s14794_s24 + $0x1638] sm:$0xf0] }
 0x400   : > { %8101 = vmatpush.bf16.msrb.mxu2 %v11818_v57  ;;  %v14006_v4 = vld [vmem:[%s14794_s24 + $0x172c] sm:$0xf]  ;;  %v11879_v0 = vld [vmem:[%s14794_s24 + $0x1738] sm:$0xf0]  ;;  %v11626_v57 = vor.u32 %v13942_v2, %v11623_v23  ;;  %v11754_v40 = vor.u32 %v13974_v36, %v11751_v38 }
 0x401   : > { %8114 = vmatpush.bf16.msrb.mxu3 %v11946_v25  ;;  %v13906_v20 = vld [vmem:[%s14794_s24 + $0x140c] sm:$0xf]  ;;  %v11479_v27 = vld [vmem:[%s14794_s24 + $0x1418] sm:$0xf0]  ;;  %v11882_v28 = vor.u32 %v14006_v4, %v11879_v0 }
 0x402   : > { %8076 = vmatpush.bf16.msrb.mxu0 %v11546_v3  ;;  %v13938_v41 = vld [vmem:[%s14794_s24 + $0x150c] sm:$0xf]  ;;  %v11607_v24 = vld [vmem:[%s14794_s24 + $0x1518] sm:$0xf0]  ;;  %v7850_v42 = vpop.f32.mrf.mxu2  ;;  %v11482_v31 = vor.u32 %v13906_v20, %v11479_v27 }
 0x403   : > { %8089 = vmatpush.bf16.msrb.mxu1 %v11674_v44  ;;  %v13970_v25 = vld [vmem:[%s14794_s24 + $0x160c] sm:$0xf]  ;;  %v11735_v58 = vld [vmem:[%s14794_s24 + $0x1618] sm:$0xf0]  ;;  %v7863_v3 = vpop.f32.mrf.mxu3 }
 0x404   : > { %8102 = vmatpush.bf16.msrb.mxu2 %v11802_v60  ;;  %v14002_v29 = vld [vmem:[%s14794_s24 + $0x170c] sm:$0xf]  ;;  %v11863_v59 = vld [vmem:[%s14794_s24 + $0x1718] sm:$0xf0]  ;;  %v11738_v49 = vor.u32 %v13970_v25, %v11735_v58 }
 0x405   : > { %8115 = vmatpush.bf16.msrb.mxu3 %v11930_v47  ;;  %v14062_v10 = vld [vmem:[%s14794_s24 + $0x18ec] sm:$0xf]  ;;  %v12103_v44 = vld [vmem:[%s14794_s24 + $0x18f8] sm:$0xf0]  ;;  %v11610_v47 = vor.u32 %v13938_v41, %v11607_v24  ;;  %v11866_v16 = vor.u32 %v14002_v29, %v11863_v59 }
 0x406   : > { %8077 = vmatpush.bf16.msrb.mxu0 %v11530_v1  ;;  %v14094_v60 = vld [vmem:[%s14794_s24 + $0x19ec] sm:$0xf]  ;;  %v12231_v45 = vld [vmem:[%s14794_s24 + $0x19f8] sm:$0xf0]  ;;  %v12106_v30 = vor.u32 %v14062_v10, %v12103_v44 }
 0x407   : > { %8090 = vmatpush.bf16.msrb.mxu1 %v11658_v51  ;;  %v14126_v46 = vld [vmem:[%s14794_s24 + $0x1aec] sm:$0xf]  ;;  %v12359_v22 = vld [vmem:[%s14794_s24 + $0x1af8] sm:$0xf0]  ;;  %v12234_v43 = vor.u32 %v14094_v60, %v12231_v45 }
 0x408   : > { %8103 = vmatpush.bf16.msrb.mxu2 %v11786_v37  ;;  %v14158_v32 = vld [vmem:[%s14794_s24 + $0x1bec] sm:$0xf]  ;;  %v12487_v33 = vld [vmem:[%s14794_s24 + $0x1bf8] sm:$0xf0]  ;;  %v12362_v1 = vor.u32 %v14126_v46, %v12359_v22 }
 0x409   : > { %8116 = vmatpush.bf16.msrb.mxu3 %v11914_v55  ;;  %v14058_v51 = vld [vmem:[%s14794_s24 + $0x18cc] sm:$0xf]  ;;  %v12087_v37 = vld [vmem:[%s14794_s24 + $0x18d8] sm:$0xf0]  ;;  %v12490_v53 = vor.u32 %v14158_v32, %v12487_v33 }
 0x40a   : > { %8078 = vmatpush.bf16.msrb.mxu0 %v11514_v17  ;;  %v14090_v9 = vld [vmem:[%s14794_s24 + $0x19cc] sm:$0xf]  ;;  %v12215_v39 = vld [vmem:[%s14794_s24 + $0x19d8] sm:$0xf0]  ;;  %v12090_v52 = vor.u32 %v14058_v51, %v12087_v37 }
 0x40b   : > { %8091 = vmatpush.bf16.msrb.mxu1 %v11642_v12  ;;  %v14122_v54 = vld [vmem:[%s14794_s24 + $0x1acc] sm:$0xf]  ;;  %v12343_v55 = vld [vmem:[%s14794_s24 + $0x1ad8] sm:$0xf0]  ;;  %v12218_v50 = vor.u32 %v14090_v9, %v12215_v39 }
 0x40c   : > { %8104 = vmatpush.bf16.msrb.mxu2 %v11770_v8  ;;  %v14154_v56 = vld [vmem:[%s14794_s24 + $0x1bcc] sm:$0xf]  ;;  %v12471_v62 = vld [vmem:[%s14794_s24 + $0x1bd8] sm:$0xf0]  ;;  %v12346_v48 = vor.u32 %v14122_v54, %v12343_v55 }
 0x40d   : > { %8117 = vmatpush.bf16.msrb.mxu3 %v11898_v34  ;;  %v14054_v7 = vld [vmem:[%s14794_s24 + $0x18ac] sm:$0xf]  ;;  %v12071_v5 = vld [vmem:[%s14794_s24 + $0x18b8] sm:$0xf0]  ;;  %v12474_v11 = vor.u32 %v14154_v56, %v12471_v62 }
 0x40e   : > { %8079 = vmatpush.bf16.msrb.mxu0 %v11498_v26  ;;  %v14086_v17 = vld [vmem:[%s14794_s24 + $0x19ac] sm:$0xf]  ;;  %v12199_v12 = vld [vmem:[%s14794_s24 + $0x19b8] sm:$0xf0] }
 0x40f   : > { %8092 = vmatpush.bf16.msrb.mxu1 %v11626_v57  ;;  %v14118_v8 = vld [vmem:[%s14794_s24 + $0x1aac] sm:$0xf]  ;;  %v12327_v35 = vld [vmem:[%s14794_s24 + $0x1ab8] sm:$0xf0]  ;;  %v12202_v21 = vor.u32 %v14086_v17, %v12199_v12 }
 0x410   : > { %8105 = vmatpush.bf16.msrb.mxu2 %v11754_v40  ;;  %v14150_v61 = vld [vmem:[%s14794_s24 + $0x1bac] sm:$0xf]  ;;  %v12455_v2 = vld [vmem:[%s14794_s24 + $0x1bb8] sm:$0xf0]  ;;  %v12330_v34 = vor.u32 %v14118_v8, %v12327_v35 }
 0x411   : > { %8118 = vmatpush.bf16.msrb.mxu3 %v11882_v28  ;;  %v14050_v23 = vld [vmem:[%s14794_s24 + $0x188c] sm:$0xf]  ;;  %v12055_v36 = vld [vmem:[%s14794_s24 + $0x1898] sm:$0xf0] }
 0x412   : > { %8080 = vmatpush.bf16.msrb.mxu0 %v11482_v31  ;;  %v12183_v38 = vld [vmem:[%s14794_s24 + $0x1998] sm:$0xf0]  ;;  %v14114_v4 = vld [vmem:[%s14794_s24 + $0x1a8c] sm:$0xf]  ;;  %v12058_v20 = vor.u32 %v14050_v23, %v12055_v36  ;;  %v7874_v27 = vpop.f32.mrf.mxu0 }
 0x413   : > { %8093 = vmatpush.bf16.msrb.mxu1 %v11610_v47  ;;  %v12311_v0 = vld [vmem:[%s14794_s24 + $0x1a98] sm:$0xf0]  ;;  %v14146_v26 = vld [vmem:[%s14794_s24 + $0x1b8c] sm:$0xf]  ;;  %v7875_v42 = vadd.f32 %v7874_v27, %v16944_v6  ;;  %v7887_v28 = vpop.f32.mrf.mxu1 }
 0x414   : > { %8106 = vmatpush.bf16.msrb.mxu2 %v11738_v49  ;;  %v12314_v40 = vor.u32 %v14114_v4, %v12311_v0  ;;  %v14046_v41 = vld [vmem:[%s14794_s24 + $0x186c] sm:$0xf]  ;;  %v12039_v24 = vld [vmem:[%s14794_s24 + $0x1878] sm:$0xf0] }
 0x415   : > { %8119 = vmatpush.bf16.msrb.mxu3 %v11866_v16  ;;  %8081 = vmatmul.bf16.vlgmr.msrb.gmra.mxu0 %v15276_v14  ;;  %v12074_v14 = vor.u32 %v14054_v7, %v12071_v5  ;;  %v14078_v25 = vld [vmem:[%s14794_s24 + $0x196c] sm:$0xf]  ;;  %v12167_v29 = vld [vmem:[%s14794_s24 + $0x1978] sm:$0xf0]  ;;  %v7888_v60 = vadd.f32 %v7887_v28, %v7875_v42  ;;  %v12042_v31 = vor.u32 %v14046_v41, %v12039_v24 }
 0x416   : > { %8125 = vmatpush.bf16.msra.mxu0 %v12106_v30  ;;  %8094 = vmatmul.bf16.vlgmr.msrb.gmra.mxu1 %v15280_v18  ;;  %v12458_v18 = vor.u32 %v14150_v61, %v12455_v2  ;;  %v14110_v59 = vld [vmem:[%s14794_s24 + $0x1a6c] sm:$0xf]  ;;  %v12295_v3 = vld [vmem:[%s14794_s24 + $0x1a78] sm:$0xf0]  ;;  %v12170_v6 = vor.u32 %v14078_v25, %v12167_v29 }
 0x417   : > { %8138 = vmatpush.bf16.msra.mxu1 %v12234_v43  ;;  %8107 = vmatmul.bf16.vlgmr.msrb.gmra.mxu2 %v15278_v15  ;;  %v14082_v15 = vld [vmem:[%s14794_s24 + $0x198c] sm:$0xf]  ;;  %v12423_v44 = vld [vmem:[%s14794_s24 + $0x1b78] sm:$0xf0]  ;;  %v12298_v45 = vor.u32 %v14110_v59, %v12295_v3 }
 0x418   : > { %8151 = vmatpush.bf16.msra.mxu2 %v12362_v1  ;;  %8120 = vmatmul.bf16.vlgmr.msrb.gmra.mxu3 %v15282_v19  ;;  %v12439_v19 = vld [vmem:[%s14794_s24 + $0x1b98] sm:$0xf0]  ;;  %v12186_v57 = vor.u32 %v14082_v15, %v12183_v38  ;;  %v14142_v10 = vld [vmem:[%s14794_s24 + $0x1b6c] sm:$0xf] }
 0x419   : > { %8164 = vmatpush.bf16.msra.mxu3 %v12490_v53  ;;  %v12442_v58 = vor.u32 %v14146_v26, %v12439_v19  ;;  %v14042_v46 = vld [vmem:[%s14794_s24 + $0x184c] sm:$0xf]  ;;  %v12023_v22 = vld [vmem:[%s14794_s24 + $0x1858] sm:$0xf0]  ;;  %v12426_v32 = vor.u32 %v14142_v10, %v12423_v44 }
 0x41a   : > { %8126 = vmatpush.bf16.msra.mxu0 %v12090_v52  ;;  %v14074_v47 = vld [vmem:[%s14794_s24 + $0x194c] sm:$0xf]  ;;  %v7900_v49 = vpop.f32.mrf.mxu2  ;;  %v12151_v33 = vld [vmem:[%s14794_s24 + $0x1958] sm:$0xf0]  ;;  %v12026_v9 = vor.u32 %v14042_v46, %v12023_v22  ;;  %v7876_v39 = vpop.f32.mrf.mxu0 }
 0x41b   : > { %8139 = vmatpush.bf16.msra.mxu1 %v12218_v50  ;;  %v14106_v16 = vld [vmem:[%s14794_s24 + $0x1a4c] sm:$0xf]  ;;  %v12279_v30 = vld [vmem:[%s14794_s24 + $0x1a58] sm:$0xf0]  ;;  %v7901_v43 = vadd.f32 %v7900_v49, %v7888_v60  ;;  %v7913_v1 = vpop.f32.mrf.mxu3  ;;  %v12154_v54 = vor.u32 %v14074_v47, %v12151_v33  ;;  %v7889_v50 = vpop.f32.mrf.mxu1 }
 0x41c   : > { %8152 = vmatpush.bf16.msra.mxu2 %v12346_v48  ;;  %v14138_v51 = vld [vmem:[%s14794_s24 + $0x1b4c] sm:$0xf]  ;;  %v12407_v37 = vld [vmem:[%s14794_s24 + $0x1b58] sm:$0xf0]  ;;  %v12282_v55 = vor.u32 %v14106_v16, %v12279_v30 }
 0x41d   : > { %8165 = vmatpush.bf16.msra.mxu3 %v12474_v11  ;;  %v17015_v53 = vadd.f32 %v7913_v1, %v7901_v43  ;;  %v14038_v56 = vld [vmem:[%s14794_s24 + $0x182c] sm:$0xf]  ;;  %v12007_v62 = vld [vmem:[%s14794_s24 + $0x1838] sm:$0xf0]  ;;  %v12410_v48 = vor.u32 %v14138_v51, %v12407_v37  ;;  %v14472_v1 = vld [vmem:[#allocation1] sm:$0xff] }
 0x41e   : > { %8127 = vmatpush.bf16.msra.mxu0 %v12074_v14  ;;  %v14070_v52 = vld [vmem:[%s14794_s24 + $0x192c] sm:$0xf]  ;;  %v12135_v7 = vld [vmem:[%s14794_s24 + $0x1938] sm:$0xf0]  ;;  %v12010_v8 = vor.u32 %v14038_v56, %v12007_v62 }
 0x41f   : > { %8140 = vmatpush.bf16.msra.mxu1 %v12202_v21  ;;  %v14102_v5 = vld [vmem:[%s14794_s24 + $0x1a2c] sm:$0xf]  ;;  %v12263_v17 = vld [vmem:[%s14794_s24 + $0x1a38] sm:$0xf0]  ;;  %v12138_v2 = vor.u32 %v14070_v52, %v12135_v7 }
 0x420   : > { %8153 = vmatpush.bf16.msra.mxu2 %v12330_v34  ;;  %v14134_v11 = vld [vmem:[%s14794_s24 + $0x1b2c] sm:$0xf]  ;;  %v12391_v12 = vld [vmem:[%s14794_s24 + $0x1b38] sm:$0xf0]  ;;  %v12266_v14 = vor.u32 %v14102_v5, %v12263_v17 }
 0x421   : > { %8166 = vmatpush.bf16.msra.mxu3 %v12458_v18  ;;  %v14034_v35 = vld [vmem:[%s14794_s24 + $0x180c] sm:$0xf]  ;;  %v11991_v61 = vld [vmem:[%s14794_s24 + $0x1818] sm:$0xf0]  ;;  %v12394_v15 = vor.u32 %v14134_v11, %v12391_v12 }
 0x422   : > { %8128 = vmatpush.bf16.msra.mxu0 %v12058_v20  ;;  %v14066_v21 = vld [vmem:[%s14794_s24 + $0x190c] sm:$0xf]  ;;  %v12119_v34 = vld [vmem:[%s14794_s24 + $0x1918] sm:$0xf0]  ;;  %v7902_v36 = vpop.f32.mrf.mxu2  ;;  %v11994_v27 = vor.u32 %v14034_v35, %v11991_v61 }
 0x423   : > { %8141 = vmatpush.bf16.msra.mxu1 %v12186_v57  ;;  %v14098_v23 = vld [vmem:[%s14794_s24 + $0x1a0c] sm:$0xf]  ;;  %v12247_v18 = vld [vmem:[%s14794_s24 + $0x1a18] sm:$0xf0]  ;;  %v7915_v0 = vpop.f32.mrf.mxu3  ;;  %v12122_v24 = vor.u32 %v14066_v21, %v12119_v34 }
 0x424   : > { %8154 = vmatpush.bf16.msra.mxu2 %v12314_v40  ;;  %v14130_v38 = vld [vmem:[%s14794_s24 + $0x1b0c] sm:$0xf]  ;;  %v12375_v4 = vld [vmem:[%s14794_s24 + $0x1b18] sm:$0xf0]  ;;  %v12250_v25 = vor.u32 %v14098_v23, %v12247_v18 }
 0x425   : > { %8167 = vmatpush.bf16.msra.mxu3 %v12442_v58  ;;  %v14190_v26 = vld [vmem:[%s14794_s24 + $0x1cec] sm:$0xf]  ;;  %v12615_v19 = vld [vmem:[%s14794_s24 + $0x1cf8] sm:$0xf0]  ;;  %v12378_v58 = vor.u32 %v14130_v38, %v12375_v4 }
 0x426   : > { %8129 = vmatpush.bf16.msra.mxu0 %v12042_v31  ;;  %v14222_v20 = vld [vmem:[%s14794_s24 + $0x1dec] sm:$0xf]  ;;  %v12743_v57 = vld [vmem:[%s14794_s24 + $0x1df8] sm:$0xf0]  ;;  %v12618_v29 = vor.u32 %v14190_v26, %v12615_v19 }
 0x427   : > { %8142 = vmatpush.bf16.msra.mxu1 %v12170_v6  ;;  %v14254_v40 = vld [vmem:[%s14794_s24 + $0x1eec] sm:$0xf]  ;;  %v12871_v41 = vld [vmem:[%s14794_s24 + $0x1ef8] sm:$0xf0]  ;;  %v12746_v59 = vor.u32 %v14222_v20, %v12743_v57 }
 0x428   : > { %8155 = vmatpush.bf16.msra.mxu2 %v12298_v45  ;;  %v14286_v42 = vld [vmem:[%s14794_s24 + $0x1fec] sm:$0xf]  ;;  %v12999_v28 = vld [vmem:[%s14794_s24 + $0x1ff8] sm:$0xf0]  ;;  %v12874_v3 = vor.u32 %v14254_v40, %v12871_v41 }
 0x429   : > { %8168 = vmatpush.bf16.msra.mxu3 %v12426_v32  ;;  %v14186_v10 = vld [vmem:[%s14794_s24 + $0x1ccc] sm:$0xf]  ;;  %v12599_v44 = vld [vmem:[%s14794_s24 + $0x1cd8] sm:$0xf0]  ;;  %v13002_v31 = vor.u32 %v14286_v42, %v12999_v28 }
 0x42a   : > { %8130 = vmatpush.bf16.msra.mxu0 %v12026_v9  ;;  %v14218_v60 = vld [vmem:[%s14794_s24 + $0x1dcc] sm:$0xf]  ;;  %v12727_v6 = vld [vmem:[%s14794_s24 + $0x1dd8] sm:$0xf0]  ;;  %v12602_v49 = vor.u32 %v14186_v10, %v12599_v44 }
 0x42b   : > { %8143 = vmatpush.bf16.msra.mxu1 %v12154_v54  ;;  %v14250_v45 = vld [vmem:[%s14794_s24 + $0x1ecc] sm:$0xf]  ;;  %v12855_v46 = vld [vmem:[%s14794_s24 + $0x1ed8] sm:$0xf0]  ;;  %v12730_v32 = vor.u32 %v14218_v60, %v12727_v6  ;;  %v14473_v54 = vld [vmem:[#allocation1 + $0x12] sm:$0xff] }
 0x42c   : > { %8156 = vmatpush.bf16.msra.mxu2 %v12282_v55  ;;  %v14282_v22 = vld [vmem:[%s14794_s24 + $0x1fcc] sm:$0xf]  ;;  %v12983_v47 = vld [vmem:[%s14794_s24 + $0x1fd8] sm:$0xf0]  ;;  %v12858_v33 = vor.u32 %v14250_v45, %v12855_v46 }
 0x42d   : > { %8169 = vmatpush.bf16.msra.mxu3 %v12410_v48  ;;  %v14182_v16 = vld [vmem:[%s14794_s24 + $0x1cac] sm:$0xf]  ;;  %v12583_v30 = vld [vmem:[%s14794_s24 + $0x1cb8] sm:$0xf0]  ;;  %v12986_v51 = vor.u32 %v14282_v22, %v12983_v47 }
 0x42e   : > { %8131 = vmatpush.bf16.msra.mxu0 %v12010_v8  ;;  %v14214_v43 = vld [vmem:[%s14794_s24 + $0x1dac] sm:$0xf]  ;;  %v12711_v37 = vld [vmem:[%s14794_s24 + $0x1db8] sm:$0xf0]  ;;  %v12586_v50 = vor.u32 %v14182_v16, %v12583_v30 }
 0x42f   : > { %8144 = vmatpush.bf16.msra.mxu1 %v12138_v2  ;;  %v14246_v9 = vld [vmem:[%s14794_s24 + $0x1eac] sm:$0xf]  ;;  %v12839_v39 = vld [vmem:[%s14794_s24 + $0x1eb8] sm:$0xf0]  ;;  %v12714_v48 = vor.u32 %v14214_v43, %v12711_v37 }
 0x430   : > { %8157 = vmatpush.bf16.msra.mxu2 %v12266_v14  ;;  %v14474_v55 = vld [vmem:[#allocation1 + $0x9] sm:$0xff]  ;;  %v14278_v56 = vld [vmem:[%s14794_s24 + $0x1fac] sm:$0xf]  ;;  %v12842_v7 = vor.u32 %v14246_v9, %v12839_v39 }
 0x431   : > { %8170 = vmatpush.bf16.msra.mxu3 %v12394_v15  ;;  %v12967_v62 = vld [vmem:[%s14794_s24 + $0x1fb8] sm:$0xf0]  ;;  %v14475_v52 = vld [vmem:[#allocation1 + $0x1b] sm:$0xff] }
 0x432   : > { %8132 = vmatpush.bf16.msra.mxu0 %v11994_v27  ;;  %v14178_v5 = vld [vmem:[%s14794_s24 + $0x1c8c] sm:$0xf]  ;;  %v12567_v17 = vld [vmem:[%s14794_s24 + $0x1c98] sm:$0xf0]  ;;  %v12970_v12 = vor.u32 %v14278_v56, %v12967_v62  ;;  %v7926_v2 = vpop.f32.mrf.mxu0 }
 0x433   : > { %8145 = vmatpush.bf16.msra.mxu1 %v12122_v24  ;;  %v14210_v11 = vld [vmem:[%s14794_s24 + $0x1d8c] sm:$0xf]  ;;  %v12695_v8 = vld [vmem:[%s14794_s24 + $0x1d98] sm:$0xf0]  ;;  %v7927_v34 = vadd.f32 %v7926_v2, %v17015_v53  ;;  %v12570_v23 = vor.u32 %v14178_v5, %v12567_v17  ;;  %v7939_v36 = vpop.f32.mrf.mxu1 }
 0x434   : > { %8158 = vmatpush.bf16.msra.mxu2 %v12250_v25  ;;  %v14242_v35 = vld [vmem:[%s14794_s24 + $0x1e8c] sm:$0xf]  ;;  %v12823_v61 = vld [vmem:[%s14794_s24 + $0x1e98] sm:$0xf0]  ;;  %v12698_v15 = vor.u32 %v14210_v11, %v12695_v8 }
 0x435   : > { %8171 = vmatpush.bf16.msra.mxu3 %v12378_v58  ;;  %8133 = vmatmul.bf16.vlgmr.msra.gmra.mxu0 %v14472_v1  ;;  %v14274_v14 = vld [vmem:[%s14794_s24 + $0x1f8c] sm:$0xf]  ;;  %v12951_v21 = vld [vmem:[%s14794_s24 + $0x1f98] sm:$0xf0]  ;;  %v12826_v18 = vor.u32 %v14242_v35, %v12823_v61  ;;  %v7940_v19 = vadd.f32 %v7939_v36, %v7927_v34 }
 0x436   : > { %8177 = vmatpush.bf16.msrb.mxu0 %v12618_v29  ;;  %8146 = vmatmul.bf16.vlgmr.msra.gmra.mxu1 %v14474_v55  ;;  %v14174_v38 = vld [vmem:[%s14794_s24 + $0x1c6c] sm:$0xf]  ;;  %v12551_v4 = vld [vmem:[%s14794_s24 + $0x1c78] sm:$0xf0]  ;;  %v12954_v26 = vor.u32 %v14274_v14, %v12951_v21 }
 0x437   : > { %8190 = vmatpush.bf16.msrb.mxu1 %v12746_v59  ;;  %8159 = vmatmul.bf16.vlgmr.msra.gmra.mxu2 %v14473_v54  ;;  %v14206_v0 = vld [vmem:[%s14794_s24 + $0x1d6c] sm:$0xf]  ;;  %v12679_v20 = vld [vmem:[%s14794_s24 + $0x1d78] sm:$0xf0]  ;;  %v12554_v41 = vor.u32 %v14174_v38, %v12551_v4 }
 0x438   : > { %8203 = vmatpush.bf16.msrb.mxu2 %v12874_v3  ;;  %8172 = vmatmul.bf16.vlgmr.msra.gmra.mxu3 %v14475_v52  ;;  %v14238_v27 = vld [vmem:[%s14794_s24 + $0x1e6c] sm:$0xf]  ;;  %v12807_v53 = vld [vmem:[%s14794_s24 + $0x1e78] sm:$0xf0]  ;;  %v12682_v24 = vor.u32 %v14206_v0, %v12679_v20 }
 0x439   : > { %8216 = vmatpush.bf16.msrb.mxu3 %v13002_v31  ;;  %v14270_v57 = vld [vmem:[%s14794_s24 + $0x1f6c] sm:$0xf]  ;;  %v12935_v40 = vld [vmem:[%s14794_s24 + $0x1f78] sm:$0xf0]  ;;  %v12810_v25 = vor.u32 %v14238_v27, %v12807_v53 }
 0x43a   : > { %8178 = vmatpush.bf16.msrb.mxu0 %v12602_v49  ;;  %v14170_v42 = vld [vmem:[%s14794_s24 + $0x1c4c] sm:$0xf]  ;;  %v12535_v28 = vld [vmem:[%s14794_s24 + $0x1c58] sm:$0xf0]  ;;  %v12938_v29 = vor.u32 %v14270_v57, %v12935_v40  ;;  %v7952_v59 = vpop.f32.mrf.mxu2  ;;  %v7928_v46 = vpop.f32.mrf.mxu0 }
 0x43b   : > { %8191 = vmatpush.bf16.msrb.mxu1 %v12730_v32  ;;  %v14202_v58 = vld [vmem:[%s14794_s24 + $0x1d4c] sm:$0xf]  ;;  %v12663_v3 = vld [vmem:[%s14794_s24 + $0x1d58] sm:$0xf0]  ;;  %v7953_v60 = vadd.f32 %v7952_v59, %v7940_v19  ;;  %v7965_v31 = vpop.f32.mrf.mxu3  ;;  %v12538_v22 = vor.u32 %v14170_v42, %v12535_v28  ;;  %v7941_v47 = vpop.f32.mrf.mxu1 }
 0x43c   : > { %8204 = vmatpush.bf16.msrb.mxu2 %v12858_v33  ;;  %v14234_v10 = vld [vmem:[%s14794_s24 + $0x1e4c] sm:$0xf]  ;;  %v12791_v44 = vld [vmem:[%s14794_s24 + $0x1e58] sm:$0xf0]  ;;  %v12666_v32 = vor.u32 %v14202_v58, %v12663_v3 }
 0x43d   : > { %8217 = vmatpush.bf16.msrb.mxu3 %v12986_v51  ;;  %v14266_v6 = vld [vmem:[%s14794_s24 + $0x1f4c] sm:$0xf]  ;;  %v12919_v45 = vld [vmem:[%s14794_s24 + $0x1f58] sm:$0xf0]  ;;  %v7966_v49 = vadd.f32 %v7965_v31, %v7953_v60  ;;  %v12794_v33 = vor.u32 %v14234_v10, %v12791_v44 }
 0x43e   : > { %8179 = vmatpush.bf16.msrb.mxu0 %v12586_v50  ;;  %v14166_v16 = vld [vmem:[%s14794_s24 + $0x1c2c] sm:$0xf]  ;;  %v12519_v30 = vld [vmem:[%s14794_s24 + $0x1c38] sm:$0xf0]  ;;  %v12922_v1 = vor.u32 %v14266_v6, %v12919_v45 }
 0x43f   : > { %8192 = vmatpush.bf16.msrb.mxu1 %v12714_v48  ;;  %v14198_v43 = vld [vmem:[%s14794_s24 + $0x1d2c] sm:$0xf]  ;;  %v12647_v51 = vld [vmem:[%s14794_s24 + $0x1d38] sm:$0xf0]  ;;  %v12522_v55 = vor.u32 %v14166_v16, %v12519_v30 }
 0x440   : > { %8205 = vmatpush.bf16.msrb.mxu2 %v12842_v7  ;;  %v14230_v37 = vld [vmem:[%s14794_s24 + $0x1e2c] sm:$0xf]  ;;  %v12775_v9 = vld [vmem:[%s14794_s24 + $0x1e38] sm:$0xf0]  ;;  %v12650_v56 = vor.u32 %v14198_v43, %v12647_v51 }
 0x441   : > { %8218 = vmatpush.bf16.msrb.mxu3 %v12970_v12  ;;  %v14262_v39 = vld [vmem:[%s14794_s24 + $0x1f2c] sm:$0xf]  ;;  %v12903_v54 = vld [vmem:[%s14794_s24 + $0x1f38] sm:$0xf0]  ;;  %v12778_v62 = vor.u32 %v14230_v37, %v12775_v9 }
 0x442   : > { %8180 = vmatpush.bf16.msrb.mxu0 %v12570_v23  ;;  %v14162_v52 = vld [vmem:[%s14794_s24 + $0x1c0c] sm:$0xf]  ;;  %v12503_v50 = vld [vmem:[%s14794_s24 + $0x1c18] sm:$0xf0]  ;;  %v12906_v7 = vor.u32 %v14262_v39, %v12903_v54  ;;  %v7954_v12 = vpop.f32.mrf.mxu2  ;;  %v14476_v23 = vld [vmem:[#allocation1 + $0x24] sm:$0xff] }
 0x443   : > { %8193 = vmatpush.bf16.msrb.mxu1 %v12698_v15  ;;  %v14194_v48 = vld [vmem:[%s14794_s24 + $0x1d0c] sm:$0xf]  ;;  %v12631_v5 = vld [vmem:[%s14794_s24 + $0x1d18] sm:$0xf0]  ;;  %v7967_v61 = vpop.f32.mrf.mxu3  ;;  %v12506_v2 = vor.u32 %v14162_v52, %v12503_v50 }
 0x444   : > { %8206 = vmatpush.bf16.msrb.mxu2 %v12826_v18  ;;  %v14226_v17 = vld [vmem:[%s14794_s24 + $0x1e0c] sm:$0xf]  ;;  %v12759_v11 = vld [vmem:[%s14794_s24 + $0x1e18] sm:$0xf0]  ;;  %v12634_v14 = vor.u32 %v14194_v48, %v12631_v5 }
 0x445   : > { %8219 = vmatpush.bf16.msrb.mxu3 %v12954_v26  ;;  %v14258_v8 = vld [vmem:[%s14794_s24 + $0x1f0c] sm:$0xf]  ;;  %v12887_v35 = vld [vmem:[%s14794_s24 + $0x1f18] sm:$0xf0]  ;;  %v12762_v21 = vor.u32 %v14226_v17, %v12759_v11 }
 0x446   : > { %8181 = vmatpush.bf16.msrb.mxu0 %v12554_v41  ;;  %v12890_v34 = vor.u32 %v14258_v8, %v12887_v35  ;;  %v14477_v36 = vld [vmem:[#allocation1 + $0x2d] sm:$0xff]  ;;  %v14478_v15 = vld [vmem:[#allocation1 + $0x36] sm:$0xff]  ;;  %v14479_v18 = vld [vmem:[#allocation1 + $0x3f] sm:$0xff] }
 0x447   : > { %8194 = vmatpush.bf16.msrb.mxu1 %v12682_v24 }
 0x448   : > { %8207 = vmatpush.bf16.msrb.mxu2 %v12810_v25 }
 0x449   : > { %8220 = vmatpush.bf16.msrb.mxu3 %v12938_v29 }
 0x44a   : > { %8182 = vmatpush.bf16.msrb.mxu0 %v12538_v22 }
 0x44b   : > { %8195 = vmatpush.bf16.msrb.mxu1 %v12666_v32 }
 0x44c   : > { %8208 = vmatpush.bf16.msrb.mxu2 %v12794_v33 }
 0x44d   : > { %8221 = vmatpush.bf16.msrb.mxu3 %v12922_v1 }
 0x44e   : > { %8183 = vmatpush.bf16.msrb.mxu0 %v12522_v55 }
 0x44f   : > { %8196 = vmatpush.bf16.msrb.mxu1 %v12650_v56 }
 0x450   : > { %8209 = vmatpush.bf16.msrb.mxu2 %v12778_v62 }
 0x451   : > { %8222 = vmatpush.bf16.msrb.mxu3 %v12906_v7 }
 0x452   : > { %8184 = vmatpush.bf16.msrb.mxu0 %v12506_v2  ;;  %v7978_v38 = vpop.f32.mrf.mxu0 }
 0x453   : > { %8197 = vmatpush.bf16.msrb.mxu1 %v12634_v14  ;;  %v7979_v4 = vadd.f32 %v7978_v38, %v7966_v49  ;;  %v7991_v0 = vpop.f32.mrf.mxu1 }
 0x454   : > { %8210 = vmatpush.bf16.msrb.mxu2 %v12762_v21 }
 0x455   : > { %8223 = vmatpush.bf16.msrb.mxu3 %v12890_v34  ;;  %8185 = vmatmul.bf16.vlgmr.msrb.gmra.mxu0 %v14476_v23  ;;  %v7992_v26 = vadd.f32 %v7991_v0, %v7979_v4  ;;  %v8234_v23 = vrot.slane %v16874_v13, 4 }
 0x456   : > { %8198 = vmatmul.bf16.vlgmr.msrb.gmra.mxu1 %v14477_v36 }
 0x457   : > { %8211 = vmatmul.bf16.vlgmr.msrb.gmra.mxu2 %v14478_v15  ;;  %v344_v15 = vld [vmem:[#allocation2] sm:$0xff] }
 0x458   : > { %8224 = vmatmul.bf16.vlgmr.msrb.gmra.mxu3 %v14479_v18 }
 0x45a   : > { %v8004_v19 = vpop.f32.mrf.mxu2  ;;  %v7980_v53 = vpop.f32.mrf.mxu0 }
 0x45b   : > { %v8005_v20 = vadd.f32 %v8004_v19, %v7992_v26  ;;  %v8017_v27 = vpop.f32.mrf.mxu3  ;;  %v7993_v57 = vpop.f32.mrf.mxu1 }
 0x45d   : > { %v8018_v40 = vadd.f32 %v8017_v27, %v8005_v20 }
 0x462   : > { %v8006_v41 = vpop.f32.mrf.mxu2 }
 0x463   : > { %v8019_v24 = vpop.f32.mrf.mxu3 }
 0x472   : > { %v8030_v25 = vpop.f32.mrf.mxu0 }
 0x473   : > { %v8031_v42 = vadd.f32 %v8030_v25, %v8018_v40  ;;  %v8043_v28 = vpop.f32.mrf.mxu1 }
 0x475   : > { %v8044_v58 = vadd.f32 %v8043_v28, %v8031_v42 }
 0x47a   : > { %v8056_v29 = vpop.f32.mrf.mxu2  ;;  %v8032_v10 = vpop.f32.mrf.mxu0 }
 0x47b   : > { %v8057_v59 = vadd.f32 %v8056_v29, %v8044_v58  ;;  %v8069_v3 = vpop.f32.mrf.mxu3  ;;  %v8045_v44 = vpop.f32.mrf.mxu1 }
 0x47d   : > { %v8070_v60 = vadd.f32 %v8069_v3, %v8057_v59 }
 0x482   : > { %v8058_v31 = vpop.f32.mrf.mxu2 }
 0x483   : > { %v8071_v6 = vpop.f32.mrf.mxu3 }
 0x492   : > { %v8082_v45 = vpop.f32.mrf.mxu0 }
 0x493   : > { %v8095_v46 = vpop.f32.mrf.mxu1  ;;  %v8083_v1 = vadd.f32 %v8082_v45, %v8070_v60 }
 0x495   : > { %v8096_v54 = vadd.f32 %v8095_v46, %v8083_v1 }
 0x49a   : > { %v8108_v22 = vpop.f32.mrf.mxu2  ;;  %v8084_v49 = vpop.f32.mrf.mxu0 }
 0x49b   : > { %v8121_v47 = vpop.f32.mrf.mxu3  ;;  %v8097_v32 = vpop.f32.mrf.mxu1  ;;  %v8109_v55 = vadd.f32 %v8108_v22, %v8096_v54 }
 0x49d   : > { %v8122_v52 = vadd.f32 %v8121_v47, %v8109_v55 }
 0x4a2   : > { %v8110_v33 = vpop.f32.mrf.mxu2 }
 0x4a3   : > { %v8123_v16 = vpop.f32.mrf.mxu3 }
 0x4b2   : > { %v8134_v30 = vpop.f32.mrf.mxu0 }
 0x4b3   : > { %v8147_v43 = vpop.f32.mrf.mxu1  ;;  %v8135_v50 = vadd.f32 %v8134_v30, %v8122_v52 }
 0x4b5   : > { %v8148_v48 = vadd.f32 %v8147_v43, %v8135_v50 }
 0x4ba   : > { %v8160_v51 = vpop.f32.mrf.mxu2  ;;  %v8136_v9 = vpop.f32.mrf.mxu0 }
 0x4bb   : > { %v8173_v37 = vpop.f32.mrf.mxu3  ;;  %v8149_v39 = vpop.f32.mrf.mxu1  ;;  %v8161_v7 = vadd.f32 %v8160_v51, %v8148_v48 }
 0x4bd   : > { %v8174_v5 = vadd.f32 %v8173_v37, %v8161_v7 }
 0x4c2   : > { %v8162_v56 = vpop.f32.mrf.mxu2 }
 0x4c3   : > { %v8175_v62 = vpop.f32.mrf.mxu3 }
 0x4d2   : > { %v8186_v17 = vpop.f32.mrf.mxu0 }
 0x4d3   : > { %v8199_v11 = vpop.f32.mrf.mxu1  ;;  %v8187_v12 = vadd.f32 %v8186_v17, %v8174_v5 }
 0x4d5   : > { %v8200_v8 = vadd.f32 %v8199_v11, %v8187_v12 }
 0x4da   : > { %v8212_v35 = vpop.f32.mrf.mxu2  ;;  %v8188_v14 = vpop.f32.mrf.mxu0 }
 0x4db   : > { %v8213_v61 = vadd.f32 %v8212_v35, %v8200_v8  ;;  %v8225_v2 = vpop.f32.mrf.mxu3  ;;  %v8201_v21 = vpop.f32.mrf.mxu1 }
 0x4dd   : > { %v8226_v34 = vadd.f32 %v8225_v2, %v8213_v61 }
 0x4df   : > { %v8235_v36 = vrot.slane %v8226_v34, 2 }
 0x4e1   : > { %v8239_v18 = vsel %vm8238_vm4, %v8234_v23, %v8235_v36  ;;  %8248 = sbr.rel (%p13003_p10) target bundleno = 1463 (0x5b7), region = 52 }
 0x4e2   : > { %v8241_v38 = vsel %vm8240_vm5, %v16325_v63, %v8239_v18  ;;  %v8214_v4 = vpop.f32.mrf.mxu2 }
 0x4e3   : > { %v8243_v0 = vadd.f32 %v8241_v38, %v344_v15  ;;  %v8227_v26 = vpop.f32.mrf.mxu3 }
 0x4e5   : > { %8244 = vst [vmem:[#allocation2] sm:$0xff] %v8243_v0 }
 0x4e6   : > { %v13062_v13 = vld [vmem:[%s14816_s13 + $0x70] sm:$0xf]  ;;  %v14304_v63 = vld [vmem:[%s14816_s13 + $0x74] sm:$0xf0]  ;;  %v13054_v42 = vld [vmem:[%s14816_s13 + $0x60] sm:$0xf] }
 0x4e7   : > { %v13126_v19 = vld [vmem:[%s14816_s13 + $0xf0] sm:$0xf]  ;;  %v13063_v20 = vor.u32 %v14304_v63, %v13062_v13  ;;  %v14320_v27 = vld [vmem:[%s14816_s13 + $0xf4] sm:$0xf0]  ;;  %v14302_v58 = vld [vmem:[%s14816_s13 + $0x64] sm:$0xf0] }
 0x4e8   : > { %v13190_v53 = vld [vmem:[%s14816_s13 + $0x170] sm:$0xf]  ;;  %v14336_v57 = vld [vmem:[%s14816_s13 + $0x174] sm:$0xf0]  ;;  %v13127_v40 = vor.u32 %v14320_v27, %v13126_v19  ;;  %v13118_v29 = vld [vmem:[%s14816_s13 + $0xe0] sm:$0xf]  ;;  %v13055_v3 = vor.u32 %v14302_v58, %v13054_v42 }
 0x4e9   : > { %v13191_v41 = vor.u32 %v14336_v57, %v13190_v53  ;;  %v13254_v24 = vld [vmem:[%s14816_s13 + $0x1f0] sm:$0xf]  ;;  %v14352_v25 = vld [vmem:[%s14816_s13 + $0x1f4] sm:$0xf0]  ;;  %8649 = vmatpush.bf16.msra.mxu0 %v13063_v20  ;;  %v14318_v59 = vld [vmem:[%s14816_s13 + $0xe4] sm:$0xf0] }
 0x4ea   : > { %v13255_v28 = vor.u32 %v14352_v25, %v13254_v24  ;;  %8662 = vmatpush.bf16.msra.mxu1 %v13127_v40  ;;  %v13119_v10 = vor.u32 %v14318_v59, %v13118_v29  ;;  %v13182_v44 = vld [vmem:[%s14816_s13 + $0x160] sm:$0xf]  ;;  %v14334_v60 = vld [vmem:[%s14816_s13 + $0x164] sm:$0xf0]  ;;  %v13046_v46 = vld [vmem:[%s14816_s13 + $0x50] sm:$0xf] }
 0x4eb   : > { %8675 = vmatpush.bf16.msra.mxu2 %v13191_v41  ;;  %v13246_v31 = vld [vmem:[%s14816_s13 + $0x1e0] sm:$0xf]  ;;  %v13183_v6 = vor.u32 %v14334_v60, %v13182_v44  ;;  %v14350_v45 = vld [vmem:[%s14816_s13 + $0x1e4] sm:$0xf0]  ;;  %v14300_v22 = vld [vmem:[%s14816_s13 + $0x54] sm:$0xf0] }
 0x4ec   : > { %8688 = vmatpush.bf16.msra.mxu3 %v13255_v28  ;;  %v13247_v47 = vor.u32 %v14350_v45, %v13246_v31  ;;  %v13110_v49 = vld [vmem:[%s14816_s13 + $0xd0] sm:$0xf]  ;;  %v14316_v32 = vld [vmem:[%s14816_s13 + $0xd4] sm:$0xf0]  ;;  %v13047_v16 = vor.u32 %v14300_v22, %v13046_v46  ;;  %v13038_v9 = vld [vmem:[%s14816_s13 + $0x40] sm:$0xf] }
 0x4ed   : > { %v13174_v33 = vld [vmem:[%s14816_s13 + $0x150] sm:$0xf]  ;;  %8650 = vmatpush.bf16.msra.mxu0 %v13055_v3  ;;  %v14332_v30 = vld [vmem:[%s14816_s13 + $0x154] sm:$0xf0]  ;;  %v13111_v51 = vor.u32 %v14316_v32, %v13110_v49  ;;  %v14298_v39 = vld [vmem:[%s14816_s13 + $0x44] sm:$0xf0] }
 0x4ee   : > { %v13238_v43 = vld [vmem:[%s14816_s13 + $0x1d0] sm:$0xf]  ;;  %v14348_v1 = vld [vmem:[%s14816_s13 + $0x1d4] sm:$0xf0]  ;;  %8663 = vmatpush.bf16.msra.mxu1 %v13119_v10  ;;  %v13175_v37 = vor.u32 %v14332_v30, %v13174_v33  ;;  %v13102_v54 = vld [vmem:[%s14816_s13 + $0xc0] sm:$0xf]  ;;  %v13039_v7 = vor.u32 %v14298_v39, %v13038_v9 }
 0x4ef   : > { %8676 = vmatpush.bf16.msra.mxu2 %v13183_v6  ;;  %v13239_v55 = vor.u32 %v14348_v1, %v13238_v43  ;;  %v14314_v56 = vld [vmem:[%s14816_s13 + $0xc4] sm:$0xf0]  ;;  %v13166_v62 = vld [vmem:[%s14816_s13 + $0x140] sm:$0xf]  ;;  %v13030_v11 = vld [vmem:[%s14816_s13 + $0x30] sm:$0xf] }
 0x4f0   : > { %8689 = vmatpush.bf16.msra.mxu3 %v13247_v47  ;;  %v14330_v52 = vld [vmem:[%s14816_s13 + $0x144] sm:$0xf0]  ;;  %v13230_v50 = vld [vmem:[%s14816_s13 + $0x1c0] sm:$0xf]  ;;  %v13103_v5 = vor.u32 %v14314_v56, %v13102_v54  ;;  %v14296_v12 = vld [vmem:[%s14816_s13 + $0x34] sm:$0xf0] }
 0x4f1   : > { %v14346_v48 = vld [vmem:[%s14816_s13 + $0x1c4] sm:$0xf0]  ;;  %8651 = vmatpush.bf16.msra.mxu0 %v13047_v16  ;;  %v13167_v17 = vor.u32 %v14330_v52, %v13166_v62  ;;  %v13094_v8 = vld [vmem:[%s14816_s13 + $0xb0] sm:$0xf]  ;;  %v14312_v61 = vld [vmem:[%s14816_s13 + $0xb4] sm:$0xf0]  ;;  %v13031_v23 = vor.u32 %v14296_v12, %v13030_v11 }
 0x4f2   : > { %8664 = vmatpush.bf16.msra.mxu1 %v13111_v51  ;;  %v13231_v35 = vor.u32 %v14346_v48, %v13230_v50  ;;  %v13158_v2 = vld [vmem:[%s14816_s13 + $0x130] sm:$0xf]  ;;  %v14328_v14 = vld [vmem:[%s14816_s13 + $0x134] sm:$0xf0]  ;;  %v13095_v36 = vor.u32 %v14312_v61, %v13094_v8  ;;  %v13022_v18 = vld [vmem:[%s14816_s13 + $0x20] sm:$0xf] }
 0x4f3   : > { %8677 = vmatpush.bf16.msra.mxu2 %v13175_v37  ;;  %v13222_v21 = vld [vmem:[%s14816_s13 + $0x1b0] sm:$0xf]  ;;  %v14344_v34 = vld [vmem:[%s14816_s13 + $0x1b4] sm:$0xf0]  ;;  %v13159_v15 = vor.u32 %v14328_v14, %v13158_v2  ;;  %v14294_v38 = vld [vmem:[%s14816_s13 + $0x24] sm:$0xf0] }
 0x4f4   : > { %8690 = vmatpush.bf16.msra.mxu3 %v13239_v55  ;;  %v13086_v4 = vld [vmem:[%s14816_s13 + $0xa0] sm:$0xf]  ;;  %v13223_v0 = vor.u32 %v14344_v34, %v13222_v21  ;;  %v14310_v26 = vld [vmem:[%s14816_s13 + $0xa4] sm:$0xf0]  ;;  %v13023_v27 = vor.u32 %v14294_v38, %v13022_v18  ;;  %v13014_v40 = vld [vmem:[%s14816_s13 + $0x10] sm:$0xf] }
 0x4f5   : > { %8652 = vmatpush.bf16.msra.mxu0 %v13039_v7  ;;  %v13150_v13 = vld [vmem:[%s14816_s13 + $0x120] sm:$0xf]  ;;  %v14326_v63 = vld [vmem:[%s14816_s13 + $0x124] sm:$0xf0]  ;;  %v13087_v53 = vor.u32 %v14310_v26, %v13086_v4  ;;  %v14292_v41 = vld [vmem:[%s14816_s13 + $0x14] sm:$0xf0] }
 0x4f6   : > { %8665 = vmatpush.bf16.msra.mxu1 %v13103_v5  ;;  %v13214_v19 = vld [vmem:[%s14816_s13 + $0x1a0] sm:$0xf]  ;;  %v14342_v20 = vld [vmem:[%s14816_s13 + $0x1a4] sm:$0xf0]  ;;  %v13151_v57 = vor.u32 %v14326_v63, %v13150_v13  ;;  %v13078_v24 = vld [vmem:[%s14816_s13 + $0x90] sm:$0xf]  ;;  %v13015_v10 = vor.u32 %v14292_v41, %v13014_v40 }
 0x4f7   : > { %8678 = vmatpush.bf16.msra.mxu2 %v13167_v17  ;;  %v13215_v25 = vor.u32 %v14342_v20, %v13214_v19  ;;  %v14308_v42 = vld [vmem:[%s14816_s13 + $0x94] sm:$0xf0]  ;;  %v13142_v28 = vld [vmem:[%s14816_s13 + $0x110] sm:$0xf]  ;;  %v13006_v3 = vld [vmem:[%s14816_s13] sm:$0xf] }
 0x4f8   : > { %8691 = vmatpush.bf16.msra.mxu3 %v13231_v35  ;;  %v14324_v58 = vld [vmem:[%s14816_s13 + $0x114] sm:$0xf0]  ;;  %v13206_v29 = vld [vmem:[%s14816_s13 + $0x190] sm:$0xf]  ;;  %v14290_v44 = vld [vmem:[%s14816_s13 + $0x4] sm:$0xf0]  ;;  %v13079_v6 = vor.u32 %v14308_v42, %v13078_v24 }
 0x4f9   : > { %8653 = vmatpush.bf16.msra.mxu0 %v13031_v23  ;;  %v14340_v59 = vld [vmem:[%s14816_s13 + $0x194] sm:$0xf0]  ;;  %v13070_v60 = vld [vmem:[%s14816_s13 + $0x80] sm:$0xf]  ;;  %v14306_v31 = vld [vmem:[%s14816_s13 + $0x84] sm:$0xf0]  ;;  %v13143_v45 = vor.u32 %v14324_v58, %v13142_v28  ;;  %v13007_v51 = vor.u32 %v14290_v44, %v13006_v3 }
 0x4fa   : > { %8666 = vmatpush.bf16.msra.mxu1 %v13095_v36  ;;  %v13134_v46 = vld [vmem:[%s14816_s13 + $0x100] sm:$0xf]  ;;  %v14322_v22 = vld [vmem:[%s14816_s13 + $0x104] sm:$0xf0]  ;;  %v13207_v49 = vor.u32 %v14340_v59, %v13206_v29  ;;  %v14303_v33 = vld [vmem:[%s14816_s13 + $0x74] sm:$0xf]  ;;  %v13071_v54 = vor.u32 %v14306_v31, %v13070_v60 }
 0x4fb   : > { %8679 = vmatpush.bf16.msra.mxu2 %v13159_v15  ;;  %v13198_v47 = vld [vmem:[%s14816_s13 + $0x180] sm:$0xf]  ;;  %v14338_v32 = vld [vmem:[%s14816_s13 + $0x184] sm:$0xf0]  ;;  %v13064_v16 = vld [vmem:[%s14816_s13 + $0x78] sm:$0xf0]  ;;  %v13135_v55 = vor.u32 %v14322_v22, %v13134_v46 }
 0x4fc   : > { %8692 = vmatpush.bf16.msra.mxu3 %v13223_v0  ;;  %v14319_v30 = vld [vmem:[%s14816_s13 + $0xf4] sm:$0xf]  ;;  %v13128_v43 = vld [vmem:[%s14816_s13 + $0xf8] sm:$0xf0]  ;;  %v8249_v1 = vld [vmem:[#allocation2] sm:$0xff]  ;;  %v13199_v52 = vor.u32 %v14338_v32, %v13198_v47  ;;  %v13067_v50 = vor.u32 %v14303_v33, %v13064_v16  ;;  %vm8758_vm6 = vcmask 584706  }
 0x4fd   : > { %8654 = vmatpush.bf16.msra.mxu0 %v13023_v27  ;;  %v14335_v37 = vld [vmem:[%s14816_s13 + $0x174] sm:$0xf]  ;;  %v13192_v9 = vld [vmem:[%s14816_s13 + $0x178] sm:$0xf0]  ;;  %v8250_v39 = vmax.f32 %v8249_v1, 0.0  ;;  %v13131_v48 = vor.u32 %v14319_v30, %v13128_v43  ;;  %vm8759_vm7 = vmor %vm8758_vm6, %vm8236_vm3 }
 0x4fe   : > { %8667 = vmatpush.bf16.msra.mxu1 %v13087_v53  ;;  %v14351_v56 = vld [vmem:[%s14816_s13 + $0x1f4] sm:$0xf]  ;;  %v13256_v62 = vld [vmem:[%s14816_s13 + $0x1f8] sm:$0xf0]  ;;  %v13195_v7 = vor.u32 %v14335_v37, %v13192_v9  ;;  %v14301_v5 = vld [vmem:[%s14816_s13 + $0x64] sm:$0xf] }
 0x4ff   : > { %8680 = vmatpush.bf16.msra.mxu2 %v13151_v57  ;;  %8252 = vst [vmem:[#allocation1] ss:$4 sm:$0xff] %v8250_v39  ;;  %v13056_v17 = vld [vmem:[%s14816_s13 + $0x68] sm:$0xf0]  ;;  %v14317_v11 = vld [vmem:[%s14816_s13 + $0xe4] sm:$0xf]  ;;  %v13259_v12 = vor.u32 %v14351_v56, %v13256_v62 }
 0x500   : > { %8693 = vmatpush.bf16.msra.mxu3 %v13215_v25  ;;  %v13120_v8 = vld [vmem:[%s14816_s13 + $0xe8] sm:$0xf0]  ;;  %v14333_v35 = vld [vmem:[%s14816_s13 + $0x164] sm:$0xf]  ;;  %v13059_v21 = vor.u32 %v14301_v5, %v13056_v17  ;;  %v14299_v34 = vld [vmem:[%s14816_s13 + $0x54] sm:$0xf] }
 0x501   : > { %8655 = vmatpush.bf16.msra.mxu0 %v13015_v10  ;;  %v13184_v61 = vld [vmem:[%s14816_s13 + $0x168] sm:$0xf0]  ;;  %v14349_v2 = vld [vmem:[%s14816_s13 + $0x1e4] sm:$0xf]  ;;  %v13048_v23 = vld [vmem:[%s14816_s13 + $0x58] sm:$0xf0]  ;;  %v13123_v36 = vor.u32 %v14317_v11, %v13120_v8 }
 0x502   : > { %8668 = vmatpush.bf16.msra.mxu1 %v13079_v6  ;;  %v13248_v14 = vld [vmem:[%s14816_s13 + $0x1e8] sm:$0xf0]  ;;  %v13187_v15 = vor.u32 %v14333_v35, %v13184_v61  ;;  %v14315_v18 = vld [vmem:[%s14816_s13 + $0xd4] sm:$0xf]  ;;  %v13112_v38 = vld [vmem:[%s14816_s13 + $0xd8] sm:$0xf0]  ;;  %v13051_v57 = vor.u32 %v14299_v34, %v13048_v23 }
 0x503   : > { %8681 = vmatpush.bf16.msra.mxu2 %v13143_v45  ;;  %v14331_v4 = vld [vmem:[%s14816_s13 + $0x154] sm:$0xf]  ;;  %v13251_v0 = vor.u32 %v14349_v2, %v13248_v14  ;;  %v13176_v26 = vld [vmem:[%s14816_s13 + $0x158] sm:$0xf0]  ;;  %v13115_v40 = vor.u32 %v14315_v18, %v13112_v38  ;;  %v14297_v58 = vld [vmem:[%s14816_s13 + $0x44] sm:$0xf] }
 0x504   : > { %8694 = vmatpush.bf16.msra.mxu3 %v13207_v49  ;;  %v14347_v13 = vld [vmem:[%s14816_s13 + $0x1d4] sm:$0xf]  ;;  %v13240_v63 = vld [vmem:[%s14816_s13 + $0x1d8] sm:$0xf0]  ;;  %v13179_v25 = vor.u32 %v14331_v4, %v13176_v26  ;;  %v13040_v29 = vld [vmem:[%s14816_s13 + $0x48] sm:$0xf0] }
 0x505   : > { %8656 = vmatpush.bf16.msra.mxu0 %v13007_v51  ;;  %v14313_v59 = vld [vmem:[%s14816_s13 + $0xc4] sm:$0xf]  ;;  %v13243_v3 = vor.u32 %v14347_v13, %v13240_v63  ;;  %v13104_v10 = vld [vmem:[%s14816_s13 + $0xc8] sm:$0xf0]  ;;  %v13043_v45 = vor.u32 %v14297_v58, %v13040_v29  ;;  %v14295_v47 = vld [vmem:[%s14816_s13 + $0x34] sm:$0xf] }
 0x506   : > { %8669 = vmatpush.bf16.msra.mxu1 %v13071_v54  ;;  %v8255_v19 = vld.sshfl [vmem:[#allocation1 + $0x10] sm:$0xff pattern:$0x73625140]  ;;  %v8256_v20 = vld.sshfl [vmem:[#allocation1 + $0x18] sm:$0xff pattern:$0x73625140]  ;;  %v13107_v46 = vor.u32 %v14313_v59, %v13104_v10 }
 0x507   : > { %8682 = vmatpush.bf16.msra.mxu2 %v13135_v55  ;;  %v17189_v27 = vpack.c.bf16 %v8255_v19, %v8255_v19  ;;  %v17191_v53 = vpack.c.bf16 %v8256_v20, %v8256_v20  ;;  %v8253_v41 = vld.sshfl [vmem:[#allocation1] sm:$0xff pattern:$0x73625140]  ;;  %v8254_v24 = vld.sshfl [vmem:[#allocation1 + $0x8] sm:$0xff pattern:$0x73625140] }
 0x508   : > { %8695 = vmatpush.bf16.msra.mxu3 %v13199_v52  ;;  %v17193_v42 = vpack.c.bf16 %v8253_v41, %v8253_v41  ;;  %v17195_v28 = vpack.c.bf16 %v8254_v24, %v8254_v24  ;;  %v14329_v44 = vld [vmem:[%s14816_s13 + $0x144] sm:$0xf]  ;;  %v13168_v60 = vld [vmem:[%s14816_s13 + $0x148] sm:$0xf0]  ;;  %v13032_v49 = vld [vmem:[%s14816_s13 + $0x38] sm:$0xf0] }
 0x509   : > { %8701 = vmatpush.bf16.msrb.mxu0 %v13067_v50  ;;  %v14345_v31 = vld [vmem:[%s14816_s13 + $0x1c4] sm:$0xf]  ;;  %v13232_v6 = vld [vmem:[%s14816_s13 + $0x1c8] sm:$0xf0]  ;;  %v13171_v22 = vor.u32 %v14329_v44, %v13168_v60  ;;  %v14311_v32 = vld [vmem:[%s14816_s13 + $0xb4] sm:$0xf]  ;;  %v13035_v37 = vor.u32 %v14295_v47, %v13032_v49 }
 0x50a   : > { %8714 = vmatpush.bf16.msrb.mxu1 %v13131_v48  ;;  %8683 = vmatmul.bf16.vlgmr.msra.gmra.mxu2 %v17189_v27  ;;  %v13235_v33 = vor.u32 %v14345_v31, %v13232_v6  ;;  %v13096_v16 = vld [vmem:[%s14816_s13 + $0xb8] sm:$0xf0]  ;;  %v14327_v30 = vld [vmem:[%s14816_s13 + $0x134] sm:$0xf]  ;;  %v14293_v54 = vld [vmem:[%s14816_s13 + $0x24] sm:$0xf] }
 0x50b   : > { %8727 = vmatpush.bf16.msrb.mxu2 %v13195_v7  ;;  %8696 = vmatmul.bf16.vlgmr.msra.gmra.mxu3 %v17191_v53  ;;  %v13160_v43 = vld [vmem:[%s14816_s13 + $0x138] sm:$0xf0]  ;;  %v14343_v1 = vld [vmem:[%s14816_s13 + $0x1b4] sm:$0xf]  ;;  %v13099_v9 = vor.u32 %v14311_v32, %v13096_v16  ;;  %v13024_v55 = vld [vmem:[%s14816_s13 + $0x28] sm:$0xf0] }
 0x50c   : > { %8740 = vmatpush.bf16.msrb.mxu3 %v13259_v12  ;;  %8657 = vmatmul.bf16.vlgmr.msra.gmra.mxu0 %v17193_v42  ;;  %v13224_v51 = vld [vmem:[%s14816_s13 + $0x1b8] sm:$0xf0]  ;;  %v13163_v39 = vor.u32 %v14327_v30, %v13160_v43  ;;  %v14309_v56 = vld [vmem:[%s14816_s13 + $0xa4] sm:$0xf]  ;;  %v13088_v52 = vld [vmem:[%s14816_s13 + $0xa8] sm:$0xf0]  ;;  %v13027_v17 = vor.u32 %v14293_v54, %v13024_v55 }
 0x50d   : > { %8702 = vmatpush.bf16.msrb.mxu0 %v13059_v21  ;;  %8670 = vmatmul.bf16.vlgmr.msra.gmra.mxu1 %v17195_v28  ;;  %v13227_v62 = vor.u32 %v14343_v1, %v13224_v51  ;;  %v14325_v50 = vld [vmem:[%s14816_s13 + $0x124] sm:$0xf]  ;;  %v13152_v48 = vld [vmem:[%s14816_s13 + $0x128] sm:$0xf0]  ;;  %v13091_v11 = vor.u32 %v14309_v56, %v13088_v52  ;;  %v14291_v8 = vld [vmem:[%s14816_s13 + $0x14] sm:$0xf] }
 0x50e   : > { %8715 = vmatpush.bf16.msrb.mxu1 %v13123_v36  ;;  %v14341_v7 = vld [vmem:[%s14816_s13 + $0x1a4] sm:$0xf]  ;;  %v13216_v5 = vld [vmem:[%s14816_s13 + $0x1a8] sm:$0xf0]  ;;  %v13155_v12 = vor.u32 %v14325_v50, %v13152_v48  ;;  %v13016_v35 = vld [vmem:[%s14816_s13 + $0x18] sm:$0xf0] }
 0x50f   : > { %8728 = vmatpush.bf16.msrb.mxu2 %v13187_v15  ;;  %v14307_v61 = vld [vmem:[%s14816_s13 + $0x94] sm:$0xf]  ;;  %v13219_v2 = vor.u32 %v14341_v7, %v13216_v5  ;;  %v13080_v14 = vld [vmem:[%s14816_s13 + $0x98] sm:$0xf0]  ;;  %v13019_v15 = vor.u32 %v14291_v8, %v13016_v35  ;;  %v14289_v4 = vld [vmem:[%s14816_s13 + $0x4] sm:$0xf] }
 0x510   : > { %8741 = vmatpush.bf16.msrb.mxu3 %v13251_v0  ;;  %v14323_v21 = vld [vmem:[%s14816_s13 + $0x114] sm:$0xf]  ;;  %v13144_v34 = vld [vmem:[%s14816_s13 + $0x118] sm:$0xf0]  ;;  %v13083_v18 = vor.u32 %v14307_v61, %v13080_v14  ;;  %v13008_v0 = vld [vmem:[%s14816_s13 + $0x8] sm:$0xf0] }
 0x511   : > { %8703 = vmatpush.bf16.msrb.mxu0 %v13051_v57  ;;  %v14339_v23 = vld [vmem:[%s14816_s13 + $0x194] sm:$0xf]  ;;  %v13208_v36 = vld [vmem:[%s14816_s13 + $0x198] sm:$0xf0]  ;;  %v13147_v38 = vor.u32 %v14323_v21, %v13144_v34  ;;  %v14305_v26 = vld [vmem:[%s14816_s13 + $0x84] sm:$0xf]  ;;  %v13011_v41 = vor.u32 %v14289_v4, %v13008_v0 }
 0x512   : > { %8716 = vmatpush.bf16.msrb.mxu1 %v13115_v40  ;;  %v13211_v13 = vor.u32 %v14339_v23, %v13208_v36  ;;  %v13072_v63 = vld [vmem:[%s14816_s13 + $0x88] sm:$0xf0]  ;;  %v14321_v19 = vld [vmem:[%s14816_s13 + $0x104] sm:$0xf] }
 0x513   : > { %8729 = vmatpush.bf16.msrb.mxu2 %v13179_v25  ;;  %v13136_v20 = vld [vmem:[%s14816_s13 + $0x108] sm:$0xf0]  ;;  %v14337_v57 = vld [vmem:[%s14816_s13 + $0x184] sm:$0xf]  ;;  %v13075_v24 = vor.u32 %v14305_v26, %v13072_v63 }
 0x514   : > { %8742 = vmatpush.bf16.msrb.mxu3 %v13243_v3  ;;  %v13200_v40 = vld [vmem:[%s14816_s13 + $0x188] sm:$0xf0]  ;;  %v13139_v25 = vor.u32 %v14321_v19, %v13136_v20 }
 0x515   : > { %8704 = vmatpush.bf16.msrb.mxu0 %v13043_v45  ;;  %v13203_v58 = vor.u32 %v14337_v57, %v13200_v40 }
 0x516   : > { %8717 = vmatpush.bf16.msrb.mxu1 %v13107_v46 }
 0x517   : > { %8730 = vmatpush.bf16.msrb.mxu2 %v13171_v22 }
 0x518   : > { %8743 = vmatpush.bf16.msrb.mxu3 %v13235_v33 }
 0x519   : > { %8705 = vmatpush.bf16.msrb.mxu0 %v13035_v37 }
 0x51a   : > { %8718 = vmatpush.bf16.msrb.mxu1 %v13099_v9 }
 0x51b   : > { %8731 = vmatpush.bf16.msrb.mxu2 %v13163_v39 }
 0x51c   : > { %8744 = vmatpush.bf16.msrb.mxu3 %v13227_v62 }
 0x51d   : > { %8706 = vmatpush.bf16.msrb.mxu0 %v13027_v17 }
 0x51e   : > { %8719 = vmatpush.bf16.msrb.mxu1 %v13091_v11 }
 0x51f   : > { %8732 = vmatpush.bf16.msrb.mxu2 %v13155_v12 }
 0x520   : > { %8745 = vmatpush.bf16.msrb.mxu3 %v13219_v2 }
 0x521   : > { %8707 = vmatpush.bf16.msrb.mxu0 %v13019_v15 }
 0x522   : > { %8720 = vmatpush.bf16.msrb.mxu1 %v13083_v18 }
 0x523   : > { %8733 = vmatpush.bf16.msrb.mxu2 %v13147_v38 }
 0x524   : > { %8746 = vmatpush.bf16.msrb.mxu3 %v13211_v13 }
 0x525   : > { %8708 = vmatpush.bf16.msrb.mxu0 %v13011_v41 }
 0x526   : > { %8721 = vmatpush.bf16.msrb.mxu1 %v13075_v24 }
 0x527   : > { %8734 = vmatpush.bf16.msrb.mxu2 %v13139_v25 }
 0x528   : > { %8747 = vmatpush.bf16.msrb.mxu3 %v13203_v58  ;;  %8709 = vmatmul.bf16.vlgmr.msrb.gmra.mxu0 %v17193_v42 }
 0x529   : > { %8722 = vmatmul.bf16.vlgmr.msrb.gmra.mxu1 %v17195_v28 }
 0x52a   : > { %8735 = vmatmul.bf16.vlgmr.msrb.gmra.mxu2 %v17189_v27 }
 0x52b   : > { %8748 = vmatmul.bf16.vlgmr.msrb.gmra.mxu3 %v17191_v53 }
 0x589   : > { %v8658_v29 = vpop.f32.mrf.mxu0 }
 0x58a   : > { %v8671_v59 = vpop.f32.mrf.mxu1 }
 0x58b   : > { %v8672_v22 = vadd.f32 %v8671_v59, %v8658_v29 }
 0x58d   : > { %v8684_v3 = vpop.f32.mrf.mxu2 }
 0x58e   : > { %v8697_v10 = vpop.f32.mrf.mxu3  ;;  %v8685_v49 = vadd.f32 %v8684_v3, %v8672_v22 }
 0x590   : > { %v8698_v16 = vadd.f32 %v8697_v10, %v8685_v49 }
 0x591   : > { %v8660_v44 = vpop.f32.mrf.mxu0 }
 0x592   : > { %v8673_v60 = vpop.f32.mrf.mxu1 }
 0x595   : > { %v8686_v31 = vpop.f32.mrf.mxu2 }
 0x596   : > { %v8699_v6 = vpop.f32.mrf.mxu3 }
 0x5a5   : > { %v8710_v45 = vpop.f32.mrf.mxu0 }
 0x5a6   : > { %v8723_v46 = vpop.f32.mrf.mxu1 }
 0x5a7   : > { %v8724_v47 = vadd.f32 %v8723_v46, %v8710_v45 }
 0x5ad   : > { %v8736_v42 = vpop.f32.mrf.mxu2  ;;  %v8712_v27 = vpop.f32.mrf.mxu0 }
 0x5ae   : > { %v8737_v28 = vadd.f32 %v8736_v42, %v8724_v47  ;;  %v8749_v32 = vpop.f32.mrf.mxu3  ;;  %v8725_v53 = vpop.f32.mrf.mxu1 }
 0x5b0   : > { %v8750_v33 = vadd.f32 %v8749_v32, %v8737_v28 }
 0x5b2   : > { %v8755_v30 = vrot.slane %v8750_v33, 6 }
 0x5b4   : > { %v8756_v43 = vsel %vm8236_vm3, %v8698_v16, %v8755_v30 }
 0x5b5   : > { %8760 = vst.msk [vmem:[%s14822_s30] sm:$0xf] %vm8759_vm7, %v8756_v43  ;;  %v8738_v1 = vpop.f32.mrf.mxu2 }
 0x5b6   : > { %v8751_v51 = vpop.f32.mrf.mxu3 }
 0x5b7 PF: > { %s20_s25 = sadd.s32 1, %s14634_s25   ;;  %s17297_s21 = smov %s14775_s18 }
 0x5b8   : > { %p17_p11 = scmp.ge.s32.totalorder %s20_s25, 8   ;;  %s17298_s22 = sld [smem:[#allocation9_spill]] }
 0x5b9   : > { %s17299_s24 = sld [smem:[#allocation10_spill]]  ;;  %s17301_s15 = smov %s14598_s16 }
 0x5ba   : > { %s17300_s7 = sld [smem:[#allocation11_spill]]  ;;  %s17302_s16 = smov %s14602_s17 }
 0x5bb   : > { %s17303_s17 = smov %s14770_s6  ;;  %s17304_s18 = smov %s14610_s19 }
 0x5bc   : > { %s17305_s19 = smov %s14614_s20  ;;  %s17306_s20 = smov %s17297_s21 }
 0x5bd   : > { %s17307_s21 = smov %s14626_s23  ;;  %19 = sbr.rel (!%p17_p11) target bundleno = 11 (0xb), region = 103 }
 0x5bf   : > { %s17308_s23 = smov %s17299_s24 }
 0x5c0   : > { %s17309_s24 = smov %s17300_s7 }
 0x5c2   :  { %8782 = vsyncpa [#allocation4], 1 }
 0x5c3   :  { %8784 = vsyncpa [#allocation4 + $0x1], 1 }
 0x5c4   :  { %8785 = vsyncpa [#allocation6], 1 }
 0x5c5   :  { %8787 = vsyncpa [#allocation6 + $0x1], 1 }

</bundles_post_ra>
